<compile_context>
chip_gen: v7x
topology: tpu7x:2x2x1
jax: 0.10.0
libtpu: 0.0.40
codegen_flags: <defaults>
</compile_context>

<pallas_src>
import functools

import jax
import jax.numpy as jnp
from jax.experimental import pallas as pl
from jax.experimental.pallas import tpu as pltpu

BN_EPS = 1e-5
LANE = 128


def _rup(v, m):
    return ((v + m - 1) // m) * m


# ---------------------------------------------------------------------------
# Pallas kernels
# ---------------------------------------------------------------------------
def _matmul_bn_act_kernel(x_ref, w_ref, scale_ref, bias_ref, o_ref, *, relu):
    # x: (TM, K) bf16, w: (K, TN) bf16, scale/bias: (1, TN) f32, o: (TM, TN) bf16
    acc = jnp.dot(x_ref[...], w_ref[...], preferred_element_type=jnp.float32)
    y = acc * scale_ref[...] + bias_ref[...]
    if relu:
        y = jnp.maximum(y, 0.0)
    o_ref[...] = y.astype(o_ref.dtype)


def _conv_kxk_kernel(*refs, kw, stride, wo, relu):
    # Direct KxK conv: grid = (Ho, kh).  The kh axis is the reduction ("arbitrary") axis:
    # f32 accumulator in VMEM scratch, BN + ReLU + store on the last tap.
    if stride == 1:
        row_refs = refs[:1]
        rest = refs[1:]
    else:  # stride == 2: even / odd column planes of the padded input
        row_refs = refs[:2]
        rest = refs[2:]
    w_ref, scale_ref, bias_ref, o_ref, acc_ref = rest

    i = pl.program_id(1)  # kh tap index

    @pl.when(i == 0)
    def _init():
        acc_ref[...] = jnp.zeros_like(acc_ref)

    rows = [r[...] for r in row_refs]          # each (Nimg, Wrow, Cin) bf16
    n_img = rows[0].shape[0]
    for n in range(n_img):
        acc_n = acc_ref[n]                     # (Wo, Cout) f32
        for j in range(kw):
            if stride == 1:
                xs = rows[0][n, j:j + wo, :]               # (Wo, Cin)
            else:
                off = j // 2
                xs = rows[j % 2][n, off:off + wo, :]       # (Wo, Cin)
            acc_n = acc_n + jnp.dot(xs, w_ref[j], preferred_element_type=jnp.float32)
        acc_ref[n] = acc_n

    @pl.when(i == pl.num_programs(1) - 1)
    def _fin():
        y = acc_ref[...] * scale_ref[...] + bias_ref[...]  # f32 epilogue
        if relu:
            y = jnp.maximum(y, 0.0)
        o_ref[...] = y.astype(o_ref.dtype)


def _maxpool_kernel(xe_ref, xo_ref, o_ref, *, wo):
    # MaxPool 3x3 s2: running max on the revisited output block across the 3 row taps.
    i = pl.program_id(1)

    @pl.when(i == 0)
    def _init():
        o_ref[...] = jnp.full_like(o_ref, -jnp.inf)

    rows = (xe_ref[...], xo_ref[...])          # (Nimg, Wh, C) each
    m = o_ref[...]
    for j in range(3):
        off = j // 2
        m = jnp.maximum(m, rows[j % 2][:, off:off + wo, :])
    o_ref[...] = m


def _add_relu_kernel(a_ref, b_ref, o_ref):
    s = a_ref[...].astype(jnp.float32) + b_ref[...].astype(jnp.float32)
    o_ref[...] = jnp.maximum(s, 0.0).astype(o_ref.dtype)


# ---------------------------------------------------------------------------
# Pallas wrappers
# ---------------------------------------------------------------------------
def matmul_bn_act(x, w, scale, bias, relu):
    """x: (M, K) bf16, w: (K, N) bf16, scale/bias: (N,) f32 -> (M, N) bf16."""
    m, k = x.shape
    _, n_out = w.shape

    tm = min(256, _rup(m, 16))                 # adaptive M tile (no forced pad to 128)
    mp = _rup(m, tm)
    if mp != m:
        x = jnp.pad(x, ((0, mp - m), (0, 0)))

    if n_out > 256 and n_out % 256 == 0:       # second parallel axis -> both v7x cores busy
        tn = 256
    else:
        tn = n_out

    kernel = functools.partial(_matmul_bn_act_kernel, relu=relu)
    cost = pl.CostEstimate(
        flops=2 * mp * k * n_out,
        transcendentals=0,
        bytes_accessed=(mp * k + k * n_out + mp * n_out) * 2 + 2 * n_out * 4,
    )
    out = pl.pallas_call(
        kernel,
        out_shape=jax.ShapeDtypeStruct((mp, n_out), jnp.bfloat16),
        grid=(mp // tm, n_out // tn),
        in_specs=[
            pl.BlockSpec((tm, k), lambda i, j: (i, 0)),
            pl.BlockSpec((k, tn), lambda i, j: (0, j)),
            pl.BlockSpec((1, tn), lambda i, j: (0, j)),
            pl.BlockSpec((1, tn), lambda i, j: (0, j)),
        ],
        out_specs=pl.BlockSpec((tm, tn), lambda i, j: (i, j)),
        compiler_params=pltpu.CompilerParams(
            dimension_semantics=("parallel", "parallel")),
        cost_estimate=cost,
    )(x, w, scale.reshape(1, n_out), bias.reshape(1, n_out))
    if mp != m:
        out = out[:m]
    return out


def conv_bn_1x1(x, params, stride, relu):
    """1x1 Conv + folded BN + optional ReLU.  x: NHWC bf16."""
    w, scale, bias = params                    # w: (1, 1, Cin, Cout) bf16
    if stride != 1:
        x = x[:, ::stride, ::stride, :]        # 1x1 stride-s conv == spatial subsample
    n, h, wdt, c = x.shape
    cout = w.shape[-1]
    y = matmul_bn_act(x.reshape(n * h * wdt, c), w.reshape(c, cout), scale, bias, relu)
    return y.reshape(n, h, wdt, cout)


def conv_bn_kxk(x, params, stride, pad, relu):
    """KxK Conv (no bias) + folded BN + optional ReLU, no im2col in HBM.  x: NHWC bf16."""
    assert stride in (1, 2)
    w, scale, bias = params                    # w: (kh, kw, Cin, Cout) bf16
    kh, kw, cin, cout = w.shape
    n, h, wdt, c = x.shape
    assert c == cin
    ho = (h + 2 * pad - kh) // stride + 1
    wo = (wdt + 2 * pad - kw) // stride + 1

    xp = jnp.pad(x, ((0, 0), (pad, pad), (pad, pad), (0, 0)))
    hp, wp = h + 2 * pad, wdt + 2 * pad
    scale3 = scale.reshape(1, 1, cout)
    bias3 = bias.reshape(1, 1, cout)

    kernel = functools.partial(_conv_kxk_kernel, kw=kw, stride=stride, wo=wo, relu=relu)
    w_spec = pl.BlockSpec((None, kw, cin, cout), lambda r, i: (i, 0, 0, 0))
    sb_spec = pl.BlockSpec((1, 1, cout), lambda r, i: (0, 0, 0))
    out_spec = pl.BlockSpec((n, None, wo, cout), lambda r, i: (0, r, 0, 0))
    cost = pl.CostEstimate(
        flops=2 * n * ho * wo * kh * kw * cin * cout,
        transcendentals=0,
        bytes_accessed=(n * hp * wp * cin + kh * kw * cin * cout + n * ho * wo * cout) * 2,
    )
    common = dict(
        out_shape=jax.ShapeDtypeStruct((n, ho, wo, cout), jnp.bfloat16),
        grid=(ho, kh),
        out_specs=out_spec,
        scratch_shapes=[pltpu.VMEM((n, wo, cout), jnp.float32)],
        compiler_params=pltpu.CompilerParams(
            dimension_semantics=("parallel", "arbitrary")),
        cost_estimate=cost,
    )

    if stride == 1:
        x_spec = pl.BlockSpec((n, None, wp, cin), lambda r, i: (0, r + i, 0, 0))
        return pl.pallas_call(
            kernel, in_specs=[x_spec, w_spec, sb_spec, sb_spec], **common
        )(xp, w, scale3, bias3)

    # stride == 2: even / odd column planes so every per-tap slice is contiguous.
    if wp % 2:
        xp = jnp.pad(xp, ((0, 0), (0, 0), (0, 1), (0, 0)))
        wp += 1
    xe = xp[:, :, 0::2, :]
    xo = xp[:, :, 1::2, :]
    wh = wp // 2
    xs_spec = pl.BlockSpec((n, None, wh, cin), lambda r, i: (0, 2 * r + i, 0, 0))
    return pl.pallas_call(
        kernel, in_specs=[xs_spec, xs_spec, w_spec, sb_spec, sb_spec], **common
    )(xe, xo, w, scale3, bias3)


def maxpool_3x3_s2_p1(x):
    """MaxPool2d(kernel_size=3, stride=2, padding=1).  x: NHWC bf16."""
    n, h, wdt, c = x.shape
    ho = (h + 2 - 3) // 2 + 1
    wo = (wdt + 2 - 3) // 2 + 1
    xp = jnp.pad(x, ((0, 0), (1, 1), (1, 1), (0, 0)), constant_values=-jnp.inf)
    wp = wdt + 2
    if wp % 2:
        xp = jnp.pad(xp, ((0, 0), (0, 0), (0, 1), (0, 0)), constant_values=-jnp.inf)
        wp += 1
    xe = xp[:, :, 0::2, :]
    xo = xp[:, :, 1::2, :]
    wh = wp // 2

    kernel = functools.partial(_maxpool_kernel, wo=wo)
    xs_spec = pl.BlockSpec((n, None, wh, c), lambda r, i: (0, 2 * r + i, 0, 0))
    return pl.pallas_call(
        kernel,
        out_shape=jax.ShapeDtypeStruct((n, ho, wo, c), jnp.bfloat16),
        grid=(ho, 3),
        in_specs=[xs_spec, xs_spec],
        out_specs=pl.BlockSpec((n, None, wo, c), lambda r, i: (0, r, 0, 0)),
        compiler_params=pltpu.CompilerParams(
            dimension_semantics=("parallel", "arbitrary")),
    )(xe, xo)


def add_relu(a, b):
    """Elementwise relu(a + b) on NHWC bf16 tensors, tiled over rows."""
    shp = a.shape
    c = shp[-1]
    m = a.size // c
    a2 = a.reshape(m, c)
    b2 = b.reshape(m, c)
    tm = min(512, _rup(m, 16))
    mp = _rup(m, tm)
    if mp != m:
        a2 = jnp.pad(a2, ((0, mp - m), (0, 0)))
        b2 = jnp.pad(b2, ((0, mp - m), (0, 0)))
    out = pl.pallas_call(
        _add_relu_kernel,
        out_shape=jax.ShapeDtypeStruct((mp, c), jnp.bfloat16),
        grid=(mp // tm,),
        in_specs=[
            pl.BlockSpec((tm, c), lambda i: (i, 0)),
            pl.BlockSpec((tm, c), lambda i: (i, 0)),
        ],
        out_specs=pl.BlockSpec((tm, c), lambda i: (i, 0)),
        compiler_params=pltpu.CompilerParams(dimension_semantics=("parallel",)),
    )(a2, b2)
    if mp != m:
        out = out[:m]
    return out.reshape(shp)


# ---------------------------------------------------------------------------
# Parameter construction (deterministic, synthetic).  Channels are zero-padded to
# multiples of 128 lanes: padded Cin rows are zero and padded Cout channels get
# scale = bias = 0, so they stay exactly 0 through the whole network.
# ---------------------------------------------------------------------------
def make_conv_bn_params(key, kh, kw, cin, cout, cin_pad=None, cout_pad=None):
    cin_pad = cin if cin_pad is None else cin_pad
    cout_pad = cout if cout_pad is None else cout_pad
    k1, k2, k3, k4, k5 = jax.random.split(key, 5)
    fan_in = kh * kw * cin
    w = jax.random.normal(k1, (kh, kw, cin, cout), jnp.float32) * (2.0 / fan_in) ** 0.5
    gamma = jax.random.uniform(k2, (cout,), jnp.float32, 0.5, 1.5)
    beta = jax.random.normal(k3, (cout,), jnp.float32) * 0.1
    mean = jax.random.normal(k4, (cout,), jnp.float32) * 0.1
    var = jax.random.uniform(k5, (cout,), jnp.float32, 0.5, 1.5)
    scale = gamma / jnp.sqrt(var + BN_EPS)
    bias = beta - mean * scale
    w = jnp.pad(w, ((0, 0), (0, 0), (0, cin_pad - cin), (0, cout_pad - cout)))
    scale = jnp.pad(scale, (0, cout_pad - cout))
    bias = jnp.pad(bias, (0, cout_pad - cout))
    return (w.astype(jnp.bfloat16), scale, bias)


def make_bottleneck_params(key, inplanes, planes, stride):
    in_p = _rup(inplanes, LANE)
    mid_p = _rup(planes, LANE)
    out_p = _rup(planes * 4, LANE)
    ks = jax.random.split(key, 4)
    p = {
        "conv1": make_conv_bn_params(ks[0], 1, 1, inplanes, planes, in_p, mid_p),
        "conv2": make_conv_bn_params(ks[1], 3, 3, planes, planes, mid_p, mid_p),
        "conv3": make_conv_bn_params(ks[2], 1, 1, planes, planes * 4, mid_p, out_p),
        "stride": stride,
    }
    if stride != 1 or inplanes != planes * 4:
        p["downsample"] = make_conv_bn_params(ks[3], 1, 1, inplanes, planes * 4, in_p, out_p)
    return p


def make_shared_module_fr_params(key):
    ks = jax.random.split(key, 8)
    params = {"conv1": make_conv_bn_params(ks[0], 7, 7, 3, 64, 3, _rup(64, LANE))}
    layer1 = [make_bottleneck_params(ks[1], 64, 64, 1)]
    layer1 += [make_bottleneck_params(ks[2 + i], 256, 64, 1) for i in range(2)]
    layer2 = [make_bottleneck_params(ks[4], 256, 128, 2)]
    layer2 += [make_bottleneck_params(ks[5 + i], 512, 128, 1) for i in range(3)]
    params["layer1"] = layer1
    params["layer2"] = layer2
    return params


# ---------------------------------------------------------------------------
# Forward pass
# ---------------------------------------------------------------------------
def bottleneck_forward(x, p):
    identity = x
    out = conv_bn_1x1(x, p["conv1"], stride=1, relu=True)
    out = conv_bn_kxk(out, p["conv2"], stride=p["stride"], pad=1, relu=True)
    out = conv_bn_1x1(out, p["conv3"], stride=1, relu=False)
    if "downsample" in p:
        identity = conv_bn_1x1(x, p["downsample"], stride=p["stride"], relu=False)
    return add_relu(out, identity)


def shared_module_fr_forward(params, x_nchw):
    # layout: NCHW (PyTorch) in -> NHWC bf16 internally -> NCHW f32 out
    x = jnp.transpose(x_nchw, (0, 2, 3, 1)).astype(jnp.bfloat16)
    x = conv_bn_kxk(x, params["conv1"], stride=2, pad=3, relu=True)   # conv1 + bn1 + relu
    x = maxpool_3x3_s2_p1(x)                                          # maxpool
    for blk in params["layer1"]:                                      # layer1
        x = bottleneck_forward(x, blk)
    for blk in params["layer2"]:                                      # layer2
        x = bottleneck_forward(x, blk)
    return jnp.transpose(x, (0, 3, 1, 2)).astype(jnp.float32)         # back to NCHW


# ---------------------------------------------------------------------------
if __name__ == "__main__":
    key = jax.random.PRNGKey(0)
    kp, kx = jax.random.split(key)
    params = make_shared_module_fr_params(kp)

    # Small input consistent with a ResNet stem: NCHW, 3 input channels.
    x = jax.random.normal(kx, (2, 3, 32, 32), jnp.float32)

    fwd = jax.jit(functools.partial(shared_module_fr_forward, params))
    out = fwd(x)
    jax.block_until_ready(out)

    assert out.shape == (2, 512, 4, 4), out.shape
    assert bool(jnp.all(jnp.isfinite(out)))
    print("KERNEL_OK")
</pallas_src>

<mosaic_0001>
module attributes {stable_mosaic.version = 11 : i64} {
  func.func @_conv_kxk_kernel(%arg0: i32, %arg1: i32, %arg2: memref<2x1x19x3xbf16, #tpu.memory_space<vmem>>, %arg3: memref<2x1x19x3xbf16, #tpu.memory_space<vmem>>, %arg4: memref<1x7x3x128xbf16, #tpu.memory_space<vmem>>, %arg5: memref<1x1x128xf32, #tpu.memory_space<vmem>>, %arg6: memref<1x1x128xf32, #tpu.memory_space<vmem>>, %arg7: memref<2x1x16x128xbf16, #tpu.memory_space<vmem>>, %arg8: memref<2x16x128xf32, #tpu.memory_space<vmem>>) attributes {dimension_semantics = [#tpu.dimension_semantics<parallel>, #tpu.dimension_semantics<arbitrary>], iteration_bounds = array<i64: 16, 7>, scalar_prefetch = 0 : i64, scratch_operands = 1 : i64, tpu.core_type = #tpu.core_type<tc>, window_params = [{transform_indices = @transform_0, window_bounds = array<i64: 2, 1, 19, 3>}, {transform_indices = @transform_1, window_bounds = array<i64: 2, 1, 19, 3>}, {transform_indices = @transform_2, window_bounds = array<i64: 1, 7, 3, 128>}, {pipeline_mode = #tpu.pipeline_mode<synchronous>, transform_indices = @transform_3, window_bounds = array<i64: 1, 1, 128>}, {pipeline_mode = #tpu.pipeline_mode<synchronous>, transform_indices = @transform_4, window_bounds = array<i64: 1, 1, 128>}, {transform_indices = @transform_5, window_bounds = array<i64: 2, 1, 16, 128>}]} {
    %c0_i32 = arith.constant 0 : i32
    %0 = arith.cmpi eq, %arg1, %c0_i32 : i32
    %1 = arith.extui %0 : i1 to i32
    %c0_i32_0 = arith.constant 0 : i32
    %2 = arith.cmpi ne, %1, %c0_i32_0 : i32
    scf.if %2 {
      %cst_84 = arith.constant 0.000000e+00 : f32
      %104 = vector.broadcast %cst_84 : f32 to vector<2x16x128xf32>
      %c0_85 = arith.constant 0 : index
      %c0_86 = arith.constant 0 : index
      %c0_87 = arith.constant 0 : index
      %105 = vector.load %arg8[%c0_85, %c0_86, %c0_87] : memref<2x16x128xf32, #tpu.memory_space<vmem>>, vector<2x16x128xf32>
      tpu.vector_store %arg8[%c0_85, %c0_86, %c0_87], %104 {strides = array<i32>} : memref<2x16x128xf32, #tpu.memory_space<vmem>>, vector<2x16x128xf32>,
    } else {
    }
    %c0 = arith.constant 0 : index
    %c0_1 = arith.constant 0 : index
    %c0_2 = arith.constant 0 : index
    %c0_3 = arith.constant 0 : index
    %3 = vector.load %arg2[%c0, %c0_1, %c0_2, %c0_3] : memref<2x1x19x3xbf16, #tpu.memory_space<vmem>>, vector<2x1x19x3xbf16>
    %4 = vector.shape_cast %3 : vector<2x1x19x3xbf16> to vector<2x19x3xbf16>
    %c0_4 = arith.constant 0 : index
    %c0_5 = arith.constant 0 : index
    %c0_6 = arith.constant 0 : index
    %c0_7 = arith.constant 0 : index
    %5 = vector.load %arg3[%c0_4, %c0_5, %c0_6, %c0_7] : memref<2x1x19x3xbf16, #tpu.memory_space<vmem>>, vector<2x1x19x3xbf16>
    %6 = vector.shape_cast %5 : vector<2x1x19x3xbf16> to vector<2x19x3xbf16>
    %c0_8 = arith.constant 0 : index
    %c0_9 = arith.constant 0 : index
    %c0_10 = arith.constant 0 : index
    %7 = vector.load %arg8[%c0_8, %c0_9, %c0_10] : memref<2x16x128xf32, #tpu.memory_space<vmem>>, vector<1x16x128xf32>
    %8 = vector.shape_cast %7 : vector<1x16x128xf32> to vector<16x128xf32>
    %9 = vector.extract_strided_slice %4 {offsets = [0, 0, 0], sizes = [1, 16, 3], strides = [1, 1, 1]} : vector<2x19x3xbf16> to vector<1x16x3xbf16>
    %10 = vector.shape_cast %9 : vector<1x16x3xbf16> to vector<16x3xbf16>
    %c0_11 = arith.constant 0 : index
    %c0_12 = arith.constant 0 : index
    %c0_13 = arith.constant 0 : index
    %c0_14 = arith.constant 0 : index
    %11 = vector.load %arg4[%c0_11, %c0_12, %c0_13, %c0_14] : memref<1x7x3x128xbf16, #tpu.memory_space<vmem>>, vector<1x1x3x128xbf16>
    %12 = vector.shape_cast %11 : vector<1x1x3x128xbf16> to vector<3x128xbf16>
    %cst = arith.constant dense<0.000000e+00> : vector<16x128xf32>
    %13 = tpu.matmul %10, %12, %cst {dimension_numbers = #tpu.dot_dimension_numbers<[1], [0], [0], [1], [0, 0, 1, 1], [], []>} : vector<16x3xbf16>, vector<3x128xbf16>, vector<16x128xf32> -> vector<16x128xf32>
    %14 = arith.addf %8, %13 : vector<16x128xf32>
    %15 = vector.extract_strided_slice %6 {offsets = [0, 0, 0], sizes = [1, 16, 3], strides = [1, 1, 1]} : vector<2x19x3xbf16> to vector<1x16x3xbf16>
    %16 = vector.shape_cast %15 : vector<1x16x3xbf16> to vector<16x3xbf16>
    %c0_15 = arith.constant 0 : index
    %c1 = arith.constant 1 : index
    %c0_16 = arith.constant 0 : index
    %c0_17 = arith.constant 0 : index
    %17 = vector.load %arg4[%c0_15, %c1, %c0_16, %c0_17] : memref<1x7x3x128xbf16, #tpu.memory_space<vmem>>, vector<1x1x3x128xbf16>
    %18 = vector.shape_cast %17 : vector<1x1x3x128xbf16> to vector<3x128xbf16>
    %cst_18 = arith.constant dense<0.000000e+00> : vector<16x128xf32>
    %19 = tpu.matmul %16, %18, %cst_18 {dimension_numbers = #tpu.dot_dimension_numbers<[1], [0], [0], [1], [0, 0, 1, 1], [], []>} : vector<16x3xbf16>, vector<3x128xbf16>, vector<16x128xf32> -> vector<16x128xf32>
    %20 = arith.addf %14, %19 : vector<16x128xf32>
    %21 = vector.extract_strided_slice %4 {offsets = [0, 1, 0], sizes = [1, 16, 3], strides = [1, 1, 1]} : vector<2x19x3xbf16> to vector<1x16x3xbf16>
    %22 = vector.shape_cast %21 : vector<1x16x3xbf16> to vector<16x3xbf16>
    %c0_19 = arith.constant 0 : index
    %c2 = arith.constant 2 : index
    %c0_20 = arith.constant 0 : index
    %c0_21 = arith.constant 0 : index
    %23 = vector.load %arg4[%c0_19, %c2, %c0_20, %c0_21] : memref<1x7x3x128xbf16, #tpu.memory_space<vmem>>, vector<1x1x3x128xbf16>
    %24 = vector.shape_cast %23 : vector<1x1x3x128xbf16> to vector<3x128xbf16>
    %cst_22 = arith.constant dense<0.000000e+00> : vector<16x128xf32>
    %25 = tpu.matmul %22, %24, %cst_22 {dimension_numbers = #tpu.dot_dimension_numbers<[1], [0], [0], [1], [0, 0, 1, 1], [], []>} : vector<16x3xbf16>, vector<3x128xbf16>, vector<16x128xf32> -> vector<16x128xf32>
    %26 = arith.addf %20, %25 : vector<16x128xf32>
    %27 = vector.extract_strided_slice %6 {offsets = [0, 1, 0], sizes = [1, 16, 3], strides = [1, 1, 1]} : vector<2x19x3xbf16> to vector<1x16x3xbf16>
    %28 = vector.shape_cast %27 : vector<1x16x3xbf16> to vector<16x3xbf16>
    %c0_23 = arith.constant 0 : index
    %c3 = arith.constant 3 : index
    %c0_24 = arith.constant 0 : index
    %c0_25 = arith.constant 0 : index
    %29 = vector.load %arg4[%c0_23, %c3, %c0_24, %c0_25] : memref<1x7x3x128xbf16, #tpu.memory_space<vmem>>, vector<1x1x3x128xbf16>
    %30 = vector.shape_cast %29 : vector<1x1x3x128xbf16> to vector<3x128xbf16>
    %cst_26 = arith.constant dense<0.000000e+00> : vector<16x128xf32>
    %31 = tpu.matmul %28, %30, %cst_26 {dimension_numbers = #tpu.dot_dimension_numbers<[1], [0], [0], [1], [0, 0, 1, 1], [], []>} : vector<16x3xbf16>, vector<3x128xbf16>, vector<16x128xf32> -> vector<16x128xf32>
    %32 = arith.addf %26, %31 : vector<16x128xf32>
    %33 = vector.extract_strided_slice %4 {offsets = [0, 2, 0], sizes = [1, 16, 3], strides = [1, 1, 1]} : vector<2x19x3xbf16> to vector<1x16x3xbf16>
    %34 = vector.shape_cast %33 : vector<1x16x3xbf16> to vector<16x3xbf16>
    %c0_27 = arith.constant 0 : index
    %c4 = arith.constant 4 : index
    %c0_28 = arith.constant 0 : index
    %c0_29 = arith.constant 0 : index
    %35 = vector.load %arg4[%c0_27, %c4, %c0_28, %c0_29] : memref<1x7x3x128xbf16, #tpu.memory_space<vmem>>, vector<1x1x3x128xbf16>
    %36 = vector.shape_cast %35 : vector<1x1x3x128xbf16> to vector<3x128xbf16>
    %cst_30 = arith.constant dense<0.000000e+00> : vector<16x128xf32>
    %37 = tpu.matmul %34, %36, %cst_30 {dimension_numbers = #tpu.dot_dimension_numbers<[1], [0], [0], [1], [0, 0, 1, 1], [], []>} : vector<16x3xbf16>, vector<3x128xbf16>, vector<16x128xf32> -> vector<16x128xf32>
    %38 = arith.addf %32, %37 : vector<16x128xf32>
    %39 = vector.extract_strided_slice %6 {offsets = [0, 2, 0], sizes = [1, 16, 3], strides = [1, 1, 1]} : vector<2x19x3xbf16> to vector<1x16x3xbf16>
    %40 = vector.shape_cast %39 : vector<1x16x3xbf16> to vector<16x3xbf16>
    %c0_31 = arith.constant 0 : index
    %c5 = arith.constant 5 : index
    %c0_32 = arith.constant 0 : index
    %c0_33 = arith.constant 0 : index
    %41 = vector.load %arg4[%c0_31, %c5, %c0_32, %c0_33] : memref<1x7x3x128xbf16, #tpu.memory_space<vmem>>, vector<1x1x3x128xbf16>
    %42 = vector.shape_cast %41 : vector<1x1x3x128xbf16> to vector<3x128xbf16>
    %cst_34 = arith.constant dense<0.000000e+00> : vector<16x128xf32>
    %43 = tpu.matmul %40, %42, %cst_34 {dimension_numbers = #tpu.dot_dimension_numbers<[1], [0], [0], [1], [0, 0, 1, 1], [], []>} : vector<16x3xbf16>, vector<3x128xbf16>, vector<16x128xf32> -> vector<16x128xf32>
    %44 = arith.addf %38, %43 : vector<16x128xf32>
    %45 = vector.extract_strided_slice %4 {offsets = [0, 3, 0], sizes = [1, 16, 3], strides = [1, 1, 1]} : vector<2x19x3xbf16> to vector<1x16x3xbf16>
    %46 = vector.shape_cast %45 : vector<1x16x3xbf16> to vector<16x3xbf16>
    %c0_35 = arith.constant 0 : index
    %c6 = arith.constant 6 : index
    %c0_36 = arith.constant 0 : index
    %c0_37 = arith.constant 0 : index
    %47 = vector.load %arg4[%c0_35, %c6, %c0_36, %c0_37] : memref<1x7x3x128xbf16, #tpu.memory_space<vmem>>, vector<1x1x3x128xbf16>
    %48 = vector.shape_cast %47 : vector<1x1x3x128xbf16> to vector<3x128xbf16>
    %cst_38 = arith.constant dense<0.000000e+00> : vector<16x128xf32>
    %49 = tpu.matmul %46, %48, %cst_38 {dimension_numbers = #tpu.dot_dimension_numbers<[1], [0], [0], [1], [0, 0, 1, 1], [], []>} : vector<16x3xbf16>, vector<3x128xbf16>, vector<16x128xf32> -> vector<16x128xf32>
    %50 = arith.addf %44, %49 : vector<16x128xf32>
    %c0_39 = arith.constant 0 : index
    %c0_40 = arith.constant 0 : index
    %c0_41 = arith.constant 0 : index
    %51 = vector.load %arg8[%c0_39, %c0_40, %c0_41] : memref<2x16x128xf32, #tpu.memory_space<vmem>>, vector<1x16x128xf32>
    %52 = vector.shape_cast %51 : vector<1x16x128xf32> to vector<16x128xf32>
    %53 = vector.shape_cast %50 : vector<16x128xf32> to vector<1x16x128xf32>
    tpu.vector_store %arg8[%c0_39, %c0_40, %c0_41], %53 {strides = array<i32>} : memref<2x16x128xf32, #tpu.memory_space<vmem>>, vector<1x16x128xf32>,
    %c1_42 = arith.constant 1 : index
    %c0_43 = arith.constant 0 : index
    %c0_44 = arith.constant 0 : index
    %54 = vector.load %arg8[%c1_42, %c0_43, %c0_44] : memref<2x16x128xf32, #tpu.memory_space<vmem>>, vector<1x16x128xf32>
    %55 = vector.shape_cast %54 : vector<1x16x128xf32> to vector<16x128xf32>
    %56 = vector.extract_strided_slice %4 {offsets = [1, 0, 0], sizes = [1, 16, 3], strides = [1, 1, 1]} : vector<2x19x3xbf16> to vector<1x16x3xbf16>
    %57 = vector.shape_cast %56 : vector<1x16x3xbf16> to vector<16x3xbf16>
    %c0_45 = arith.constant 0 : index
    %c0_46 = arith.constant 0 : index
    %c0_47 = arith.constant 0 : index
    %c0_48 = arith.constant 0 : index
    %58 = vector.load %arg4[%c0_45, %c0_46, %c0_47, %c0_48] : memref<1x7x3x128xbf16, #tpu.memory_space<vmem>>, vector<1x1x3x128xbf16>
    %59 = vector.shape_cast %58 : vector<1x1x3x128xbf16> to vector<3x128xbf16>
    %cst_49 = arith.constant dense<0.000000e+00> : vector<16x128xf32>
    %60 = tpu.matmul %57, %59, %cst_49 {dimension_numbers = #tpu.dot_dimension_numbers<[1], [0], [0], [1], [0, 0, 1, 1], [], []>} : vector<16x3xbf16>, vector<3x128xbf16>, vector<16x128xf32> -> vector<16x128xf32>
    %61 = arith.addf %55, %60 : vector<16x128xf32>
    %62 = vector.extract_strided_slice %6 {offsets = [1, 0, 0], sizes = [1, 16, 3], strides = [1, 1, 1]} : vector<2x19x3xbf16> to vector<1x16x3xbf16>
    %63 = vector.shape_cast %62 : vector<1x16x3xbf16> to vector<16x3xbf16>
    %c0_50 = arith.constant 0 : index
    %c1_51 = arith.constant 1 : index
    %c0_52 = arith.constant 0 : index
    %c0_53 = arith.constant 0 : index
    %64 = vector.load %arg4[%c0_50, %c1_51, %c0_52, %c0_53] : memref<1x7x3x128xbf16, #tpu.memory_space<vmem>>, vector<1x1x3x128xbf16>
    %65 = vector.shape_cast %64 : vector<1x1x3x128xbf16> to vector<3x128xbf16>
    %cst_54 = arith.constant dense<0.000000e+00> : vector<16x128xf32>
    %66 = tpu.matmul %63, %65, %cst_54 {dimension_numbers = #tpu.dot_dimension_numbers<[1], [0], [0], [1], [0, 0, 1, 1], [], []>} : vector<16x3xbf16>, vector<3x128xbf16>, vector<16x128xf32> -> vector<16x128xf32>
    %67 = arith.addf %61, %66 : vector<16x128xf32>
    %68 = vector.extract_strided_slice %4 {offsets = [1, 1, 0], sizes = [1, 16, 3], strides = [1, 1, 1]} : vector<2x19x3xbf16> to vector<1x16x3xbf16>
    %69 = vector.shape_cast %68 : vector<1x16x3xbf16> to vector<16x3xbf16>
    %c0_55 = arith.constant 0 : index
    %c2_56 = arith.constant 2 : index
    %c0_57 = arith.constant 0 : index
    %c0_58 = arith.constant 0 : index
    %70 = vector.load %arg4[%c0_55, %c2_56, %c0_57, %c0_58] : memref<1x7x3x128xbf16, #tpu.memory_space<vmem>>, vector<1x1x3x128xbf16>
    %71 = vector.shape_cast %70 : vector<1x1x3x128xbf16> to vector<3x128xbf16>
    %cst_59 = arith.constant dense<0.000000e+00> : vector<16x128xf32>
    %72 = tpu.matmul %69, %71, %cst_59 {dimension_numbers = #tpu.dot_dimension_numbers<[1], [0], [0], [1], [0, 0, 1, 1], [], []>} : vector<16x3xbf16>, vector<3x128xbf16>, vector<16x128xf32> -> vector<16x128xf32>
    %73 = arith.addf %67, %72 : vector<16x128xf32>
    %74 = vector.extract_strided_slice %6 {offsets = [1, 1, 0], sizes = [1, 16, 3], strides = [1, 1, 1]} : vector<2x19x3xbf16> to vector<1x16x3xbf16>
    %75 = vector.shape_cast %74 : vector<1x16x3xbf16> to vector<16x3xbf16>
    %c0_60 = arith.constant 0 : index
    %c3_61 = arith.constant 3 : index
    %c0_62 = arith.constant 0 : index
    %c0_63 = arith.constant 0 : index
    %76 = vector.load %arg4[%c0_60, %c3_61, %c0_62, %c0_63] : memref<1x7x3x128xbf16, #tpu.memory_space<vmem>>, vector<1x1x3x128xbf16>
    %77 = vector.shape_cast %76 : vector<1x1x3x128xbf16> to vector<3x128xbf16>
    %cst_64 = arith.constant dense<0.000000e+00> : vector<16x128xf32>
    %78 = tpu.matmul %75, %77, %cst_64 {dimension_numbers = #tpu.dot_dimension_numbers<[1], [0], [0], [1], [0, 0, 1, 1], [], []>} : vector<16x3xbf16>, vector<3x128xbf16>, vector<16x128xf32> -> vector<16x128xf32>
    %79 = arith.addf %73, %78 : vector<16x128xf32>
    %80 = vector.extract_strided_slice %4 {offsets = [1, 2, 0], sizes = [1, 16, 3], strides = [1, 1, 1]} : vector<2x19x3xbf16> to vector<1x16x3xbf16>
    %81 = vector.shape_cast %80 : vector<1x16x3xbf16> to vector<16x3xbf16>
    %c0_65 = arith.constant 0 : index
    %c4_66 = arith.constant 4 : index
    %c0_67 = arith.constant 0 : index
    %c0_68 = arith.constant 0 : index
    %82 = vector.load %arg4[%c0_65, %c4_66, %c0_67, %c0_68] : memref<1x7x3x128xbf16, #tpu.memory_space<vmem>>, vector<1x1x3x128xbf16>
    %83 = vector.shape_cast %82 : vector<1x1x3x128xbf16> to vector<3x128xbf16>
    %cst_69 = arith.constant dense<0.000000e+00> : vector<16x128xf32>
    %84 = tpu.matmul %81, %83, %cst_69 {dimension_numbers = #tpu.dot_dimension_numbers<[1], [0], [0], [1], [0, 0, 1, 1], [], []>} : vector<16x3xbf16>, vector<3x128xbf16>, vector<16x128xf32> -> vector<16x128xf32>
    %85 = arith.addf %79, %84 : vector<16x128xf32>
    %86 = vector.extract_strided_slice %6 {offsets = [1, 2, 0], sizes = [1, 16, 3], strides = [1, 1, 1]} : vector<2x19x3xbf16> to vector<1x16x3xbf16>
    %87 = vector.shape_cast %86 : vector<1x16x3xbf16> to vector<16x3xbf16>
    %c0_70 = arith.constant 0 : index
    %c5_71 = arith.constant 5 : index
    %c0_72 = arith.constant 0 : index
    %c0_73 = arith.constant 0 : index
    %88 = vector.load %arg4[%c0_70, %c5_71, %c0_72, %c0_73] : memref<1x7x3x128xbf16, #tpu.memory_space<vmem>>, vector<1x1x3x128xbf16>
    %89 = vector.shape_cast %88 : vector<1x1x3x128xbf16> to vector<3x128xbf16>
    %cst_74 = arith.constant dense<0.000000e+00> : vector<16x128xf32>
    %90 = tpu.matmul %87, %89, %cst_74 {dimension_numbers = #tpu.dot_dimension_numbers<[1], [0], [0], [1], [0, 0, 1, 1], [], []>} : vector<16x3xbf16>, vector<3x128xbf16>, vector<16x128xf32> -> vector<16x128xf32>
    %91 = arith.addf %85, %90 : vector<16x128xf32>
    %92 = vector.extract_strided_slice %4 {offsets = [1, 3, 0], sizes = [1, 16, 3], strides = [1, 1, 1]} : vector<2x19x3xbf16> to vector<1x16x3xbf16>
    %93 = vector.shape_cast %92 : vector<1x16x3xbf16> to vector<16x3xbf16>
    %c0_75 = arith.constant 0 : index
    %c6_76 = arith.constant 6 : index
    %c0_77 = arith.constant 0 : index
    %c0_78 = arith.constant 0 : index
    %94 = vector.load %arg4[%c0_75, %c6_76, %c0_77, %c0_78] : memref<1x7x3x128xbf16, #tpu.memory_space<vmem>>, vector<1x1x3x128xbf16>
    %95 = vector.shape_cast %94 : vector<1x1x3x128xbf16> to vector<3x128xbf16>
    %cst_79 = arith.constant dense<0.000000e+00> : vector<16x128xf32>
    %96 = tpu.matmul %93, %95, %cst_79 {dimension_numbers = #tpu.dot_dimension_numbers<[1], [0], [0], [1], [0, 0, 1, 1], [], []>} : vector<16x3xbf16>, vector<3x128xbf16>, vector<16x128xf32> -> vector<16x128xf32>
    %97 = arith.addf %91, %96 : vector<16x128xf32>
    %c1_80 = arith.constant 1 : index
    %c0_81 = arith.constant 0 : index
    %c0_82 = arith.constant 0 : index
    %98 = vector.load %arg8[%c1_80, %c0_81, %c0_82] : memref<2x16x128xf32, #tpu.memory_space<vmem>>, vector<1x16x128xf32>
    %99 = vector.shape_cast %98 : vector<1x16x128xf32> to vector<16x128xf32>
    %100 = vector.shape_cast %97 : vector<16x128xf32> to vector<1x16x128xf32>
    tpu.vector_store %arg8[%c1_80, %c0_81, %c0_82], %100 {strides = array<i32>} : memref<2x16x128xf32, #tpu.memory_space<vmem>>, vector<1x16x128xf32>,
    %c6_i32 = arith.constant 6 : i32
    %101 = arith.cmpi eq, %arg1, %c6_i32 : i32
    %102 = arith.extui %101 : i1 to i32
    %c0_i32_83 = arith.constant 0 : i32
    %103 = arith.cmpi ne, %102, %c0_i32_83 : i32
    scf.if %103 {
      %c0_84 = arith.constant 0 : index
      %c0_85 = arith.constant 0 : index
      %c0_86 = arith.constant 0 : index
      %104 = vector.load %arg8[%c0_84, %c0_85, %c0_86] : memref<2x16x128xf32, #tpu.memory_space<vmem>>, vector<2x16x128xf32>
      %c0_87 = arith.constant 0 : index
      %c0_88 = arith.constant 0 : index
      %c0_89 = arith.constant 0 : index
      %105 = vector.load %arg5[%c0_87, %c0_88, %c0_89] : memref<1x1x128xf32, #tpu.memory_space<vmem>>, vector<1x1x128xf32>
      %106 = vector.broadcast %105 : vector<1x1x128xf32> to vector<2x16x128xf32>
      %107 = arith.mulf %104, %106 : vector<2x16x128xf32>
      %c0_90 = arith.constant 0 : index
      %c0_91 = arith.constant 0 : index
      %c0_92 = arith.constant 0 : index
      %108 = vector.load %arg6[%c0_90, %c0_91, %c0_92] : memref<1x1x128xf32, #tpu.memory_space<vmem>>, vector<1x1x128xf32>
      %109 = vector.broadcast %108 : vector<1x1x128xf32> to vector<2x16x128xf32>
      %110 = arith.addf %107, %109 : vector<2x16x128xf32>
      %cst_93 = arith.constant 0.000000e+00 : f32
      %111 = vector.broadcast %cst_93 : f32 to vector<2x16x128xf32>
      %112 = arith.maximumf %110, %111 : vector<2x16x128xf32>
      %113 = arith.truncf %112 : vector<2x16x128xf32> to vector<2x16x128xbf16>
      %c0_94 = arith.constant 0 : index
      %c0_95 = arith.constant 0 : index
      %c0_96 = arith.constant 0 : index
      %c0_97 = arith.constant 0 : index
      %114 = vector.load %arg7[%c0_94, %c0_95, %c0_96, %c0_97] : memref<2x1x16x128xbf16, #tpu.memory_space<vmem>>, vector<2x1x16x128xbf16>
      %115 = vector.shape_cast %114 : vector<2x1x16x128xbf16> to vector<2x16x128xbf16>
      %116 = vector.shape_cast %113 : vector<2x16x128xbf16> to vector<2x1x16x128xbf16>
      tpu.vector_store %arg7[%c0_94, %c0_95, %c0_96, %c0_97], %116 {strides = array<i32>} : memref<2x1x16x128xbf16, #tpu.memory_space<vmem>>, vector<2x1x16x128xbf16>,
    } else {
    }
    return
  }
  func.func @transform_0(%arg0: i32, %arg1: i32) -> (i32, i32, i32, i32) {
    %c2_i32 = arith.constant 2 : i32
    %0 = arith.muli %c2_i32, %arg0 : i32
    %1 = arith.addi %0, %arg1 : i32
    %c0_i32 = arith.constant 0 : i32
    %c0_i32_0 = arith.constant 0 : i32
    %c0_i32_1 = arith.constant 0 : i32
    %c0_i32_2 = arith.constant 0 : i32
    return %c0_i32, %1, %c0_i32_0, %c0_i32_1 : i32, i32, i32, i32
  }
  func.func @transform_1(%arg0: i32, %arg1: i32) -> (i32, i32, i32, i32) {
    %c2_i32 = arith.constant 2 : i32
    %0 = arith.muli %c2_i32, %arg0 : i32
    %1 = arith.addi %0, %arg1 : i32
    %c0_i32 = arith.constant 0 : i32
    %c0_i32_0 = arith.constant 0 : i32
    %c0_i32_1 = arith.constant 0 : i32
    %c0_i32_2 = arith.constant 0 : i32
    return %c0_i32, %1, %c0_i32_0, %c0_i32_1 : i32, i32, i32, i32
  }
  func.func @transform_2(%arg0: i32, %arg1: i32) -> (i32, i32, i32, i32) {
    %c0_i32 = arith.constant 0 : i32
    %c0_i32_0 = arith.constant 0 : i32
    %c0_i32_1 = arith.constant 0 : i32
    %c0_i32_2 = arith.constant 0 : i32
    return %arg1, %c0_i32, %c0_i32_0, %c0_i32_1 : i32, i32, i32, i32
  }
  func.func @transform_3(%arg0: i32, %arg1: i32) -> (i32, i32, i32) {
    %c0_i32 = arith.constant 0 : i32
    %c0_i32_0 = arith.constant 0 : i32
    %c0_i32_1 = arith.constant 0 : i32
    %c0_i32_2 = arith.constant 0 : i32
    return %c0_i32, %c0_i32_0, %c0_i32_1 : i32, i32, i32
  }
  func.func @transform_4(%arg0: i32, %arg1: i32) -> (i32, i32, i32) {
    %c0_i32 = arith.constant 0 : i32
    %c0_i32_0 = arith.constant 0 : i32
    %c0_i32_1 = arith.constant 0 : i32
    %c0_i32_2 = arith.constant 0 : i32
    return %c0_i32, %c0_i32_0, %c0_i32_1 : i32, i32, i32
  }
  func.func @transform_5(%arg0: i32, %arg1: i32) -> (i32, i32, i32, i32) {
    %c0_i32 = arith.constant 0 : i32
    %c0_i32_0 = arith.constant 0 : i32
    %c0_i32_1 = arith.constant 0 : i32
    %c0_i32_2 = arith.constant 0 : i32
    return %c0_i32, %arg0, %c0_i32_0, %c0_i32_1 : i32, i32, i32, i32
  }
}

module attributes {stable_mosaic.version = 11 : i64} {
  func.func @_conv_kxk_kernel(%arg0: i32, %arg1: i32, %arg2: memref<2x1x10x128xbf16, #tpu.memory_space<vmem>>, %arg3: memref<1x3x128x128xbf16, #tpu.memory_space<vmem>>, %arg4: memref<1x1x128xf32, #tpu.memory_space<vmem>>, %arg5: memref<1x1x128xf32, #tpu.memory_space<vmem>>, %arg6: memref<2x1x8x128xbf16, #tpu.memory_space<vmem>>, %arg7: memref<2x8x128xf32, #tpu.memory_space<vmem>>) attributes {dimension_semantics = [#tpu.dimension_semantics<parallel>, #tpu.dimension_semantics<arbitrary>], iteration_bounds = array<i64: 8, 3>, scalar_prefetch = 0 : i64, scratch_operands = 1 : i64, tpu.core_type = #tpu.core_type<tc>, window_params = [{transform_indices = @transform_0, window_bounds = array<i64: 2, 1, 10, 128>}, {transform_indices = @transform_1, window_bounds = array<i64: 1, 3, 128, 128>}, {pipeline_mode = #tpu.pipeline_mode<synchronous>, transform_indices = @transform_2, window_bounds = array<i64: 1, 1, 128>}, {pipeline_mode = #tpu.pipeline_mode<synchronous>, transform_indices = @transform_3, window_bounds = array<i64: 1, 1, 128>}, {transform_indices = @transform_4, window_bounds = array<i64: 2, 1, 8, 128>}]} {
    %c0_i32 = arith.constant 0 : i32
    %0 = arith.cmpi eq, %arg1, %c0_i32 : i32
    %1 = arith.extui %0 : i1 to i32
    %c0_i32_0 = arith.constant 0 : i32
    %2 = arith.cmpi ne, %1, %c0_i32_0 : i32
    scf.if %2 {
      %cst_44 = arith.constant 0.000000e+00 : f32
      %54 = vector.broadcast %cst_44 : f32 to vector<2x8x128xf32>
      %c0_45 = arith.constant 0 : index
      %c0_46 = arith.constant 0 : index
      %c0_47 = arith.constant 0 : index
      %55 = vector.load %arg7[%c0_45, %c0_46, %c0_47] : memref<2x8x128xf32, #tpu.memory_space<vmem>>, vector<2x8x128xf32>
      tpu.vector_store %arg7[%c0_45, %c0_46, %c0_47], %54 {strides = array<i32>} : memref<2x8x128xf32, #tpu.memory_space<vmem>>, vector<2x8x128xf32>,
    } else {
    }
    %c0 = arith.constant 0 : index
    %c0_1 = arith.constant 0 : index
    %c0_2 = arith.constant 0 : index
    %c0_3 = arith.constant 0 : index
    %3 = vector.load %arg2[%c0, %c0_1, %c0_2, %c0_3] : memref<2x1x10x128xbf16, #tpu.memory_space<vmem>>, vector<2x1x10x128xbf16>
    %4 = vector.shape_cast %3 : vector<2x1x10x128xbf16> to vector<2x10x128xbf16>
    %c0_4 = arith.constant 0 : index
    %c0_5 = arith.constant 0 : index
    %c0_6 = arith.constant 0 : index
    %5 = vector.load %arg7[%c0_4, %c0_5, %c0_6] : memref<2x8x128xf32, #tpu.memory_space<vmem>>, vector<1x8x128xf32>
    %6 = vector.shape_cast %5 : vector<1x8x128xf32> to vector<8x128xf32>
    %7 = vector.extract_strided_slice %4 {offsets = [0, 0, 0], sizes = [1, 8, 128], strides = [1, 1, 1]} : vector<2x10x128xbf16> to vector<1x8x128xbf16>
    %8 = vector.shape_cast %7 : vector<1x8x128xbf16> to vector<8x128xbf16>
    %c0_7 = arith.constant 0 : index
    %c0_8 = arith.constant 0 : index
    %c0_9 = arith.constant 0 : index
    %c0_10 = arith.constant 0 : index
    %9 = vector.load %arg3[%c0_7, %c0_8, %c0_9, %c0_10] : memref<1x3x128x128xbf16, #tpu.memory_space<vmem>>, vector<1x1x128x128xbf16>
    %10 = vector.shape_cast %9 : vector<1x1x128x128xbf16> to vector<128x128xbf16>
    %cst = arith.constant dense<0.000000e+00> : vector<8x128xf32>
    %11 = tpu.matmul %8, %10, %cst {dimension_numbers = #tpu.dot_dimension_numbers<[1], [0], [0], [1], [0, 0, 1, 1], [], []>} : vector<8x128xbf16>, vector<128x128xbf16>, vector<8x128xf32> -> vector<8x128xf32>
    %12 = arith.addf %6, %11 : vector<8x128xf32>
    %13 = vector.extract_strided_slice %4 {offsets = [0, 1, 0], sizes = [1, 8, 128], strides = [1, 1, 1]} : vector<2x10x128xbf16> to vector<1x8x128xbf16>
    %14 = vector.shape_cast %13 : vector<1x8x128xbf16> to vector<8x128xbf16>
    %c0_11 = arith.constant 0 : index
    %c1 = arith.constant 1 : index
    %c0_12 = arith.constant 0 : index
    %c0_13 = arith.constant 0 : index
    %15 = vector.load %arg3[%c0_11, %c1, %c0_12, %c0_13] : memref<1x3x128x128xbf16, #tpu.memory_space<vmem>>, vector<1x1x128x128xbf16>
    %16 = vector.shape_cast %15 : vector<1x1x128x128xbf16> to vector<128x128xbf16>
    %cst_14 = arith.constant dense<0.000000e+00> : vector<8x128xf32>
    %17 = tpu.matmul %14, %16, %cst_14 {dimension_numbers = #tpu.dot_dimension_numbers<[1], [0], [0], [1], [0, 0, 1, 1], [], []>} : vector<8x128xbf16>, vector<128x128xbf16>, vector<8x128xf32> -> vector<8x128xf32>
    %18 = arith.addf %12, %17 : vector<8x128xf32>
    %19 = vector.extract_strided_slice %4 {offsets = [0, 2, 0], sizes = [1, 8, 128], strides = [1, 1, 1]} : vector<2x10x128xbf16> to vector<1x8x128xbf16>
    %20 = vector.shape_cast %19 : vector<1x8x128xbf16> to vector<8x128xbf16>
    %c0_15 = arith.constant 0 : index
    %c2 = arith.constant 2 : index
    %c0_16 = arith.constant 0 : index
    %c0_17 = arith.constant 0 : index
    %21 = vector.load %arg3[%c0_15, %c2, %c0_16, %c0_17] : memref<1x3x128x128xbf16, #tpu.memory_space<vmem>>, vector<1x1x128x128xbf16>
    %22 = vector.shape_cast %21 : vector<1x1x128x128xbf16> to vector<128x128xbf16>
    %cst_18 = arith.constant dense<0.000000e+00> : vector<8x128xf32>
    %23 = tpu.matmul %20, %22, %cst_18 {dimension_numbers = #tpu.dot_dimension_numbers<[1], [0], [0], [1], [0, 0, 1, 1], [], []>} : vector<8x128xbf16>, vector<128x128xbf16>, vector<8x128xf32> -> vector<8x128xf32>
    %24 = arith.addf %18, %23 : vector<8x128xf32>
    %c0_19 = arith.constant 0 : index
    %c0_20 = arith.constant 0 : index
    %c0_21 = arith.constant 0 : index
    %25 = vector.load %arg7[%c0_19, %c0_20, %c0_21] : memref<2x8x128xf32, #tpu.memory_space<vmem>>, vector<1x8x128xf32>
    %26 = vector.shape_cast %25 : vector<1x8x128xf32> to vector<8x128xf32>
    %27 = vector.shape_cast %24 : vector<8x128xf32> to vector<1x8x128xf32>
    tpu.vector_store %arg7[%c0_19, %c0_20, %c0_21], %27 {strides = array<i32>} : memref<2x8x128xf32, #tpu.memory_space<vmem>>, vector<1x8x128xf32>,
    %c1_22 = arith.constant 1 : index
    %c0_23 = arith.constant 0 : index
    %c0_24 = arith.constant 0 : index
    %28 = vector.load %arg7[%c1_22, %c0_23, %c0_24] : memref<2x8x128xf32, #tpu.memory_space<vmem>>, vector<1x8x128xf32>
    %29 = vector.shape_cast %28 : vector<1x8x128xf32> to vector<8x128xf32>
    %30 = vector.extract_strided_slice %4 {offsets = [1, 0, 0], sizes = [1, 8, 128], strides = [1, 1, 1]} : vector<2x10x128xbf16> to vector<1x8x128xbf16>
    %31 = vector.shape_cast %30 : vector<1x8x128xbf16> to vector<8x128xbf16>
    %c0_25 = arith.constant 0 : index
    %c0_26 = arith.constant 0 : index
    %c0_27 = arith.constant 0 : index
    %c0_28 = arith.constant 0 : index
    %32 = vector.load %arg3[%c0_25, %c0_26, %c0_27, %c0_28] : memref<1x3x128x128xbf16, #tpu.memory_space<vmem>>, vector<1x1x128x128xbf16>
    %33 = vector.shape_cast %32 : vector<1x1x128x128xbf16> to vector<128x128xbf16>
    %cst_29 = arith.constant dense<0.000000e+00> : vector<8x128xf32>
    %34 = tpu.matmul %31, %33, %cst_29 {dimension_numbers = #tpu.dot_dimension_numbers<[1], [0], [0], [1], [0, 0, 1, 1], [], []>} : vector<8x128xbf16>, vector<128x128xbf16>, vector<8x128xf32> -> vector<8x128xf32>
    %35 = arith.addf %29, %34 : vector<8x128xf32>
    %36 = vector.extract_strided_slice %4 {offsets = [1, 1, 0], sizes = [1, 8, 128], strides = [1, 1, 1]} : vector<2x10x128xbf16> to vector<1x8x128xbf16>
    %37 = vector.shape_cast %36 : vector<1x8x128xbf16> to vector<8x128xbf16>
    %c0_30 = arith.constant 0 : index
    %c1_31 = arith.constant 1 : index
    %c0_32 = arith.constant 0 : index
    %c0_33 = arith.constant 0 : index
    %38 = vector.load %arg3[%c0_30, %c1_31, %c0_32, %c0_33] : memref<1x3x128x128xbf16, #tpu.memory_space<vmem>>, vector<1x1x128x128xbf16>
    %39 = vector.shape_cast %38 : vector<1x1x128x128xbf16> to vector<128x128xbf16>
    %cst_34 = arith.constant dense<0.000000e+00> : vector<8x128xf32>
    %40 = tpu.matmul %37, %39, %cst_34 {dimension_numbers = #tpu.dot_dimension_numbers<[1], [0], [0], [1], [0, 0, 1, 1], [], []>} : vector<8x128xbf16>, vector<128x128xbf16>, vector<8x128xf32> -> vector<8x128xf32>
    %41 = arith.addf %35, %40 : vector<8x128xf32>
    %42 = vector.extract_strided_slice %4 {offsets = [1, 2, 0], sizes = [1, 8, 128], strides = [1, 1, 1]} : vector<2x10x128xbf16> to vector<1x8x128xbf16>
    %43 = vector.shape_cast %42 : vector<1x8x128xbf16> to vector<8x128xbf16>
    %c0_35 = arith.constant 0 : index
    %c2_36 = arith.constant 2 : index
    %c0_37 = arith.constant 0 : index
    %c0_38 = arith.constant 0 : index
    %44 = vector.load %arg3[%c0_35, %c2_36, %c0_37, %c0_38] : memref<1x3x128x128xbf16, #tpu.memory_space<vmem>>, vector<1x1x128x128xbf16>
    %45 = vector.shape_cast %44 : vector<1x1x128x128xbf16> to vector<128x128xbf16>
    %cst_39 = arith.constant dense<0.000000e+00> : vector<8x128xf32>
    %46 = tpu.matmul %43, %45, %cst_39 {dimension_numbers = #tpu.dot_dimension_numbers<[1], [0], [0], [1], [0, 0, 1, 1], [], []>} : vector<8x128xbf16>, vector<128x128xbf16>, vector<8x128xf32> -> vector<8x128xf32>
    %47 = arith.addf %41, %46 : vector<8x128xf32>
    %c1_40 = arith.constant 1 : index
    %c0_41 = arith.constant 0 : index
    %c0_42 = arith.constant 0 : index
    %48 = vector.load %arg7[%c1_40, %c0_41, %c0_42] : memref<2x8x128xf32, #tpu.memory_space<vmem>>, vector<1x8x128xf32>
    %49 = vector.shape_cast %48 : vector<1x8x128xf32> to vector<8x128xf32>
    %50 = vector.shape_cast %47 : vector<8x128xf32> to vector<1x8x128xf32>
    tpu.vector_store %arg7[%c1_40, %c0_41, %c0_42], %50 {strides = array<i32>} : memref<2x8x128xf32, #tpu.memory_space<vmem>>, vector<1x8x128xf32>,
    %c2_i32 = arith.constant 2 : i32
    %51 = arith.cmpi eq, %arg1, %c2_i32 : i32
    %52 = arith.extui %51 : i1 to i32
    %c0_i32_43 = arith.constant 0 : i32
    %53 = arith.cmpi ne, %52, %c0_i32_43 : i32
    scf.if %53 {
      %c0_44 = arith.constant 0 : index
      %c0_45 = arith.constant 0 : index
      %c0_46 = arith.constant 0 : index
      %54 = vector.load %arg7[%c0_44, %c0_45, %c0_46] : memref<2x8x128xf32, #tpu.memory_space<vmem>>, vector<2x8x128xf32>
      %c0_47 = arith.constant 0 : index
      %c0_48 = arith.constant 0 : index
      %c0_49 = arith.constant 0 : index
      %55 = vector.load %arg4[%c0_47, %c0_48, %c0_49] : memref<1x1x128xf32, #tpu.memory_space<vmem>>, vector<1x1x128xf32>
      %56 = vector.broadcast %55 : vector<1x1x128xf32> to vector<2x8x128xf32>
      %57 = arith.mulf %54, %56 : vector<2x8x128xf32>
      %c0_50 = arith.constant 0 : index
      %c0_51 = arith.constant 0 : index
      %c0_52 = arith.constant 0 : index
      %58 = vector.load %arg5[%c0_50, %c0_51, %c0_52] : memref<1x1x128xf32, #tpu.memory_space<vmem>>, vector<1x1x128xf32>
      %59 = vector.broadcast %58 : vector<1x1x128xf32> to vector<2x8x128xf32>
      %60 = arith.addf %57, %59 : vector<2x8x128xf32>
      %cst_53 = arith.constant 0.000000e+00 : f32
      %61 = vector.broadcast %cst_53 : f32 to vector<2x8x128xf32>
      %62 = arith.maximumf %60, %61 : vector<2x8x128xf32>
      %63 = arith.truncf %62 : vector<2x8x128xf32> to vector<2x8x128xbf16>
      %c0_54 = arith.constant 0 : index
      %c0_55 = arith.constant 0 : index
      %c0_56 = arith.constant 0 : index
      %c0_57 = arith.constant 0 : index
      %64 = vector.load %arg6[%c0_54, %c0_55, %c0_56, %c0_57] : memref<2x1x8x128xbf16, #tpu.memory_space<vmem>>, vector<2x1x8x128xbf16>
      %65 = vector.shape_cast %64 : vector<2x1x8x128xbf16> to vector<2x8x128xbf16>
      %66 = vector.shape_cast %63 : vector<2x8x128xbf16> to vector<2x1x8x128xbf16>
      tpu.vector_store %arg6[%c0_54, %c0_55, %c0_56, %c0_57], %66 {strides = array<i32>} : memref<2x1x8x128xbf16, #tpu.memory_space<vmem>>, vector<2x1x8x128xbf16>,
    } else {
    }
    return
  }
  func.func @transform_0(%arg0: i32, %arg1: i32) -> (i32, i32, i32, i32) {
    %0 = arith.addi %arg0, %arg1 : i32
    %c0_i32 = arith.constant 0 : i32
    %c0_i32_0 = arith.constant 0 : i32
    %c0_i32_1 = arith.constant 0 : i32
    %c0_i32_2 = arith.constant 0 : i32
    return %c0_i32, %0, %c0_i32_0, %c0_i32_1 : i32, i32, i32, i32
  }
  func.func @transform_1(%arg0: i32, %arg1: i32) -> (i32, i32, i32, i32) {
    %c0_i32 = arith.constant 0 : i32
    %c0_i32_0 = arith.constant 0 : i32
    %c0_i32_1 = arith.constant 0 : i32
    %c0_i32_2 = arith.constant 0 : i32
    return %arg1, %c0_i32, %c0_i32_0, %c0_i32_1 : i32, i32, i32, i32
  }
  func.func @transform_2(%arg0: i32, %arg1: i32) -> (i32, i32, i32) {
    %c0_i32 = arith.constant 0 : i32
    %c0_i32_0 = arith.constant 0 : i32
    %c0_i32_1 = arith.constant 0 : i32
    %c0_i32_2 = arith.constant 0 : i32
    return %c0_i32, %c0_i32_0, %c0_i32_1 : i32, i32, i32
  }
  func.func @transform_3(%arg0: i32, %arg1: i32) -> (i32, i32, i32) {
    %c0_i32 = arith.constant 0 : i32
    %c0_i32_0 = arith.constant 0 : i32
    %c0_i32_1 = arith.constant 0 : i32
    %c0_i32_2 = arith.constant 0 : i32
    return %c0_i32, %c0_i32_0, %c0_i32_1 : i32, i32, i32
  }
  func.func @transform_4(%arg0: i32, %arg1: i32) -> (i32, i32, i32, i32) {
    %c0_i32 = arith.constant 0 : i32
    %c0_i32_0 = arith.constant 0 : i32
    %c0_i32_1 = arith.constant 0 : i32
    %c0_i32_2 = arith.constant 0 : i32
    return %c0_i32, %arg0, %c0_i32_0, %c0_i32_1 : i32, i32, i32, i32
  }
}

module attributes {stable_mosaic.version = 11 : i64} {
  func.func @_maxpool_kernel(%arg0: i32, %arg1: i32, %arg2: memref<2x1x9x128xbf16, #tpu.memory_space<vmem>>, %arg3: memref<2x1x9x128xbf16, #tpu.memory_space<vmem>>, %arg4: memref<2x1x8x128xbf16, #tpu.memory_space<vmem>>) attributes {dimension_semantics = [#tpu.dimension_semantics<parallel>, #tpu.dimension_semantics<arbitrary>], iteration_bounds = array<i64: 8, 3>, scalar_prefetch = 0 : i64, scratch_operands = 0 : i64, tpu.core_type = #tpu.core_type<tc>, window_params = [{transform_indices = @transform_0, window_bounds = array<i64: 2, 1, 9, 128>}, {transform_indices = @transform_1, window_bounds = array<i64: 2, 1, 9, 128>}, {transform_indices = @transform_2, window_bounds = array<i64: 2, 1, 8, 128>}]} {
    %c0_i32 = arith.constant 0 : i32
    %0 = arith.cmpi eq, %arg1, %c0_i32 : i32
    %1 = arith.extui %0 : i1 to i32
    %c0_i32_0 = arith.constant 0 : i32
    %2 = arith.cmpi ne, %1, %c0_i32_0 : i32
    scf.if %2 {
      %cst = arith.constant 0xFF80 : bf16
      %18 = vector.broadcast %cst : bf16 to vector<2x8x128xbf16>
      %c0_16 = arith.constant 0 : index
      %c0_17 = arith.constant 0 : index
      %c0_18 = arith.constant 0 : index
      %c0_19 = arith.constant 0 : index
      %19 = vector.load %arg4[%c0_16, %c0_17, %c0_18, %c0_19] : memref<2x1x8x128xbf16, #tpu.memory_space<vmem>>, vector<2x1x8x128xbf16>
      %20 = vector.shape_cast %19 : vector<2x1x8x128xbf16> to vector<2x8x128xbf16>
      %21 = vector.shape_cast %18 : vector<2x8x128xbf16> to vector<2x1x8x128xbf16>
      tpu.vector_store %arg4[%c0_16, %c0_17, %c0_18, %c0_19], %21 {strides = array<i32>} : memref<2x1x8x128xbf16, #tpu.memory_space<vmem>>, vector<2x1x8x128xbf16>,
    } else {
    }
    %c0 = arith.constant 0 : index
    %c0_1 = arith.constant 0 : index
    %c0_2 = arith.constant 0 : index
    %c0_3 = arith.constant 0 : index
    %3 = vector.load %arg2[%c0, %c0_1, %c0_2, %c0_3] : memref<2x1x9x128xbf16, #tpu.memory_space<vmem>>, vector<2x1x9x128xbf16>
    %4 = vector.shape_cast %3 : vector<2x1x9x128xbf16> to vector<2x9x128xbf16>
    %c0_4 = arith.constant 0 : index
    %c0_5 = arith.constant 0 : index
    %c0_6 = arith.constant 0 : index
    %c0_7 = arith.constant 0 : index
    %5 = vector.load %arg3[%c0_4, %c0_5, %c0_6, %c0_7] : memref<2x1x9x128xbf16, #tpu.memory_space<vmem>>, vector<2x1x9x128xbf16>
    %6 = vector.shape_cast %5 : vector<2x1x9x128xbf16> to vector<2x9x128xbf16>
    %c0_8 = arith.constant 0 : index
    %c0_9 = arith.constant 0 : index
    %c0_10 = arith.constant 0 : index
    %c0_11 = arith.constant 0 : index
    %7 = vector.load %arg4[%c0_8, %c0_9, %c0_10, %c0_11] : memref<2x1x8x128xbf16, #tpu.memory_space<vmem>>, vector<2x1x8x128xbf16>
    %8 = vector.shape_cast %7 : vector<2x1x8x128xbf16> to vector<2x8x128xbf16>
    %9 = vector.extract_strided_slice %4 {offsets = [0, 0, 0], sizes = [2, 8, 128], strides = [1, 1, 1]} : vector<2x9x128xbf16> to vector<2x8x128xbf16>
    %10 = arith.maximumf %8, %9 : vector<2x8x128xbf16>
    %11 = vector.extract_strided_slice %6 {offsets = [0, 0, 0], sizes = [2, 8, 128], strides = [1, 1, 1]} : vector<2x9x128xbf16> to vector<2x8x128xbf16>
    %12 = arith.maximumf %10, %11 : vector<2x8x128xbf16>
    %13 = vector.extract_strided_slice %4 {offsets = [0, 1, 0], sizes = [2, 8, 128], strides = [1, 1, 1]} : vector<2x9x128xbf16> to vector<2x8x128xbf16>
    %14 = arith.maximumf %12, %13 : vector<2x8x128xbf16>
    %c0_12 = arith.constant 0 : index
    %c0_13 = arith.constant 0 : index
    %c0_14 = arith.constant 0 : index
    %c0_15 = arith.constant 0 : index
    %15 = vector.load %arg4[%c0_12, %c0_13, %c0_14, %c0_15] : memref<2x1x8x128xbf16, #tpu.memory_space<vmem>>, vector<2x1x8x128xbf16>
    %16 = vector.shape_cast %15 : vector<2x1x8x128xbf16> to vector<2x8x128xbf16>
    %17 = vector.shape_cast %14 : vector<2x8x128xbf16> to vector<2x1x8x128xbf16>
    tpu.vector_store %arg4[%c0_12, %c0_13, %c0_14, %c0_15], %17 {strides = array<i32>} : memref<2x1x8x128xbf16, #tpu.memory_space<vmem>>, vector<2x1x8x128xbf16>,
    return
  }
  func.func @transform_0(%arg0: i32, %arg1: i32) -> (i32, i32, i32, i32) {
    %c2_i32 = arith.constant 2 : i32
    %0 = arith.muli %c2_i32, %arg0 : i32
    %1 = arith.addi %0, %arg1 : i32
    %c0_i32 = arith.constant 0 : i32
    %c0_i32_0 = arith.constant 0 : i32
    %c0_i32_1 = arith.constant 0 : i32
    %c0_i32_2 = arith.constant 0 : i32
    return %c0_i32, %1, %c0_i32_0, %c0_i32_1 : i32, i32, i32, i32
  }
  func.func @transform_1(%arg0: i32, %arg1: i32) -> (i32, i32, i32, i32) {
    %c2_i32 = arith.constant 2 : i32
    %0 = arith.muli %c2_i32, %arg0 : i32
    %1 = arith.addi %0, %arg1 : i32
    %c0_i32 = arith.constant 0 : i32
    %c0_i32_0 = arith.constant 0 : i32
    %c0_i32_1 = arith.constant 0 : i32
    %c0_i32_2 = arith.constant 0 : i32
    return %c0_i32, %1, %c0_i32_0, %c0_i32_1 : i32, i32, i32, i32
  }
  func.func @transform_2(%arg0: i32, %arg1: i32) -> (i32, i32, i32, i32) {
    %c0_i32 = arith.constant 0 : i32
    %c0_i32_0 = arith.constant 0 : i32
    %c0_i32_1 = arith.constant 0 : i32
    %c0_i32_2 = arith.constant 0 : i32
    return %c0_i32, %arg0, %c0_i32_0, %c0_i32_1 : i32, i32, i32, i32
  }
}

module attributes {stable_mosaic.version = 11 : i64} {
  func.func @_matmul_bn_act_kernel(%arg0: i32, %arg1: i32, %arg2: memref<128x128xbf16, #tpu.memory_space<vmem>>, %arg3: memref<128x128xbf16, #tpu.memory_space<vmem>>, %arg4: memref<1x128xf32, #tpu.memory_space<vmem>>, %arg5: memref<1x128xf32, #tpu.memory_space<vmem>>, %arg6: memref<128x128xbf16, #tpu.memory_space<vmem>>) attributes {dimension_semantics = [#tpu.dimension_semantics<parallel>, #tpu.dimension_semantics<parallel>], iteration_bounds = array<i64: 1, 1>, scalar_prefetch = 0 : i64, scratch_operands = 0 : i64, tpu.core_type = #tpu.core_type<tc>, window_params = [{transform_indices = @transform_0, window_bounds = array<i64: 128, 128>}, {transform_indices = @transform_1, window_bounds = array<i64: 128, 128>}, {transform_indices = @transform_2, window_bounds = array<i64: 1, 128>}, {transform_indices = @transform_3, window_bounds = array<i64: 1, 128>}, {transform_indices = @transform_4, window_bounds = array<i64: 128, 128>}]} {
    %c0 = arith.constant 0 : index
    %c0_0 = arith.constant 0 : index
    %0 = vector.load %arg2[%c0, %c0_0] : memref<128x128xbf16, #tpu.memory_space<vmem>>, vector<128x128xbf16>
    %c0_1 = arith.constant 0 : index
    %c0_2 = arith.constant 0 : index
    %1 = vector.load %arg3[%c0_1, %c0_2] : memref<128x128xbf16, #tpu.memory_space<vmem>>, vector<128x128xbf16>
    %cst = arith.constant dense<0.000000e+00> : vector<128x128xf32>
    %2 = tpu.matmul %0, %1, %cst {dimension_numbers = #tpu.dot_dimension_numbers<[1], [0], [0], [1], [0, 0, 1, 1], [], []>} : vector<128x128xbf16>, vector<128x128xbf16>, vector<128x128xf32> -> vector<128x128xf32>
    %c0_3 = arith.constant 0 : index
    %c0_4 = arith.constant 0 : index
    %3 = vector.load %arg4[%c0_3, %c0_4] : memref<1x128xf32, #tpu.memory_space<vmem>>, vector<1x128xf32>
    %4 = vector.broadcast %3 : vector<1x128xf32> to vector<128x128xf32>
    %5 = arith.mulf %2, %4 : vector<128x128xf32>
    %c0_5 = arith.constant 0 : index
    %c0_6 = arith.constant 0 : index
    %6 = vector.load %arg5[%c0_5, %c0_6] : memref<1x128xf32, #tpu.memory_space<vmem>>, vector<1x128xf32>
    %7 = vector.broadcast %6 : vector<1x128xf32> to vector<128x128xf32>
    %8 = arith.addf %5, %7 : vector<128x128xf32>
    %cst_7 = arith.constant 0.000000e+00 : f32
    %9 = vector.broadcast %cst_7 : f32 to vector<128x128xf32>
    %10 = arith.maximumf %8, %9 : vector<128x128xf32>
    %11 = arith.truncf %10 : vector<128x128xf32> to vector<128x128xbf16>
    %c0_8 = arith.constant 0 : index
    %c0_9 = arith.constant 0 : index
    %12 = vector.load %arg6[%c0_8, %c0_9] : memref<128x128xbf16, #tpu.memory_space<vmem>>, vector<128x128xbf16>
    tpu.vector_store %arg6[%c0_8, %c0_9], %11 {strides = array<i32>} : memref<128x128xbf16, #tpu.memory_space<vmem>>, vector<128x128xbf16>,
    return
  }
  func.func @transform_0(%arg0: i32, %arg1: i32) -> (i32, i32) {
    %c0_i32 = arith.constant 0 : i32
    %c0_i32_0 = arith.constant 0 : i32
    return %arg0, %c0_i32 : i32, i32
  }
  func.func @transform_1(%arg0: i32, %arg1: i32) -> (i32, i32) {
    %c0_i32 = arith.constant 0 : i32
    %c0_i32_0 = arith.constant 0 : i32
    return %c0_i32, %arg1 : i32, i32
  }
  func.func @transform_2(%arg0: i32, %arg1: i32) -> (i32, i32) {
    %c0_i32 = arith.constant 0 : i32
    %c0_i32_0 = arith.constant 0 : i32
    return %c0_i32, %arg1 : i32, i32
  }
  func.func @transform_3(%arg0: i32, %arg1: i32) -> (i32, i32) {
    %c0_i32 = arith.constant 0 : i32
    %c0_i32_0 = arith.constant 0 : i32
    return %c0_i32, %arg1 : i32, i32
  }
  func.func @transform_4(%arg0: i32, %arg1: i32) -> (i32, i32) {
    %c0_i32 = arith.constant 0 : i32
    return %arg0, %arg1 : i32, i32
  }
}

module attributes {stable_mosaic.version = 11 : i64} {
  func.func @_matmul_bn_act_kernel(%arg0: i32, %arg1: i32, %arg2: memref<128x128xbf16, #tpu.memory_space<vmem>>, %arg3: memref<128x256xbf16, #tpu.memory_space<vmem>>, %arg4: memref<1x256xf32, #tpu.memory_space<vmem>>, %arg5: memref<1x256xf32, #tpu.memory_space<vmem>>, %arg6: memref<128x256xbf16, #tpu.memory_space<vmem>>) attributes {dimension_semantics = [#tpu.dimension_semantics<parallel>, #tpu.dimension_semantics<parallel>], iteration_bounds = array<i64: 1, 1>, scalar_prefetch = 0 : i64, scratch_operands = 0 : i64, tpu.core_type = #tpu.core_type<tc>, window_params = [{transform_indices = @transform_0, window_bounds = array<i64: 128, 128>}, {transform_indices = @transform_1, window_bounds = array<i64: 128, 256>}, {transform_indices = @transform_2, window_bounds = array<i64: 1, 256>}, {transform_indices = @transform_3, window_bounds = array<i64: 1, 256>}, {transform_indices = @transform_4, window_bounds = array<i64: 128, 256>}]} {
    %c0 = arith.constant 0 : index
    %c0_0 = arith.constant 0 : index
    %0 = vector.load %arg2[%c0, %c0_0] : memref<128x128xbf16, #tpu.memory_space<vmem>>, vector<128x128xbf16>
    %c0_1 = arith.constant 0 : index
    %c0_2 = arith.constant 0 : index
    %1 = vector.load %arg3[%c0_1, %c0_2] : memref<128x256xbf16, #tpu.memory_space<vmem>>, vector<128x256xbf16>
    %cst = arith.constant dense<0.000000e+00> : vector<128x256xf32>
    %2 = tpu.matmul %0, %1, %cst {dimension_numbers = #tpu.dot_dimension_numbers<[1], [0], [0], [1], [0, 0, 1, 1], [], []>} : vector<128x128xbf16>, vector<128x256xbf16>, vector<128x256xf32> -> vector<128x256xf32>
    %c0_3 = arith.constant 0 : index
    %c0_4 = arith.constant 0 : index
    %3 = vector.load %arg4[%c0_3, %c0_4] : memref<1x256xf32, #tpu.memory_space<vmem>>, vector<1x256xf32>
    %4 = vector.broadcast %3 : vector<1x256xf32> to vector<128x256xf32>
    %5 = arith.mulf %2, %4 : vector<128x256xf32>
    %c0_5 = arith.constant 0 : index
    %c0_6 = arith.constant 0 : index
    %6 = vector.load %arg5[%c0_5, %c0_6] : memref<1x256xf32, #tpu.memory_space<vmem>>, vector<1x256xf32>
    %7 = vector.broadcast %6 : vector<1x256xf32> to vector<128x256xf32>
    %8 = arith.addf %5, %7 : vector<128x256xf32>
    %9 = arith.truncf %8 : vector<128x256xf32> to vector<128x256xbf16>
    %c0_7 = arith.constant 0 : index
    %c0_8 = arith.constant 0 : index
    %10 = vector.load %arg6[%c0_7, %c0_8] : memref<128x256xbf16, #tpu.memory_space<vmem>>, vector<128x256xbf16>
    tpu.vector_store %arg6[%c0_7, %c0_8], %9 {strides = array<i32>} : memref<128x256xbf16, #tpu.memory_space<vmem>>, vector<128x256xbf16>,
    return
  }
  func.func @transform_0(%arg0: i32, %arg1: i32) -> (i32, i32) {
    %c0_i32 = arith.constant 0 : i32
    %c0_i32_0 = arith.constant 0 : i32
    return %arg0, %c0_i32 : i32, i32
  }
  func.func @transform_1(%arg0: i32, %arg1: i32) -> (i32, i32) {
    %c0_i32 = arith.constant 0 : i32
    %c0_i32_0 = arith.constant 0 : i32
    return %c0_i32, %arg1 : i32, i32
  }
  func.func @transform_2(%arg0: i32, %arg1: i32) -> (i32, i32) {
    %c0_i32 = arith.constant 0 : i32
    %c0_i32_0 = arith.constant 0 : i32
    return %c0_i32, %arg1 : i32, i32
  }
  func.func @transform_3(%arg0: i32, %arg1: i32) -> (i32, i32) {
    %c0_i32 = arith.constant 0 : i32
    %c0_i32_0 = arith.constant 0 : i32
    return %c0_i32, %arg1 : i32, i32
  }
  func.func @transform_4(%arg0: i32, %arg1: i32) -> (i32, i32) {
    %c0_i32 = arith.constant 0 : i32
    return %arg0, %arg1 : i32, i32
  }
}

module attributes {stable_mosaic.version = 11 : i64} {
  func.func @_add_relu_kernel(%arg0: i32, %arg1: memref<128x256xbf16, #tpu.memory_space<vmem>>, %arg2: memref<128x256xbf16, #tpu.memory_space<vmem>>, %arg3: memref<128x256xbf16, #tpu.memory_space<vmem>>) attributes {dimension_semantics = [#tpu.dimension_semantics<parallel>], iteration_bounds = array<i64: 1>, scalar_prefetch = 0 : i64, scratch_operands = 0 : i64, tpu.core_type = #tpu.core_type<tc>, window_params = [{transform_indices = @transform_0, window_bounds = array<i64: 128, 256>}, {transform_indices = @transform_1, window_bounds = array<i64: 128, 256>}, {transform_indices = @transform_2, window_bounds = array<i64: 128, 256>}]} {
    %c0 = arith.constant 0 : index
    %c0_0 = arith.constant 0 : index
    %0 = vector.load %arg1[%c0, %c0_0] : memref<128x256xbf16, #tpu.memory_space<vmem>>, vector<128x256xbf16>
    %1 = arith.extf %0 : vector<128x256xbf16> to vector<128x256xf32>
    %c0_1 = arith.constant 0 : index
    %c0_2 = arith.constant 0 : index
    %2 = vector.load %arg2[%c0_1, %c0_2] : memref<128x256xbf16, #tpu.memory_space<vmem>>, vector<128x256xbf16>
    %3 = arith.extf %2 : vector<128x256xbf16> to vector<128x256xf32>
    %4 = arith.addf %1, %3 : vector<128x256xf32>
    %cst = arith.constant 0.000000e+00 : f32
    %5 = vector.broadcast %cst : f32 to vector<128x256xf32>
    %6 = arith.maximumf %4, %5 : vector<128x256xf32>
    %7 = arith.truncf %6 : vector<128x256xf32> to vector<128x256xbf16>
    %c0_3 = arith.constant 0 : index
    %c0_4 = arith.constant 0 : index
    %8 = vector.load %arg3[%c0_3, %c0_4] : memref<128x256xbf16, #tpu.memory_space<vmem>>, vector<128x256xbf16>
    tpu.vector_store %arg3[%c0_3, %c0_4], %7 {strides = array<i32>} : memref<128x256xbf16, #tpu.memory_space<vmem>>, vector<128x256xbf16>,
    return
  }
  func.func @transform_0(%arg0: i32) -> (i32, i32) {
    %c0_i32 = arith.constant 0 : i32
    %c0_i32_0 = arith.constant 0 : i32
    return %arg0, %c0_i32 : i32, i32
  }
  func.func @transform_1(%arg0: i32) -> (i32, i32) {
    %c0_i32 = arith.constant 0 : i32
    %c0_i32_0 = arith.constant 0 : i32
    return %arg0, %c0_i32 : i32, i32
  }
  func.func @transform_2(%arg0: i32) -> (i32, i32) {
    %c0_i32 = arith.constant 0 : i32
    %c0_i32_0 = arith.constant 0 : i32
    return %arg0, %c0_i32 : i32, i32
  }
}

module attributes {stable_mosaic.version = 11 : i64} {
  func.func @_matmul_bn_act_kernel(%arg0: i32, %arg1: i32, %arg2: memref<128x256xbf16, #tpu.memory_space<vmem>>, %arg3: memref<256x128xbf16, #tpu.memory_space<vmem>>, %arg4: memref<1x128xf32, #tpu.memory_space<vmem>>, %arg5: memref<1x128xf32, #tpu.memory_space<vmem>>, %arg6: memref<128x128xbf16, #tpu.memory_space<vmem>>) attributes {dimension_semantics = [#tpu.dimension_semantics<parallel>, #tpu.dimension_semantics<parallel>], iteration_bounds = array<i64: 1, 1>, scalar_prefetch = 0 : i64, scratch_operands = 0 : i64, tpu.core_type = #tpu.core_type<tc>, window_params = [{transform_indices = @transform_0, window_bounds = array<i64: 128, 256>}, {transform_indices = @transform_1, window_bounds = array<i64: 256, 128>}, {transform_indices = @transform_2, window_bounds = array<i64: 1, 128>}, {transform_indices = @transform_3, window_bounds = array<i64: 1, 128>}, {transform_indices = @transform_4, window_bounds = array<i64: 128, 128>}]} {
    %c0 = arith.constant 0 : index
    %c0_0 = arith.constant 0 : index
    %0 = vector.load %arg2[%c0, %c0_0] : memref<128x256xbf16, #tpu.memory_space<vmem>>, vector<128x256xbf16>
    %c0_1 = arith.constant 0 : index
    %c0_2 = arith.constant 0 : index
    %1 = vector.load %arg3[%c0_1, %c0_2] : memref<256x128xbf16, #tpu.memory_space<vmem>>, vector<256x128xbf16>
    %cst = arith.constant dense<0.000000e+00> : vector<128x128xf32>
    %2 = tpu.matmul %0, %1, %cst {dimension_numbers = #tpu.dot_dimension_numbers<[1], [0], [0], [1], [0, 0, 1, 1], [], []>} : vector<128x256xbf16>, vector<256x128xbf16>, vector<128x128xf32> -> vector<128x128xf32>
    %c0_3 = arith.constant 0 : index
    %c0_4 = arith.constant 0 : index
    %3 = vector.load %arg4[%c0_3, %c0_4] : memref<1x128xf32, #tpu.memory_space<vmem>>, vector<1x128xf32>
    %4 = vector.broadcast %3 : vector<1x128xf32> to vector<128x128xf32>
    %5 = arith.mulf %2, %4 : vector<128x128xf32>
    %c0_5 = arith.constant 0 : index
    %c0_6 = arith.constant 0 : index
    %6 = vector.load %arg5[%c0_5, %c0_6] : memref<1x128xf32, #tpu.memory_space<vmem>>, vector<1x128xf32>
    %7 = vector.broadcast %6 : vector<1x128xf32> to vector<128x128xf32>
    %8 = arith.addf %5, %7 : vector<128x128xf32>
    %cst_7 = arith.constant 0.000000e+00 : f32
    %9 = vector.broadcast %cst_7 : f32 to vector<128x128xf32>
    %10 = arith.maximumf %8, %9 : vector<128x128xf32>
    %11 = arith.truncf %10 : vector<128x128xf32> to vector<128x128xbf16>
    %c0_8 = arith.constant 0 : index
    %c0_9 = arith.constant 0 : index
    %12 = vector.load %arg6[%c0_8, %c0_9] : memref<128x128xbf16, #tpu.memory_space<vmem>>, vector<128x128xbf16>
    tpu.vector_store %arg6[%c0_8, %c0_9], %11 {strides = array<i32>} : memref<128x128xbf16, #tpu.memory_space<vmem>>, vector<128x128xbf16>,
    return
  }
  func.func @transform_0(%arg0: i32, %arg1: i32) -> (i32, i32) {
    %c0_i32 = arith.constant 0 : i32
    %c0_i32_0 = arith.constant 0 : i32
    return %arg0, %c0_i32 : i32, i32
  }
  func.func @transform_1(%arg0: i32, %arg1: i32) -> (i32, i32) {
    %c0_i32 = arith.constant 0 : i32
    %c0_i32_0 = arith.constant 0 : i32
    return %c0_i32, %arg1 : i32, i32
  }
  func.func @transform_2(%arg0: i32, %arg1: i32) -> (i32, i32) {
    %c0_i32 = arith.constant 0 : i32
    %c0_i32_0 = arith.constant 0 : i32
    return %c0_i32, %arg1 : i32, i32
  }
  func.func @transform_3(%arg0: i32, %arg1: i32) -> (i32, i32) {
    %c0_i32 = arith.constant 0 : i32
    %c0_i32_0 = arith.constant 0 : i32
    return %c0_i32, %arg1 : i32, i32
  }
  func.func @transform_4(%arg0: i32, %arg1: i32) -> (i32, i32) {
    %c0_i32 = arith.constant 0 : i32
    return %arg0, %arg1 : i32, i32
  }
}

module attributes {stable_mosaic.version = 11 : i64} {
  func.func @_matmul_bn_act_kernel(%arg0: i32, %arg1: i32, %arg2: memref<32x128xbf16, #tpu.memory_space<vmem>>, %arg3: memref<128x256xbf16, #tpu.memory_space<vmem>>, %arg4: memref<1x256xf32, #tpu.memory_space<vmem>>, %arg5: memref<1x256xf32, #tpu.memory_space<vmem>>, %arg6: memref<32x256xbf16, #tpu.memory_space<vmem>>) attributes {dimension_semantics = [#tpu.dimension_semantics<parallel>, #tpu.dimension_semantics<parallel>], iteration_bounds = array<i64: 1, 2>, scalar_prefetch = 0 : i64, scratch_operands = 0 : i64, tpu.core_type = #tpu.core_type<tc>, window_params = [{transform_indices = @transform_0, window_bounds = array<i64: 32, 128>}, {transform_indices = @transform_1, window_bounds = array<i64: 128, 256>}, {transform_indices = @transform_2, window_bounds = array<i64: 1, 256>}, {transform_indices = @transform_3, window_bounds = array<i64: 1, 256>}, {transform_indices = @transform_4, window_bounds = array<i64: 32, 256>}]} {
    %c0 = arith.constant 0 : index
    %c0_0 = arith.constant 0 : index
    %0 = vector.load %arg2[%c0, %c0_0] : memref<32x128xbf16, #tpu.memory_space<vmem>>, vector<32x128xbf16>
    %c0_1 = arith.constant 0 : index
    %c0_2 = arith.constant 0 : index
    %1 = vector.load %arg3[%c0_1, %c0_2] : memref<128x256xbf16, #tpu.memory_space<vmem>>, vector<128x256xbf16>
    %cst = arith.constant dense<0.000000e+00> : vector<32x256xf32>
    %2 = tpu.matmul %0, %1, %cst {dimension_numbers = #tpu.dot_dimension_numbers<[1], [0], [0], [1], [0, 0, 1, 1], [], []>} : vector<32x128xbf16>, vector<128x256xbf16>, vector<32x256xf32> -> vector<32x256xf32>
    %c0_3 = arith.constant 0 : index
    %c0_4 = arith.constant 0 : index
    %3 = vector.load %arg4[%c0_3, %c0_4] : memref<1x256xf32, #tpu.memory_space<vmem>>, vector<1x256xf32>
    %4 = vector.broadcast %3 : vector<1x256xf32> to vector<32x256xf32>
    %5 = arith.mulf %2, %4 : vector<32x256xf32>
    %c0_5 = arith.constant 0 : index
    %c0_6 = arith.constant 0 : index
    %6 = vector.load %arg5[%c0_5, %c0_6] : memref<1x256xf32, #tpu.memory_space<vmem>>, vector<1x256xf32>
    %7 = vector.broadcast %6 : vector<1x256xf32> to vector<32x256xf32>
    %8 = arith.addf %5, %7 : vector<32x256xf32>
    %9 = arith.truncf %8 : vector<32x256xf32> to vector<32x256xbf16>
    %c0_7 = arith.constant 0 : index
    %c0_8 = arith.constant 0 : index
    %10 = vector.load %arg6[%c0_7, %c0_8] : memref<32x256xbf16, #tpu.memory_space<vmem>>, vector<32x256xbf16>
    tpu.vector_store %arg6[%c0_7, %c0_8], %9 {strides = array<i32>} : memref<32x256xbf16, #tpu.memory_space<vmem>>, vector<32x256xbf16>,
    return
  }
  func.func @transform_0(%arg0: i32, %arg1: i32) -> (i32, i32) {
    %c0_i32 = arith.constant 0 : i32
    %c0_i32_0 = arith.constant 0 : i32
    return %arg0, %c0_i32 : i32, i32
  }
  func.func @transform_1(%arg0: i32, %arg1: i32) -> (i32, i32) {
    %c0_i32 = arith.constant 0 : i32
    %c0_i32_0 = arith.constant 0 : i32
    return %c0_i32, %arg1 : i32, i32
  }
  func.func @transform_2(%arg0: i32, %arg1: i32) -> (i32, i32) {
    %c0_i32 = arith.constant 0 : i32
    %c0_i32_0 = arith.constant 0 : i32
    return %c0_i32, %arg1 : i32, i32
  }
  func.func @transform_3(%arg0: i32, %arg1: i32) -> (i32, i32) {
    %c0_i32 = arith.constant 0 : i32
    %c0_i32_0 = arith.constant 0 : i32
    return %c0_i32, %arg1 : i32, i32
  }
  func.func @transform_4(%arg0: i32, %arg1: i32) -> (i32, i32) {
    %c0_i32 = arith.constant 0 : i32
    return %arg0, %arg1 : i32, i32
  }
}

module attributes {stable_mosaic.version = 11 : i64} {
  func.func @_conv_kxk_kernel(%arg0: i32, %arg1: i32, %arg2: memref<2x1x5x128xbf16, #tpu.memory_space<vmem>>, %arg3: memref<2x1x5x128xbf16, #tpu.memory_space<vmem>>, %arg4: memref<1x3x128x128xbf16, #tpu.memory_space<vmem>>, %arg5: memref<1x1x128xf32, #tpu.memory_space<vmem>>, %arg6: memref<1x1x128xf32, #tpu.memory_space<vmem>>, %arg7: memref<2x1x4x128xbf16, #tpu.memory_space<vmem>>, %arg8: memref<2x4x128xf32, #tpu.memory_space<vmem>>) attributes {dimension_semantics = [#tpu.dimension_semantics<parallel>, #tpu.dimension_semantics<arbitrary>], iteration_bounds = array<i64: 4, 3>, scalar_prefetch = 0 : i64, scratch_operands = 1 : i64, tpu.core_type = #tpu.core_type<tc>, window_params = [{transform_indices = @transform_0, window_bounds = array<i64: 2, 1, 5, 128>}, {transform_indices = @transform_1, window_bounds = array<i64: 2, 1, 5, 128>}, {transform_indices = @transform_2, window_bounds = array<i64: 1, 3, 128, 128>}, {pipeline_mode = #tpu.pipeline_mode<synchronous>, transform_indices = @transform_3, window_bounds = array<i64: 1, 1, 128>}, {pipeline_mode = #tpu.pipeline_mode<synchronous>, transform_indices = @transform_4, window_bounds = array<i64: 1, 1, 128>}, {transform_indices = @transform_5, window_bounds = array<i64: 2, 1, 4, 128>}]} {
    %c0_i32 = arith.constant 0 : i32
    %0 = arith.cmpi eq, %arg1, %c0_i32 : i32
    %1 = arith.extui %0 : i1 to i32
    %c0_i32_0 = arith.constant 0 : i32
    %2 = arith.cmpi ne, %1, %c0_i32_0 : i32
    scf.if %2 {
      %cst_48 = arith.constant 0.000000e+00 : f32
      %56 = vector.broadcast %cst_48 : f32 to vector<2x4x128xf32>
      %c0_49 = arith.constant 0 : index
      %c0_50 = arith.constant 0 : index
      %c0_51 = arith.constant 0 : index
      %57 = vector.load %arg8[%c0_49, %c0_50, %c0_51] : memref<2x4x128xf32, #tpu.memory_space<vmem>>, vector<2x4x128xf32>
      tpu.vector_store %arg8[%c0_49, %c0_50, %c0_51], %56 {strides = array<i32>} : memref<2x4x128xf32, #tpu.memory_space<vmem>>, vector<2x4x128xf32>,
    } else {
    }
    %c0 = arith.constant 0 : index
    %c0_1 = arith.constant 0 : index
    %c0_2 = arith.constant 0 : index
    %c0_3 = arith.constant 0 : index
    %3 = vector.load %arg2[%c0, %c0_1, %c0_2, %c0_3] : memref<2x1x5x128xbf16, #tpu.memory_space<vmem>>, vector<2x1x5x128xbf16>
    %4 = vector.shape_cast %3 : vector<2x1x5x128xbf16> to vector<2x5x128xbf16>
    %c0_4 = arith.constant 0 : index
    %c0_5 = arith.constant 0 : index
    %c0_6 = arith.constant 0 : index
    %c0_7 = arith.constant 0 : index
    %5 = vector.load %arg3[%c0_4, %c0_5, %c0_6, %c0_7] : memref<2x1x5x128xbf16, #tpu.memory_space<vmem>>, vector<2x1x5x128xbf16>
    %6 = vector.shape_cast %5 : vector<2x1x5x128xbf16> to vector<2x5x128xbf16>
    %c0_8 = arith.constant 0 : index
    %c0_9 = arith.constant 0 : index
    %c0_10 = arith.constant 0 : index
    %7 = vector.load %arg8[%c0_8, %c0_9, %c0_10] : memref<2x4x128xf32, #tpu.memory_space<vmem>>, vector<1x4x128xf32>
    %8 = vector.shape_cast %7 : vector<1x4x128xf32> to vector<4x128xf32>
    %9 = vector.extract_strided_slice %4 {offsets = [0, 0, 0], sizes = [1, 4, 128], strides = [1, 1, 1]} : vector<2x5x128xbf16> to vector<1x4x128xbf16>
    %10 = vector.shape_cast %9 : vector<1x4x128xbf16> to vector<4x128xbf16>
    %c0_11 = arith.constant 0 : index
    %c0_12 = arith.constant 0 : index
    %c0_13 = arith.constant 0 : index
    %c0_14 = arith.constant 0 : index
    %11 = vector.load %arg4[%c0_11, %c0_12, %c0_13, %c0_14] : memref<1x3x128x128xbf16, #tpu.memory_space<vmem>>, vector<1x1x128x128xbf16>
    %12 = vector.shape_cast %11 : vector<1x1x128x128xbf16> to vector<128x128xbf16>
    %cst = arith.constant dense<0.000000e+00> : vector<4x128xf32>
    %13 = tpu.matmul %10, %12, %cst {dimension_numbers = #tpu.dot_dimension_numbers<[1], [0], [0], [1], [0, 0, 1, 1], [], []>} : vector<4x128xbf16>, vector<128x128xbf16>, vector<4x128xf32> -> vector<4x128xf32>
    %14 = arith.addf %8, %13 : vector<4x128xf32>
    %15 = vector.extract_strided_slice %6 {offsets = [0, 0, 0], sizes = [1, 4, 128], strides = [1, 1, 1]} : vector<2x5x128xbf16> to vector<1x4x128xbf16>
    %16 = vector.shape_cast %15 : vector<1x4x128xbf16> to vector<4x128xbf16>
    %c0_15 = arith.constant 0 : index
    %c1 = arith.constant 1 : index
    %c0_16 = arith.constant 0 : index
    %c0_17 = arith.constant 0 : index
    %17 = vector.load %arg4[%c0_15, %c1, %c0_16, %c0_17] : memref<1x3x128x128xbf16, #tpu.memory_space<vmem>>, vector<1x1x128x128xbf16>
    %18 = vector.shape_cast %17 : vector<1x1x128x128xbf16> to vector<128x128xbf16>
    %cst_18 = arith.constant dense<0.000000e+00> : vector<4x128xf32>
    %19 = tpu.matmul %16, %18, %cst_18 {dimension_numbers = #tpu.dot_dimension_numbers<[1], [0], [0], [1], [0, 0, 1, 1], [], []>} : vector<4x128xbf16>, vector<128x128xbf16>, vector<4x128xf32> -> vector<4x128xf32>
    %20 = arith.addf %14, %19 : vector<4x128xf32>
    %21 = vector.extract_strided_slice %4 {offsets = [0, 1, 0], sizes = [1, 4, 128], strides = [1, 1, 1]} : vector<2x5x128xbf16> to vector<1x4x128xbf16>
    %22 = vector.shape_cast %21 : vector<1x4x128xbf16> to vector<4x128xbf16>
    %c0_19 = arith.constant 0 : index
    %c2 = arith.constant 2 : index
    %c0_20 = arith.constant 0 : index
    %c0_21 = arith.constant 0 : index
    %23 = vector.load %arg4[%c0_19, %c2, %c0_20, %c0_21] : memref<1x3x128x128xbf16, #tpu.memory_space<vmem>>, vector<1x1x128x128xbf16>
    %24 = vector.shape_cast %23 : vector<1x1x128x128xbf16> to vector<128x128xbf16>
    %cst_22 = arith.constant dense<0.000000e+00> : vector<4x128xf32>
    %25 = tpu.matmul %22, %24, %cst_22 {dimension_numbers = #tpu.dot_dimension_numbers<[1], [0], [0], [1], [0, 0, 1, 1], [], []>} : vector<4x128xbf16>, vector<128x128xbf16>, vector<4x128xf32> -> vector<4x128xf32>
    %26 = arith.addf %20, %25 : vector<4x128xf32>
    %c0_23 = arith.constant 0 : index
    %c0_24 = arith.constant 0 : index
    %c0_25 = arith.constant 0 : index
    %27 = vector.load %arg8[%c0_23, %c0_24, %c0_25] : memref<2x4x128xf32, #tpu.memory_space<vmem>>, vector<1x4x128xf32>
    %28 = vector.shape_cast %27 : vector<1x4x128xf32> to vector<4x128xf32>
    %29 = vector.shape_cast %26 : vector<4x128xf32> to vector<1x4x128xf32>
    tpu.vector_store %arg8[%c0_23, %c0_24, %c0_25], %29 {strides = array<i32>} : memref<2x4x128xf32, #tpu.memory_space<vmem>>, vector<1x4x128xf32>,
    %c1_26 = arith.constant 1 : index
    %c0_27 = arith.constant 0 : index
    %c0_28 = arith.constant 0 : index
    %30 = vector.load %arg8[%c1_26, %c0_27, %c0_28] : memref<2x4x128xf32, #tpu.memory_space<vmem>>, vector<1x4x128xf32>
    %31 = vector.shape_cast %30 : vector<1x4x128xf32> to vector<4x128xf32>
    %32 = vector.extract_strided_slice %4 {offsets = [1, 0, 0], sizes = [1, 4, 128], strides = [1, 1, 1]} : vector<2x5x128xbf16> to vector<1x4x128xbf16>
    %33 = vector.shape_cast %32 : vector<1x4x128xbf16> to vector<4x128xbf16>
    %c0_29 = arith.constant 0 : index
    %c0_30 = arith.constant 0 : index
    %c0_31 = arith.constant 0 : index
    %c0_32 = arith.constant 0 : index
    %34 = vector.load %arg4[%c0_29, %c0_30, %c0_31, %c0_32] : memref<1x3x128x128xbf16, #tpu.memory_space<vmem>>, vector<1x1x128x128xbf16>
    %35 = vector.shape_cast %34 : vector<1x1x128x128xbf16> to vector<128x128xbf16>
    %cst_33 = arith.constant dense<0.000000e+00> : vector<4x128xf32>
    %36 = tpu.matmul %33, %35, %cst_33 {dimension_numbers = #tpu.dot_dimension_numbers<[1], [0], [0], [1], [0, 0, 1, 1], [], []>} : vector<4x128xbf16>, vector<128x128xbf16>, vector<4x128xf32> -> vector<4x128xf32>
    %37 = arith.addf %31, %36 : vector<4x128xf32>
    %38 = vector.extract_strided_slice %6 {offsets = [1, 0, 0], sizes = [1, 4, 128], strides = [1, 1, 1]} : vector<2x5x128xbf16> to vector<1x4x128xbf16>
    %39 = vector.shape_cast %38 : vector<1x4x128xbf16> to vector<4x128xbf16>
    %c0_34 = arith.constant 0 : index
    %c1_35 = arith.constant 1 : index
    %c0_36 = arith.constant 0 : index
    %c0_37 = arith.constant 0 : index
    %40 = vector.load %arg4[%c0_34, %c1_35, %c0_36, %c0_37] : memref<1x3x128x128xbf16, #tpu.memory_space<vmem>>, vector<1x1x128x128xbf16>
    %41 = vector.shape_cast %40 : vector<1x1x128x128xbf16> to vector<128x128xbf16>
    %cst_38 = arith.constant dense<0.000000e+00> : vector<4x128xf32>
    %42 = tpu.matmul %39, %41, %cst_38 {dimension_numbers = #tpu.dot_dimension_numbers<[1], [0], [0], [1], [0, 0, 1, 1], [], []>} : vector<4x128xbf16>, vector<128x128xbf16>, vector<4x128xf32> -> vector<4x128xf32>
    %43 = arith.addf %37, %42 : vector<4x128xf32>
    %44 = vector.extract_strided_slice %4 {offsets = [1, 1, 0], sizes = [1, 4, 128], strides = [1, 1, 1]} : vector<2x5x128xbf16> to vector<1x4x128xbf16>
    %45 = vector.shape_cast %44 : vector<1x4x128xbf16> to vector<4x128xbf16>
    %c0_39 = arith.constant 0 : index
    %c2_40 = arith.constant 2 : index
    %c0_41 = arith.constant 0 : index
    %c0_42 = arith.constant 0 : index
    %46 = vector.load %arg4[%c0_39, %c2_40, %c0_41, %c0_42] : memref<1x3x128x128xbf16, #tpu.memory_space<vmem>>, vector<1x1x128x128xbf16>
    %47 = vector.shape_cast %46 : vector<1x1x128x128xbf16> to vector<128x128xbf16>
    %cst_43 = arith.constant dense<0.000000e+00> : vector<4x128xf32>
    %48 = tpu.matmul %45, %47, %cst_43 {dimension_numbers = #tpu.dot_dimension_numbers<[1], [0], [0], [1], [0, 0, 1, 1], [], []>} : vector<4x128xbf16>, vector<128x128xbf16>, vector<4x128xf32> -> vector<4x128xf32>
    %49 = arith.addf %43, %48 : vector<4x128xf32>
    %c1_44 = arith.constant 1 : index
    %c0_45 = arith.constant 0 : index
    %c0_46 = arith.constant 0 : index
    %50 = vector.load %arg8[%c1_44, %c0_45, %c0_46] : memref<2x4x128xf32, #tpu.memory_space<vmem>>, vector<1x4x128xf32>
    %51 = vector.shape_cast %50 : vector<1x4x128xf32> to vector<4x128xf32>
    %52 = vector.shape_cast %49 : vector<4x128xf32> to vector<1x4x128xf32>
    tpu.vector_store %arg8[%c1_44, %c0_45, %c0_46], %52 {strides = array<i32>} : memref<2x4x128xf32, #tpu.memory_space<vmem>>, vector<1x4x128xf32>,
    %c2_i32 = arith.constant 2 : i32
    %53 = arith.cmpi eq, %arg1, %c2_i32 : i32
    %54 = arith.extui %53 : i1 to i32
    %c0_i32_47 = arith.constant 0 : i32
    %55 = arith.cmpi ne, %54, %c0_i32_47 : i32
    scf.if %55 {
      %c0_48 = arith.constant 0 : index
      %c0_49 = arith.constant 0 : index
      %c0_50 = arith.constant 0 : index
      %56 = vector.load %arg8[%c0_48, %c0_49, %c0_50] : memref<2x4x128xf32, #tpu.memory_space<vmem>>, vector<2x4x128xf32>
      %c0_51 = arith.constant 0 : index
      %c0_52 = arith.constant 0 : index
      %c0_53 = arith.constant 0 : index
      %57 = vector.load %arg5[%c0_51, %c0_52, %c0_53] : memref<1x1x128xf32, #tpu.memory_space<vmem>>, vector<1x1x128xf32>
      %58 = vector.broadcast %57 : vector<1x1x128xf32> to vector<2x4x128xf32>
      %59 = arith.mulf %56, %58 : vector<2x4x128xf32>
      %c0_54 = arith.constant 0 : index
      %c0_55 = arith.constant 0 : index
      %c0_56 = arith.constant 0 : index
      %60 = vector.load %arg6[%c0_54, %c0_55, %c0_56] : memref<1x1x128xf32, #tpu.memory_space<vmem>>, vector<1x1x128xf32>
      %61 = vector.broadcast %60 : vector<1x1x128xf32> to vector<2x4x128xf32>
      %62 = arith.addf %59, %61 : vector<2x4x128xf32>
      %cst_57 = arith.constant 0.000000e+00 : f32
      %63 = vector.broadcast %cst_57 : f32 to vector<2x4x128xf32>
      %64 = arith.maximumf %62, %63 : vector<2x4x128xf32>
      %65 = arith.truncf %64 : vector<2x4x128xf32> to vector<2x4x128xbf16>
      %c0_58 = arith.constant 0 : index
      %c0_59 = arith.constant 0 : index
      %c0_60 = arith.constant 0 : index
      %c0_61 = arith.constant 0 : index
      %66 = vector.load %arg7[%c0_58, %c0_59, %c0_60, %c0_61] : memref<2x1x4x128xbf16, #tpu.memory_space<vmem>>, vector<2x1x4x128xbf16>
      %67 = vector.shape_cast %66 : vector<2x1x4x128xbf16> to vector<2x4x128xbf16>
      %68 = vector.shape_cast %65 : vector<2x4x128xbf16> to vector<2x1x4x128xbf16>
      tpu.vector_store %arg7[%c0_58, %c0_59, %c0_60, %c0_61], %68 {strides = array<i32>} : memref<2x1x4x128xbf16, #tpu.memory_space<vmem>>, vector<2x1x4x128xbf16>,
    } else {
    }
    return
  }
  func.func @transform_0(%arg0: i32, %arg1: i32) -> (i32, i32, i32, i32) {
    %c2_i32 = arith.constant 2 : i32
    %0 = arith.muli %c2_i32, %arg0 : i32
    %1 = arith.addi %0, %arg1 : i32
    %c0_i32 = arith.constant 0 : i32
    %c0_i32_0 = arith.constant 0 : i32
    %c0_i32_1 = arith.constant 0 : i32
    %c0_i32_2 = arith.constant 0 : i32
    return %c0_i32, %1, %c0_i32_0, %c0_i32_1 : i32, i32, i32, i32
  }
  func.func @transform_1(%arg0: i32, %arg1: i32) -> (i32, i32, i32, i32) {
    %c2_i32 = arith.constant 2 : i32
    %0 = arith.muli %c2_i32, %arg0 : i32
    %1 = arith.addi %0, %arg1 : i32
    %c0_i32 = arith.constant 0 : i32
    %c0_i32_0 = arith.constant 0 : i32
    %c0_i32_1 = arith.constant 0 : i32
    %c0_i32_2 = arith.constant 0 : i32
    return %c0_i32, %1, %c0_i32_0, %c0_i32_1 : i32, i32, i32, i32
  }
  func.func @transform_2(%arg0: i32, %arg1: i32) -> (i32, i32, i32, i32) {
    %c0_i32 = arith.constant 0 : i32
    %c0_i32_0 = arith.constant 0 : i32
    %c0_i32_1 = arith.constant 0 : i32
    %c0_i32_2 = arith.constant 0 : i32
    return %arg1, %c0_i32, %c0_i32_0, %c0_i32_1 : i32, i32, i32, i32
  }
  func.func @transform_3(%arg0: i32, %arg1: i32) -> (i32, i32, i32) {
    %c0_i32 = arith.constant 0 : i32
    %c0_i32_0 = arith.constant 0 : i32
    %c0_i32_1 = arith.constant 0 : i32
    %c0_i32_2 = arith.constant 0 : i32
    return %c0_i32, %c0_i32_0, %c0_i32_1 : i32, i32, i32
  }
  func.func @transform_4(%arg0: i32, %arg1: i32) -> (i32, i32, i32) {
    %c0_i32 = arith.constant 0 : i32
    %c0_i32_0 = arith.constant 0 : i32
    %c0_i32_1 = arith.constant 0 : i32
    %c0_i32_2 = arith.constant 0 : i32
    return %c0_i32, %c0_i32_0, %c0_i32_1 : i32, i32, i32
  }
  func.func @transform_5(%arg0: i32, %arg1: i32) -> (i32, i32, i32, i32) {
    %c0_i32 = arith.constant 0 : i32
    %c0_i32_0 = arith.constant 0 : i32
    %c0_i32_1 = arith.constant 0 : i32
    %c0_i32_2 = arith.constant 0 : i32
    return %c0_i32, %arg0, %c0_i32_0, %c0_i32_1 : i32, i32, i32, i32
  }
}

module attributes {stable_mosaic.version = 11 : i64} {
  func.func @_matmul_bn_act_kernel(%arg0: i32, %arg1: i32, %arg2: memref<32x256xbf16, #tpu.memory_space<vmem>>, %arg3: memref<256x256xbf16, #tpu.memory_space<vmem>>, %arg4: memref<1x256xf32, #tpu.memory_space<vmem>>, %arg5: memref<1x256xf32, #tpu.memory_space<vmem>>, %arg6: memref<32x256xbf16, #tpu.memory_space<vmem>>) attributes {dimension_semantics = [#tpu.dimension_semantics<parallel>, #tpu.dimension_semantics<parallel>], iteration_bounds = array<i64: 1, 2>, scalar_prefetch = 0 : i64, scratch_operands = 0 : i64, tpu.core_type = #tpu.core_type<tc>, window_params = [{transform_indices = @transform_0, window_bounds = array<i64: 32, 256>}, {transform_indices = @transform_1, window_bounds = array<i64: 256, 256>}, {transform_indices = @transform_2, window_bounds = array<i64: 1, 256>}, {transform_indices = @transform_3, window_bounds = array<i64: 1, 256>}, {transform_indices = @transform_4, window_bounds = array<i64: 32, 256>}]} {
    %c0 = arith.constant 0 : index
    %c0_0 = arith.constant 0 : index
    %0 = vector.load %arg2[%c0, %c0_0] : memref<32x256xbf16, #tpu.memory_space<vmem>>, vector<32x256xbf16>
    %c0_1 = arith.constant 0 : index
    %c0_2 = arith.constant 0 : index
    %1 = vector.load %arg3[%c0_1, %c0_2] : memref<256x256xbf16, #tpu.memory_space<vmem>>, vector<256x256xbf16>
    %cst = arith.constant dense<0.000000e+00> : vector<32x256xf32>
    %2 = tpu.matmul %0, %1, %cst {dimension_numbers = #tpu.dot_dimension_numbers<[1], [0], [0], [1], [0, 0, 1, 1], [], []>} : vector<32x256xbf16>, vector<256x256xbf16>, vector<32x256xf32> -> vector<32x256xf32>
    %c0_3 = arith.constant 0 : index
    %c0_4 = arith.constant 0 : index
    %3 = vector.load %arg4[%c0_3, %c0_4] : memref<1x256xf32, #tpu.memory_space<vmem>>, vector<1x256xf32>
    %4 = vector.broadcast %3 : vector<1x256xf32> to vector<32x256xf32>
    %5 = arith.mulf %2, %4 : vector<32x256xf32>
    %c0_5 = arith.constant 0 : index
    %c0_6 = arith.constant 0 : index
    %6 = vector.load %arg5[%c0_5, %c0_6] : memref<1x256xf32, #tpu.memory_space<vmem>>, vector<1x256xf32>
    %7 = vector.broadcast %6 : vector<1x256xf32> to vector<32x256xf32>
    %8 = arith.addf %5, %7 : vector<32x256xf32>
    %9 = arith.truncf %8 : vector<32x256xf32> to vector<32x256xbf16>
    %c0_7 = arith.constant 0 : index
    %c0_8 = arith.constant 0 : index
    %10 = vector.load %arg6[%c0_7, %c0_8] : memref<32x256xbf16, #tpu.memory_space<vmem>>, vector<32x256xbf16>
    tpu.vector_store %arg6[%c0_7, %c0_8], %9 {strides = array<i32>} : memref<32x256xbf16, #tpu.memory_space<vmem>>, vector<32x256xbf16>,
    return
  }
  func.func @transform_0(%arg0: i32, %arg1: i32) -> (i32, i32) {
    %c0_i32 = arith.constant 0 : i32
    %c0_i32_0 = arith.constant 0 : i32
    return %arg0, %c0_i32 : i32, i32
  }
  func.func @transform_1(%arg0: i32, %arg1: i32) -> (i32, i32) {
    %c0_i32 = arith.constant 0 : i32
    %c0_i32_0 = arith.constant 0 : i32
    return %c0_i32, %arg1 : i32, i32
  }
  func.func @transform_2(%arg0: i32, %arg1: i32) -> (i32, i32) {
    %c0_i32 = arith.constant 0 : i32
    %c0_i32_0 = arith.constant 0 : i32
    return %c0_i32, %arg1 : i32, i32
  }
  func.func @transform_3(%arg0: i32, %arg1: i32) -> (i32, i32) {
    %c0_i32 = arith.constant 0 : i32
    %c0_i32_0 = arith.constant 0 : i32
    return %c0_i32, %arg1 : i32, i32
  }
  func.func @transform_4(%arg0: i32, %arg1: i32) -> (i32, i32) {
    %c0_i32 = arith.constant 0 : i32
    return %arg0, %arg1 : i32, i32
  }
}

module attributes {stable_mosaic.version = 11 : i64} {
  func.func @_add_relu_kernel(%arg0: i32, %arg1: memref<32x512xbf16, #tpu.memory_space<vmem>>, %arg2: memref<32x512xbf16, #tpu.memory_space<vmem>>, %arg3: memref<32x512xbf16, #tpu.memory_space<vmem>>) attributes {dimension_semantics = [#tpu.dimension_semantics<parallel>], iteration_bounds = array<i64: 1>, scalar_prefetch = 0 : i64, scratch_operands = 0 : i64, tpu.core_type = #tpu.core_type<tc>, window_params = [{transform_indices = @transform_0, window_bounds = array<i64: 32, 512>}, {transform_indices = @transform_1, window_bounds = array<i64: 32, 512>}, {transform_indices = @transform_2, window_bounds = array<i64: 32, 512>}]} {
    %c0 = arith.constant 0 : index
    %c0_0 = arith.constant 0 : index
    %0 = vector.load %arg1[%c0, %c0_0] : memref<32x512xbf16, #tpu.memory_space<vmem>>, vector<32x512xbf16>
    %1 = arith.extf %0 : vector<32x512xbf16> to vector<32x512xf32>
    %c0_1 = arith.constant 0 : index
    %c0_2 = arith.constant 0 : index
    %2 = vector.load %arg2[%c0_1, %c0_2] : memref<32x512xbf16, #tpu.memory_space<vmem>>, vector<32x512xbf16>
    %3 = arith.extf %2 : vector<32x512xbf16> to vector<32x512xf32>
    %4 = arith.addf %1, %3 : vector<32x512xf32>
    %cst = arith.constant 0.000000e+00 : f32
    %5 = vector.broadcast %cst : f32 to vector<32x512xf32>
    %6 = arith.maximumf %4, %5 : vector<32x512xf32>
    %7 = arith.truncf %6 : vector<32x512xf32> to vector<32x512xbf16>
    %c0_3 = arith.constant 0 : index
    %c0_4 = arith.constant 0 : index
    %8 = vector.load %arg3[%c0_3, %c0_4] : memref<32x512xbf16, #tpu.memory_space<vmem>>, vector<32x512xbf16>
    tpu.vector_store %arg3[%c0_3, %c0_4], %7 {strides = array<i32>} : memref<32x512xbf16, #tpu.memory_space<vmem>>, vector<32x512xbf16>,
    return
  }
  func.func @transform_0(%arg0: i32) -> (i32, i32) {
    %c0_i32 = arith.constant 0 : i32
    %c0_i32_0 = arith.constant 0 : i32
    return %arg0, %c0_i32 : i32, i32
  }
  func.func @transform_1(%arg0: i32) -> (i32, i32) {
    %c0_i32 = arith.constant 0 : i32
    %c0_i32_0 = arith.constant 0 : i32
    return %arg0, %c0_i32 : i32, i32
  }
  func.func @transform_2(%arg0: i32) -> (i32, i32) {
    %c0_i32 = arith.constant 0 : i32
    %c0_i32_0 = arith.constant 0 : i32
    return %arg0, %c0_i32 : i32, i32
  }
}

module attributes {stable_mosaic.version = 11 : i64} {
  func.func @_matmul_bn_act_kernel(%arg0: i32, %arg1: i32, %arg2: memref<32x512xbf16, #tpu.memory_space<vmem>>, %arg3: memref<512x128xbf16, #tpu.memory_space<vmem>>, %arg4: memref<1x128xf32, #tpu.memory_space<vmem>>, %arg5: memref<1x128xf32, #tpu.memory_space<vmem>>, %arg6: memref<32x128xbf16, #tpu.memory_space<vmem>>) attributes {dimension_semantics = [#tpu.dimension_semantics<parallel>, #tpu.dimension_semantics<parallel>], iteration_bounds = array<i64: 1, 1>, scalar_prefetch = 0 : i64, scratch_operands = 0 : i64, tpu.core_type = #tpu.core_type<tc>, window_params = [{transform_indices = @transform_0, window_bounds = array<i64: 32, 512>}, {transform_indices = @transform_1, window_bounds = array<i64: 512, 128>}, {transform_indices = @transform_2, window_bounds = array<i64: 1, 128>}, {transform_indices = @transform_3, window_bounds = array<i64: 1, 128>}, {transform_indices = @transform_4, window_bounds = array<i64: 32, 128>}]} {
    %c0 = arith.constant 0 : index
    %c0_0 = arith.constant 0 : index
    %0 = vector.load %arg2[%c0, %c0_0] : memref<32x512xbf16, #tpu.memory_space<vmem>>, vector<32x512xbf16>
    %c0_1 = arith.constant 0 : index
    %c0_2 = arith.constant 0 : index
    %1 = vector.load %arg3[%c0_1, %c0_2] : memref<512x128xbf16, #tpu.memory_space<vmem>>, vector<512x128xbf16>
    %cst = arith.constant dense<0.000000e+00> : vector<32x128xf32>
    %2 = tpu.matmul %0, %1, %cst {dimension_numbers = #tpu.dot_dimension_numbers<[1], [0], [0], [1], [0, 0, 1, 1], [], []>} : vector<32x512xbf16>, vector<512x128xbf16>, vector<32x128xf32> -> vector<32x128xf32>
    %c0_3 = arith.constant 0 : index
    %c0_4 = arith.constant 0 : index
    %3 = vector.load %arg4[%c0_3, %c0_4] : memref<1x128xf32, #tpu.memory_space<vmem>>, vector<1x128xf32>
    %4 = vector.broadcast %3 : vector<1x128xf32> to vector<32x128xf32>
    %5 = arith.mulf %2, %4 : vector<32x128xf32>
    %c0_5 = arith.constant 0 : index
    %c0_6 = arith.constant 0 : index
    %6 = vector.load %arg5[%c0_5, %c0_6] : memref<1x128xf32, #tpu.memory_space<vmem>>, vector<1x128xf32>
    %7 = vector.broadcast %6 : vector<1x128xf32> to vector<32x128xf32>
    %8 = arith.addf %5, %7 : vector<32x128xf32>
    %cst_7 = arith.constant 0.000000e+00 : f32
    %9 = vector.broadcast %cst_7 : f32 to vector<32x128xf32>
    %10 = arith.maximumf %8, %9 : vector<32x128xf32>
    %11 = arith.truncf %10 : vector<32x128xf32> to vector<32x128xbf16>
    %c0_8 = arith.constant 0 : index
    %c0_9 = arith.constant 0 : index
    %12 = vector.load %arg6[%c0_8, %c0_9] : memref<32x128xbf16, #tpu.memory_space<vmem>>, vector<32x128xbf16>
    tpu.vector_store %arg6[%c0_8, %c0_9], %11 {strides = array<i32>} : memref<32x128xbf16, #tpu.memory_space<vmem>>, vector<32x128xbf16>,
    return
  }
  func.func @transform_0(%arg0: i32, %arg1: i32) -> (i32, i32) {
    %c0_i32 = arith.constant 0 : i32
    %c0_i32_0 = arith.constant 0 : i32
    return %arg0, %c0_i32 : i32, i32
  }
  func.func @transform_1(%arg0: i32, %arg1: i32) -> (i32, i32) {
    %c0_i32 = arith.constant 0 : i32
    %c0_i32_0 = arith.constant 0 : i32
    return %c0_i32, %arg1 : i32, i32
  }
  func.func @transform_2(%arg0: i32, %arg1: i32) -> (i32, i32) {
    %c0_i32 = arith.constant 0 : i32
    %c0_i32_0 = arith.constant 0 : i32
    return %c0_i32, %arg1 : i32, i32
  }
  func.func @transform_3(%arg0: i32, %arg1: i32) -> (i32, i32) {
    %c0_i32 = arith.constant 0 : i32
    %c0_i32_0 = arith.constant 0 : i32
    return %c0_i32, %arg1 : i32, i32
  }
  func.func @transform_4(%arg0: i32, %arg1: i32) -> (i32, i32) {
    %c0_i32 = arith.constant 0 : i32
    return %arg0, %arg1 : i32, i32
  }
}

module attributes {stable_mosaic.version = 11 : i64} {
  func.func @_conv_kxk_kernel(%arg0: i32, %arg1: i32, %arg2: memref<2x1x6x128xbf16, #tpu.memory_space<vmem>>, %arg3: memref<1x3x128x128xbf16, #tpu.memory_space<vmem>>, %arg4: memref<1x1x128xf32, #tpu.memory_space<vmem>>, %arg5: memref<1x1x128xf32, #tpu.memory_space<vmem>>, %arg6: memref<2x1x4x128xbf16, #tpu.memory_space<vmem>>, %arg7: memref<2x4x128xf32, #tpu.memory_space<vmem>>) attributes {dimension_semantics = [#tpu.dimension_semantics<parallel>, #tpu.dimension_semantics<arbitrary>], iteration_bounds = array<i64: 4, 3>, scalar_prefetch = 0 : i64, scratch_operands = 1 : i64, tpu.core_type = #tpu.core_type<tc>, window_params = [{transform_indices = @transform_0, window_bounds = array<i64: 2, 1, 6, 128>}, {transform_indices = @transform_1, window_bounds = array<i64: 1, 3, 128, 128>}, {pipeline_mode = #tpu.pipeline_mode<synchronous>, transform_indices = @transform_2, window_bounds = array<i64: 1, 1, 128>}, {pipeline_mode = #tpu.pipeline_mode<synchronous>, transform_indices = @transform_3, window_bounds = array<i64: 1, 1, 128>}, {transform_indices = @transform_4, window_bounds = array<i64: 2, 1, 4, 128>}]} {
    %c0_i32 = arith.constant 0 : i32
    %0 = arith.cmpi eq, %arg1, %c0_i32 : i32
    %1 = arith.extui %0 : i1 to i32
    %c0_i32_0 = arith.constant 0 : i32
    %2 = arith.cmpi ne, %1, %c0_i32_0 : i32
    scf.if %2 {
      %cst_44 = arith.constant 0.000000e+00 : f32
      %54 = vector.broadcast %cst_44 : f32 to vector<2x4x128xf32>
      %c0_45 = arith.constant 0 : index
      %c0_46 = arith.constant 0 : index
      %c0_47 = arith.constant 0 : index
      %55 = vector.load %arg7[%c0_45, %c0_46, %c0_47] : memref<2x4x128xf32, #tpu.memory_space<vmem>>, vector<2x4x128xf32>
      tpu.vector_store %arg7[%c0_45, %c0_46, %c0_47], %54 {strides = array<i32>} : memref<2x4x128xf32, #tpu.memory_space<vmem>>, vector<2x4x128xf32>,
    } else {
    }
    %c0 = arith.constant 0 : index
    %c0_1 = arith.constant 0 : index
    %c0_2 = arith.constant 0 : index
    %c0_3 = arith.constant 0 : index
    %3 = vector.load %arg2[%c0, %c0_1, %c0_2, %c0_3] : memref<2x1x6x128xbf16, #tpu.memory_space<vmem>>, vector<2x1x6x128xbf16>
    %4 = vector.shape_cast %3 : vector<2x1x6x128xbf16> to vector<2x6x128xbf16>
    %c0_4 = arith.constant 0 : index
    %c0_5 = arith.constant 0 : index
    %c0_6 = arith.constant 0 : index
    %5 = vector.load %arg7[%c0_4, %c0_5, %c0_6] : memref<2x4x128xf32, #tpu.memory_space<vmem>>, vector<1x4x128xf32>
    %6 = vector.shape_cast %5 : vector<1x4x128xf32> to vector<4x128xf32>
    %7 = vector.extract_strided_slice %4 {offsets = [0, 0, 0], sizes = [1, 4, 128], strides = [1, 1, 1]} : vector<2x6x128xbf16> to vector<1x4x128xbf16>
    %8 = vector.shape_cast %7 : vector<1x4x128xbf16> to vector<4x128xbf16>
    %c0_7 = arith.constant 0 : index
    %c0_8 = arith.constant 0 : index
    %c0_9 = arith.constant 0 : index
    %c0_10 = arith.constant 0 : index
    %9 = vector.load %arg3[%c0_7, %c0_8, %c0_9, %c0_10] : memref<1x3x128x128xbf16, #tpu.memory_space<vmem>>, vector<1x1x128x128xbf16>
    %10 = vector.shape_cast %9 : vector<1x1x128x128xbf16> to vector<128x128xbf16>
    %cst = arith.constant dense<0.000000e+00> : vector<4x128xf32>
    %11 = tpu.matmul %8, %10, %cst {dimension_numbers = #tpu.dot_dimension_numbers<[1], [0], [0], [1], [0, 0, 1, 1], [], []>} : vector<4x128xbf16>, vector<128x128xbf16>, vector<4x128xf32> -> vector<4x128xf32>
    %12 = arith.addf %6, %11 : vector<4x128xf32>
    %13 = vector.extract_strided_slice %4 {offsets = [0, 1, 0], sizes = [1, 4, 128], strides = [1, 1, 1]} : vector<2x6x128xbf16> to vector<1x4x128xbf16>
    %14 = vector.shape_cast %13 : vector<1x4x128xbf16> to vector<4x128xbf16>
    %c0_11 = arith.constant 0 : index
    %c1 = arith.constant 1 : index
    %c0_12 = arith.constant 0 : index
    %c0_13 = arith.constant 0 : index
    %15 = vector.load %arg3[%c0_11, %c1, %c0_12, %c0_13] : memref<1x3x128x128xbf16, #tpu.memory_space<vmem>>, vector<1x1x128x128xbf16>
    %16 = vector.shape_cast %15 : vector<1x1x128x128xbf16> to vector<128x128xbf16>
    %cst_14 = arith.constant dense<0.000000e+00> : vector<4x128xf32>
    %17 = tpu.matmul %14, %16, %cst_14 {dimension_numbers = #tpu.dot_dimension_numbers<[1], [0], [0], [1], [0, 0, 1, 1], [], []>} : vector<4x128xbf16>, vector<128x128xbf16>, vector<4x128xf32> -> vector<4x128xf32>
    %18 = arith.addf %12, %17 : vector<4x128xf32>
    %19 = vector.extract_strided_slice %4 {offsets = [0, 2, 0], sizes = [1, 4, 128], strides = [1, 1, 1]} : vector<2x6x128xbf16> to vector<1x4x128xbf16>
    %20 = vector.shape_cast %19 : vector<1x4x128xbf16> to vector<4x128xbf16>
    %c0_15 = arith.constant 0 : index
    %c2 = arith.constant 2 : index
    %c0_16 = arith.constant 0 : index
    %c0_17 = arith.constant 0 : index
    %21 = vector.load %arg3[%c0_15, %c2, %c0_16, %c0_17] : memref<1x3x128x128xbf16, #tpu.memory_space<vmem>>, vector<1x1x128x128xbf16>
    %22 = vector.shape_cast %21 : vector<1x1x128x128xbf16> to vector<128x128xbf16>
    %cst_18 = arith.constant dense<0.000000e+00> : vector<4x128xf32>
    %23 = tpu.matmul %20, %22, %cst_18 {dimension_numbers = #tpu.dot_dimension_numbers<[1], [0], [0], [1], [0, 0, 1, 1], [], []>} : vector<4x128xbf16>, vector<128x128xbf16>, vector<4x128xf32> -> vector<4x128xf32>
    %24 = arith.addf %18, %23 : vector<4x128xf32>
    %c0_19 = arith.constant 0 : index
    %c0_20 = arith.constant 0 : index
    %c0_21 = arith.constant 0 : index
    %25 = vector.load %arg7[%c0_19, %c0_20, %c0_21] : memref<2x4x128xf32, #tpu.memory_space<vmem>>, vector<1x4x128xf32>
    %26 = vector.shape_cast %25 : vector<1x4x128xf32> to vector<4x128xf32>
    %27 = vector.shape_cast %24 : vector<4x128xf32> to vector<1x4x128xf32>
    tpu.vector_store %arg7[%c0_19, %c0_20, %c0_21], %27 {strides = array<i32>} : memref<2x4x128xf32, #tpu.memory_space<vmem>>, vector<1x4x128xf32>,
    %c1_22 = arith.constant 1 : index
    %c0_23 = arith.constant 0 : index
    %c0_24 = arith.constant 0 : index
    %28 = vector.load %arg7[%c1_22, %c0_23, %c0_24] : memref<2x4x128xf32, #tpu.memory_space<vmem>>, vector<1x4x128xf32>
    %29 = vector.shape_cast %28 : vector<1x4x128xf32> to vector<4x128xf32>
    %30 = vector.extract_strided_slice %4 {offsets = [1, 0, 0], sizes = [1, 4, 128], strides = [1, 1, 1]} : vector<2x6x128xbf16> to vector<1x4x128xbf16>
    %31 = vector.shape_cast %30 : vector<1x4x128xbf16> to vector<4x128xbf16>
    %c0_25 = arith.constant 0 : index
    %c0_26 = arith.constant 0 : index
    %c0_27 = arith.constant 0 : index
    %c0_28 = arith.constant 0 : index
    %32 = vector.load %arg3[%c0_25, %c0_26, %c0_27, %c0_28] : memref<1x3x128x128xbf16, #tpu.memory_space<vmem>>, vector<1x1x128x128xbf16>
    %33 = vector.shape_cast %32 : vector<1x1x128x128xbf16> to vector<128x128xbf16>
    %cst_29 = arith.constant dense<0.000000e+00> : vector<4x128xf32>
    %34 = tpu.matmul %31, %33, %cst_29 {dimension_numbers = #tpu.dot_dimension_numbers<[1], [0], [0], [1], [0, 0, 1, 1], [], []>} : vector<4x128xbf16>, vector<128x128xbf16>, vector<4x128xf32> -> vector<4x128xf32>
    %35 = arith.addf %29, %34 : vector<4x128xf32>
    %36 = vector.extract_strided_slice %4 {offsets = [1, 1, 0], sizes = [1, 4, 128], strides = [1, 1, 1]} : vector<2x6x128xbf16> to vector<1x4x128xbf16>
    %37 = vector.shape_cast %36 : vector<1x4x128xbf16> to vector<4x128xbf16>
    %c0_30 = arith.constant 0 : index
    %c1_31 = arith.constant 1 : index
    %c0_32 = arith.constant 0 : index
    %c0_33 = arith.constant 0 : index
    %38 = vector.load %arg3[%c0_30, %c1_31, %c0_32, %c0_33] : memref<1x3x128x128xbf16, #tpu.memory_space<vmem>>, vector<1x1x128x128xbf16>
    %39 = vector.shape_cast %38 : vector<1x1x128x128xbf16> to vector<128x128xbf16>
    %cst_34 = arith.constant dense<0.000000e+00> : vector<4x128xf32>
    %40 = tpu.matmul %37, %39, %cst_34 {dimension_numbers = #tpu.dot_dimension_numbers<[1], [0], [0], [1], [0, 0, 1, 1], [], []>} : vector<4x128xbf16>, vector<128x128xbf16>, vector<4x128xf32> -> vector<4x128xf32>
    %41 = arith.addf %35, %40 : vector<4x128xf32>
    %42 = vector.extract_strided_slice %4 {offsets = [1, 2, 0], sizes = [1, 4, 128], strides = [1, 1, 1]} : vector<2x6x128xbf16> to vector<1x4x128xbf16>
    %43 = vector.shape_cast %42 : vector<1x4x128xbf16> to vector<4x128xbf16>
    %c0_35 = arith.constant 0 : index
    %c2_36 = arith.constant 2 : index
    %c0_37 = arith.constant 0 : index
    %c0_38 = arith.constant 0 : index
    %44 = vector.load %arg3[%c0_35, %c2_36, %c0_37, %c0_38] : memref<1x3x128x128xbf16, #tpu.memory_space<vmem>>, vector<1x1x128x128xbf16>
    %45 = vector.shape_cast %44 : vector<1x1x128x128xbf16> to vector<128x128xbf16>
    %cst_39 = arith.constant dense<0.000000e+00> : vector<4x128xf32>
    %46 = tpu.matmul %43, %45, %cst_39 {dimension_numbers = #tpu.dot_dimension_numbers<[1], [0], [0], [1], [0, 0, 1, 1], [], []>} : vector<4x128xbf16>, vector<128x128xbf16>, vector<4x128xf32> -> vector<4x128xf32>
    %47 = arith.addf %41, %46 : vector<4x128xf32>
    %c1_40 = arith.constant 1 : index
    %c0_41 = arith.constant 0 : index
    %c0_42 = arith.constant 0 : index
    %48 = vector.load %arg7[%c1_40, %c0_41, %c0_42] : memref<2x4x128xf32, #tpu.memory_space<vmem>>, vector<1x4x128xf32>
    %49 = vector.shape_cast %48 : vector<1x4x128xf32> to vector<4x128xf32>
    %50 = vector.shape_cast %47 : vector<4x128xf32> to vector<1x4x128xf32>
    tpu.vector_store %arg7[%c1_40, %c0_41, %c0_42], %50 {strides = array<i32>} : memref<2x4x128xf32, #tpu.memory_space<vmem>>, vector<1x4x128xf32>,
    %c2_i32 = arith.constant 2 : i32
    %51 = arith.cmpi eq, %arg1, %c2_i32 : i32
    %52 = arith.extui %51 : i1 to i32
    %c0_i32_43 = arith.constant 0 : i32
    %53 = arith.cmpi ne, %52, %c0_i32_43 : i32
    scf.if %53 {
      %c0_44 = arith.constant 0 : index
      %c0_45 = arith.constant 0 : index
      %c0_46 = arith.constant 0 : index
      %54 = vector.load %arg7[%c0_44, %c0_45, %c0_46] : memref<2x4x128xf32, #tpu.memory_space<vmem>>, vector<2x4x128xf32>
      %c0_47 = arith.constant 0 : index
      %c0_48 = arith.constant 0 : index
      %c0_49 = arith.constant 0 : index
      %55 = vector.load %arg4[%c0_47, %c0_48, %c0_49] : memref<1x1x128xf32, #tpu.memory_space<vmem>>, vector<1x1x128xf32>
      %56 = vector.broadcast %55 : vector<1x1x128xf32> to vector<2x4x128xf32>
      %57 = arith.mulf %54, %56 : vector<2x4x128xf32>
      %c0_50 = arith.constant 0 : index
      %c0_51 = arith.constant 0 : index
      %c0_52 = arith.constant 0 : index
      %58 = vector.load %arg5[%c0_50, %c0_51, %c0_52] : memref<1x1x128xf32, #tpu.memory_space<vmem>>, vector<1x1x128xf32>
      %59 = vector.broadcast %58 : vector<1x1x128xf32> to vector<2x4x128xf32>
      %60 = arith.addf %57, %59 : vector<2x4x128xf32>
      %cst_53 = arith.constant 0.000000e+00 : f32
      %61 = vector.broadcast %cst_53 : f32 to vector<2x4x128xf32>
      %62 = arith.maximumf %60, %61 : vector<2x4x128xf32>
      %63 = arith.truncf %62 : vector<2x4x128xf32> to vector<2x4x128xbf16>
      %c0_54 = arith.constant 0 : index
      %c0_55 = arith.constant 0 : index
      %c0_56 = arith.constant 0 : index
      %c0_57 = arith.constant 0 : index
      %64 = vector.load %arg6[%c0_54, %c0_55, %c0_56, %c0_57] : memref<2x1x4x128xbf16, #tpu.memory_space<vmem>>, vector<2x1x4x128xbf16>
      %65 = vector.shape_cast %64 : vector<2x1x4x128xbf16> to vector<2x4x128xbf16>
      %66 = vector.shape_cast %63 : vector<2x4x128xbf16> to vector<2x1x4x128xbf16>
      tpu.vector_store %arg6[%c0_54, %c0_55, %c0_56, %c0_57], %66 {strides = array<i32>} : memref<2x1x4x128xbf16, #tpu.memory_space<vmem>>, vector<2x1x4x128xbf16>,
    } else {
    }
    return
  }
  func.func @transform_0(%arg0: i32, %arg1: i32) -> (i32, i32, i32, i32) {
    %0 = arith.addi %arg0, %arg1 : i32
    %c0_i32 = arith.constant 0 : i32
    %c0_i32_0 = arith.constant 0 : i32
    %c0_i32_1 = arith.constant 0 : i32
    %c0_i32_2 = arith.constant 0 : i32
    return %c0_i32, %0, %c0_i32_0, %c0_i32_1 : i32, i32, i32, i32
  }
  func.func @transform_1(%arg0: i32, %arg1: i32) -> (i32, i32, i32, i32) {
    %c0_i32 = arith.constant 0 : i32
    %c0_i32_0 = arith.constant 0 : i32
    %c0_i32_1 = arith.constant 0 : i32
    %c0_i32_2 = arith.constant 0 : i32
    return %arg1, %c0_i32, %c0_i32_0, %c0_i32_1 : i32, i32, i32, i32
  }
  func.func @transform_2(%arg0: i32, %arg1: i32) -> (i32, i32, i32) {
    %c0_i32 = arith.constant 0 : i32
    %c0_i32_0 = arith.constant 0 : i32
    %c0_i32_1 = arith.constant 0 : i32
    %c0_i32_2 = arith.constant 0 : i32
    return %c0_i32, %c0_i32_0, %c0_i32_1 : i32, i32, i32
  }
  func.func @transform_3(%arg0: i32, %arg1: i32) -> (i32, i32, i32) {
    %c0_i32 = arith.constant 0 : i32
    %c0_i32_0 = arith.constant 0 : i32
    %c0_i32_1 = arith.constant 0 : i32
    %c0_i32_2 = arith.constant 0 : i32
    return %c0_i32, %c0_i32_0, %c0_i32_1 : i32, i32, i32
  }
  func.func @transform_4(%arg0: i32, %arg1: i32) -> (i32, i32, i32, i32) {
    %c0_i32 = arith.constant 0 : i32
    %c0_i32_0 = arith.constant 0 : i32
    %c0_i32_1 = arith.constant 0 : i32
    %c0_i32_2 = arith.constant 0 : i32
    return %c0_i32, %arg0, %c0_i32_0, %c0_i32_1 : i32, i32, i32, i32
  }
}

</mosaic_0001>

<bundles_post_ra>
// kernel: shared_module_fr_forward.32
= control target key start
LH: loop header
LB: loop body
LE: loop exit
PB: predicated region body
PF: predicated region fallthrough
CT: control target
= control target key end

     0   :  { %s2244_s0 = inlined_call_operand.vmem [shape: bf16[2,38,19,3], index: 0, kind: input, shape index: {}]   ;;  %s2245_s1 = inlined_call_operand.vmem [shape: bf16[2,38,19,3], index: 1, kind: input, shape index: {}]   ;;  %s2246_s2 = inlined_call_operand.vmem [shape: bf16[7,7,3,128], index: 2, kind: input, shape index: {}]   ;;  %s2247_s3 = inlined_call_operand.vmem [shape: f32[1,1,128], index: 3, kind: input, shape index: {}]   ;;  %s2248_s4 = inlined_call_operand.vmem [shape: f32[1,1,128], index: 4, kind: input, shape index: {}]   ;;  %s2249_s5 = inlined_call_operand.vmem [shape: bf16[2,16,16,128], index: 5, kind: output, shape index: {}]  }
   0x1   :  { %2250 = sst [smem:[#allocation6_spill]] %s2244_s0 }
   0x2   :  { %s1916_s18 = smov 0   ;;  %s1918_s19 = smov 0  }
   0x3   :  { %s1920_s20 = smov 0   ;;  %s1922_s21 = smov 0  }
   0x4   :  { %s1924_s22 = smov 0   ;;  %s1926_s23 = smov 0  }
   0x5   :  { %s1928_s24 = smov 0   ;;  %s1930_s25 = smov 0  }
   0x6   :  { %s1932_s26 = smov 0  }
   0x7 LB: > { %s1478_s27 = sadd.s32 4294967295, %s1880_s26   ;;  %s24_s28 = sadd.s32 1, %s1872_s24  ;;  %s1880_s26 = sphi %s1932_s26, %s15_s26   ;;  %s1876_s25 = sphi %s1930_s25, %s2261_s25   ;;  %s1872_s24 = sphi %s1928_s24, %s2260_s24   ;;  %s1868_s23 = sphi %s1926_s23, %s2259_s23   ;;  %s1864_s22 = sphi %s1924_s22, %s2258_s22   ;;  %s1860_s21 = sphi %s1922_s21, %s2257_s21   ;;  %s1856_s20 = sphi %s1920_s20, %s2256_s20   ;;  %s1852_s19 = sphi %s1918_s19, %s2255_s19   ;;  %s1848_s18 = sphi %s1916_s18, %s2254_s18  }
   0x8   : > { %p25_p0 = scmp.ge.s32.totalorder %s24_s28, 7  ;;  %s27_s29 = sadd.s32 1, %s1876_s25 }
   0x9   : > { %s1480_s30 = sshll.u32 %s1876_s25, 1  ;;  %s38_s6 = sadd.s32 1, %s1860_s21 }
   0xa   : > { %s2263_s28 = smov (%p25_p0, %s24_s28), 0  ;;  %s2265_s29 = smov (!%p25_p0, %s27_s29), %s1876_s25 }
   0xb   : > { %s1970_s7 = sadd.s32 %s1872_s24, %s1480_s30  ;;  %p45_p1 = scmp.ne.s32.totalorder %s1860_s21, %s1856_s20 }
   0xc   : > { %p29_p2 = scmp.ge.s32.totalorder %s2265_s29, 16  ;;  %p46_p3 = scmp.eq.s32.totalorder %s1880_s26, 0 }
   0xd   : > { %s162_s8 = sadd.s32 1, %s1852_s19  ;;  %p172_p4 = scmp.ne.s32.totalorder %s1852_s19, %s1848_s18 }
   0xe   : > { %s2267_s29 = smov (%p29_p2, %s2265_s29), 0  ;;  %p1980_p5 = por %p46_p3, %p45_p1 }
   0xf   : > { %p173_p6 = scmp.eq.s32.totalorder %s1478_s27, 111  ;;  %s1481_s10 = sshll.u32 %s2267_s29, 1 }
  0x10   : > { %s159_s11 = ssub.s32 %s1876_s25, %s2267_s29  ;;  %s34_s12 = sadd.s32 %s1481_s10, %s2263_s28 }
  0x11   : > { %p160_p7 = scmp.eq.s32.totalorder %s159_s11, 0  ;;  %s35_s13 = ssub.s32 %s1970_s7, %s34_s12 }
  0x12   : > { %p1989_p8 = por %p173_p6, %p172_p4  ;;  %p36_p9 = scmp.eq.s32.totalorder %s35_s13, 0 }
  0x13   : > { %s1994_s15 = scalar_select %p160_p7, %s1852_s19, %s162_s8  }
  0x14   : > { %s1997_s16 = scalar_select %p36_p9, %s1860_s21, %s38_s6  }
  0x15   : > { %p1485_p10 = scmp.ge.s32.totalorder %s1880_s26, 112 }
  0x17   : > { %201 = sbr.rel (%p1485_p10) target bundleno = 48 (0x30), region = 24 }
  0x1e   : > { %204 = sbr.rel (!%p1980_p5) target bundleno = 41 (0x29), region = 28  ;;  %s206_s17 = sand.u32 (%p1980_p5), 1, %s1860_s21  }
  0x1f   : > { %s1721_s27 = smul.u32 (%p1980_p5), 12, %s1970_s7  ;;  %s2253_s0 = sld [smem:[#allocation6_spill]] (%p1980_p5) }
  0x20   : > { %s1720_s30 = smul.u32 (%p1980_p5), 24, %s206_s17 }
  0x22   : > { %s208_s6 = scalar_lea.vmem (%p1980_p5), [#allocation3], %s1720_s30 }
  0x25   : > { %s213_s12 = scalar_lea.vmem %s2253_s0, %s1721_s27 }
  0x26   : > { %v229_v0 = vld [vmem:[%s213_s12] sm:$0xff]   ;;  %v233_v1 = vld [vmem:[%s213_s12 + $0x8] sm:$0xf]  ;;  %v239_v3 = vld [vmem:[%s213_s12 + $0x1d0] sm:$0xf] }
  0x27   : > { %v235_v2 = vld [vmem:[%s213_s12 + $0x1c8] sm:$0xff]   ;;  %230 = vst [vmem:[%s208_s6] sm:$0xff] %v229_v0   ;;  %234 = vst [vmem:[%s208_s6 + $0x8] sm:$0xf] %v233_v1 }
  0x28   : > { %236 = vst [vmem:[%s208_s6 + $0xc] sm:$0xff] %v235_v2   ;;  %240 = vst [vmem:[%s208_s6 + $0x14] sm:$0xf] %v239_v3 }
  0x29 PF: > { %275 = sbr.rel (!%p1980_p5) target bundleno = 48 (0x30), region = 69  ;;  %s277_s8 = sand.u32 (%p1980_p5), 1, %s1860_s21  }
  0x2a   : > { %s1723_s13 = smul.u32 (%p1980_p5), 12, %s1970_s7 }
  0x2b   : > { %s1722_s17 = smul.u32 (%p1980_p5), 24, %s277_s8 }
  0x2c   : > { %s284_s11 = scalar_lea.vmem (%p1980_p5), %s2245_s1, %s1723_s13 }
  0x2d   : > { %v300_v4 = vld [vmem:[%s284_s11] sm:$0xff] (%p1980_p5)   ;;  %v304_v5 = vld [vmem:[%s284_s11 + $0x8] sm:$0xf] (%p1980_p5)  ;;  %s279_s30 = scalar_lea.vmem (%p1980_p5), [#allocation4], %s1722_s17  ;;  %v310_v7 = vld [vmem:[%s284_s11 + $0x1d0] sm:$0xf] (%p1980_p5) }
  0x2e   : > { %v306_v6 = vld [vmem:[%s284_s11 + $0x1c8] sm:$0xff] (%p1980_p5)   ;;  %301 = vst [vmem:[%s279_s30] sm:$0xff] (%p1980_p5), %v300_v4   ;;  %305 = vst [vmem:[%s279_s30 + $0x8] sm:$0xf] (%p1980_p5), %v304_v5 }
  0x2f   : > { %307 = vst [vmem:[%s279_s30 + $0xc] sm:$0xff] (%p1980_p5), %v306_v6   ;;  %311 = vst [vmem:[%s279_s30 + $0x14] sm:$0xf] (%p1980_p5), %v310_v7 }
  0x30 PF: > { %p1490_p11 = scmp.ge.s32.totalorder %s1880_s26, 1  ;;  %p353_p12 = scmp.lt.s32.totalorder %s1880_s26, 113 }
  0x32   : > { %p354_p13 = pnand %p1490_p11, %p353_p12 }
  0x33   : > { %s360_s7 = sand.u32 (!%p354_p13), 1, %s1856_s20   ;;  %s399_s9 = sand.u32 (!%p354_p13), 1, %s1848_s18  }
  0x34   : > { %357 = sbr.rel (%p354_p13) target bundleno = 388 (0x184), region = 114  ;;  %s1491_s6 = sshll.u32 (!%p354_p13), %s399_s9, 4 }
  0x35   : > { %s1724_s12 = smul.u32 (!%p354_p13), 24, %s360_s7  ;;  %p406_p0 = scmp.lt.s32.totalorder (!%p354_p13), %s1864_s22, 6 }
  0x36   : > { %s2029_s0 = scalar_lea.vmem (!%p354_p13), [#allocation5], %s1491_s6  ;;  %p1493_p1 = scmp.ne.s32.totalorder (!%p354_p13), %s1864_s22, 0 }
  0x37   : > { %s2025_s11 = scalar_lea.vmem (!%p354_p13), [#allocation3], %s1724_s12  ;;  %s2027_s30 = scalar_lea.vmem (!%p354_p13), [#allocation4], %s1724_s12 }
  0x3b   : > { %s407_s8 = scalar_select %p406_p0, %s1864_s22, 6 }
  0x3c   : > { %415 = sbr.rel (%p1493_p1) target bundleno = 67 (0x43), region = 126  ;;  %v1882_v8 = vmov (!%p1493_p1), 0.0  }
  0x3d   : > { %s1725_s13 = smul.u32 14, %s407_s8  ;;  %416 = vst [vmem:[#allocation2] sm:$0xff] (!%p1493_p1), %v1882_v8  ;;  %417 = vst [vmem:[#allocation2 + $0x8] sm:$0xff] (!%p1493_p1), %v1882_v8 }
  0x3e   : > { %418 = vst [vmem:[#allocation2 + $0x10] sm:$0xff] (!%p1493_p1), %v1882_v8  ;;  %419 = vst [vmem:[#allocation2 + $0x18] sm:$0xff] (!%p1493_p1), %v1882_v8 }
  0x3f   : > { %s2023_s27 = scalar_lea.vmem %s2246_s2, %s1725_s13 }
  0x43 PF: > { %v434_v9 = vld [vmem:[%s2023_s27] sm:$0x3]  ;;  %vm444_vm0 = vcmask 1040384   ;;  %vm445_vm1 = vcmask 1041408   ;;  %v1883_v10 = vmov 0.0   ;;  %v1884_v11 = vmov 65535  }
  0x44   : > { %1584 = vmatprep.subr.bf16.mxu0 %v1883_v10  ;;  %1626 = vmatprep.subr.bf16.mxu1 %v1883_v10  ;;  %v446_v12 = vsel %vm444_vm0, 4294967295, %v1884_v11  ;;  %v856_v13 = vld [vmem:[%s2023_s27] sm:$0x3]  ;;  %vm1885_vm2 = vmmov 0   ;;  %v2046_v16 = vld [vmem:[%s2025_s11 + $0xc] sm:$0xff]   ;;  %vm440_vm3 = vcmask 23552  }
  0x45   : > { %v2036_v14 = vsel %vm445_vm1, %v446_v12, 0  ;;  %1586 = vmatprep.mubr.msk.bf16.mxu0 %vm1885_vm2, %v1883_v10  ;;  %1628 = vmatprep.mubr.msk.bf16.mxu1 %vm1885_vm2, %v1883_v10  ;;  %v2043_v15 = vld [vmem:[%s2025_s11] sm:$0xff]   ;;  %v2069_v25 = vld [vmem:[%s2027_s30] sm:$0xff]   ;;  %v2075_v27 = vld [vmem:[%s2025_s11 + $0x8] ss:$0 sps:$4 sm:$0x33]  }
  0x46   : > { %v449_v17 = vand.u32 %v2036_v14, %v434_v9  ;;  %v866_v18 = vand.u32 %v856_v13, %v2036_v14  ;;  %v1496_v19 = vld [vmem:[%s2023_s27 + $0x2] sm:$0x3]  ;;  %v1499_v23 = vld [vmem:[%s2023_s27 + $0x4] sm:$0x3]  ;;  %v558_v30 = vshll.u32 %v2043_v15, 16  ;;  %v972_v32 = vshll.u32 %v2046_v16, 16 }
  0x47   : > { %v1513_v20 = vld [vmem:[%s2023_s27 + $0x2] sm:$0x3]  ;;  %v505_v21 = vand.u32 %v1496_v19, %v2036_v14  ;;  %v1516_v24 = vld [vmem:[%s2023_s27 + $0x4] sm:$0x3]  ;;  %v571_v28 = vand.u32 %v1499_v23, %v2036_v14  ;;  %v556_v33 = vshrl.u32 %v2043_v15, 16  ;;  %v970_v34 = vshrl.u32 %v2046_v16, 16 }
  0x48   : > { %1585 = vmatpush3.bf16.msra.mxu0 %v449_v17  ;;  %1627 = vmatpush3.bf16.msra.mxu1 %v866_v18  ;;  %v921_v22 = vand.u32 %v1513_v20, %v2036_v14  ;;  %v2072_v26 = vld [vmem:[%s2027_s30 + $0xc] sm:$0xff]   ;;  %v985_v29 = vand.u32 %v1516_v24, %v2036_v14  ;;  %v2081_v31 = vld [vmem:[%s2025_s11 + $0x14] ss:$0 sps:$4 sm:$0x33]   ;;  %v560_v35 = vrot.slane %v558_v30, 1  ;;  %v563_v36 = vshll.u32 %v2075_v27, 16 }
  0x49   : > { %1590 = vmatprep.subr.bf16.mxu0 %v1883_v10  ;;  %1632 = vmatprep.subr.bf16.mxu1 %v1883_v10  ;;  %v974_v37 = vrot.slane %v972_v32, 1  ;;  %v977_v38 = vshll.u32 %v2081_v31, 16  ;;  %v1502_v43 = vld [vmem:[%s2023_s27 + $0x6] sm:$0x3]  ;;  %vm555_vm4 = vsmask.f32 7424 }
  0x4a   : > { %v561_v39 = vor.u32 %v560_v35, %v556_v33  ;;  %v565_v40 = vrot.slane %v563_v36, 1  ;;  %v1519_v44 = vld [vmem:[%s2023_s27 + $0x6] sm:$0x3]  ;;  %v636_v45 = vand.u32 %v1502_v43, %v2036_v14  ;;  %v2115_v47 = vld [vmem:[%s2027_s30 + $0x8] ss:$0 sps:$4 sm:$0x33]  }
  0x4b   : > { %1587 = vmatmul.mubr.msk.bf16.vlgmr.msra.gmra.mrb[0].mxu0 %vm440_vm3, %v2043_v15  ;;  %1629 = vmatmul.mubr.msk.bf16.vlgmr.msra.gmra.mrb[0].mxu1 %vm440_vm3, %v2046_v16  ;;  %v975_v41 = vor.u32 %v974_v37, %v970_v34  ;;  %v979_v42 = vrot.slane %v977_v38, 1  ;;  %v1049_v46 = vand.u32 %v1519_v44, %v2036_v14  ;;  %v623_v50 = vshll.u32 %v2069_v25, 16  ;;  %v2121_v51 = vld [vmem:[%s2027_s30 + $0x14] ss:$0 sps:$4 sm:$0x33]   ;;  %p1528_p2 = scmp.ne.s32.totalorder %s1864_s22, 6 }
  0x4c   : > { %1591 = vmatpush3.bf16.msra.mxu0 %v505_v21  ;;  %1633 = vmatpush3.bf16.msra.mxu1 %v921_v22  ;;  %v566_v48 = vsel %vm555_vm4, %v561_v39, %v565_v40  ;;  %v1036_v52 = vshll.u32 %v2072_v26, 16  ;;  %v621_v53 = vshrl.u32 %v2069_v25, 16  ;;  %v1034_v54 = vshrl.u32 %v2072_v26, 16  ;;  %v1505_v63 = vld [vmem:[%s2023_s27 + $0x8] sm:$0x3] }
  0x4d   : > { %1592 = vmatprep.mubr.msk.bf16.mxu0 %vm1885_vm2, %v1883_v10  ;;  %1634 = vmatprep.mubr.msk.bf16.mxu1 %vm1885_vm2, %v1883_v10  ;;  %v980_v49 = vsel %vm555_vm4, %v975_v41, %v979_v42  ;;  %v625_v55 = vrot.slane %v623_v50, 1  ;;  %v628_v56 = vshll.u32 %v2115_v47, 16  ;;  %v1041_v58 = vshll.u32 %v2121_v51, 16  ;;  %v1522_v0 = vld [vmem:[%s2023_s27 + $0x8] sm:$0x3] }
  0x4e   : > { %1596 = vmatprep.subr.bf16.mxu0 %v1883_v10  ;;  %1638 = vmatprep.subr.bf16.mxu1 %v1883_v10  ;;  %v1038_v57 = vrot.slane %v1036_v52, 1  ;;  %v691_v3 = vand.u32 %v1505_v63, %v2036_v14  ;;  %v1102_v4 = vand.u32 %v1522_v0, %v2036_v14  ;;  %v684_v5 = vrot.slane %v2043_v15, 1  ;;  %v1507_v9 = vld [vmem:[%s2023_s27 + $0xa] sm:$0x3]  ;;  %v1509_v19 = vld [vmem:[%s2023_s27 + $0xc] sm:$0x3] }
  0x4f   : > { %v626_v59 = vor.u32 %v625_v55, %v621_v53  ;;  %v630_v60 = vrot.slane %v628_v56, 1  ;;  %v1043_v62 = vrot.slane %v1041_v58, 1  ;;  %v685_v6 = vrot.slane %v2075_v27, 1  ;;  %v1524_v11 = vld [vmem:[%s2023_s27 + $0xa] sm:$0x3] }
  0x50   : > { %v1039_v61 = vor.u32 %v1038_v57, %v1034_v54  ;;  %v1095_v7 = vrot.slane %v2046_v16, 1  ;;  %v1096_v8 = vrot.slane %v2081_v31, 1  ;;  %vm683_vm5 = vcmask 1046528   ;;  %v1526_v24 = vld [vmem:[%s2023_s27 + $0xc] sm:$0x3]  ;;  %v432_v16 = vld [vmem:[#allocation2] sm:$0xff] }
  0x51   : > { %v631_v1 = vsel %vm555_vm4, %v626_v59, %v630_v60  ;;  %v686_v12 = vsel %vm683_vm5, %v684_v5, %v685_v6  ;;  %v745_v17 = vand.u32 %v1507_v9, %v2036_v14  ;;  %v1155_v18 = vand.u32 %v1524_v11, %v2036_v14  ;;  %v1529_v59 = vld [vmem:[%s2247_s3] ss:$0 sm:$0xff] (!%p1528_p2) }
  0x52   : > { %v1044_v2 = vsel %vm555_vm4, %v1039_v61, %v1043_v62  ;;  %v1097_v13 = vsel %vm683_vm5, %v1095_v7, %v1096_v8  ;;  %v738_v20 = vrot.slane %v2069_v25, 1  ;;  %v739_v21 = vrot.slane %v2115_v47, 1  ;;  %v855_v47 = vld [vmem:[#allocation2 + $0x18] sm:$0xff]  ;;  %v1530_v62 = vld [vmem:[%s2248_s4] ss:$0 sm:$0xff] (!%p1528_p2) }
  0x53   : > { %v1148_v22 = vrot.slane %v2072_v26, 1  ;;  %v1149_v23 = vrot.slane %v2121_v51, 1  ;;  %v796_v39 = vshrl.u32 %v2075_v27, 16  ;;  %v1204_v40 = vshrl.u32 %v2081_v31, 16  ;;  %v854_v31 = vld [vmem:[#allocation2 + $0x10] sm:$0xff] }
  0x54   : > { %v740_v35 = vsel %vm683_vm5, %v738_v20, %v739_v21  ;;  %v1201_v41 = vrot.slane %v970_v34, 1  ;;  %v1202_v43 = vrot.slane %v972_v32, 2  ;;  %vm792_vm6 = vsmask.f32 6400 }
  0x55   : > { %v1150_v37 = vsel %vm683_vm5, %v1148_v22, %v1149_v23  ;;  %v798_v42 = vrot.slane %v796_v39, 1  ;;  %v1206_v44 = vrot.slane %v1204_v40, 1 }
  0x57   : > { %1593 = vmatmul.mubr.msk.bf16.vlgmr.msra.gmra.mrb[0].mxu0 %vm440_vm3, %v2069_v25  ;;  %1635 = vmatmul.mubr.msk.bf16.vlgmr.msra.gmra.mrb[0].mxu1 %vm440_vm3, %v2072_v26  ;;  %v793_v25 = vrot.slane %v556_v33, 1  ;;  %v794_v26 = vrot.slane %v558_v30, 2  ;;  %v1203_v30 = vor.u32 %v1202_v43, %v1201_v41 }
  0x58   : > { %1597 = vmatpush3.bf16.msra.mxu0 %v571_v28  ;;  %1639 = vmatpush3.bf16.msra.mxu1 %v985_v29  ;;  %v806_v28 = vand.u32 %v1509_v19, %v2036_v14  ;;  %v1214_v29 = vand.u32 %v1526_v24, %v2036_v14  ;;  %v799_v14 = vrot.slane %v563_v36, 2 }
  0x59   : > { %1598 = vmatprep.mubr.msk.bf16.mxu0 %vm1885_vm2, %v1883_v10  ;;  %1640 = vmatprep.mubr.msk.bf16.mxu1 %vm1885_vm2, %v1883_v10  ;;  %v795_v15 = vor.u32 %v794_v26, %v793_v25 }
  0x5a   : > { %1602 = vmatprep.subr.bf16.mxu0 %v1883_v10  ;;  %1644 = vmatprep.subr.bf16.mxu1 %v1883_v10  ;;  %v800_v27 = vor.u32 %v799_v14, %v798_v42 }
  0x5c   : > { %v801_v34 = vsel %vm792_vm6, %v795_v15, %v800_v27 }
  0x63   : > { %1599 = vmatmul.mubr.msk.bf16.vlgmr.msra.gmra.mrb[0].mxu0 %vm440_vm3, %v566_v48  ;;  %1641 = vmatmul.mubr.msk.bf16.vlgmr.msra.gmra.mrb[0].mxu1 %vm440_vm3, %v980_v49 }
  0x64   : > { %1603 = vmatpush3.bf16.msra.mxu0 %v636_v45  ;;  %1645 = vmatpush3.bf16.msra.mxu1 %v1049_v46  ;;  %v1207_v45 = vrot.slane %v977_v38, 2  ;;  %v433_v46 = vld [vmem:[#allocation2 + $0x8] sm:$0xff] }
  0x65   : > { %1604 = vmatprep.mubr.msk.bf16.mxu0 %vm1885_vm2, %v1883_v10  ;;  %1646 = vmatprep.mubr.msk.bf16.mxu1 %vm1885_vm2, %v1883_v10 }
  0x66   : > { %1608 = vmatprep.subr.bf16.mxu0 %v1883_v10  ;;  %1650 = vmatprep.subr.bf16.mxu1 %v1883_v10  ;;  %v1208_v33 = vor.u32 %v1207_v45, %v1206_v44 }
  0x68   : > { %v1209_v36 = vsel %vm792_vm6, %v1203_v30, %v1208_v33 }
  0x6f   : > { %1605 = vmatmul.mubr.msk.bf16.vlgmr.msra.gmra.mrb[0].mxu0 %vm440_vm3, %v631_v1  ;;  %1647 = vmatmul.mubr.msk.bf16.vlgmr.msra.gmra.mrb[0].mxu1 %vm440_vm3, %v1044_v2 }
  0x70   : > { %1609 = vmatpush3.bf16.msra.mxu0 %v691_v3  ;;  %1651 = vmatpush3.bf16.msra.mxu1 %v1102_v4 }
  0x71   : > { %1610 = vmatprep.mubr.msk.bf16.mxu0 %vm1885_vm2, %v1883_v10  ;;  %1652 = vmatprep.mubr.msk.bf16.mxu1 %vm1885_vm2, %v1883_v10 }
  0x72   : > { %1614 = vmatprep.subr.bf16.mxu0 %v1883_v10  ;;  %1656 = vmatprep.subr.bf16.mxu1 %v1883_v10 }
  0x7b   : > { %1611 = vmatmul.mubr.msk.bf16.vlgmr.msra.gmra.mrb[0].mxu0 %vm440_vm3, %v686_v12  ;;  %1653 = vmatmul.mubr.msk.bf16.vlgmr.msra.gmra.mrb[0].mxu1 %vm440_vm3, %v1097_v13 }
  0x7c   : > { %1615 = vmatpush3.bf16.msra.mxu0 %v745_v17  ;;  %1657 = vmatpush3.bf16.msra.mxu1 %v1155_v18 }
  0x7d   : > { %1616 = vmatprep.mubr.msk.bf16.mxu0 %vm1885_vm2, %v1883_v10  ;;  %1658 = vmatprep.mubr.msk.bf16.mxu1 %vm1885_vm2, %v1883_v10 }
  0x7e   : > { %1620 = vmatprep.subr.bf16.mxu0 %v1883_v10  ;;  %1662 = vmatprep.subr.bf16.mxu1 %v1883_v10 }
  0x87   : > { %1617 = vmatmul.mubr.msk.bf16.vlgmr.msra.gmra.mrb[0].mxu0 %vm440_vm3, %v740_v35  ;;  %1659 = vmatmul.mubr.msk.bf16.vlgmr.msra.gmra.mrb[0].mxu1 %vm440_vm3, %v1150_v37 }
  0x88   : > { %1621 = vmatpush3.bf16.msra.mxu0 %v806_v28  ;;  %1663 = vmatpush3.bf16.msra.mxu1 %v1214_v29 }
  0x89   : > { %1622 = vmatprep.mubr.msk.bf16.mxu0 %vm1885_vm2, %v1883_v10  ;;  %1664 = vmatprep.mubr.msk.bf16.mxu1 %vm1885_vm2, %v1883_v10 }
  0x93   : > { %1623 = vmatmul.mubr.msk.bf16.vlgmr.msra.gmra.mrb[0].mxu0 %vm440_vm3, %v801_v34  ;;  %1665 = vmatmul.mubr.msk.bf16.vlgmr.msra.gmra.mrb[0].mxu1 %vm440_vm3, %v1209_v36 }
 0x165   : > { %1264 = sbr.rel (%p1528_p2) target bundleno = 380 (0x17c), region = 130 }
 0x166   : > { %v842_v32 = vpop.f32.mrb[0].mxu0  ;;  %v1250_v38 = vpop.f32.mrb[0].mxu1 }
 0x167   : > { %v1668_v48 = vadd.f32 %v842_v32, %v432_v16  ;;  %v1670_v49 = vadd.f32 %v1250_v38, %v854_v31  ;;  %v1624_v10 = vpop.f32.mrb[1].mxu0  ;;  %v1666_v50 = vpop.f32.mrb[1].mxu1 }
 0x168   : > { %v845_v51 = vpop.f32.mrb[2].mxu0  ;;  %v1253_v52 = vpop.f32.mrb[2].mxu1 }
 0x169   : > { %851 = vst [vmem:[#allocation2] sm:$0xff] %v1668_v48  ;;  %1259 = vst [vmem:[#allocation2 + $0x10] sm:$0xff] %v1670_v49  ;;  %v1669_v53 = vadd.f32 %v845_v51, %v433_v46  ;;  %v1671_v54 = vadd.f32 %v1253_v52, %v855_v47  ;;  %v1625_v55 = vpop.f32.mrb[3].mxu0  ;;  %v1667_v56 = vpop.f32.mrb[3].mxu1 }
 0x16b   : > { %852 = vst [vmem:[#allocation2 + $0x8] sm:$0xff] %v1669_v53  ;;  %1260 = vst [vmem:[#allocation2 + $0x18] sm:$0xff] %v1671_v54 }
 0x170   : > { %v1265_v57 = vld [vmem:[#allocation2] sm:$0xff]  ;;  %v1267_v63 = vld [vmem:[#allocation2 + $0x10] sm:$0xff] }
 0x171   : > { %v1276_v60 = vmul.f32 %v1529_v59, %v1265_v57  ;;  %v1278_v1 = vmul.f32 %v1529_v59, %v1267_v63 }
 0x172   : > { %v1266_v58 = vld [vmem:[#allocation2 + $0x8] sm:$0xff]  ;;  %v1268_v0 = vld [vmem:[#allocation2 + $0x18] sm:$0xff] }
 0x173   : > { %v1277_v61 = vmul.f32 %v1529_v59, %v1266_v58  ;;  %v1279_v2 = vmul.f32 %v1529_v59, %v1268_v0  ;;  %v1287_v3 = vadd.f32 %v1530_v62, %v1276_v60  ;;  %v1289_v5 = vadd.f32 %v1530_v62, %v1278_v1 }
 0x175   : > { %v1288_v4 = vadd.f32 %v1530_v62, %v1277_v61  ;;  %v1290_v6 = vadd.f32 %v1530_v62, %v1279_v2  ;;  %v1291_v7 = vmax.f32 %v1287_v3, 0.0  ;;  %v1293_v9 = vmax.f32 %v1289_v5, 0.0 }
 0x177   : > { %v1292_v8 = vmax.f32 %v1288_v4, 0.0  ;;  %v1294_v11 = vmax.f32 %v1290_v6, 0.0 }
 0x179   : > { %v1548_v12 = vpack.c.bf16 %v1292_v8, %v1291_v7  ;;  %v1553_v13 = vpack.c.bf16 %v1294_v11, %v1293_v9 }
 0x17b   : > { %1549 = vst [vmem:[%s2029_s0] sm:$0xff] %v1548_v12   ;;  %1555 = vst [vmem:[%s2029_s0 + $0x8] sm:$0xff] %v1553_v13  }
 0x17c PF: > { %1321 = sbr.rel (!%p1989_p8) target bundleno = 388 (0x184), region = 134  ;;  %s1544_s22 = sshll.u32 (%p1989_p8), %s1868_s23, 3 }
 0x17d   : > { %s1324_s8 = scalar_lea.vmem (%p1989_p8), %s2249_s5, %s1544_s22 }
 0x182   : > { %v1340_v17 = vld [vmem:[%s2029_s0] sm:$0xff] (%p1989_p8)   ;;  %v1344_v18 = vld [vmem:[%s2029_s0 + $0x8] sm:$0xff] (%p1989_p8)  }
 0x183   : > { %1341 = vst [vmem:[%s1324_s8] sm:$0xff] %v1340_v17   ;;  %1345 = vst [vmem:[%s1324_s8 + $0x80] sm:$0xff] %v1344_v18  }
 0x184 PF: > { %s15_s26 = sadd.s32 1, %s1880_s26   ;;  %s2254_s18 = smov %s1852_s19 }
 0x185   : > { %p12_p3 = scmp.ge.s32.totalorder %s15_s26, 114   ;;  %s2255_s19 = smov %s1994_s15 }
 0x186   : > { %s2256_s20 = smov %s1860_s21  ;;  %s2257_s21 = smov %s1997_s16 }
 0x187   : > { %s2258_s22 = smov %s1872_s24  ;;  %s2259_s23 = smov %s1876_s25 }
 0x188   : > { %s2260_s24 = smov %s2263_s28  ;;  %s2261_s25 = smov %s2267_s29 }
 0x189   :  { %14 = sbr.rel (!%p12_p3) target bundleno = 7 (0x7), region = 224 }

// kernel: shared_module_fr_forward.33
= control target key start
LH: loop header
LB: loop body
LE: loop exit
PB: predicated region body
PF: predicated region fallthrough
CT: control target
= control target key end

     0   :  { %s686_s9 = smov 0   ;;  %s688_s10 = smov 0   ;;  %s832_s0 = inlined_call_operand.vmem [shape: bf16[2,18,9,128], index: 0, kind: input, shape index: {}]   ;;  %s833_s1 = inlined_call_operand.vmem [shape: bf16[2,18,9,128], index: 1, kind: input, shape index: {}]   ;;  %s834_s2 = inlined_call_operand.vmem [shape: bf16[2,8,8,128], index: 2, kind: output, shape index: {}]  }
   0x1   :  { %s690_s11 = smov 0   ;;  %s692_s12 = smov 0  }
   0x2   :  { %s694_s13 = smov 0   ;;  %s696_s14 = smov 0  }
   0x3   :  { %s698_s15 = smov 0   ;;  %s700_s16 = smov 0  }
   0x4   :  { %s702_s17 = smov 0  }
   0x5 LB: > { %s492_s18 = sadd.s32 4294967295, %s668_s17   ;;  %s21_s19 = sadd.s32 1, %s660_s15  ;;  %s668_s17 = sphi %s702_s17, %s12_s17   ;;  %s664_s16 = sphi %s700_s16, %s844_s16   ;;  %s660_s15 = sphi %s698_s15, %s843_s15   ;;  %s656_s14 = sphi %s696_s14, %s842_s14   ;;  %s652_s13 = sphi %s694_s13, %s841_s13   ;;  %s648_s12 = sphi %s692_s12, %s840_s12   ;;  %s644_s11 = sphi %s690_s11, %s839_s11   ;;  %s640_s10 = sphi %s688_s10, %s838_s10   ;;  %s636_s9 = sphi %s686_s9, %s837_s9  }
   0x6   : > { %p22_p0 = scmp.ge.s32.totalorder %s21_s19, 3  ;;  %s24_s20 = sadd.s32 1, %s664_s16 }
   0x7   : > { %s494_s21 = sshll.u32 %s664_s16, 1  ;;  %s35_s22 = sadd.s32 1, %s648_s12 }
   0x8   : > { %s846_s19 = smov (%p22_p0, %s21_s19), 0  ;;  %s848_s20 = smov (!%p22_p0, %s24_s20), %s664_s16 }
   0x9   : > { %s740_s23 = sadd.s32 %s660_s15, %s494_s21  ;;  %p42_p1 = scmp.ne.s32.totalorder %s648_s12, %s644_s11 }
   0xa   : > { %p26_p2 = scmp.ge.s32.totalorder %s848_s20, 8  ;;  %p43_p3 = scmp.eq.s32.totalorder %s668_s17, 0 }
   0xb   : > { %s91_s24 = sadd.s32 1, %s640_s10  ;;  %p101_p4 = scmp.ne.s32.totalorder %s640_s10, %s636_s9 }
   0xc   : > { %s850_s20 = smov (%p26_p2, %s848_s20), 0  ;;  %p750_p5 = por %p43_p3, %p42_p1 }
   0xd   : > { %p102_p6 = scmp.eq.s32.totalorder %s492_s18, 23  ;;  %s495_s26 = sshll.u32 %s850_s20, 1 }
   0xe   : > { %s88_s27 = ssub.s32 %s664_s16, %s850_s20  ;;  %s31_s28 = sadd.s32 %s495_s26, %s846_s19 }
   0xf   : > { %p89_p7 = scmp.eq.s32.totalorder %s88_s27, 0  ;;  %s32_s29 = ssub.s32 %s740_s23, %s31_s28 }
  0x10   : > { %p759_p8 = por %p102_p6, %p101_p4  ;;  %p33_p9 = scmp.eq.s32.totalorder %s32_s29, 0 }
  0x11   : > { %s764_s3 = scalar_select %p89_p7, %s640_s10, %s91_s24  }
  0x12   : > { %s767_s4 = scalar_select %p33_p9, %s648_s12, %s35_s22  }
  0x13   : > { %p499_p10 = scmp.ge.s32.totalorder %s668_s17, 24 }
  0x15   : > { %124 = sbr.rel (%p499_p10) target bundleno = 42 (0x2a), region = 16 }
  0x1c   : > { %127 = sbr.rel (!%p750_p5) target bundleno = 35 (0x23), region = 20  ;;  %s129_s5 = sand.u32 (%p750_p5), 1, %s648_s12  }
  0x1d   : > { %s517_s6 = sshll.u32 (%p750_p5), %s740_s23, 3  ;;  %s500_s7 = sshll.u32 (%p750_p5), %s129_s5, 4 }
  0x1e   : > { %s136_s21 = scalar_lea.vmem (%p750_p5), %s832_s0, %s517_s6  ;;  %s131_s24 = scalar_lea.vmem (%p750_p5), [#allocation2], %s500_s7 }
  0x1f   : > { %v152_v0 = vld [vmem:[%s136_s21] sm:$0xff] (%p750_p5)   ;;  %v156_v1 = vld [vmem:[%s136_s21 + $0x90] sm:$0xff] (%p750_p5)  }
  0x20   : > { %153 = vst [vmem:[%s131_s24] sm:$0xff] (%p750_p5), %v152_v0   ;;  %157 = vst [vmem:[%s131_s24 + $0x8] sm:$0xff] (%p750_p5), %v156_v1  }
  0x23 PF: > { %190 = sbr.rel (!%p750_p5) target bundleno = 42 (0x2a), region = 61  ;;  %s192_s22 = sand.u32 (%p750_p5), 1, %s648_s12  }
  0x24   : > { %s518_s26 = sshll.u32 (%p750_p5), %s740_s23, 3  ;;  %s504_s27 = sshll.u32 (%p750_p5), %s192_s22, 4 }
  0x25   : > { %s199_s5 = scalar_lea.vmem (%p750_p5), %s833_s1, %s518_s26  ;;  %s194_s6 = scalar_lea.vmem (%p750_p5), [#allocation3], %s504_s27 }
  0x26   : > { %v215_v2 = vld [vmem:[%s199_s5] sm:$0xff] (%p750_p5)   ;;  %v219_v3 = vld [vmem:[%s199_s5 + $0x90] sm:$0xff] (%p750_p5)  }
  0x27   : > { %216 = vst [vmem:[%s194_s6] sm:$0xff] (%p750_p5), %v215_v2   ;;  %220 = vst [vmem:[%s194_s6 + $0x8] sm:$0xff] (%p750_p5), %v219_v3  }
  0x2a PF: > { %p508_p11 = scmp.ge.s32.totalorder %s668_s17, 1  ;;  %p252_p12 = scmp.lt.s32.totalorder %s668_s17, 25 }
  0x2c   : > { %p253_p13 = pnand %p508_p11, %p252_p12 }
  0x2d   : > { %s259_s23 = sand.u32 (!%p253_p13), 1, %s644_s11   ;;  %s287_s25 = sand.u32 (!%p253_p13), 1, %s636_s9  }
  0x2e   : > { %256 = sbr.rel (%p253_p13) target bundleno = 85 (0x55), region = 102  ;;  %s509_s7 = sshll.u32 (!%p253_p13), %s259_s23, 4 }
  0x2f   : > { %s511_s8 = sshll.u32 (!%p253_p13), %s287_s25, 3  ;;  %s261_s18 = scalar_lea.vmem (!%p253_p13), [#allocation2], %s509_s7 }
  0x30   : > { %s268_s21 = scalar_lea.vmem (!%p253_p13), [#allocation3], %s509_s7  ;;  %s788_s24 = scalar_lea.vmem (!%p253_p13), [#allocation4], %s511_s8 }
  0x31   : > { %p512_p0 = scmp.ne.s32.totalorder (!%p253_p13), %s652_s13, 0 }
  0x35   : > { %298 = sbr.rel (%p512_p0) target bundleno = 60 (0x3c), region = 114  ;;  %v670_v4 = vmov (!%p512_p0), 4286644096  }
  0x36   : > { %299 = vst [vmem:[%s788_s24] sm:$0xf] (!%p512_p0), %v670_v4  ;;  %300 = vst [vmem:[%s788_s24 + $0x4] sm:$0xf] (!%p512_p0), %v670_v4 }
  0x3c PF: > { %v301_v5 = vld [vmem:[%s261_s18] sm:$0xf]  ;;  %v302_v6 = vld [vmem:[%s261_s18 + $0x4] sm:$0x1]  ;;  %v303_v7 = vld [vmem:[%s261_s18 + $0x8] sm:$0xf] }
  0x3d   : > { %v304_v8 = vld [vmem:[%s261_s18 + $0xc] sm:$0x1]  ;;  %v307_v9 = vld [vmem:[%s788_s24] sm:$0xf]  ;;  %v308_v10 = vld [vmem:[%s788_s24 + $0x4] sm:$0xf] }
  0x3e   : > { %vm313_vm0 = vsmask.f32 3328  ;;  %v317_v11 = vshrl.u32 %v301_v5, 16  ;;  %v320_v12 = vshll.u32 %v301_v5, 16  ;;  %v326_v13 = vshll.u32 %v302_v6, 16  ;;  %s514_s9 = sshll.u32 (%p759_p8), %s656_s14, 2 }
  0x3f   : > { %v331_v14 = vshrl.u32 %v303_v7, 16  ;;  %v334_v15 = vshll.u32 %v303_v7, 16  ;;  %v305_v16 = vld [vmem:[%s268_s21] sm:$0xf]  ;;  %v306_v17 = vld [vmem:[%s268_s21 + $0x8] sm:$0xf]  ;;  %v309_v18 = vmax.bf16 %v307_v9, %v301_v5  ;;  %v310_v19 = vmax.bf16 %v308_v10, %v303_v7  ;;  %s358_s22 = scalar_lea.vmem (%p759_p8), %s834_s2, %s514_s9 }
  0x40   : > { %v319_v20 = vrot.slane %v317_v11, 4  ;;  %v340_v21 = vshll.u32 %v304_v8, 16  ;;  %vm314_vm1 = vsmask.f32 7440  ;;  %v322_v22 = vrot.slane %v320_v12, 5 }
  0x41   : > { %v333_v23 = vrot.slane %v331_v14, 4  ;;  %v336_v24 = vrot.slane %v334_v15, 5  ;;  %v328_v26 = vrot.slane %v326_v13, 5  ;;  %v311_v29 = vmax.bf16 %v309_v18, %v305_v16  ;;  %vm315_vm2 = vmor %vm313_vm0, %vm314_vm1 }
  0x42   : > { %v323_v25 = vor.u32 %v322_v22, %v319_v20  ;;  %v342_v28 = vrot.slane %v340_v21, 5  ;;  %v312_v30 = vmax.bf16 %v310_v19, %v306_v17 }
  0x43   : > { %v337_v27 = vor.u32 %v336_v24, %v333_v23 }
  0x44   : > { %v324_v31 = vrot.slane %v323_v25, 4 }
  0x45   : > { %v338_v32 = vrot.slane %v337_v27, 4 }
  0x46   : > { %v329_v33 = vsel %vm315_vm2, %v324_v31, %v328_v26  ;;  %356 = sbr.rel (!%p759_p8) target bundleno = 85 (0x55), region = 118 }
  0x47   : > { %v343_v34 = vsel %vm315_vm2, %v338_v32, %v342_v28  ;;  %v346_v35 = vmax.bf16 %v329_v33, %v311_v29 }
  0x48   : > { %v347_v36 = vmax.bf16 %v343_v34, %v312_v30 }
  0x4a   : > { %v524_v37 = vcombine.low %v346_v35, %v347_v36 }
  0x4c   : > { %523 = vst [vmem:[%s788_s24] sm:$0xff] %v524_v37  }
  0x53   : > { %v374_v38 = vld [vmem:[%s788_s24] sm:$0xf]  ;;  %v376_v39 = vld [vmem:[%s788_s24 + $0x4] sm:$0xf] }
  0x54   : > { %375 = vst [vmem:[%s358_s22] sm:$0xf] %v374_v38  ;;  %377 = vst [vmem:[%s358_s22 + $0x20] sm:$0xf] %v376_v39 }
  0x55 PF: > { %s12_s17 = sadd.s32 1, %s668_s17   ;;  %s837_s9 = smov %s640_s10 }
  0x56   : > { %p9_p1 = scmp.ge.s32.totalorder %s12_s17, 26   ;;  %s838_s10 = smov %s764_s3 }
  0x57   : > { %s839_s11 = smov %s648_s12  ;;  %s840_s12 = smov %s767_s4 }
  0x58   : > { %s841_s13 = smov %s660_s15  ;;  %s842_s14 = smov %s664_s16 }
  0x59   : > { %s843_s15 = smov %s846_s19  ;;  %s844_s16 = smov %s850_s20 }
  0x5a   :  { %11 = sbr.rel (!%p9_p1) target bundleno = 5 (0x5), region = 198 }

// kernel: shared_module_fr_forward.34
= control target key start
LH: loop header
LB: loop body
LE: loop exit
PB: predicated region body
PF: predicated region fallthrough
CT: control target
= control target key end

     0   :  { %s687_s1 = inlined_call_operand.vmem [shape: bf16[128,128], index: 1, kind: input, shape index: {}]   ;;  %s688_s0 = inlined_call_operand.vmem [shape: bf16[128,128], index: 0, kind: input, shape index: {}]   ;;  %s689_s2 = inlined_call_operand.vmem [shape: f32[1,128], index: 2, kind: input, shape index: {}]   ;;  %s690_s3 = inlined_call_operand.vmem [shape: f32[1,128], index: 3, kind: input, shape index: {}]   ;;  %s691_s4 = inlined_call_operand.vmem [shape: bf16[128,128], index: 4, kind: output, shape index: {}]  }
   0x1   :  { %v550_v0 = vld [vmem:[%s687_s1] sm:$0xff]   ;;  %v551_v1 = vld [vmem:[%s687_s1 + $0x8] sm:$0xff]   ;;  %v552_v2 = vld [vmem:[%s687_s1 + $0x10] sm:$0xff]  }
   0x2   :  { %502 = vmatprep.subr.bf16.mxu0 %v550_v0  ;;  %534 = vmatprep.subr.bf16.mxu1 %v550_v0  ;;  %v553_v3 = vld [vmem:[%s687_s1 + $0x18] sm:$0xff]   ;;  %v558_v4 = vld [vmem:[%s688_s0] sm:$0xff]   ;;  %v555_v7 = vld [vmem:[%s687_s1 + $0x28] sm:$0xff]  }
   0x3   :  { %503 = vmatpush3.bf16.msra.mxu0 %v550_v0  ;;  %542 = vmatpush3.bf16.msra.mxu1 %v550_v0  ;;  %v559_v5 = vld [vmem:[%s688_s0 + $0x20] sm:$0xff]   ;;  %v556_v8 = vld [vmem:[%s687_s1 + $0x30] sm:$0xff]   ;;  %v557_v9 = vld [vmem:[%s687_s1 + $0x38] sm:$0xff]  }
   0x4   :  { %504 = vmatprep.subr.bf16.mxu0 %v551_v1  ;;  %535 = vmatprep.subr.bf16.mxu1 %v551_v1  ;;  %v554_v6 = vld [vmem:[%s687_s1 + $0x20] sm:$0xff]   ;;  %v560_v10 = vld [vmem:[%s688_s0 + $0x8] sm:$0xff]   ;;  %v562_v12 = vld [vmem:[%s688_s0 + $0x10] sm:$0xff]  }
   0x5   :  { %518 = vmatprep.mubr.bf16.mxu0 %v558_v4  ;;  %526 = vmatprep.mubr.bf16.mxu1 %v559_v5  ;;  %v561_v11 = vld [vmem:[%s688_s0 + $0x28] sm:$0xff]   ;;  %v563_v13 = vld [vmem:[%s688_s0 + $0x30] sm:$0xff]   ;;  %v564_v14 = vld [vmem:[%s688_s0 + $0x18] sm:$0xff]  }
   0x6   :  { %v565_v15 = vld [vmem:[%s688_s0 + $0x38] sm:$0xff]   ;;  %v405_v16 = vld [vmem:[%s689_s2] ss:$0 sm:$0xff] }
   0x7   :  { %505 = vmatpush3.bf16.msra.mxu0 %v551_v1  ;;  %543 = vmatpush3.bf16.msra.mxu1 %v551_v1  ;;  %v645_v18 = vld [vmem:[%s690_s3] ss:$0 sm:$0xff] }
   0x8   :  { %506 = vmatprep.subr.bf16.mxu0 %v552_v2  ;;  %536 = vmatprep.subr.bf16.mxu1 %v552_v2 }
   0xb   :  { %507 = vmatpush3.bf16.msra.mxu0 %v552_v2  ;;  %544 = vmatpush3.bf16.msra.mxu1 %v552_v2 }
   0xc   :  { %508 = vmatprep.subr.bf16.mxu0 %v553_v3  ;;  %537 = vmatprep.subr.bf16.mxu1 %v553_v3 }
   0xf   :  { %509 = vmatpush3.bf16.msra.mxu0 %v553_v3  ;;  %545 = vmatpush3.bf16.msra.mxu1 %v553_v3 }
  0x10   :  { %510 = vmatprep.subr.bf16.mxu0 %v554_v6  ;;  %538 = vmatprep.subr.bf16.mxu1 %v554_v6 }
  0x13   :  { %511 = vmatpush3.bf16.msra.mxu0 %v554_v6  ;;  %546 = vmatpush3.bf16.msra.mxu1 %v554_v6 }
  0x14   :  { %512 = vmatprep.subr.bf16.mxu0 %v555_v7  ;;  %539 = vmatprep.subr.bf16.mxu1 %v555_v7 }
  0x17   :  { %513 = vmatpush3.bf16.msra.mxu0 %v555_v7  ;;  %547 = vmatpush3.bf16.msra.mxu1 %v555_v7 }
  0x18   :  { %514 = vmatprep.subr.bf16.mxu0 %v556_v8  ;;  %540 = vmatprep.subr.bf16.mxu1 %v556_v8 }
  0x1b   :  { %515 = vmatpush3.bf16.msra.mxu0 %v556_v8  ;;  %548 = vmatpush3.bf16.msra.mxu1 %v556_v8 }
  0x1c   :  { %516 = vmatprep.subr.bf16.mxu0 %v557_v9  ;;  %541 = vmatprep.subr.bf16.mxu1 %v557_v9 }
  0x1f   :  { %517 = vmatpush3.bf16.msra.mxu0 %v557_v9  ;;  %549 = vmatpush3.bf16.msra.mxu1 %v557_v9 }
  0x22   :  { %519 = vmatmul.mubr.bf16.vlgmr.msra.gmra.mrb[0].mxu0 %v560_v10  ;;  %527 = vmatmul.mubr.bf16.vlgmr.msra.gmra.mrb[0].mxu1 %v561_v11 }
  0x23   :  { %522 = vmatprep.mubr.bf16.mxu0 %v562_v12  ;;  %530 = vmatprep.mubr.bf16.mxu1 %v563_v13 }
  0x2a   :  { %523 = vmatmul.mubr.bf16.gmra.mrb[4].mxu0 %v564_v14  ;;  %531 = vmatmul.mubr.bf16.gmra.mrb[4].mxu1 %v565_v15 }
  0xf5   :  { %v520_v17 = vpop.f32.mrb[0].mxu0  ;;  %v528_v19 = vpop.f32.mrb[0].mxu1 }
  0xf6   :  { %v252_v20 = vmul.f32 %v520_v17, %v405_v16  ;;  %v260_v21 = vmul.f32 %v528_v19, %v405_v16  ;;  %v180_v22 = vpop.f32.mrb[1].mxu0  ;;  %v212_v23 = vpop.f32.mrb[1].mxu1 }
  0xf7   :  { %v250_v24 = vmul.f32 %v405_v16, %v180_v22  ;;  %v258_v25 = vmul.f32 %v405_v16, %v212_v23  ;;  %v521_v26 = vpop.f32.mrb[2].mxu0  ;;  %v529_v27 = vpop.f32.mrb[2].mxu1 }
  0xf8   :  { %v275_v28 = vadd.f32 %v645_v18, %v252_v20  ;;  %v283_v29 = vadd.f32 %v645_v18, %v260_v21  ;;  %v253_v30 = vmul.f32 %v521_v26, %v405_v16  ;;  %v261_v31 = vmul.f32 %v529_v27, %v405_v16  ;;  %v183_v32 = vpop.f32.mrb[3].mxu0  ;;  %v215_v33 = vpop.f32.mrb[3].mxu1 }
  0xf9   :  { %v273_v34 = vadd.f32 %v645_v18, %v250_v24  ;;  %v281_v35 = vadd.f32 %v645_v18, %v258_v25  ;;  %v251_v36 = vmul.f32 %v405_v16, %v183_v32  ;;  %v259_v37 = vmul.f32 %v405_v16, %v215_v33 }
  0xfa   :  { %v276_v38 = vadd.f32 %v645_v18, %v253_v30  ;;  %v284_v39 = vadd.f32 %v645_v18, %v261_v31  ;;  %v291_v42 = vmax.f32 %v275_v28, 0.0  ;;  %v299_v43 = vmax.f32 %v283_v29, 0.0 }
  0xfb   :  { %v274_v40 = vadd.f32 %v645_v18, %v251_v36  ;;  %v282_v41 = vadd.f32 %v645_v18, %v259_v37  ;;  %v289_v46 = vmax.f32 %v273_v34, 0.0  ;;  %v297_v47 = vmax.f32 %v281_v35, 0.0 }
  0xfc   :  { %v292_v44 = vmax.f32 %v276_v38, 0.0  ;;  %v300_v45 = vmax.f32 %v284_v39, 0.0 }
  0xfd   :  { %v290_v48 = vmax.f32 %v274_v40, 0.0  ;;  %v298_v49 = vmax.f32 %v282_v41, 0.0  ;;  %v524_v50 = vpop.f32.mrb[4].mxu0  ;;  %v532_v51 = vpop.f32.mrb[4].mxu1 }
  0xfe   :  { %v447_v52 = vpack.c.bf16 %v292_v44, %v291_v42  ;;  %v467_v53 = vpack.c.bf16 %v300_v45, %v299_v43  ;;  %v256_v54 = vmul.f32 %v524_v50, %v405_v16  ;;  %v264_v55 = vmul.f32 %v532_v51, %v405_v16  ;;  %v196_v56 = vpop.f32.mrb[5].mxu0  ;;  %v228_v57 = vpop.f32.mrb[5].mxu1 }
  0xff   :  { %v442_v58 = vpack.c.bf16 %v290_v48, %v289_v46  ;;  %v462_v59 = vpack.c.bf16 %v298_v49, %v297_v47  ;;  %v254_v60 = vmul.f32 %v405_v16, %v196_v56  ;;  %v262_v61 = vmul.f32 %v405_v16, %v228_v57  ;;  %v525_v62 = vpop.f32.mrb[6].mxu0  ;;  %v533_v63 = vpop.f32.mrb[6].mxu1 }
 0x100   :  { %479 = vst [vmem:[%s691_s4 + $0x8] sm:$0xff] %v447_v52   ;;  %483 = vst [vmem:[%s691_s4 + $0x28] sm:$0xff] %v467_v53   ;;  %v279_v0 = vadd.f32 %v645_v18, %v256_v54  ;;  %v287_v1 = vadd.f32 %v645_v18, %v264_v55  ;;  %v257_v2 = vmul.f32 %v525_v62, %v405_v16  ;;  %v199_v4 = vpop.f32.mrb[7].mxu0  ;;  %v231_v5 = vpop.f32.mrb[7].mxu1 }
 0x101   :  { %v265_v3 = vmul.f32 %v533_v63, %v405_v16  ;;  %443 = vst [vmem:[%s691_s4] sm:$0xff] %v442_v58   ;;  %482 = vst [vmem:[%s691_s4 + $0x20] sm:$0xff] %v462_v59   ;;  %v277_v6 = vadd.f32 %v645_v18, %v254_v60  ;;  %v285_v7 = vadd.f32 %v645_v18, %v262_v61 }
 0x102   :  { %v255_v8 = vmul.f32 %v405_v16, %v199_v4  ;;  %v263_v9 = vmul.f32 %v405_v16, %v231_v5  ;;  %v280_v10 = vadd.f32 %v645_v18, %v257_v2  ;;  %v295_v14 = vmax.f32 %v279_v0, 0.0 }
 0x103   :  { %v288_v11 = vadd.f32 %v645_v18, %v265_v3  ;;  %v303_v15 = vmax.f32 %v287_v1, 0.0  ;;  %v293_v20 = vmax.f32 %v277_v6, 0.0  ;;  %v301_v21 = vmax.f32 %v285_v7, 0.0 }
 0x104   :  { %v278_v12 = vadd.f32 %v645_v18, %v255_v8  ;;  %v286_v13 = vadd.f32 %v645_v18, %v263_v9  ;;  %v296_v17 = vmax.f32 %v280_v10, 0.0 }
 0x105   :  { %v304_v19 = vmax.f32 %v288_v11, 0.0 }
 0x106   :  { %v294_v22 = vmax.f32 %v278_v12, 0.0  ;;  %v302_v23 = vmax.f32 %v286_v13, 0.0  ;;  %v457_v24 = vpack.c.bf16 %v296_v17, %v295_v14 }
 0x107   :  { %v477_v25 = vpack.c.bf16 %v304_v19, %v303_v15 }
 0x108   :  { %v452_v26 = vpack.c.bf16 %v294_v22, %v293_v20  ;;  %v472_v16 = vpack.c.bf16 %v302_v23, %v301_v21  ;;  %481 = vst [vmem:[%s691_s4 + $0x18] sm:$0xff] %v457_v24  }
 0x109   :  { %485 = vst [vmem:[%s691_s4 + $0x38] sm:$0xff] %v477_v25  }
 0x10a   :  { %480 = vst [vmem:[%s691_s4 + $0x10] sm:$0xff] %v452_v26   ;;  %484 = vst [vmem:[%s691_s4 + $0x30] sm:$0xff] %v472_v16  }

// kernel: shared_module_fr_forward.35
= control target key start
LH: loop header
LB: loop body
LE: loop exit
PB: predicated region body
PF: predicated region fallthrough
CT: control target
= control target key end

     0   :  { %s1680_s15 = smov 0   ;;  %s1682_s16 = smov 0   ;;  %s1948_s0 = inlined_call_operand.vmem [shape: bf16[2,10,10,128], index: 0, kind: input, shape index: {}]   ;;  %s1949_s1 = inlined_call_operand.vmem [shape: bf16[3,3,128,128], index: 1, kind: input, shape index: {}]   ;;  %s1950_s2 = inlined_call_operand.vmem [shape: f32[1,1,128], index: 2, kind: input, shape index: {}]   ;;  %s1951_s3 = inlined_call_operand.vmem [shape: f32[1,1,128], index: 3, kind: input, shape index: {}]   ;;  %s1952_s4 = inlined_call_operand.vmem [shape: bf16[2,8,8,128], index: 4, kind: output, shape index: {}]  }
   0x1   :  { %s1684_s17 = smov 0   ;;  %s1686_s18 = smov 0  }
   0x2   :  { %s1688_s19 = smov 0   ;;  %s1690_s20 = smov 0  }
   0x3   :  { %s1692_s21 = smov 0   ;;  %s1694_s22 = smov 0  }
   0x4   :  { %s1696_s23 = smov 0  }
   0x5 LB: > { %s23_s24 = sadd.s32 1, %s1642_s21  ;;  %s26_s25 = sadd.s32 1, %s1646_s22  ;;  %s1650_s23 = sphi %s1696_s23, %s14_s23   ;;  %s1646_s22 = sphi %s1694_s22, %s1962_s22   ;;  %s1642_s21 = sphi %s1692_s21, %s1961_s21   ;;  %s1638_s20 = sphi %s1690_s20, %s1960_s20   ;;  %s1634_s19 = sphi %s1688_s19, %s1959_s19   ;;  %s1630_s18 = sphi %s1686_s18, %s1958_s18   ;;  %s1626_s17 = sphi %s1684_s17, %s1957_s17   ;;  %s1622_s16 = sphi %s1682_s16, %s1956_s16   ;;  %s1618_s15 = sphi %s1680_s15, %s1955_s15  }
   0x6   : > { %p24_p0 = scmp.ge.s32.totalorder %s23_s24, 3  ;;  %s1123_s26 = sadd.s32 4294967295, %s1650_s23  }
   0x7   : > { %s30_s27 = sadd.s32 %s1642_s21, %s1646_s22  ;;  %p42_p1 = scmp.ne.s32.totalorder %s1630_s18, %s1626_s17 }
   0x8   : > { %s1964_s24 = smov (%p24_p0, %s23_s24), 0  ;;  %s1966_s25 = smov (!%p24_p0, %s26_s25), %s1646_s22 }
   0x9   : > { %p43_p2 = scmp.eq.s32.totalorder %s1650_s23, 0  ;;  %p28_p3 = scmp.ge.s32.totalorder %s1966_s25, 8 }
   0xa   : > { %s35_s28 = sadd.s32 1, %s1630_s18  ;;  %p139_p5 = scmp.ne.s32.totalorder %s1622_s16, %s1618_s15 }
   0xb   : > { %p1737_p4 = por %p43_p2, %p42_p1  ;;  %s1968_s25 = smov (%p28_p3, %s1966_s25), 0 }
   0xc   : > { %s129_s30 = sadd.s32 1, %s1622_s16  ;;  %p140_p6 = scmp.eq.s32.totalorder %s1123_s26, 23 }
   0xd   : > { %s31_s5 = sadd.s32 %s1968_s25, %s1964_s24  ;;  %s126_s6 = ssub.s32 %s1646_s22, %s1968_s25 }
   0xe   : > { %s32_s7 = ssub.s32 %s30_s27, %s31_s5  ;;  %p127_p7 = scmp.eq.s32.totalorder %s126_s6, 0 }
   0xf   : > { %p33_p8 = scmp.eq.s32.totalorder %s32_s7, 0  ;;  %p1750_p9 = por %p140_p6, %p139_p5 }
  0x10   : > { %s1755_s9 = scalar_select %p127_p7, %s1622_s16, %s129_s30  }
  0x11   : > { %s1758_s10 = scalar_select %p33_p8, %s1630_s18, %s35_s28  }
  0x12   : > { %p1126_p10 = scmp.ge.s32.totalorder %s1650_s23, 24 }
  0x14   : > { %168 = sbr.rel (%p1126_p10) target bundleno = 34 (0x22), region = 24 }
  0x1b   : > { %171 = sbr.rel (!%p1737_p4) target bundleno = 34 (0x22), region = 28  ;;  %s173_s11 = sand.u32 (%p1737_p4), 1, %s1630_s18  }
  0x1c   : > { %s1256_s12 = sshll.u32 (%p1737_p4), %s30_s27, 3  ;;  %s1127_s13 = sshll.u32 (%p1737_p4), %s173_s11, 4 }
  0x1d   : > { %s179_s5 = scalar_lea.vmem (%p1737_p4), %s1948_s0, %s1256_s12  ;;  %s175_s30 = scalar_lea.vmem (%p1737_p4), [#allocation3], %s1127_s13 }
  0x1e   : > { %v195_v0 = vld [vmem:[%s179_s5] sm:$0xff] (%p1737_p4)   ;;  %v199_v1 = vld [vmem:[%s179_s5 + $0x50] sm:$0xff] (%p1737_p4)  }
  0x1f   : > { %196 = vst [vmem:[%s175_s30] sm:$0xff] (%p1737_p4), %v195_v0   ;;  %200 = vst [vmem:[%s175_s30 + $0x8] sm:$0xff] (%p1737_p4), %v199_v1  }
  0x22 PF: > { %p1130_p11 = scmp.ge.s32.totalorder %s1650_s23, 1  ;;  %p240_p12 = scmp.lt.s32.totalorder %s1650_s23, 25 }
  0x24   : > { %p241_p13 = pnand %p1130_p11, %p240_p12 }
  0x25   : > { %s247_s27 = sand.u32 (!%p241_p13), 1, %s1626_s17   ;;  %s273_s28 = sand.u32 (!%p241_p13), 1, %s1618_s15  }
  0x26   : > { %244 = sbr.rel (%p241_p13) target bundleno = 390 (0x186), region = 73  ;;  %s1131_s29 = sshll.u32 (!%p241_p13), %s247_s27, 4 }
  0x27   : > { %s1132_s6 = sshll.u32 (!%p241_p13), %s273_s28, 3  ;;  %p277_p0 = scmp.lt.s32.totalorder (!%p241_p13), %s1634_s19, 2 }
  0x28   : > { %s1778_s26 = scalar_lea.vmem (!%p241_p13), [#allocation3], %s1131_s29  ;;  %s1780_s5 = scalar_lea.vmem (!%p241_p13), [#allocation4], %s1132_s6 }
  0x29   : > { %p1134_p1 = scmp.ne.s32.totalorder (!%p241_p13), %s1634_s19, 0 }
  0x2d   : > { %s278_s7 = scalar_select %p277_p0, %s1634_s19, 2 }
  0x2e   : > { %286 = sbr.rel (%p1134_p1) target bundleno = 53 (0x35), region = 81  ;;  %v1652_v2 = vmov (!%p1134_p1), 0.0  }
  0x2f   : > { %s1454_s11 = smul.u32 192, %s278_s7  ;;  %287 = vst [vmem:[#allocation2] sm:$0xff] (!%p1134_p1), %v1652_v2  ;;  %288 = vst [vmem:[#allocation2 + $0x8] sm:$0xff] (!%p1134_p1), %v1652_v2 }
  0x31   : > { %s1776_s14 = scalar_lea.vmem %s1949_s1, %s1454_s11 }
  0x35 PF: > { %v1530_v3 = vld [vmem:[%s1776_s14] sm:$0xff]   ;;  %v1653_v4 = vmov 0.0   ;;  %v1532_v6 = vld [vmem:[%s1776_s14 + $0x8] sm:$0xff]   ;;  %vm1654_vm0 = vmmov 0   ;;  %v1534_v8 = vld [vmem:[%s1776_s14 + $0x10] sm:$0xff]   ;;  %p1249_p2 = scmp.ne.s32.totalorder %s1634_s19, 2 }
  0x36   : > { %1316 = vmatprep.subr.bf16.mxu0 %v1653_v4  ;;  %1376 = vmatprep.subr.bf16.mxu1 %v1653_v4  ;;  %v1531_v5 = vld [vmem:[%s1776_s14] sm:$0xff]   ;;  %v1533_v7 = vld [vmem:[%s1776_s14 + $0x8] sm:$0xff]   ;;  %v1535_v9 = vld [vmem:[%s1776_s14 + $0x10] sm:$0xff]  }
  0x37   : > { %1317 = vmatpush3.bf16.msra.mxu0 %v1530_v3  ;;  %1332 = vmatprep.mubr.msk.bf16.mxu0 %vm1654_vm0, %v1653_v4  ;;  %v1536_v10 = vld [vmem:[%s1776_s14 + $0x18] sm:$0xff]   ;;  %v1538_v12 = vld [vmem:[%s1776_s14 + $0x20] sm:$0xff]   ;;  %v1540_v14 = vld [vmem:[%s1776_s14 + $0x28] sm:$0xff]  }
  0x38   : > { %1377 = vmatpush3.bf16.msra.mxu1 %v1531_v5  ;;  %1318 = vmatprep.subr.bf16.mxu0 %v1653_v4  ;;  %v1537_v11 = vld [vmem:[%s1776_s14 + $0x18] sm:$0xff]   ;;  %v1539_v13 = vld [vmem:[%s1776_s14 + $0x20] sm:$0xff]   ;;  %v1541_v15 = vld [vmem:[%s1776_s14 + $0x28] sm:$0xff]  }
  0x39   : > { %1378 = vmatprep.subr.bf16.mxu1 %v1653_v4  ;;  %1392 = vmatprep.mubr.msk.bf16.mxu1 %vm1654_vm0, %v1653_v4  ;;  %v1542_v16 = vld [vmem:[%s1776_s14 + $0x30] sm:$0xff]   ;;  %v1544_v18 = vld [vmem:[%s1776_s14 + $0x38] sm:$0xff]   ;;  %v1547_v21 = vld [vmem:[%s1776_s14 + $0x40] sm:$0xff]  }
  0x3a   : > { %v1543_v17 = vld [vmem:[%s1776_s14 + $0x30] sm:$0xff]   ;;  %v1545_v19 = vld [vmem:[%s1776_s14 + $0x38] sm:$0xff]   ;;  %v1549_v23 = vld [vmem:[%s1776_s14 + $0x40] sm:$0xff]  }
  0x3b   : > { %1319 = vmatpush3.bf16.msra.mxu0 %v1532_v6  ;;  %v289_v20 = vld [vmem:[%s1778_s26] sm:$0xf]  ;;  %v291_v22 = vld [vmem:[%s1778_s26 + $0x8] sm:$0xf]  ;;  %v290_v30 = vld [vmem:[%s1778_s26 + $0x4] sm:$0x1] }
  0x3c   : > { %1379 = vmatpush3.bf16.msra.mxu1 %v1533_v7  ;;  %1320 = vmatprep.subr.bf16.mxu0 %v1653_v4  ;;  %v1550_v24 = vld [vmem:[%s1776_s14 + $0x48] sm:$0xff]   ;;  %v1552_v26 = vld [vmem:[%s1776_s14 + $0x50] sm:$0xff]   ;;  %v1554_v28 = vld [vmem:[%s1776_s14 + $0x58] sm:$0xff]   ;;  %v1847_v34 = vcombine.low %v289_v20, %v290_v30 }
  0x3d   : > { %1380 = vmatprep.subr.bf16.mxu1 %v1653_v4  ;;  %v1551_v25 = vld [vmem:[%s1776_s14 + $0x48] sm:$0xff]   ;;  %v1553_v27 = vld [vmem:[%s1776_s14 + $0x50] sm:$0xff]   ;;  %v1555_v29 = vld [vmem:[%s1776_s14 + $0x58] sm:$0xff]  }
  0x3e   : > { %v292_v31 = vld [vmem:[%s1778_s26 + $0xc] sm:$0x1]  ;;  %v1556_v32 = vld [vmem:[%s1776_s14 + $0x60] sm:$0xff]   ;;  %v424_v38 = vshll.u32 %v1847_v34, 16  ;;  %v1560_v40 = vld [vmem:[%s1776_s14 + $0x70] sm:$0xff]   ;;  %v422_v42 = vshrl.u32 %v1847_v34, 16 }
  0x3f   : > { %1321 = vmatpush3.bf16.msra.mxu0 %v1534_v8  ;;  %v1557_v33 = vld [vmem:[%s1776_s14 + $0x60] sm:$0xff]   ;;  %v1849_v35 = vcombine.low %v291_v22, %v292_v31  ;;  %v1558_v36 = vld [vmem:[%s1776_s14 + $0x68] sm:$0xff]   ;;  %v1561_v41 = vld [vmem:[%s1776_s14 + $0x70] sm:$0xff]   ;;  %v535_v2 = vrot.slane %v1847_v34, 1 }
  0x40   : > { %1381 = vmatpush3.bf16.msra.mxu1 %v1535_v9  ;;  %1322 = vmatprep.subr.bf16.mxu0 %v1653_v4  ;;  %v1559_v37 = vld [vmem:[%s1776_s14 + $0x68] sm:$0xff]   ;;  %v426_v43 = vrot.slane %v424_v38, 1  ;;  %v1562_v46 = vld [vmem:[%s1776_s14 + $0x78] sm:$0xff]   ;;  %v1564_v49 = vld [vmem:[%s1776_s14 + $0x80] sm:$0xff]  }
  0x41   : > { %1382 = vmatprep.subr.bf16.mxu1 %v1653_v4  ;;  %v758_v39 = vshll.u32 %v1849_v35, 16  ;;  %v756_v44 = vshrl.u32 %v1849_v35, 16  ;;  %v1563_v47 = vld [vmem:[%s1776_s14 + $0x78] sm:$0xff]   ;;  %v1565_v51 = vld [vmem:[%s1776_s14 + $0x80] sm:$0xff]   ;;  %v1566_v52 = vld [vmem:[%s1776_s14 + $0x88] sm:$0xff]   ;;  %v868_v3 = vrot.slane %v1849_v35, 1 }
  0x42   : > { %v427_v48 = vor.u32 %v426_v43, %v422_v42  ;;  %v1567_v53 = vld [vmem:[%s1776_s14 + $0x88] sm:$0xff]   ;;  %v1568_v54 = vld [vmem:[%s1776_s14 + $0x90] sm:$0xff]   ;;  %v1570_v56 = vld [vmem:[%s1776_s14 + $0x98] sm:$0xff]  }
  0x43   : > { %1323 = vmatpush3.bf16.msra.mxu0 %v1536_v10  ;;  %v760_v45 = vrot.slane %v758_v39, 1  ;;  %v1569_v55 = vld [vmem:[%s1776_s14 + $0x90] sm:$0xff]   ;;  %v1571_v57 = vld [vmem:[%s1776_s14 + $0x98] sm:$0xff]   ;;  %v1572_v58 = vld [vmem:[%s1776_s14 + $0xa0] sm:$0xff]  }
  0x44   : > { %1383 = vmatpush3.bf16.msra.mxu1 %v1537_v11  ;;  %1324 = vmatprep.subr.bf16.mxu0 %v1653_v4  ;;  %v1573_v59 = vld [vmem:[%s1776_s14 + $0xa0] sm:$0xff]   ;;  %v1574_v60 = vld [vmem:[%s1776_s14 + $0xa8] sm:$0xff]   ;;  %v1576_v62 = vld [vmem:[%s1776_s14 + $0xb0] sm:$0xff]  }
  0x45   : > { %1384 = vmatprep.subr.bf16.mxu1 %v1653_v4  ;;  %v761_v50 = vor.u32 %v760_v45, %v756_v44  ;;  %v1575_v61 = vld [vmem:[%s1776_s14 + $0xa8] sm:$0xff]   ;;  %v1577_v63 = vld [vmem:[%s1776_s14 + $0xb0] sm:$0xff]   ;;  %v1578_v0 = vld [vmem:[%s1776_s14 + $0xb8] sm:$0xff]  }
  0x46   : > { %v1579_v1 = vld [vmem:[%s1776_s14 + $0xb8] sm:$0xff]   ;;  %v293_v5 = vld [vmem:[#allocation2] sm:$0xff]  ;;  %v628_v6 = vld [vmem:[#allocation2 + $0x8] sm:$0xff] }
  0x47   : > { %1325 = vmatpush3.bf16.msra.mxu0 %v1538_v12 }
  0x48   : > { %1385 = vmatpush3.bf16.msra.mxu1 %v1539_v13  ;;  %1326 = vmatprep.subr.bf16.mxu0 %v1653_v4 }
  0x49   : > { %1386 = vmatprep.subr.bf16.mxu1 %v1653_v4 }
  0x4b   : > { %1327 = vmatpush3.bf16.msra.mxu0 %v1540_v14 }
  0x4c   : > { %1387 = vmatpush3.bf16.msra.mxu1 %v1541_v15  ;;  %1328 = vmatprep.subr.bf16.mxu0 %v1653_v4 }
  0x4d   : > { %1388 = vmatprep.subr.bf16.mxu1 %v1653_v4 }
  0x4f   : > { %1329 = vmatpush3.bf16.msra.mxu0 %v1542_v16 }
  0x50   : > { %1389 = vmatpush3.bf16.msra.mxu1 %v1543_v17  ;;  %1330 = vmatprep.subr.bf16.mxu0 %v1653_v4 }
  0x51   : > { %1390 = vmatprep.subr.bf16.mxu1 %v1653_v4 }
  0x53   : > { %1331 = vmatpush3.bf16.msra.mxu0 %v1544_v18  ;;  %v1250_v18 = vld [vmem:[%s1950_s2] ss:$0 sm:$0xff] (!%p1249_p2) }
  0x54   : > { %1391 = vmatpush3.bf16.msra.mxu1 %v1545_v19  ;;  %1336 = vmatprep.subr.bf16.mxu0 %v1653_v4 }
  0x55   : > { %1396 = vmatprep.subr.bf16.mxu1 %v1653_v4 }
  0x56   : > { %1333 = vmatmul.mubr.bf16.vlgmr.msra.gmra.mrb[0].mxu0 %v289_v20 }
  0x57   : > { %1337 = vmatpush3.bf16.msra.mxu0 %v1547_v21  ;;  %1393 = vmatmul.mubr.bf16.vlgmr.msra.gmra.mrb[0].mxu1 %v291_v22  ;;  %v1251_v21 = vld [vmem:[%s1951_s3] ss:$0 sm:$0xff] (!%p1249_p2) }
  0x58   : > { %1397 = vmatpush3.bf16.msra.mxu1 %v1549_v23  ;;  %1338 = vmatprep.subr.bf16.mxu0 %v1653_v4 }
  0x59   : > { %1398 = vmatprep.subr.bf16.mxu1 %v1653_v4  ;;  %1352 = vmatprep.mubr.msk.bf16.mxu0 %vm1654_vm0, %v1653_v4 }
  0x5a   : > { %1412 = vmatprep.mubr.msk.bf16.mxu1 %vm1654_vm0, %v1653_v4 }
  0x5b   : > { %1339 = vmatpush3.bf16.msra.mxu0 %v1550_v24 }
  0x5c   : > { %1399 = vmatpush3.bf16.msra.mxu1 %v1551_v25  ;;  %1340 = vmatprep.subr.bf16.mxu0 %v1653_v4 }
  0x5d   : > { %1400 = vmatprep.subr.bf16.mxu1 %v1653_v4 }
  0x5f   : > { %1341 = vmatpush3.bf16.msra.mxu0 %v1552_v26 }
  0x60   : > { %1401 = vmatpush3.bf16.msra.mxu1 %v1553_v27  ;;  %1342 = vmatprep.subr.bf16.mxu0 %v1653_v4 }
  0x61   : > { %1402 = vmatprep.subr.bf16.mxu1 %v1653_v4 }
  0x63   : > { %1343 = vmatpush3.bf16.msra.mxu0 %v1554_v28 }
  0x64   : > { %1403 = vmatpush3.bf16.msra.mxu1 %v1555_v29  ;;  %1344 = vmatprep.subr.bf16.mxu0 %v1653_v4 }
  0x65   : > { %1404 = vmatprep.subr.bf16.mxu1 %v1653_v4 }
  0x67   : > { %1345 = vmatpush3.bf16.msra.mxu0 %v1556_v32 }
  0x68   : > { %1405 = vmatpush3.bf16.msra.mxu1 %v1557_v33  ;;  %1346 = vmatprep.subr.bf16.mxu0 %v1653_v4 }
  0x69   : > { %1406 = vmatprep.subr.bf16.mxu1 %v1653_v4 }
  0x6b   : > { %1347 = vmatpush3.bf16.msra.mxu0 %v1558_v36 }
  0x6c   : > { %1407 = vmatpush3.bf16.msra.mxu1 %v1559_v37  ;;  %1348 = vmatprep.subr.bf16.mxu0 %v1653_v4 }
  0x6d   : > { %1408 = vmatprep.subr.bf16.mxu1 %v1653_v4 }
  0x6f   : > { %1349 = vmatpush3.bf16.msra.mxu0 %v1560_v40 }
  0x70   : > { %1409 = vmatpush3.bf16.msra.mxu1 %v1561_v41  ;;  %1350 = vmatprep.subr.bf16.mxu0 %v1653_v4 }
  0x71   : > { %1410 = vmatprep.subr.bf16.mxu1 %v1653_v4 }
  0x73   : > { %1351 = vmatpush3.bf16.msra.mxu0 %v1562_v46 }
  0x74   : > { %1411 = vmatpush3.bf16.msra.mxu1 %v1563_v47  ;;  %1356 = vmatprep.subr.bf16.mxu0 %v1653_v4 }
  0x75   : > { %1416 = vmatprep.subr.bf16.mxu1 %v1653_v4 }
  0x76   : > { %1353 = vmatmul.mubr.bf16.vlgmr.msra.gmra.mrb[0].mxu0 %v427_v48 }
  0x77   : > { %1357 = vmatpush3.bf16.msra.mxu0 %v1564_v49  ;;  %1413 = vmatmul.mubr.bf16.vlgmr.msra.gmra.mrb[0].mxu1 %v761_v50 }
  0x78   : > { %1417 = vmatpush3.bf16.msra.mxu1 %v1565_v51  ;;  %1358 = vmatprep.subr.bf16.mxu0 %v1653_v4 }
  0x79   : > { %1418 = vmatprep.subr.bf16.mxu1 %v1653_v4  ;;  %1372 = vmatprep.mubr.msk.bf16.mxu0 %vm1654_vm0, %v1653_v4 }
  0x7a   : > { %1432 = vmatprep.mubr.msk.bf16.mxu1 %vm1654_vm0, %v1653_v4 }
  0x7b   : > { %1359 = vmatpush3.bf16.msra.mxu0 %v1566_v52 }
  0x7c   : > { %1419 = vmatpush3.bf16.msra.mxu1 %v1567_v53  ;;  %1360 = vmatprep.subr.bf16.mxu0 %v1653_v4 }
  0x7d   : > { %1420 = vmatprep.subr.bf16.mxu1 %v1653_v4 }
  0x7f   : > { %1361 = vmatpush3.bf16.msra.mxu0 %v1568_v54 }
  0x80   : > { %1421 = vmatpush3.bf16.msra.mxu1 %v1569_v55  ;;  %1362 = vmatprep.subr.bf16.mxu0 %v1653_v4 }
  0x81   : > { %1422 = vmatprep.subr.bf16.mxu1 %v1653_v4 }
  0x83   : > { %1363 = vmatpush3.bf16.msra.mxu0 %v1570_v56 }
  0x84   : > { %1423 = vmatpush3.bf16.msra.mxu1 %v1571_v57  ;;  %1364 = vmatprep.subr.bf16.mxu0 %v1653_v4 }
  0x85   : > { %1424 = vmatprep.subr.bf16.mxu1 %v1653_v4 }
  0x87   : > { %1365 = vmatpush3.bf16.msra.mxu0 %v1572_v58 }
  0x88   : > { %1425 = vmatpush3.bf16.msra.mxu1 %v1573_v59  ;;  %1366 = vmatprep.subr.bf16.mxu0 %v1653_v4 }
  0x89   : > { %1426 = vmatprep.subr.bf16.mxu1 %v1653_v4 }
  0x8b   : > { %1367 = vmatpush3.bf16.msra.mxu0 %v1574_v60 }
  0x8c   : > { %1427 = vmatpush3.bf16.msra.mxu1 %v1575_v61  ;;  %1368 = vmatprep.subr.bf16.mxu0 %v1653_v4 }
  0x8d   : > { %1428 = vmatprep.subr.bf16.mxu1 %v1653_v4 }
  0x8f   : > { %1369 = vmatpush3.bf16.msra.mxu0 %v1576_v62 }
  0x90   : > { %1429 = vmatpush3.bf16.msra.mxu1 %v1577_v63  ;;  %1370 = vmatprep.subr.bf16.mxu0 %v1653_v4 }
  0x91   : > { %1430 = vmatprep.subr.bf16.mxu1 %v1653_v4 }
  0x93   : > { %1371 = vmatpush3.bf16.msra.mxu0 %v1578_v0 }
  0x94   : > { %1431 = vmatpush3.bf16.msra.mxu1 %v1579_v1 }
  0x96   : > { %1373 = vmatmul.mubr.bf16.vlgmr.msra.gmra.mrb[0].mxu0 %v535_v2 }
  0x97   : > { %1433 = vmatmul.mubr.bf16.vlgmr.msra.gmra.mrb[0].mxu1 %v868_v3 }
 0x167   : > { %963 = sbr.rel (%p1249_p2) target bundleno = 382 (0x17e), region = 85 }
 0x169   : > { %v619_v7 = vpop.f32.mrb[0].mxu0 }
 0x16a   : > { %v1436_v8 = vadd.f32 %v619_v7, %v293_v5  ;;  %v952_v9 = vpop.f32.mrb[0].mxu1  ;;  %v1374_v10 = vpop.f32.mrb[1].mxu0 }
 0x16b   : > { %v1437_v11 = vadd.f32 %v952_v9, %v628_v6  ;;  %v1434_v12 = vpop.f32.mrb[1].mxu1  ;;  %v622_v13 = vpop.f32.mrb[2].mxu0 }
 0x16c   : > { %626 = vst [vmem:[#allocation2] sm:$0xff] %v1436_v8  ;;  %v955_v14 = vpop.f32.mrb[2].mxu1  ;;  %v1375_v4 = vpop.f32.mrb[3].mxu0 }
 0x16d   : > { %959 = vst [vmem:[#allocation2 + $0x8] sm:$0xff] %v1437_v11  ;;  %v1435_v15 = vpop.f32.mrb[3].mxu1 }
 0x173   : > { %v964_v16 = vld [vmem:[#allocation2] sm:$0xff] }
 0x174   : > { %v965_v17 = vld [vmem:[#allocation2 + $0x8] sm:$0xff]  ;;  %v973_v19 = vmul.f32 %v1250_v18, %v964_v16 }
 0x175   : > { %v974_v20 = vmul.f32 %v1250_v18, %v965_v17 }
 0x176   : > { %v982_v22 = vadd.f32 %v1251_v21, %v973_v19 }
 0x177   : > { %v983_v23 = vadd.f32 %v1251_v21, %v974_v20 }
 0x178   : > { %v984_v24 = vmax.f32 %v982_v22, 0.0 }
 0x179   : > { %v985_v25 = vmax.f32 %v983_v23, 0.0 }
 0x17b   : > { %v1260_v26 = vpack.c.bf16 %v985_v25, %v984_v24 }
 0x17d   : > { %1261 = vst [vmem:[%s1780_s5] sm:$0xff] %v1260_v26  }
 0x17e PF: > { %996 = sbr.rel (!%p1750_p9) target bundleno = 390 (0x186), region = 89  ;;  %s1253_s19 = sshll.u32 (%p1750_p9), %s1638_s20, 2 }
 0x17f   : > { %s998_s6 = scalar_lea.vmem (%p1750_p9), %s1952_s4, %s1253_s19 }
 0x184   : > { %v1014_v27 = vld [vmem:[%s1780_s5] sm:$0xf] (%p1750_p9)  ;;  %v1016_v28 = vld [vmem:[%s1780_s5 + $0x4] sm:$0xf] (%p1750_p9) }
 0x185   : > { %1015 = vst [vmem:[%s998_s6] sm:$0xf] %v1014_v27  ;;  %1017 = vst [vmem:[%s998_s6 + $0x20] sm:$0xf] %v1016_v28 }
 0x186 PF: > { %s14_s23 = sadd.s32 1, %s1650_s23   ;;  %s1955_s15 = smov %s1622_s16 }
 0x187   : > { %p11_p3 = scmp.ge.s32.totalorder %s14_s23, 26   ;;  %s1956_s16 = smov %s1755_s9 }
 0x188   : > { %s1957_s17 = smov %s1630_s18  ;;  %s1958_s18 = smov %s1758_s10 }
 0x189   : > { %s1959_s19 = smov %s1642_s21  ;;  %s1960_s20 = smov %s1646_s22 }
 0x18a   : > { %s1961_s21 = smov %s1964_s24  ;;  %s1962_s22 = smov %s1968_s25 }
 0x18b   :  { %13 = sbr.rel (!%p11_p3) target bundleno = 5 (0x5), region = 167 }

// kernel: shared_module_fr_forward.38
= control target key start
LH: loop header
LB: loop body
LE: loop exit
PB: predicated region body
PF: predicated region fallthrough
CT: control target
= control target key end

     0   :  { %s478_s0 = inlined_call_operand.vmem [shape: bf16[128,256], index: 0, kind: input, shape index: {}]   ;;  %s479_s1 = inlined_call_operand.vmem [shape: bf16[128,256], index: 1, kind: input, shape index: {}]   ;;  %s480_s2 = inlined_call_operand.vmem [shape: bf16[128,256], index: 2, kind: output, shape index: {}]  }
   0x1   :  { %v11_v0 = vld [vmem:[%s478_s0] sm:$0xff]  ;;  %v12_v2 = vld [vmem:[%s478_s0 + $0x8] sm:$0xff]  ;;  %v13_v8 = vld [vmem:[%s478_s0 + $0x10] sm:$0xff] }
   0x2   :  { %v59_v1 = vld [vmem:[%s479_s1] sm:$0xff]  ;;  %v27_v3 = vunpack.c.l.bf16 %v11_v0  ;;  %v28_v4 = vunpack.c.h.bf16 %v11_v0  ;;  %v60_v7 = vld [vmem:[%s479_s1 + $0x8] sm:$0xff]  ;;  %v61_v9 = vld [vmem:[%s479_s1 + $0x10] sm:$0xff]  ;;  %v29_v10 = vunpack.c.l.bf16 %v12_v2  ;;  %v30_v11 = vunpack.c.h.bf16 %v12_v2 }
   0x3   :  { %v75_v5 = vunpack.c.l.bf16 %v59_v1  ;;  %v76_v6 = vunpack.c.h.bf16 %v59_v1  ;;  %v77_v12 = vunpack.c.l.bf16 %v60_v7  ;;  %v78_v13 = vunpack.c.h.bf16 %v60_v7  ;;  %v14_v14 = vld [vmem:[%s478_s0 + $0x18] sm:$0xff]  ;;  %v15_v24 = vld [vmem:[%s478_s0 + $0x20] sm:$0xff]  ;;  %v16_v38 = vld [vmem:[%s478_s0 + $0x28] sm:$0xff] }
   0x4   :  { %v31_v17 = vunpack.c.l.bf16 %v13_v8  ;;  %v32_v18 = vunpack.c.h.bf16 %v13_v8  ;;  %v79_v21 = vunpack.c.l.bf16 %v61_v9  ;;  %v80_v22 = vunpack.c.h.bf16 %v61_v9  ;;  %v62_v23 = vld [vmem:[%s479_s1 + $0x18] sm:$0xff]  ;;  %v63_v33 = vld [vmem:[%s479_s1 + $0x20] sm:$0xff]  ;;  %v64_v39 = vld [vmem:[%s479_s1 + $0x28] sm:$0xff] }
   0x5   :  { %v107_v15 = vadd.f32 %v75_v5, %v27_v3  ;;  %v108_v16 = vadd.f32 %v76_v6, %v28_v4  ;;  %v109_v19 = vadd.f32 %v77_v12, %v29_v10  ;;  %v110_v20 = vadd.f32 %v78_v13, %v30_v11  ;;  %v17_v48 = vld [vmem:[%s478_s0 + $0x30] sm:$0xff]  ;;  %v18_v58 = vld [vmem:[%s478_s0 + $0x38] sm:$0xff]  ;;  %v19_v4 = vld [vmem:[%s478_s0 + $0x40] sm:$0xff] }
   0x6   :  { %v33_v27 = vunpack.c.l.bf16 %v14_v14  ;;  %v34_v28 = vunpack.c.h.bf16 %v14_v14  ;;  %v111_v31 = vadd.f32 %v79_v21, %v31_v17  ;;  %v112_v32 = vadd.f32 %v80_v22, %v32_v18  ;;  %v65_v53 = vld [vmem:[%s479_s1 + $0x30] sm:$0xff]  ;;  %v66_v63 = vld [vmem:[%s479_s1 + $0x38] sm:$0xff]  ;;  %v67_v9 = vld [vmem:[%s479_s1 + $0x40] sm:$0xff] }
   0x7   :  { %v139_v25 = vmax.f32 %v107_v15, 0.0  ;;  %v140_v26 = vmax.f32 %v108_v16, 0.0  ;;  %v141_v29 = vmax.f32 %v109_v19, 0.0  ;;  %v142_v30 = vmax.f32 %v110_v20, 0.0  ;;  %v20_v18 = vld [vmem:[%s478_s0 + $0x48] sm:$0xff] }
   0x8   :  { %v81_v35 = vunpack.c.l.bf16 %v62_v23  ;;  %v82_v36 = vunpack.c.h.bf16 %v62_v23  ;;  %v35_v37 = vunpack.c.l.bf16 %v15_v24  ;;  %v143_v41 = vmax.f32 %v111_v31, 0.0  ;;  %v68_v23 = vld [vmem:[%s479_s1 + $0x48] sm:$0xff] }
   0x9   :  { %v303_v34 = vpack.c.bf16 %v140_v26, %v139_v25  ;;  %v304_v40 = vpack.c.bf16 %v142_v30, %v141_v29  ;;  %v144_v42 = vmax.f32 %v112_v32, 0.0  ;;  %v36_v43 = vunpack.c.h.bf16 %v15_v24 }
   0xa   :  { %v113_v44 = vadd.f32 %v81_v35, %v33_v27  ;;  %v114_v45 = vadd.f32 %v82_v36, %v34_v28  ;;  %v83_v46 = vunpack.c.l.bf16 %v63_v33  ;;  %v84_v47 = vunpack.c.h.bf16 %v63_v33  ;;  %v21_v28 = vld [vmem:[%s478_s0 + $0x50] sm:$0xff] }
   0xb   :  { %267 = vst [vmem:[%s480_s2] sm:$0xff] %v303_v34  ;;  %268 = vst [vmem:[%s480_s2 + $0x8] sm:$0xff] %v304_v40  ;;  %v305_v49 = vpack.c.bf16 %v144_v42, %v143_v41  ;;  %v37_v50 = vunpack.c.l.bf16 %v16_v38  ;;  %v38_v51 = vunpack.c.h.bf16 %v16_v38  ;;  %v85_v52 = vunpack.c.l.bf16 %v64_v39  ;;  %v69_v33 = vld [vmem:[%s479_s1 + $0x50] sm:$0xff]  ;;  %v22_v38 = vld [vmem:[%s478_s0 + $0x58] sm:$0xff] }
   0xc   :  { %v145_v54 = vmax.f32 %v113_v44, 0.0  ;;  %v146_v55 = vmax.f32 %v114_v45, 0.0  ;;  %v115_v56 = vadd.f32 %v83_v46, %v35_v37  ;;  %v116_v57 = vadd.f32 %v84_v47, %v36_v43  ;;  %v70_v43 = vld [vmem:[%s479_s1 + $0x58] sm:$0xff] }
   0xd   :  { %269 = vst [vmem:[%s480_s2 + $0x10] sm:$0xff] %v305_v49  ;;  %v86_v59 = vunpack.c.h.bf16 %v64_v39  ;;  %v117_v60 = vadd.f32 %v85_v52, %v37_v50  ;;  %v39_v61 = vunpack.c.l.bf16 %v17_v48  ;;  %v40_v62 = vunpack.c.h.bf16 %v17_v48  ;;  %v23_v48 = vld [vmem:[%s478_s0 + $0x60] sm:$0xff] }
   0xe   :  { %v306_v0 = vpack.c.bf16 %v146_v55, %v145_v54  ;;  %v147_v1 = vmax.f32 %v115_v56, 0.0  ;;  %v148_v2 = vmax.f32 %v116_v57, 0.0  ;;  %v87_v3 = vunpack.c.l.bf16 %v65_v53 }
   0xf   :  { %v118_v5 = vadd.f32 %v86_v59, %v38_v51  ;;  %v149_v6 = vmax.f32 %v117_v60, 0.0  ;;  %v88_v7 = vunpack.c.h.bf16 %v65_v53  ;;  %v41_v8 = vunpack.c.l.bf16 %v18_v58  ;;  %v71_v53 = vld [vmem:[%s479_s1 + $0x60] sm:$0xff] }
  0x10   :  { %270 = vst [vmem:[%s480_s2 + $0x18] sm:$0xff] %v306_v0  ;;  %v307_v10 = vpack.c.bf16 %v148_v2, %v147_v1  ;;  %v119_v11 = vadd.f32 %v87_v3, %v39_v61  ;;  %v42_v12 = vunpack.c.h.bf16 %v18_v58  ;;  %v89_v13 = vunpack.c.l.bf16 %v66_v63  ;;  %v72_v3 = vld [vmem:[%s479_s1 + $0x68] sm:$0xff] }
  0x11   :  { %v150_v14 = vmax.f32 %v118_v5, 0.0  ;;  %v120_v15 = vadd.f32 %v88_v7, %v40_v62  ;;  %v90_v16 = vunpack.c.h.bf16 %v66_v63  ;;  %v43_v17 = vunpack.c.l.bf16 %v19_v4  ;;  %v24_v62 = vld [vmem:[%s478_s0 + $0x68] sm:$0xff] }
  0x12   :  { %271 = vst [vmem:[%s480_s2 + $0x20] sm:$0xff] %v307_v10  ;;  %v151_v19 = vmax.f32 %v119_v11, 0.0  ;;  %v121_v20 = vadd.f32 %v89_v13, %v41_v8  ;;  %v44_v21 = vunpack.c.h.bf16 %v19_v4  ;;  %v91_v22 = vunpack.c.l.bf16 %v67_v9  ;;  %v25_v8 = vld [vmem:[%s478_s0 + $0x70] sm:$0xff] }
  0x13   :  { %v308_v24 = vpack.c.bf16 %v150_v14, %v149_v6  ;;  %v152_v25 = vmax.f32 %v120_v15, 0.0  ;;  %v122_v26 = vadd.f32 %v90_v16, %v42_v12  ;;  %v92_v27 = vunpack.c.h.bf16 %v67_v9  ;;  %v73_v13 = vld [vmem:[%s479_s1 + $0x70] sm:$0xff] }
  0x14   :  { %v153_v29 = vmax.f32 %v121_v20, 0.0  ;;  %v123_v30 = vadd.f32 %v91_v22, %v43_v17  ;;  %v45_v31 = vunpack.c.l.bf16 %v20_v18  ;;  %v46_v32 = vunpack.c.h.bf16 %v20_v18  ;;  %v26_v18 = vld [vmem:[%s478_s0 + $0x78] sm:$0xff] }
  0x15   :  { %272 = vst [vmem:[%s480_s2 + $0x28] sm:$0xff] %v308_v24  ;;  %v309_v34 = vpack.c.bf16 %v152_v25, %v151_v19  ;;  %v154_v35 = vmax.f32 %v122_v26, 0.0  ;;  %v124_v36 = vadd.f32 %v92_v27, %v44_v21  ;;  %v93_v37 = vunpack.c.l.bf16 %v68_v23 }
  0x16   :  { %v155_v39 = vmax.f32 %v123_v30, 0.0  ;;  %v94_v40 = vunpack.c.h.bf16 %v68_v23  ;;  %v47_v41 = vunpack.c.l.bf16 %v21_v28  ;;  %v48_v42 = vunpack.c.h.bf16 %v21_v28  ;;  %v74_v23 = vld [vmem:[%s479_s1 + $0x78] sm:$0xff] }
  0x17   :  { %273 = vst [vmem:[%s480_s2 + $0x30] sm:$0xff] %v309_v34  ;;  %v310_v44 = vpack.c.bf16 %v154_v35, %v153_v29  ;;  %v156_v45 = vmax.f32 %v124_v36, 0.0  ;;  %v125_v46 = vadd.f32 %v93_v37, %v45_v31  ;;  %v95_v47 = vunpack.c.l.bf16 %v69_v33 }
  0x18   :  { %v126_v49 = vadd.f32 %v94_v40, %v46_v32  ;;  %v96_v50 = vunpack.c.h.bf16 %v69_v33  ;;  %v49_v51 = vunpack.c.l.bf16 %v22_v38  ;;  %v50_v52 = vunpack.c.h.bf16 %v22_v38 }
  0x19   :  { %274 = vst [vmem:[%s480_s2 + $0x38] sm:$0xff] %v310_v44  ;;  %v311_v54 = vpack.c.bf16 %v156_v45, %v155_v39  ;;  %v157_v55 = vmax.f32 %v125_v46, 0.0  ;;  %v127_v56 = vadd.f32 %v95_v47, %v47_v41  ;;  %v97_v57 = vunpack.c.l.bf16 %v70_v43 }
  0x1a   :  { %v158_v58 = vmax.f32 %v126_v49, 0.0  ;;  %v128_v59 = vadd.f32 %v96_v50, %v48_v42  ;;  %v98_v60 = vunpack.c.h.bf16 %v70_v43  ;;  %v51_v61 = vunpack.c.l.bf16 %v23_v48 }
  0x1b   :  { %275 = vst [vmem:[%s480_s2 + $0x40] sm:$0xff] %v311_v54  ;;  %v159_v63 = vmax.f32 %v127_v56, 0.0  ;;  %v129_v0 = vadd.f32 %v97_v57, %v49_v51  ;;  %v52_v1 = vunpack.c.h.bf16 %v23_v48  ;;  %v99_v2 = vunpack.c.l.bf16 %v71_v53 }
  0x1c   :  { %v312_v4 = vpack.c.bf16 %v158_v58, %v157_v55  ;;  %v160_v5 = vmax.f32 %v128_v59, 0.0  ;;  %v130_v6 = vadd.f32 %v98_v60, %v50_v52  ;;  %v100_v7 = vunpack.c.h.bf16 %v71_v53 }
  0x1d   :  { %v161_v9 = vmax.f32 %v129_v0, 0.0  ;;  %v131_v10 = vadd.f32 %v99_v2, %v51_v61  ;;  %v53_v11 = vunpack.c.l.bf16 %v24_v62  ;;  %v54_v12 = vunpack.c.h.bf16 %v24_v62 }
  0x1e   :  { %276 = vst [vmem:[%s480_s2 + $0x48] sm:$0xff] %v312_v4  ;;  %v313_v14 = vpack.c.bf16 %v160_v5, %v159_v63  ;;  %v162_v15 = vmax.f32 %v130_v6, 0.0  ;;  %v132_v16 = vadd.f32 %v100_v7, %v52_v1  ;;  %v101_v17 = vunpack.c.l.bf16 %v72_v3 }
  0x1f   :  { %v163_v19 = vmax.f32 %v131_v10, 0.0  ;;  %v102_v20 = vunpack.c.h.bf16 %v72_v3  ;;  %v55_v21 = vunpack.c.l.bf16 %v25_v8  ;;  %v56_v22 = vunpack.c.h.bf16 %v25_v8 }
  0x20   :  { %277 = vst [vmem:[%s480_s2 + $0x50] sm:$0xff] %v313_v14  ;;  %v314_v24 = vpack.c.bf16 %v162_v15, %v161_v9  ;;  %v164_v25 = vmax.f32 %v132_v16, 0.0  ;;  %v133_v26 = vadd.f32 %v101_v17, %v53_v11  ;;  %v103_v27 = vunpack.c.l.bf16 %v73_v13 }
  0x21   :  { %v134_v28 = vadd.f32 %v102_v20, %v54_v12  ;;  %v104_v29 = vunpack.c.h.bf16 %v73_v13  ;;  %v57_v30 = vunpack.c.l.bf16 %v26_v18  ;;  %v58_v31 = vunpack.c.h.bf16 %v26_v18 }
  0x22   :  { %278 = vst [vmem:[%s480_s2 + $0x58] sm:$0xff] %v314_v24  ;;  %v315_v32 = vpack.c.bf16 %v164_v25, %v163_v19  ;;  %v165_v33 = vmax.f32 %v133_v26, 0.0  ;;  %v135_v34 = vadd.f32 %v103_v27, %v55_v21  ;;  %v105_v35 = vunpack.c.l.bf16 %v74_v23 }
  0x23   :  { %v166_v36 = vmax.f32 %v134_v28, 0.0  ;;  %v136_v37 = vadd.f32 %v104_v29, %v56_v22  ;;  %v106_v38 = vunpack.c.h.bf16 %v74_v23 }
  0x24   :  { %279 = vst [vmem:[%s480_s2 + $0x60] sm:$0xff] %v315_v32  ;;  %v167_v39 = vmax.f32 %v135_v34, 0.0  ;;  %v137_v40 = vadd.f32 %v105_v35, %v57_v30 }
  0x25   :  { %v316_v41 = vpack.c.bf16 %v166_v36, %v165_v33  ;;  %v168_v42 = vmax.f32 %v136_v37, 0.0  ;;  %v138_v43 = vadd.f32 %v106_v38, %v58_v31 }
  0x26   :  { %v169_v44 = vmax.f32 %v137_v40, 0.0 }
  0x27   :  { %280 = vst [vmem:[%s480_s2 + $0x68] sm:$0xff] %v316_v41  ;;  %v317_v45 = vpack.c.bf16 %v168_v42, %v167_v39  ;;  %v170_v46 = vmax.f32 %v138_v43, 0.0 }
  0x29   :  { %281 = vst [vmem:[%s480_s2 + $0x70] sm:$0xff] %v317_v45  ;;  %v318_v47 = vpack.c.bf16 %v170_v46, %v169_v44 }
  0x2b   :  { %282 = vst [vmem:[%s480_s2 + $0x78] sm:$0xff] %v318_v47 }

// kernel: shared_module_fr_forward.36
= control target key start
LH: loop header
LB: loop body
LE: loop exit
PB: predicated region body
PF: predicated region fallthrough
CT: control target
= control target key end

     0   :  { %v600_v1 = vmov 0   ;;  %v293_v25 = vlaneseq  ;;  %s832_s1 = inlined_call_operand.vmem [shape: bf16[128,256], index: 1, kind: input, shape index: {}]   ;;  %s833_s0 = inlined_call_operand.vmem [shape: bf16[128,128], index: 0, kind: input, shape index: {}]   ;;  %s834_s2 = inlined_call_operand.vmem [shape: f32[1,256], index: 2, kind: input, shape index: {}]   ;;  %s835_s3 = inlined_call_operand.vmem [shape: f32[1,256], index: 3, kind: input, shape index: {}]   ;;  %s836_s4 = inlined_call_operand.vmem [shape: bf16[128,256], index: 4, kind: output, shape index: {}]  }
   0x1   :  { %v568_v0 = vld [vmem:[%s832_s1 + $0x4] ss:$8 sps:$4 sm:$0xff]   ;;  %210 = vmatprep.mubr.bf16.mxu0 %v600_v1  ;;  %250 = vmatprep.mubr.bf16.mxu1 %v600_v1  ;;  %v570_v2 = vld [vmem:[%s832_s1] ss:$8 sps:$4 sm:$0xff]   ;;  %v571_v3 = vld [vmem:[%s832_s1 + $0x14] ss:$8 sps:$4 sm:$0xff]  }
   0x2   :  { %178 = vmatprep.subr.bf16.mxu0 %v568_v0  ;;  %551 = vmatprep.subr.bf16.mxu1 %v568_v0  ;;  %v573_v4 = vld [vmem:[%s832_s1 + $0x10] ss:$8 sps:$4 sm:$0xff]   ;;  %v574_v5 = vld [vmem:[%s832_s1 + $0x24] ss:$8 sps:$4 sm:$0xff]   ;;  %v576_v6 = vld [vmem:[%s832_s1 + $0x20] ss:$8 sps:$4 sm:$0xff]  }
   0x3   :  { %179 = vmatpush1.bf16.msra.mxu0 %v570_v2  ;;  %559 = vmatpush1.bf16.msra.mxu1 %v570_v2  ;;  %v577_v7 = vld [vmem:[%s832_s1 + $0x34] ss:$8 sps:$4 sm:$0xff]   ;;  %v579_v8 = vld [vmem:[%s832_s1 + $0x30] ss:$8 sps:$4 sm:$0xff]   ;;  %v580_v9 = vld [vmem:[%s832_s1 + $0x44] ss:$8 sps:$4 sm:$0xff]  }
   0x4   :  { %180 = vmatprep.subr.bf16.mxu0 %v571_v3  ;;  %552 = vmatprep.subr.bf16.mxu1 %v571_v3  ;;  %v582_v10 = vld [vmem:[%s832_s1 + $0x40] ss:$8 sps:$4 sm:$0xff]   ;;  %v583_v11 = vld [vmem:[%s832_s1 + $0x54] ss:$8 sps:$4 sm:$0xff]   ;;  %v585_v12 = vld [vmem:[%s832_s1 + $0x50] ss:$8 sps:$4 sm:$0xff]  }
   0x5   :  { %v586_v13 = vld [vmem:[%s832_s1 + $0x64] ss:$8 sps:$4 sm:$0xff]   ;;  %v588_v14 = vld [vmem:[%s832_s1 + $0x60] ss:$8 sps:$4 sm:$0xff]   ;;  %v589_v15 = vld [vmem:[%s832_s1 + $0x74] ss:$8 sps:$4 sm:$0xff]  }
   0x6   :  { %v591_v16 = vld [vmem:[%s832_s1 + $0x70] ss:$8 sps:$4 sm:$0xff]   ;;  %v592_v17 = vld [vmem:[%s833_s0] sm:$0xff]   ;;  %v594_v19 = vld [vmem:[%s833_s0 + $0x8] sm:$0xff]   ;;  %v294_v26 = vshrl.u32 %v293_v25, 7 }
   0x7   :  { %181 = vmatpush1.bf16.msra.mxu0 %v573_v4  ;;  %560 = vmatpush1.bf16.msra.mxu1 %v573_v4  ;;  %v593_v18 = vld [vmem:[%s833_s0 + $0x20] sm:$0xff]   ;;  %v595_v20 = vld [vmem:[%s833_s0 + $0x28] sm:$0xff]   ;;  %v596_v21 = vld [vmem:[%s833_s0 + $0x10] sm:$0xff]  }
   0x8   :  { %182 = vmatprep.subr.bf16.mxu0 %v574_v5  ;;  %553 = vmatprep.subr.bf16.mxu1 %v574_v5  ;;  %v597_v22 = vld [vmem:[%s833_s0 + $0x30] sm:$0xff]   ;;  %v598_v23 = vld [vmem:[%s833_s0 + $0x18] sm:$0xff]   ;;  %v295_v27 = vsub.s32 0, %v294_v26  ;;  %v291_v28 = vld [vmem:[%s834_s2] sm:$0x3]  ;;  %v299_v29 = vsub.s32 1, %v294_v26 }
   0x9   :  { %v599_v24 = vld [vmem:[%s833_s0 + $0x38] sm:$0xff]   ;;  %v335_v30 = vld [vmem:[%s835_s3] sm:$0x3] }
   0xa   :  { %v712_v31 = vrot.slane %v291_v28, %v295_v27  ;;  %v714_v32 = vrot.slane %v291_v28, %v299_v29  ;;  %v716_v33 = vrot.slane %v335_v30, %v295_v27  ;;  %v718_v36 = vrot.slane %v335_v30, %v299_v29 }
   0xb   :  { %183 = vmatpush1.bf16.msra.mxu0 %v576_v6  ;;  %561 = vmatpush1.bf16.msra.mxu1 %v576_v6 }
   0xc   :  { %184 = vmatprep.subr.bf16.mxu0 %v577_v7  ;;  %554 = vmatprep.subr.bf16.mxu1 %v577_v7 }
   0xf   :  { %185 = vmatpush1.bf16.msra.mxu0 %v579_v8  ;;  %562 = vmatpush1.bf16.msra.mxu1 %v579_v8 }
  0x10   :  { %186 = vmatprep.subr.bf16.mxu0 %v580_v9  ;;  %555 = vmatprep.subr.bf16.mxu1 %v580_v9 }
  0x13   :  { %187 = vmatpush1.bf16.msra.mxu0 %v582_v10  ;;  %563 = vmatpush1.bf16.msra.mxu1 %v582_v10 }
  0x14   :  { %188 = vmatprep.subr.bf16.mxu0 %v583_v11  ;;  %556 = vmatprep.subr.bf16.mxu1 %v583_v11 }
  0x17   :  { %189 = vmatpush1.bf16.msra.mxu0 %v585_v12  ;;  %564 = vmatpush1.bf16.msra.mxu1 %v585_v12 }
  0x18   :  { %190 = vmatprep.subr.bf16.mxu0 %v586_v13  ;;  %557 = vmatprep.subr.bf16.mxu1 %v586_v13 }
  0x1b   :  { %191 = vmatpush1.bf16.msra.mxu0 %v588_v14  ;;  %565 = vmatpush1.bf16.msra.mxu1 %v588_v14 }
  0x1c   :  { %192 = vmatprep.subr.bf16.mxu0 %v589_v15  ;;  %558 = vmatprep.subr.bf16.mxu1 %v589_v15 }
  0x1f   :  { %193 = vmatpush1.bf16.msra.mxu0 %v591_v16  ;;  %566 = vmatpush1.bf16.msra.mxu1 %v591_v16 }
  0x22   :  { %211 = vmatmul.mubr.bf16.vlgmr.msra.gmra.mrb[0].mxu0 %v592_v17  ;;  %251 = vmatmul.mubr.bf16.vlgmr.msra.gmra.mrb[0].mxu1 %v593_v18 }
  0x23   :  { %220 = vmatprep.mubr.bf16.mxu0 %v600_v1  ;;  %260 = vmatprep.mubr.bf16.mxu1 %v600_v1 }
  0x2a   :  { %221 = vmatmul.mubr.bf16.gmra.mrb[4].mxu0 %v594_v19  ;;  %261 = vmatmul.mubr.bf16.gmra.mrb[4].mxu1 %v595_v20 }
  0x2b   :  { %230 = vmatprep.mubr.bf16.mxu0 %v600_v1  ;;  %270 = vmatprep.mubr.bf16.mxu1 %v600_v1 }
  0x32   :  { %231 = vmatmul.mubr.bf16.gmra.mrb[8].mxu0 %v596_v21  ;;  %271 = vmatmul.mubr.bf16.gmra.mrb[8].mxu1 %v597_v22 }
  0x33   :  { %240 = vmatprep.mubr.bf16.mxu0 %v600_v1  ;;  %280 = vmatprep.mubr.bf16.mxu1 %v600_v1 }
  0x3a   :  { %241 = vmatmul.mubr.bf16.gmra.mrb[12].mxu0 %v598_v23  ;;  %281 = vmatmul.mubr.bf16.gmra.mrb[12].mxu1 %v599_v24 }
  0xf5   :  { %v212_v34 = vpop.f32.mrb[0].mxu0  ;;  %v252_v35 = vpop.f32.mrb[0].mxu1 }
  0xf6   :  { %v303_v37 = vmul.f32 %v712_v31, %v212_v34  ;;  %v319_v38 = vmul.f32 %v712_v31, %v252_v35  ;;  %v214_v39 = vpop.f32.mrb[1].mxu0  ;;  %v254_v40 = vpop.f32.mrb[1].mxu1 }
  0xf7   :  { %v304_v41 = vmul.f32 %v714_v32, %v214_v39  ;;  %v320_v42 = vmul.f32 %v714_v32, %v254_v40  ;;  %v216_v43 = vpop.f32.mrb[2].mxu0  ;;  %v256_v44 = vpop.f32.mrb[2].mxu1 }
  0xf8   :  { %v347_v45 = vadd.f32 %v716_v33, %v303_v37  ;;  %v363_v46 = vadd.f32 %v716_v33, %v319_v38  ;;  %v305_v47 = vmul.f32 %v712_v31, %v216_v43  ;;  %v321_v48 = vmul.f32 %v712_v31, %v256_v44  ;;  %v218_v49 = vpop.f32.mrb[3].mxu0  ;;  %v258_v50 = vpop.f32.mrb[3].mxu1 }
  0xf9   :  { %v348_v51 = vadd.f32 %v718_v36, %v304_v41  ;;  %v364_v52 = vadd.f32 %v718_v36, %v320_v42  ;;  %v306_v53 = vmul.f32 %v714_v32, %v218_v49  ;;  %v322_v54 = vmul.f32 %v714_v32, %v258_v50 }
  0xfa   :  { %v349_v55 = vadd.f32 %v716_v33, %v305_v47  ;;  %v365_v56 = vadd.f32 %v716_v33, %v321_v48 }
  0xfb   :  { %v535_v57 = vpack.c.bf16 %v348_v51, %v347_v45  ;;  %v543_v58 = vpack.c.bf16 %v364_v52, %v363_v46  ;;  %v350_v59 = vadd.f32 %v718_v36, %v306_v53  ;;  %v366_v60 = vadd.f32 %v718_v36, %v322_v54 }
  0xfd   :  { %475 = vst [vmem:[%s836_s4] sm:$0xff] %v535_v57  ;;  %483 = vst [vmem:[%s836_s4 + $0x40] sm:$0xff] %v543_v58  ;;  %v536_v61 = vpack.c.bf16 %v350_v59, %v349_v55  ;;  %v544_v62 = vpack.c.bf16 %v366_v60, %v365_v56  ;;  %v222_v63 = vpop.f32.mrb[4].mxu0  ;;  %v262_v0 = vpop.f32.mrb[4].mxu1 }
  0xfe   :  { %v307_v1 = vmul.f32 %v712_v31, %v222_v63  ;;  %v323_v2 = vmul.f32 %v712_v31, %v262_v0  ;;  %v224_v3 = vpop.f32.mrb[5].mxu0  ;;  %v264_v4 = vpop.f32.mrb[5].mxu1 }
  0xff   :  { %476 = vst [vmem:[%s836_s4 + $0x8] sm:$0xff] %v536_v61  ;;  %484 = vst [vmem:[%s836_s4 + $0x48] sm:$0xff] %v544_v62  ;;  %v308_v5 = vmul.f32 %v714_v32, %v224_v3  ;;  %v324_v6 = vmul.f32 %v714_v32, %v264_v4  ;;  %v226_v7 = vpop.f32.mrb[6].mxu0  ;;  %v266_v8 = vpop.f32.mrb[6].mxu1 }
 0x100   :  { %v351_v9 = vadd.f32 %v716_v33, %v307_v1  ;;  %v367_v10 = vadd.f32 %v716_v33, %v323_v2  ;;  %v309_v11 = vmul.f32 %v712_v31, %v226_v7  ;;  %v325_v12 = vmul.f32 %v712_v31, %v266_v8  ;;  %v228_v13 = vpop.f32.mrb[7].mxu0  ;;  %v268_v14 = vpop.f32.mrb[7].mxu1 }
 0x101   :  { %v352_v15 = vadd.f32 %v718_v36, %v308_v5  ;;  %v368_v16 = vadd.f32 %v718_v36, %v324_v6  ;;  %v310_v17 = vmul.f32 %v714_v32, %v228_v13  ;;  %v326_v18 = vmul.f32 %v714_v32, %v268_v14 }
 0x102   :  { %v353_v19 = vadd.f32 %v716_v33, %v309_v11  ;;  %v369_v20 = vadd.f32 %v716_v33, %v325_v12 }
 0x103   :  { %v537_v21 = vpack.c.bf16 %v352_v15, %v351_v9  ;;  %v545_v22 = vpack.c.bf16 %v368_v16, %v367_v10  ;;  %v354_v23 = vadd.f32 %v718_v36, %v310_v17  ;;  %v370_v24 = vadd.f32 %v718_v36, %v326_v18 }
 0x105   :  { %477 = vst [vmem:[%s836_s4 + $0x10] sm:$0xff] %v537_v21  ;;  %485 = vst [vmem:[%s836_s4 + $0x50] sm:$0xff] %v545_v22  ;;  %v538_v25 = vpack.c.bf16 %v354_v23, %v353_v19  ;;  %v546_v26 = vpack.c.bf16 %v370_v24, %v369_v20  ;;  %v232_v27 = vpop.f32.mrb[8].mxu0  ;;  %v272_v28 = vpop.f32.mrb[8].mxu1 }
 0x106   :  { %v311_v29 = vmul.f32 %v712_v31, %v232_v27  ;;  %v327_v30 = vmul.f32 %v712_v31, %v272_v28  ;;  %v234_v34 = vpop.f32.mrb[9].mxu0  ;;  %v274_v35 = vpop.f32.mrb[9].mxu1 }
 0x107   :  { %478 = vst [vmem:[%s836_s4 + $0x18] sm:$0xff] %v538_v25  ;;  %486 = vst [vmem:[%s836_s4 + $0x58] sm:$0xff] %v546_v26  ;;  %v312_v37 = vmul.f32 %v714_v32, %v234_v34  ;;  %v328_v38 = vmul.f32 %v714_v32, %v274_v35  ;;  %v236_v39 = vpop.f32.mrb[10].mxu0  ;;  %v276_v40 = vpop.f32.mrb[10].mxu1 }
 0x108   :  { %v355_v41 = vadd.f32 %v716_v33, %v311_v29  ;;  %v371_v42 = vadd.f32 %v716_v33, %v327_v30  ;;  %v313_v43 = vmul.f32 %v712_v31, %v236_v39  ;;  %v329_v44 = vmul.f32 %v712_v31, %v276_v40  ;;  %v238_v45 = vpop.f32.mrb[11].mxu0  ;;  %v278_v46 = vpop.f32.mrb[11].mxu1 }
 0x109   :  { %v356_v47 = vadd.f32 %v718_v36, %v312_v37  ;;  %v372_v48 = vadd.f32 %v718_v36, %v328_v38  ;;  %v314_v49 = vmul.f32 %v714_v32, %v238_v45  ;;  %v330_v50 = vmul.f32 %v714_v32, %v278_v46 }
 0x10a   :  { %v357_v51 = vadd.f32 %v716_v33, %v313_v43  ;;  %v373_v52 = vadd.f32 %v716_v33, %v329_v44 }
 0x10b   :  { %v539_v53 = vpack.c.bf16 %v356_v47, %v355_v41  ;;  %v547_v54 = vpack.c.bf16 %v372_v48, %v371_v42  ;;  %v358_v55 = vadd.f32 %v718_v36, %v314_v49  ;;  %v374_v56 = vadd.f32 %v718_v36, %v330_v50 }
 0x10d   :  { %479 = vst [vmem:[%s836_s4 + $0x20] sm:$0xff] %v539_v53  ;;  %487 = vst [vmem:[%s836_s4 + $0x60] sm:$0xff] %v547_v54  ;;  %v540_v57 = vpack.c.bf16 %v358_v55, %v357_v51  ;;  %v548_v58 = vpack.c.bf16 %v374_v56, %v373_v52  ;;  %v242_v59 = vpop.f32.mrb[12].mxu0  ;;  %v282_v60 = vpop.f32.mrb[12].mxu1 }
 0x10e   :  { %v315_v61 = vmul.f32 %v712_v31, %v242_v59  ;;  %v331_v62 = vmul.f32 %v712_v31, %v282_v60  ;;  %v244_v63 = vpop.f32.mrb[13].mxu0  ;;  %v284_v0 = vpop.f32.mrb[13].mxu1 }
 0x10f   :  { %480 = vst [vmem:[%s836_s4 + $0x28] sm:$0xff] %v540_v57  ;;  %488 = vst [vmem:[%s836_s4 + $0x68] sm:$0xff] %v548_v58  ;;  %v316_v1 = vmul.f32 %v714_v32, %v244_v63  ;;  %v332_v2 = vmul.f32 %v714_v32, %v284_v0  ;;  %v246_v3 = vpop.f32.mrb[14].mxu0  ;;  %v286_v4 = vpop.f32.mrb[14].mxu1 }
 0x110   :  { %v359_v5 = vadd.f32 %v716_v33, %v315_v61  ;;  %v375_v6 = vadd.f32 %v716_v33, %v331_v62  ;;  %v317_v7 = vmul.f32 %v712_v31, %v246_v3  ;;  %v333_v8 = vmul.f32 %v712_v31, %v286_v4  ;;  %v248_v9 = vpop.f32.mrb[15].mxu0  ;;  %v288_v10 = vpop.f32.mrb[15].mxu1 }
 0x111   :  { %v360_v11 = vadd.f32 %v718_v36, %v316_v1  ;;  %v376_v12 = vadd.f32 %v718_v36, %v332_v2  ;;  %v318_v13 = vmul.f32 %v714_v32, %v248_v9  ;;  %v334_v14 = vmul.f32 %v714_v32, %v288_v10 }
 0x112   :  { %v361_v15 = vadd.f32 %v716_v33, %v317_v7  ;;  %v377_v16 = vadd.f32 %v716_v33, %v333_v8 }
 0x113   :  { %v541_v17 = vpack.c.bf16 %v360_v11, %v359_v5  ;;  %v549_v18 = vpack.c.bf16 %v376_v12, %v375_v6  ;;  %v362_v19 = vadd.f32 %v718_v36, %v318_v13  ;;  %v378_v31 = vadd.f32 %v718_v36, %v334_v14 }
 0x115   :  { %481 = vst [vmem:[%s836_s4 + $0x30] sm:$0xff] %v541_v17  ;;  %489 = vst [vmem:[%s836_s4 + $0x70] sm:$0xff] %v549_v18  ;;  %v542_v20 = vpack.c.bf16 %v362_v19, %v361_v15  ;;  %v550_v32 = vpack.c.bf16 %v378_v31, %v377_v16 }
 0x117   :  { %482 = vst [vmem:[%s836_s4 + $0x38] sm:$0xff] %v542_v20  ;;  %490 = vst [vmem:[%s836_s4 + $0x78] sm:$0xff] %v550_v32 }

// kernel: shared_module_fr_forward.39
= control target key start
LH: loop header
LB: loop body
LE: loop exit
PB: predicated region body
PF: predicated region fallthrough
CT: control target
= control target key end

     0   :  { %s905_s1 = inlined_call_operand.vmem [shape: bf16[256,128], index: 1, kind: input, shape index: {}]   ;;  %s906_s0 = inlined_call_operand.vmem [shape: bf16[128,256], index: 0, kind: input, shape index: {}]   ;;  %s907_s2 = inlined_call_operand.vmem [shape: f32[1,128], index: 2, kind: input, shape index: {}]   ;;  %s908_s3 = inlined_call_operand.vmem [shape: f32[1,128], index: 3, kind: input, shape index: {}]   ;;  %s909_s4 = inlined_call_operand.vmem [shape: bf16[128,128], index: 4, kind: output, shape index: {}]  }
   0x1   :  { %v678_v0 = vld [vmem:[%s905_s1 + $0x40] sm:$0xff]   ;;  %v680_v2 = vld [vmem:[%s905_s1 + $0x48] sm:$0xff]   ;;  %v682_v4 = vld [vmem:[%s905_s1 + $0x50] sm:$0xff]  }
   0x2   :  { %v679_v1 = vld [vmem:[%s905_s1] sm:$0xff]   ;;  %598 = vmatprep.subr.bf16.mxu0 %v678_v0  ;;  %662 = vmatprep.subr.bf16.mxu1 %v678_v0  ;;  %v681_v3 = vld [vmem:[%s905_s1 + $0x8] sm:$0xff]   ;;  %v683_v5 = vld [vmem:[%s905_s1 + $0x10] sm:$0xff]  }
   0x3   :  { %599 = vmatpush3.bf16.msra.mxu0 %v679_v1  ;;  %670 = vmatpush3.bf16.msra.mxu1 %v679_v1  ;;  %v684_v6 = vld [vmem:[%s905_s1 + $0x58] sm:$0xff]   ;;  %v686_v8 = vld [vmem:[%s905_s1 + $0x60] sm:$0xff]   ;;  %v688_v10 = vld [vmem:[%s905_s1 + $0x68] sm:$0xff]  }
   0x4   :  { %600 = vmatprep.subr.bf16.mxu0 %v680_v2  ;;  %663 = vmatprep.subr.bf16.mxu1 %v680_v2  ;;  %v685_v7 = vld [vmem:[%s905_s1 + $0x18] sm:$0xff]   ;;  %v687_v9 = vld [vmem:[%s905_s1 + $0x20] sm:$0xff]   ;;  %v689_v13 = vld [vmem:[%s905_s1 + $0x28] sm:$0xff]  }
   0x5   :  { %v696_v11 = vld [vmem:[%s906_s0 + $0x4] ss:$8 sps:$4 sm:$0xff]   ;;  %v690_v14 = vld [vmem:[%s905_s1 + $0x70] sm:$0xff]   ;;  %v692_v16 = vld [vmem:[%s905_s1 + $0x78] sm:$0xff]  }
   0x6   :  { %v699_v12 = vld [vmem:[%s906_s0 + $0x44] ss:$8 sps:$4 sm:$0xff]   ;;  %274 = vmatprep.mubr.bf16.mxu0 %v696_v11  ;;  %v691_v15 = vld [vmem:[%s905_s1 + $0x30] sm:$0xff]   ;;  %v693_v17 = vld [vmem:[%s905_s1 + $0x38] sm:$0xff]  }
   0x7   :  { %601 = vmatpush3.bf16.msra.mxu0 %v681_v3  ;;  %671 = vmatpush3.bf16.msra.mxu1 %v681_v3  ;;  %v694_v18 = vld [vmem:[%s906_s0] ss:$8 sps:$4 sm:$0xff]   ;;  %v700_v20 = vld [vmem:[%s906_s0 + $0x14] ss:$8 sps:$4 sm:$0xff]   ;;  %v704_v22 = vld [vmem:[%s906_s0 + $0x10] ss:$8 sps:$4 sm:$0xff]  }
   0x8   :  { %602 = vmatprep.subr.bf16.mxu0 %v682_v4  ;;  %664 = vmatprep.subr.bf16.mxu1 %v682_v4  ;;  %v697_v19 = vld [vmem:[%s906_s0 + $0x40] ss:$8 sps:$4 sm:$0xff]   ;;  %v702_v21 = vld [vmem:[%s906_s0 + $0x54] ss:$8 sps:$4 sm:$0xff]   ;;  %v705_v23 = vld [vmem:[%s906_s0 + $0x50] ss:$8 sps:$4 sm:$0xff]  }
   0x9   :  { %306 = vmatprep.mubr.bf16.mxu1 %v699_v12  ;;  %v706_v24 = vld [vmem:[%s906_s0 + $0x24] ss:$8 sps:$4 sm:$0xff]   ;;  %v710_v26 = vld [vmem:[%s906_s0 + $0x20] ss:$8 sps:$4 sm:$0xff]   ;;  %v712_v28 = vld [vmem:[%s906_s0 + $0x34] ss:$8 sps:$4 sm:$0xff]  }
   0xa   :  { %v708_v25 = vld [vmem:[%s906_s0 + $0x64] ss:$8 sps:$4 sm:$0xff]   ;;  %v711_v27 = vld [vmem:[%s906_s0 + $0x60] ss:$8 sps:$4 sm:$0xff]   ;;  %v714_v29 = vld [vmem:[%s906_s0 + $0x74] ss:$8 sps:$4 sm:$0xff]  }
   0xb   :  { %603 = vmatpush3.bf16.msra.mxu0 %v683_v5  ;;  %672 = vmatpush3.bf16.msra.mxu1 %v683_v5  ;;  %v716_v30 = vld [vmem:[%s906_s0 + $0x30] ss:$8 sps:$4 sm:$0xff]   ;;  %v842_v35 = vld [vmem:[%s907_s2] ss:$0 sm:$0xff] }
   0xc   :  { %604 = vmatprep.subr.bf16.mxu0 %v684_v6  ;;  %665 = vmatprep.subr.bf16.mxu1 %v684_v6  ;;  %v717_v31 = vld [vmem:[%s906_s0 + $0x70] ss:$8 sps:$4 sm:$0xff]   ;;  %v847_v41 = vld [vmem:[%s908_s3] ss:$0 sm:$0xff] }
   0xf   :  { %605 = vmatpush3.bf16.msra.mxu0 %v685_v7  ;;  %673 = vmatpush3.bf16.msra.mxu1 %v685_v7 }
  0x10   :  { %606 = vmatprep.subr.bf16.mxu0 %v686_v8  ;;  %666 = vmatprep.subr.bf16.mxu1 %v686_v8 }
  0x13   :  { %607 = vmatpush3.bf16.msra.mxu0 %v687_v9  ;;  %674 = vmatpush3.bf16.msra.mxu1 %v687_v9 }
  0x14   :  { %608 = vmatprep.subr.bf16.mxu0 %v688_v10  ;;  %667 = vmatprep.subr.bf16.mxu1 %v688_v10 }
  0x17   :  { %609 = vmatpush3.bf16.msra.mxu0 %v689_v13  ;;  %675 = vmatpush3.bf16.msra.mxu1 %v689_v13 }
  0x18   :  { %610 = vmatprep.subr.bf16.mxu0 %v690_v14  ;;  %668 = vmatprep.subr.bf16.mxu1 %v690_v14 }
  0x1b   :  { %611 = vmatpush3.bf16.msra.mxu0 %v691_v15  ;;  %676 = vmatpush3.bf16.msra.mxu1 %v691_v15 }
  0x1c   :  { %612 = vmatprep.subr.bf16.mxu0 %v692_v16  ;;  %669 = vmatprep.subr.bf16.mxu1 %v692_v16 }
  0x1f   :  { %613 = vmatpush3.bf16.msra.mxu0 %v693_v17  ;;  %677 = vmatpush3.bf16.msra.mxu1 %v693_v17 }
  0x22   :  { %275 = vmatmul.mubr.bf16.vlgmr.msra.gmra.mrb[0].mxu0 %v694_v18  ;;  %307 = vmatmul.mubr.bf16.vlgmr.msra.gmra.mrb[0].mxu1 %v697_v19 }
  0x23   :  { %282 = vmatprep.mubr.bf16.mxu0 %v700_v20  ;;  %314 = vmatprep.mubr.bf16.mxu1 %v702_v21 }
  0x2a   :  { %283 = vmatmul.mubr.bf16.gmra.mrb[4].mxu0 %v704_v22  ;;  %315 = vmatmul.mubr.bf16.gmra.mrb[4].mxu1 %v705_v23 }
  0x2b   :  { %290 = vmatprep.mubr.bf16.mxu0 %v706_v24  ;;  %322 = vmatprep.mubr.bf16.mxu1 %v708_v25 }
  0x32   :  { %291 = vmatmul.mubr.bf16.gmra.mrb[8].mxu0 %v710_v26  ;;  %323 = vmatmul.mubr.bf16.gmra.mrb[8].mxu1 %v711_v27 }
  0x33   :  { %298 = vmatprep.mubr.bf16.mxu0 %v712_v28  ;;  %330 = vmatprep.mubr.bf16.mxu1 %v714_v29 }
  0x3a   :  { %299 = vmatmul.mubr.bf16.gmra.mrb[12].mxu0 %v716_v30  ;;  %331 = vmatmul.mubr.bf16.gmra.mrb[12].mxu1 %v717_v31 }
  0xf5   :  { %v614_v32 = vpop.f32.mrb[0].mxu0  ;;  %v638_v33 = vpop.f32.mrb[0].mxu1 }
  0xf6   :  { %v615_v34 = vpop.f32.mrb[1].mxu0  ;;  %v639_v36 = vpop.f32.mrb[1].mxu1 }
  0xf7   :  { %v616_v37 = vadd.f32 %v615_v34, %v614_v32  ;;  %v640_v38 = vadd.f32 %v639_v36, %v638_v33  ;;  %v617_v39 = vpop.f32.mrb[2].mxu0  ;;  %v641_v40 = vpop.f32.mrb[2].mxu1 }
  0xf8   :  { %v618_v42 = vpop.f32.mrb[3].mxu0  ;;  %v642_v43 = vpop.f32.mrb[3].mxu1 }
  0xf9   :  { %v346_v44 = vmul.f32 %v616_v37, %v842_v35  ;;  %v354_v45 = vmul.f32 %v640_v38, %v842_v35  ;;  %v619_v46 = vadd.f32 %v618_v42, %v617_v39  ;;  %v643_v47 = vadd.f32 %v642_v43, %v641_v40 }
  0xfb   :  { %v369_v48 = vadd.f32 %v847_v41, %v346_v44  ;;  %v377_v49 = vadd.f32 %v847_v41, %v354_v45  ;;  %v347_v50 = vmul.f32 %v619_v46, %v842_v35  ;;  %v355_v51 = vmul.f32 %v643_v47, %v842_v35 }
  0xfd   :  { %v370_v52 = vadd.f32 %v847_v41, %v347_v50  ;;  %v378_v53 = vadd.f32 %v847_v41, %v355_v51  ;;  %v620_v54 = vpop.f32.mrb[4].mxu0  ;;  %v644_v55 = vpop.f32.mrb[4].mxu1  ;;  %v385_v56 = vmax.f32 %v369_v48, 0.0  ;;  %v393_v57 = vmax.f32 %v377_v49, 0.0 }
  0xfe   :  { %v621_v58 = vpop.f32.mrb[5].mxu0  ;;  %v645_v59 = vpop.f32.mrb[5].mxu1 }
  0xff   :  { %v386_v60 = vmax.f32 %v370_v52, 0.0  ;;  %v394_v61 = vmax.f32 %v378_v53, 0.0  ;;  %v622_v62 = vadd.f32 %v621_v58, %v620_v54  ;;  %v646_v63 = vadd.f32 %v645_v59, %v644_v55  ;;  %v623_v0 = vpop.f32.mrb[6].mxu0  ;;  %v647_v1 = vpop.f32.mrb[6].mxu1 }
 0x100   :  { %v624_v2 = vpop.f32.mrb[7].mxu0  ;;  %v648_v3 = vpop.f32.mrb[7].mxu1 }
 0x101   :  { %v554_v4 = vpack.c.bf16 %v386_v60, %v385_v56  ;;  %v574_v5 = vpack.c.bf16 %v394_v61, %v393_v57  ;;  %v348_v6 = vmul.f32 %v622_v62, %v842_v35  ;;  %v356_v7 = vmul.f32 %v646_v63, %v842_v35 }
 0x102   :  { %v625_v8 = vadd.f32 %v624_v2, %v623_v0  ;;  %v649_v9 = vadd.f32 %v648_v3, %v647_v1 }
 0x103   :  { %555 = vst [vmem:[%s909_s4] sm:$0xff] %v554_v4   ;;  %594 = vst [vmem:[%s909_s4 + $0x20] sm:$0xff] %v574_v5   ;;  %v371_v10 = vadd.f32 %v847_v41, %v348_v6  ;;  %v379_v11 = vadd.f32 %v847_v41, %v356_v7 }
 0x104   :  { %v349_v12 = vmul.f32 %v625_v8, %v842_v35  ;;  %v357_v13 = vmul.f32 %v649_v9, %v842_v35 }
 0x105   :  { %v626_v14 = vpop.f32.mrb[8].mxu0  ;;  %v650_v15 = vpop.f32.mrb[8].mxu1  ;;  %v387_v24 = vmax.f32 %v371_v10, 0.0  ;;  %v395_v25 = vmax.f32 %v379_v11, 0.0 }
 0x106   :  { %v372_v16 = vadd.f32 %v847_v41, %v349_v12  ;;  %v380_v17 = vadd.f32 %v847_v41, %v357_v13  ;;  %v627_v18 = vpop.f32.mrb[9].mxu0  ;;  %v651_v19 = vpop.f32.mrb[9].mxu1 }
 0x107   :  { %v628_v20 = vadd.f32 %v627_v18, %v626_v14  ;;  %v652_v21 = vadd.f32 %v651_v19, %v650_v15  ;;  %v629_v22 = vpop.f32.mrb[10].mxu0  ;;  %v653_v23 = vpop.f32.mrb[10].mxu1 }
 0x108   :  { %v388_v26 = vmax.f32 %v372_v16, 0.0  ;;  %v396_v27 = vmax.f32 %v380_v17, 0.0  ;;  %v630_v28 = vpop.f32.mrb[11].mxu0  ;;  %v654_v29 = vpop.f32.mrb[11].mxu1 }
 0x109   :  { %v350_v30 = vmul.f32 %v628_v20, %v842_v35  ;;  %v358_v31 = vmul.f32 %v652_v21, %v842_v35  ;;  %v631_v32 = vadd.f32 %v630_v28, %v629_v22  ;;  %v655_v33 = vadd.f32 %v654_v29, %v653_v23 }
 0x10a   :  { %v559_v34 = vpack.c.bf16 %v388_v26, %v387_v24  ;;  %v579_v36 = vpack.c.bf16 %v396_v27, %v395_v25 }
 0x10b   :  { %v373_v37 = vadd.f32 %v847_v41, %v350_v30  ;;  %v381_v38 = vadd.f32 %v847_v41, %v358_v31  ;;  %v351_v39 = vmul.f32 %v631_v32, %v842_v35  ;;  %v359_v40 = vmul.f32 %v655_v33, %v842_v35 }
 0x10c   :  { %591 = vst [vmem:[%s909_s4 + $0x8] sm:$0xff] %v559_v34   ;;  %595 = vst [vmem:[%s909_s4 + $0x28] sm:$0xff] %v579_v36  }
 0x10d   :  { %v374_v42 = vadd.f32 %v847_v41, %v351_v39  ;;  %v382_v43 = vadd.f32 %v847_v41, %v359_v40  ;;  %v632_v44 = vpop.f32.mrb[12].mxu0  ;;  %v656_v45 = vpop.f32.mrb[12].mxu1  ;;  %v389_v46 = vmax.f32 %v373_v37, 0.0  ;;  %v397_v47 = vmax.f32 %v381_v38, 0.0 }
 0x10e   :  { %v633_v48 = vpop.f32.mrb[13].mxu0  ;;  %v657_v49 = vpop.f32.mrb[13].mxu1 }
 0x10f   :  { %v390_v50 = vmax.f32 %v374_v42, 0.0  ;;  %v398_v51 = vmax.f32 %v382_v43, 0.0  ;;  %v634_v52 = vadd.f32 %v633_v48, %v632_v44  ;;  %v658_v53 = vadd.f32 %v657_v49, %v656_v45  ;;  %v635_v54 = vpop.f32.mrb[14].mxu0  ;;  %v659_v55 = vpop.f32.mrb[14].mxu1 }
 0x110   :  { %v636_v56 = vpop.f32.mrb[15].mxu0  ;;  %v660_v57 = vpop.f32.mrb[15].mxu1 }
 0x111   :  { %v564_v58 = vpack.c.bf16 %v390_v50, %v389_v46  ;;  %v584_v59 = vpack.c.bf16 %v398_v51, %v397_v47  ;;  %v352_v60 = vmul.f32 %v634_v52, %v842_v35  ;;  %v360_v61 = vmul.f32 %v658_v53, %v842_v35 }
 0x112   :  { %v637_v62 = vadd.f32 %v636_v56, %v635_v54  ;;  %v661_v63 = vadd.f32 %v660_v57, %v659_v55 }
 0x113   :  { %592 = vst [vmem:[%s909_s4 + $0x10] sm:$0xff] %v564_v58   ;;  %596 = vst [vmem:[%s909_s4 + $0x30] sm:$0xff] %v584_v59   ;;  %v375_v0 = vadd.f32 %v847_v41, %v352_v60  ;;  %v383_v1 = vadd.f32 %v847_v41, %v360_v61 }
 0x114   :  { %v353_v2 = vmul.f32 %v637_v62, %v842_v35  ;;  %v361_v3 = vmul.f32 %v661_v63, %v842_v35 }
 0x115   :  { %v391_v6 = vmax.f32 %v375_v0, 0.0  ;;  %v399_v7 = vmax.f32 %v383_v1, 0.0 }
 0x116   :  { %v376_v4 = vadd.f32 %v847_v41, %v353_v2  ;;  %v384_v5 = vadd.f32 %v847_v41, %v361_v3 }
 0x118   :  { %v392_v8 = vmax.f32 %v376_v4, 0.0  ;;  %v400_v9 = vmax.f32 %v384_v5, 0.0 }
 0x11a   :  { %v569_v10 = vpack.c.bf16 %v392_v8, %v391_v6  ;;  %v589_v11 = vpack.c.bf16 %v400_v9, %v399_v7 }
 0x11c   :  { %593 = vst [vmem:[%s909_s4 + $0x18] sm:$0xff] %v569_v10   ;;  %597 = vst [vmem:[%s909_s4 + $0x38] sm:$0xff] %v589_v11  }

// kernel: shared_module_fr_forward.49
= control target key start
LH: loop header
LB: loop body
LE: loop exit
PB: predicated region body
PF: predicated region fallthrough
CT: control target
= control target key end

     0   :  { %s951_s15 = smov 0   ;;  %s953_s16 = smov 0   ;;  %s1076_s0 = inlined_call_operand.vmem [shape: bf16[32,128], index: 0, kind: input, shape index: {}]   ;;  %s1077_s1 = inlined_call_operand.vmem [shape: bf16[128,512], index: 1, kind: input, shape index: {}]   ;;  %s1078_s2 = inlined_call_operand.vmem [shape: f32[1,512], index: 2, kind: input, shape index: {}]   ;;  %s1079_s3 = inlined_call_operand.vmem [shape: f32[1,512], index: 3, kind: input, shape index: {}]   ;;  %s1080_s4 = inlined_call_operand.vmem [shape: bf16[32,512], index: 4, kind: output, shape index: {}]  }
   0x1   :  { %s955_s17 = smov 0   ;;  %s957_s18 = smov 0  }
   0x2   :  { %s959_s19 = smov 0  }
   0x3 LB: > { %s23_s20 = sadd.s32 1, %s919_s18  ;;  %s756_s21 = sadd.s32 4294967295, %s923_s19   ;;  %s923_s19 = sphi %s959_s19, %s14_s19   ;;  %s919_s18 = sphi %s957_s18, %s1085_s18   ;;  %s915_s17 = sphi %s955_s17, %s1084_s17   ;;  %s911_s16 = sphi %s953_s16, %s1083_s16   ;;  %s907_s15 = sphi %s951_s15, %s1082_s15  }
   0x4   : > { %p24_p0 = scmp.ge.s32.totalorder %s23_s20, 2  ;;  %p66_p1 = scmp.ne.s32.totalorder %s911_s16, %s907_s15 }
   0x5   : > { %p67_p2 = scmp.eq.s32.totalorder %s923_s19, 0  ;;  %p150_p4 = scmp.eq.s32.totalorder %s756_s21, 1 }
   0x6   : > { %s1087_s20 = smov (%p24_p0, %s23_s20), 0  ;;  %s59_s23 = sadd.s32 1, %s911_s16 }
   0x7   : > { %p68_p3 = por %p67_p2, %p66_p1  ;;  %s56_s22 = ssub.s32 %s919_s18, %s1087_s20 }
   0x8   : > { %p57_p5 = scmp.eq.s32.totalorder %s56_s22, 0  ;;  %p986_p6 = por %p150_p4, %p66_p1 }
   0x9   : > { %p760_p7 = scmp.ge.s32.totalorder %s923_s19, 2 }
   0xa   : > { %s991_s25 = scalar_select %p57_p5, %s911_s16, %s59_s23  }
   0xb   : > { %181 = sbr.rel (%p760_p7) target bundleno = 30 (0x1e), region = 20 }
  0x12   : > { %184 = sbr.rel (!%p68_p3) target bundleno = 30 (0x1e), region = 24  ;;  %s186_s26 = sand.u32 (%p68_p3), 1, %s911_s16  }
  0x13   : > { %s796_s27 = sshll.u32 (%p68_p3), %s919_s18, 3  ;;  %s761_s28 = sshll.u32 (%p68_p3), %s186_s26, 7 }
  0x14   : > { %s999_s5 = scalar_lea.vmem (%p68_p3), %s1077_s1, %s796_s27  ;;  %s188_s6 = scalar_lea.vmem (%p68_p3), [#allocation2], %s761_s28 }
  0x15   : > { %v249_v0 = vld [vmem:[%s999_s5] sm:$0xff] (%p68_p3)  ;;  %v251_v1 = vld [vmem:[%s999_s5 + $0x10] sm:$0xff] (%p68_p3) }
  0x16   : > { %v253_v2 = vld [vmem:[%s999_s5 + $0x20] sm:$0xff] (%p68_p3)  ;;  %250 = vst [vmem:[%s188_s6] sm:$0xff] (%p68_p3), %v249_v0  ;;  %252 = vst [vmem:[%s188_s6 + $0x8] sm:$0xff] (%p68_p3), %v251_v1  ;;  %v255_v3 = vld [vmem:[%s999_s5 + $0x30] sm:$0xff] (%p68_p3) }
  0x17   : > { %254 = vst [vmem:[%s188_s6 + $0x10] sm:$0xff] (%p68_p3), %v253_v2  ;;  %v257_v4 = vld [vmem:[%s999_s5 + $0x40] sm:$0xff] (%p68_p3)  ;;  %v259_v5 = vld [vmem:[%s999_s5 + $0x50] sm:$0xff] (%p68_p3)  ;;  %256 = vst [vmem:[%s188_s6 + $0x18] sm:$0xff] (%p68_p3), %v255_v3 }
  0x18   : > { %258 = vst [vmem:[%s188_s6 + $0x20] sm:$0xff] (%p68_p3), %v257_v4  ;;  %260 = vst [vmem:[%s188_s6 + $0x28] sm:$0xff] (%p68_p3), %v259_v5  ;;  %v261_v6 = vld [vmem:[%s999_s5 + $0x60] sm:$0xff] (%p68_p3)  ;;  %v263_v7 = vld [vmem:[%s999_s5 + $0x70] sm:$0xff] (%p68_p3) }
  0x19   : > { %v265_v8 = vld [vmem:[%s999_s5 + $0x80] sm:$0xff]  ;;  %262 = vst [vmem:[%s188_s6 + $0x30] sm:$0xff] %v261_v6  ;;  %264 = vst [vmem:[%s188_s6 + $0x38] sm:$0xff] %v263_v7  ;;  %v267_v9 = vld [vmem:[%s999_s5 + $0x90] sm:$0xff] }
  0x1a   : > { %266 = vst [vmem:[%s188_s6 + $0x40] sm:$0xff] %v265_v8  ;;  %v269_v10 = vld [vmem:[%s999_s5 + $0xa0] sm:$0xff]  ;;  %v271_v11 = vld [vmem:[%s999_s5 + $0xb0] sm:$0xff]  ;;  %268 = vst [vmem:[%s188_s6 + $0x48] sm:$0xff] %v267_v9 }
  0x1b   : > { %270 = vst [vmem:[%s188_s6 + $0x50] sm:$0xff] %v269_v10  ;;  %272 = vst [vmem:[%s188_s6 + $0x58] sm:$0xff] %v271_v11  ;;  %v273_v12 = vld [vmem:[%s999_s5 + $0xc0] sm:$0xff]  ;;  %v275_v13 = vld [vmem:[%s999_s5 + $0xd0] sm:$0xff] }
  0x1c   : > { %v277_v14 = vld [vmem:[%s999_s5 + $0xe0] sm:$0xff]  ;;  %274 = vst [vmem:[%s188_s6 + $0x60] sm:$0xff] %v273_v12  ;;  %276 = vst [vmem:[%s188_s6 + $0x68] sm:$0xff] %v275_v13  ;;  %v279_v15 = vld [vmem:[%s999_s5 + $0xf0] sm:$0xff] }
  0x1d   : > { %278 = vst [vmem:[%s188_s6 + $0x70] sm:$0xff] %v277_v14  ;;  %280 = vst [vmem:[%s188_s6 + $0x78] sm:$0xff] %v279_v15 }
  0x1e PF: > { %p764_p8 = scmp.ge.s32.totalorder %s923_s19, 1  ;;  %p301_p9 = scmp.lt.s32.totalorder %s923_s19, 3 }
  0x20   : > { %p302_p10 = pnand %p764_p8, %p301_p9 }
  0x21   : > { %s308_s7 = sand.u32 (!%p302_p10), 1, %s907_s15   ;;  %v925_v16 = vmov (!%p302_p10), 0   ;;  %v883_v33 = vld [vmem:[%s1076_s0] sm:$0xff] (!%p302_p10)   ;;  %v884_v34 = vld [vmem:[%s1076_s0 + $0x8] sm:$0xff] (!%p302_p10)   ;;  %s767_s14 = sshll.u32 (!%p302_p10), %s915_s17, 1  ;;  %v532_v35 = vlaneseq (!%p302_p10) }
  0x22   : > { %305 = sbr.rel (%p302_p10) target bundleno = 299 (0x12b), region = 70  ;;  %s765_s8 = sshll.u32 (!%p302_p10), %s308_s7, 7  ;;  %509 = vmatprep.mubr.bf16.mxu0 (!%p302_p10), %v925_v16  ;;  %519 = vmatprep.mubr.bf16.mxu1 (!%p302_p10), %v925_v16 }
  0x23   : > { %s1022_s9 = scalar_lea.vmem (!%p302_p10), [#allocation2], %s765_s8  ;;  %p353_p11 = scmp.lt.s32.totalorder (!%p302_p10), %s767_s14, 3  ;;  %v533_v36 = vshrl.u32 (!%p302_p10), %v532_v35, 7 }
  0x24   : > { %v859_v17 = vld [vmem:[%s1022_s9 + $0x4] ss:$8 sps:$4 sm:$0xff] (!%p302_p10)   ;;  %v861_v18 = vld [vmem:[%s1022_s9] ss:$8 sps:$4 sm:$0xff] (!%p302_p10)   ;;  %v862_v19 = vld [vmem:[%s1022_s9 + $0x14] ss:$8 sps:$4 sm:$0xff] (!%p302_p10)  }
  0x25   : > { %477 = vmatprep.subr.bf16.mxu0 (!%p302_p10), %v859_v17  ;;  %802 = vmatprep.subr.bf16.mxu1 (!%p302_p10), %v859_v17  ;;  %v864_v20 = vld [vmem:[%s1022_s9 + $0x10] ss:$8 sps:$4 sm:$0xff] (!%p302_p10)   ;;  %v865_v21 = vld [vmem:[%s1022_s9 + $0x24] ss:$8 sps:$4 sm:$0xff] (!%p302_p10)   ;;  %v867_v22 = vld [vmem:[%s1022_s9 + $0x20] ss:$8 sps:$4 sm:$0xff] (!%p302_p10)  }
  0x26   : > { %478 = vmatpush1.bf16.msra.mxu0 (!%p302_p10), %v861_v18  ;;  %810 = vmatpush1.bf16.msra.mxu1 (!%p302_p10), %v861_v18  ;;  %v868_v23 = vld [vmem:[%s1022_s9 + $0x34] ss:$8 sps:$4 sm:$0xff] (!%p302_p10)   ;;  %v870_v24 = vld [vmem:[%s1022_s9 + $0x30] ss:$8 sps:$4 sm:$0xff] (!%p302_p10)   ;;  %v871_v25 = vld [vmem:[%s1022_s9 + $0x44] ss:$8 sps:$4 sm:$0xff] (!%p302_p10)  }
  0x27   : > { %479 = vmatprep.subr.bf16.mxu0 (!%p302_p10), %v862_v19  ;;  %803 = vmatprep.subr.bf16.mxu1 (!%p302_p10), %v862_v19  ;;  %v873_v26 = vld [vmem:[%s1022_s9 + $0x40] ss:$8 sps:$4 sm:$0xff] (!%p302_p10)   ;;  %v874_v27 = vld [vmem:[%s1022_s9 + $0x54] ss:$8 sps:$4 sm:$0xff] (!%p302_p10)   ;;  %v876_v28 = vld [vmem:[%s1022_s9 + $0x50] ss:$8 sps:$4 sm:$0xff] (!%p302_p10)  }
  0x28   : > { %v877_v29 = vld [vmem:[%s1022_s9 + $0x64] ss:$8 sps:$4 sm:$0xff] (!%p302_p10)   ;;  %v879_v30 = vld [vmem:[%s1022_s9 + $0x60] ss:$8 sps:$4 sm:$0xff] (!%p302_p10)   ;;  %v880_v31 = vld [vmem:[%s1022_s9 + $0x74] ss:$8 sps:$4 sm:$0xff] (!%p302_p10)  }
  0x29   : > { %v882_v32 = vld [vmem:[%s1022_s9 + $0x70] ss:$8 sps:$4 sm:$0xff]   ;;  %s1089_s14 = smov (!%p353_p11, %s767_s14), 3  ;;  %v534_v37 = vsub.s32 0, %v533_v36  ;;  %v538_v39 = vsub.s32 1, %v533_v36  ;;  %s766_s29 = sshll.u32 %s308_s7, 5 }
  0x2a   : > { %480 = vmatpush1.bf16.msra.mxu0 %v864_v20  ;;  %811 = vmatpush1.bf16.msra.mxu1 %v864_v20  ;;  %s355_s23 = scalar_lea.vmem %s1078_s2, %s1089_s14  ;;  %s360_s28 = scalar_lea.vmem %s1079_s3, %s1089_s14 }
  0x2b   : > { %481 = vmatprep.subr.bf16.mxu0 %v865_v21  ;;  %804 = vmatprep.subr.bf16.mxu1 %v865_v21  ;;  %v530_v38 = vld [vmem:[%s355_s23] sm:$0x3]  ;;  %s344_s15 = scalar_lea.vmem [#allocation3], %s766_s29  ;;  %s801_s30 = sshll.u32 (%p986_p6), %s915_s17, 3 }
  0x2c   : > { %v550_v40 = vld [vmem:[%s360_s28] sm:$0x3]  ;;  %v535_v41 = vrot.slane %v530_v38, %v534_v37  ;;  %v539_v42 = vrot.slane %v530_v38, %v538_v39  ;;  %s610_s7 = scalar_lea.vmem (%p986_p6), %s1080_s4, %s801_s30 }
  0x2d   : > { %v555_v43 = vrot.slane %v550_v40, %v534_v37  ;;  %v559_v46 = vrot.slane %v550_v40, %v538_v39 }
  0x2e   : > { %482 = vmatpush1.bf16.msra.mxu0 %v867_v22  ;;  %812 = vmatpush1.bf16.msra.mxu1 %v867_v22 }
  0x2f   : > { %483 = vmatprep.subr.bf16.mxu0 %v868_v23  ;;  %805 = vmatprep.subr.bf16.mxu1 %v868_v23 }
  0x32   : > { %484 = vmatpush1.bf16.msra.mxu0 %v870_v24  ;;  %813 = vmatpush1.bf16.msra.mxu1 %v870_v24 }
  0x33   : > { %485 = vmatprep.subr.bf16.mxu0 %v871_v25  ;;  %806 = vmatprep.subr.bf16.mxu1 %v871_v25 }
  0x36   : > { %486 = vmatpush1.bf16.msra.mxu0 %v873_v26  ;;  %814 = vmatpush1.bf16.msra.mxu1 %v873_v26 }
  0x37   : > { %487 = vmatprep.subr.bf16.mxu0 %v874_v27  ;;  %807 = vmatprep.subr.bf16.mxu1 %v874_v27 }
  0x3a   : > { %488 = vmatpush1.bf16.msra.mxu0 %v876_v28  ;;  %815 = vmatpush1.bf16.msra.mxu1 %v876_v28 }
  0x3b   : > { %489 = vmatprep.subr.bf16.mxu0 %v877_v29  ;;  %808 = vmatprep.subr.bf16.mxu1 %v877_v29 }
  0x3e   : > { %490 = vmatpush1.bf16.msra.mxu0 %v879_v30  ;;  %816 = vmatpush1.bf16.msra.mxu1 %v879_v30 }
  0x3f   : > { %491 = vmatprep.subr.bf16.mxu0 %v880_v31  ;;  %809 = vmatprep.subr.bf16.mxu1 %v880_v31 }
  0x42   : > { %492 = vmatpush1.bf16.msra.mxu0 %v882_v32  ;;  %817 = vmatpush1.bf16.msra.mxu1 %v882_v32 }
  0x45   : > { %510 = vmatmul.mubr.bf16.vlgmr.msra.gmra.mrb[0].mxu0 %v883_v33  ;;  %520 = vmatmul.mubr.bf16.vlgmr.msra.gmra.mrb[0].mxu1 %v884_v34 }
 0x118   : > { %v511_v44 = vpop.f32.mrb[0].mxu0  ;;  %v521_v45 = vpop.f32.mrb[0].mxu1 }
 0x119   : > { %v542_v47 = vmul.f32 %v535_v41, %v511_v44  ;;  %v546_v48 = vmul.f32 %v535_v41, %v521_v45  ;;  %v513_v49 = vpop.f32.mrb[1].mxu0  ;;  %v523_v50 = vpop.f32.mrb[1].mxu1 }
 0x11a   : > { %v543_v51 = vmul.f32 %v539_v42, %v513_v49  ;;  %v547_v52 = vmul.f32 %v539_v42, %v523_v50  ;;  %v515_v53 = vpop.f32.mrb[2].mxu0  ;;  %v525_v54 = vpop.f32.mrb[2].mxu1 }
 0x11b   : > { %v562_v55 = vadd.f32 %v555_v43, %v542_v47  ;;  %v566_v56 = vadd.f32 %v555_v43, %v546_v48  ;;  %v544_v57 = vmul.f32 %v535_v41, %v515_v53  ;;  %v548_v58 = vmul.f32 %v535_v41, %v525_v54  ;;  %v517_v59 = vpop.f32.mrb[3].mxu0  ;;  %v527_v60 = vpop.f32.mrb[3].mxu1 }
 0x11c   : > { %v563_v61 = vadd.f32 %v559_v46, %v543_v51  ;;  %v567_v62 = vadd.f32 %v559_v46, %v547_v52  ;;  %v545_v63 = vmul.f32 %v539_v42, %v517_v59  ;;  %v549_v0 = vmul.f32 %v539_v42, %v527_v60  ;;  %604 = sbr.rel (!%p986_p6) target bundleno = 299 (0x12b), region = 78 }
 0x11d   : > { %v564_v1 = vadd.f32 %v555_v43, %v544_v57  ;;  %v568_v2 = vadd.f32 %v555_v43, %v548_v58 }
 0x11e   : > { %v797_v3 = vpack.c.bf16 %v563_v61, %v562_v55  ;;  %v799_v4 = vpack.c.bf16 %v567_v62, %v566_v56  ;;  %v565_v5 = vadd.f32 %v559_v46, %v545_v63  ;;  %v569_v6 = vadd.f32 %v559_v46, %v549_v0 }
 0x120   : > { %594 = vst [vmem:[%s344_s15] sm:$0xff] %v797_v3  ;;  %596 = vst [vmem:[%s344_s15 + $0x10] sm:$0xff] %v799_v4  ;;  %v798_v7 = vpack.c.bf16 %v565_v5, %v564_v1  ;;  %v800_v8 = vpack.c.bf16 %v569_v6, %v568_v2 }
 0x122   : > { %595 = vst [vmem:[%s344_s15 + $0x8] sm:$0xff] %v798_v7  ;;  %597 = vst [vmem:[%s344_s15 + $0x18] sm:$0xff] %v800_v8 }
 0x127   : > { %v644_v9 = vld [vmem:[%s344_s15] sm:$0xff]  ;;  %v648_v11 = vld [vmem:[%s344_s15 + $0x10] sm:$0xff] }
 0x128   : > { %645 = vst [vmem:[%s610_s7] sm:$0xff] %v644_v9  ;;  %649 = vst [vmem:[%s610_s7 + $0x20] sm:$0xff] %v648_v11 }
 0x129   : > { %v646_v10 = vld [vmem:[%s344_s15 + $0x8] sm:$0xff]  ;;  %v650_v12 = vld [vmem:[%s344_s15 + $0x18] sm:$0xff] }
 0x12a   : > { %647 = vst [vmem:[%s610_s7 + $0x10] sm:$0xff] %v646_v10  ;;  %651 = vst [vmem:[%s610_s7 + $0x30] sm:$0xff] %v650_v12 }
 0x12b PF: > { %s14_s19 = sadd.s32 1, %s923_s19   ;;  %s1082_s15 = smov %s911_s16 }
 0x12c   : > { %p11_p12 = scmp.ge.s32.totalorder %s14_s19, 4   ;;  %s1083_s16 = smov %s991_s25 }
 0x12d   : > { %s1084_s17 = smov %s919_s18  ;;  %s1085_s18 = smov %s1087_s20 }
 0x12e   :  { %13 = sbr.rel (!%p11_p12) target bundleno = 3 (0x3), region = 156 }

// kernel: shared_module_fr_forward.50
= control target key start
LH: loop header
LB: loop body
LE: loop exit
PB: predicated region body
PF: predicated region fallthrough
CT: control target
= control target key end

     0   :  { %s1181_s15 = smov 0   ;;  %s1183_s16 = smov 0   ;;  %s1378_s0 = inlined_call_operand.vmem [shape: bf16[32,256], index: 0, kind: input, shape index: {}]   ;;  %s1379_s1 = inlined_call_operand.vmem [shape: bf16[256,512], index: 1, kind: input, shape index: {}]   ;;  %s1380_s2 = inlined_call_operand.vmem [shape: f32[1,512], index: 2, kind: input, shape index: {}]   ;;  %s1381_s3 = inlined_call_operand.vmem [shape: f32[1,512], index: 3, kind: input, shape index: {}]   ;;  %s1382_s4 = inlined_call_operand.vmem [shape: bf16[32,512], index: 4, kind: output, shape index: {}]  }
   0x1   :  { %s1185_s17 = smov 0   ;;  %s1187_s18 = smov 0  }
   0x2   :  { %s1189_s19 = smov 0  }
   0x3 LB: > { %s23_s20 = sadd.s32 1, %s1150_s18  ;;  %s926_s21 = sadd.s32 4294967295, %s1154_s19   ;;  %s1154_s19 = sphi %s1189_s19, %s14_s19   ;;  %s1150_s18 = sphi %s1187_s18, %s1387_s18   ;;  %s1146_s17 = sphi %s1185_s17, %s1386_s17   ;;  %s1142_s16 = sphi %s1183_s16, %s1385_s16   ;;  %s1138_s15 = sphi %s1181_s15, %s1384_s15  }
   0x4   : > { %p24_p0 = scmp.ge.s32.totalorder %s23_s20, 2  ;;  %p66_p1 = scmp.ne.s32.totalorder %s1142_s16, %s1138_s15 }
   0x5   : > { %p67_p2 = scmp.eq.s32.totalorder %s1154_s19, 0  ;;  %p150_p4 = scmp.eq.s32.totalorder %s926_s21, 1 }
   0x6   : > { %s1389_s20 = smov (%p24_p0, %s23_s20), 0  ;;  %s59_s23 = sadd.s32 1, %s1142_s16 }
   0x7   : > { %p68_p3 = por %p67_p2, %p66_p1  ;;  %s56_s22 = ssub.s32 %s1150_s18, %s1389_s20 }
   0x8   : > { %p57_p5 = scmp.eq.s32.totalorder %s56_s22, 0  ;;  %p1216_p6 = por %p150_p4, %p66_p1 }
   0x9   : > { %p930_p7 = scmp.ge.s32.totalorder %s1154_s19, 2 }
   0xa   : > { %s1221_s25 = scalar_select %p57_p5, %s1142_s16, %s59_s23  }
   0xb   : > { %182 = sbr.rel (%p930_p7) target bundleno = 38 (0x26), region = 20 }
  0x12   : > { %185 = sbr.rel (!%p68_p3) target bundleno = 38 (0x26), region = 24  ;;  %s187_s26 = sand.u32 (%p68_p3), 1, %s1142_s16  }
  0x13   : > { %s984_s27 = sshll.u32 (%p68_p3), %s1150_s18, 3  ;;  %s931_s28 = sshll.u32 (%p68_p3), %s187_s26, 8 }
  0x14   : > { %s1229_s5 = scalar_lea.vmem (%p68_p3), %s1379_s1, %s984_s27  ;;  %s1234_s6 = scalar_lea.vmem (%p68_p3), [#allocation2], %s931_s28 }
  0x15   : > { %v282_v0 = vld [vmem:[%s1229_s5] sm:$0xff] (%p68_p3)  ;;  %v284_v1 = vld [vmem:[%s1229_s5 + $0x10] sm:$0xff] (%p68_p3) }
  0x16   : > { %v286_v2 = vld [vmem:[%s1229_s5 + $0x20] sm:$0xff] (%p68_p3)  ;;  %283 = vst [vmem:[%s1234_s6] sm:$0xff] (%p68_p3), %v282_v0  ;;  %285 = vst [vmem:[%s1234_s6 + $0x8] sm:$0xff] (%p68_p3), %v284_v1  ;;  %v288_v3 = vld [vmem:[%s1229_s5 + $0x30] sm:$0xff] (%p68_p3) }
  0x17   : > { %287 = vst [vmem:[%s1234_s6 + $0x10] sm:$0xff] (%p68_p3), %v286_v2  ;;  %v290_v4 = vld [vmem:[%s1229_s5 + $0x40] sm:$0xff] (%p68_p3)  ;;  %v292_v5 = vld [vmem:[%s1229_s5 + $0x50] sm:$0xff] (%p68_p3)  ;;  %289 = vst [vmem:[%s1234_s6 + $0x18] sm:$0xff] (%p68_p3), %v288_v3 }
  0x18   : > { %291 = vst [vmem:[%s1234_s6 + $0x20] sm:$0xff] (%p68_p3), %v290_v4  ;;  %293 = vst [vmem:[%s1234_s6 + $0x28] sm:$0xff] (%p68_p3), %v292_v5  ;;  %v294_v6 = vld [vmem:[%s1229_s5 + $0x60] sm:$0xff] (%p68_p3)  ;;  %v296_v7 = vld [vmem:[%s1229_s5 + $0x70] sm:$0xff] (%p68_p3) }
  0x19   : > { %v298_v8 = vld [vmem:[%s1229_s5 + $0x80] sm:$0xff]  ;;  %295 = vst [vmem:[%s1234_s6 + $0x30] sm:$0xff] %v294_v6  ;;  %297 = vst [vmem:[%s1234_s6 + $0x38] sm:$0xff] %v296_v7  ;;  %v300_v9 = vld [vmem:[%s1229_s5 + $0x90] sm:$0xff] }
  0x1a   : > { %299 = vst [vmem:[%s1234_s6 + $0x40] sm:$0xff] %v298_v8  ;;  %v302_v10 = vld [vmem:[%s1229_s5 + $0xa0] sm:$0xff]  ;;  %v304_v11 = vld [vmem:[%s1229_s5 + $0xb0] sm:$0xff]  ;;  %301 = vst [vmem:[%s1234_s6 + $0x48] sm:$0xff] %v300_v9 }
  0x1b   : > { %303 = vst [vmem:[%s1234_s6 + $0x50] sm:$0xff] %v302_v10  ;;  %305 = vst [vmem:[%s1234_s6 + $0x58] sm:$0xff] %v304_v11  ;;  %v306_v12 = vld [vmem:[%s1229_s5 + $0xc0] sm:$0xff]  ;;  %v308_v13 = vld [vmem:[%s1229_s5 + $0xd0] sm:$0xff] }
  0x1c   : > { %v310_v14 = vld [vmem:[%s1229_s5 + $0xe0] sm:$0xff]  ;;  %307 = vst [vmem:[%s1234_s6 + $0x60] sm:$0xff] %v306_v12  ;;  %309 = vst [vmem:[%s1234_s6 + $0x68] sm:$0xff] %v308_v13  ;;  %v312_v15 = vld [vmem:[%s1229_s5 + $0xf0] sm:$0xff] }
  0x1d   : > { %311 = vst [vmem:[%s1234_s6 + $0x70] sm:$0xff] %v310_v14  ;;  %v314_v16 = vld [vmem:[%s1229_s5 + $0x100] sm:$0xff]  ;;  %v316_v17 = vld [vmem:[%s1229_s5 + $0x110] sm:$0xff]  ;;  %313 = vst [vmem:[%s1234_s6 + $0x78] sm:$0xff] %v312_v15 }
  0x1e   : > { %315 = vst [vmem:[%s1234_s6 + $0x80] sm:$0xff] %v314_v16  ;;  %317 = vst [vmem:[%s1234_s6 + $0x88] sm:$0xff] %v316_v17  ;;  %v318_v18 = vld [vmem:[%s1229_s5 + $0x120] sm:$0xff]  ;;  %v320_v19 = vld [vmem:[%s1229_s5 + $0x130] sm:$0xff] }
  0x1f   : > { %v322_v20 = vld [vmem:[%s1229_s5 + $0x140] sm:$0xff]  ;;  %319 = vst [vmem:[%s1234_s6 + $0x90] sm:$0xff] %v318_v18  ;;  %321 = vst [vmem:[%s1234_s6 + $0x98] sm:$0xff] %v320_v19  ;;  %v324_v21 = vld [vmem:[%s1229_s5 + $0x150] sm:$0xff] }
  0x20   : > { %323 = vst [vmem:[%s1234_s6 + $0xa0] sm:$0xff] %v322_v20  ;;  %v326_v22 = vld [vmem:[%s1229_s5 + $0x160] sm:$0xff]  ;;  %v328_v23 = vld [vmem:[%s1229_s5 + $0x170] sm:$0xff]  ;;  %325 = vst [vmem:[%s1234_s6 + $0xa8] sm:$0xff] %v324_v21 }
  0x21   : > { %327 = vst [vmem:[%s1234_s6 + $0xb0] sm:$0xff] %v326_v22  ;;  %329 = vst [vmem:[%s1234_s6 + $0xb8] sm:$0xff] %v328_v23  ;;  %v330_v24 = vld [vmem:[%s1229_s5 + $0x180] sm:$0xff]  ;;  %v332_v25 = vld [vmem:[%s1229_s5 + $0x190] sm:$0xff] }
  0x22   : > { %v334_v26 = vld [vmem:[%s1229_s5 + $0x1a0] sm:$0xff]  ;;  %331 = vst [vmem:[%s1234_s6 + $0xc0] sm:$0xff] %v330_v24  ;;  %333 = vst [vmem:[%s1234_s6 + $0xc8] sm:$0xff] %v332_v25  ;;  %v336_v27 = vld [vmem:[%s1229_s5 + $0x1b0] sm:$0xff] }
  0x23   : > { %335 = vst [vmem:[%s1234_s6 + $0xd0] sm:$0xff] %v334_v26  ;;  %v338_v28 = vld [vmem:[%s1229_s5 + $0x1c0] sm:$0xff]  ;;  %v340_v29 = vld [vmem:[%s1229_s5 + $0x1d0] sm:$0xff]  ;;  %337 = vst [vmem:[%s1234_s6 + $0xd8] sm:$0xff] %v336_v27 }
  0x24   : > { %339 = vst [vmem:[%s1234_s6 + $0xe0] sm:$0xff] %v338_v28  ;;  %341 = vst [vmem:[%s1234_s6 + $0xe8] sm:$0xff] %v340_v29  ;;  %v342_v30 = vld [vmem:[%s1229_s5 + $0x1e0] sm:$0xff]  ;;  %v344_v31 = vld [vmem:[%s1229_s5 + $0x1f0] sm:$0xff] }
  0x25   : > { %343 = vst [vmem:[%s1234_s6 + $0xf0] sm:$0xff] %v342_v30  ;;  %345 = vst [vmem:[%s1234_s6 + $0xf8] sm:$0xff] %v344_v31 }
  0x26 PF: > { %p934_p8 = scmp.ge.s32.totalorder %s1154_s19, 1  ;;  %p366_p9 = scmp.lt.s32.totalorder %s1154_s19, 3 }
  0x28   : > { %p367_p10 = pnand %p934_p8, %p366_p9 }
  0x29   : > { %s373_s7 = sand.u32 (!%p367_p10), 1, %s1138_s15   ;;  %v1112_v32 = vld [vmem:[%s1378_s0 + $0x4] ss:$8 sps:$4 sm:$0xff] (!%p367_p10)   ;;  %v1115_v33 = vld [vmem:[%s1378_s0 + $0x14] ss:$8 sps:$4 sm:$0xff] (!%p367_p10)   ;;  %s937_s26 = sshll.u32 (!%p367_p10), %s1146_s17, 1  ;;  %v702_v4 = vlaneseq (!%p367_p10) }
  0x2a   : > { %370 = sbr.rel (%p367_p10) target bundleno = 339 (0x153), region = 70  ;;  %s935_s8 = sshll.u32 (!%p367_p10), %s373_s7, 8  ;;  %679 = vmatprep.mubr.bf16.mxu0 (!%p367_p10), %v1112_v32  ;;  %689 = vmatprep.mubr.bf16.mxu1 (!%p367_p10), %v1115_v33  ;;  %v1110_v2 = vld [vmem:[%s1378_s0] ss:$8 sps:$4 sm:$0xff] (!%p367_p10)   ;;  %v1113_v3 = vld [vmem:[%s1378_s0 + $0x10] ss:$8 sps:$4 sm:$0xff] (!%p367_p10)  }
  0x2b   : > { %s1308_s13 = scalar_lea.vmem (!%p367_p10), [#allocation2], %s935_s8  ;;  %p420_p11 = scmp.lt.s32.totalorder (!%p367_p10), %s937_s26, 3  ;;  %v703_v5 = vshrl.u32 (!%p367_p10), %v702_v4, 7 }
  0x2c   : > { %v1062_v34 = vld [vmem:[%s1308_s13 + $0x4] ss:$8 sps:$4 sm:$0xff] (!%p367_p10)   ;;  %v1064_v35 = vld [vmem:[%s1308_s13] ss:$8 sps:$4 sm:$0xff] (!%p367_p10)   ;;  %v1065_v36 = vld [vmem:[%s1308_s13 + $0x14] ss:$8 sps:$4 sm:$0xff] (!%p367_p10)  }
  0x2d   : > { %647 = vmatprep.subr.bf16.mxu0 (!%p367_p10), %v1062_v34  ;;  %990 = vmatprep.subr.bf16.mxu1 (!%p367_p10), %v1062_v34  ;;  %v1067_v37 = vld [vmem:[%s1308_s13 + $0x10] ss:$8 sps:$4 sm:$0xff] (!%p367_p10)   ;;  %v1068_v38 = vld [vmem:[%s1308_s13 + $0x24] ss:$8 sps:$4 sm:$0xff] (!%p367_p10)   ;;  %v1070_v39 = vld [vmem:[%s1308_s13 + $0x20] ss:$8 sps:$4 sm:$0xff] (!%p367_p10)  }
  0x2e   : > { %648 = vmatpush1.bf16.msra.mxu0 (!%p367_p10), %v1064_v35  ;;  %1006 = vmatpush1.bf16.msra.mxu1 (!%p367_p10), %v1064_v35  ;;  %v1071_v40 = vld [vmem:[%s1308_s13 + $0x34] ss:$8 sps:$4 sm:$0xff] (!%p367_p10)   ;;  %v1073_v41 = vld [vmem:[%s1308_s13 + $0x30] ss:$8 sps:$4 sm:$0xff] (!%p367_p10)   ;;  %v1074_v42 = vld [vmem:[%s1308_s13 + $0x44] ss:$8 sps:$4 sm:$0xff] (!%p367_p10)  }
  0x2f   : > { %649 = vmatprep.subr.bf16.mxu0 (!%p367_p10), %v1065_v36  ;;  %991 = vmatprep.subr.bf16.mxu1 (!%p367_p10), %v1065_v36  ;;  %v1076_v43 = vld [vmem:[%s1308_s13 + $0x40] ss:$8 sps:$4 sm:$0xff] (!%p367_p10)   ;;  %v1077_v44 = vld [vmem:[%s1308_s13 + $0x54] ss:$8 sps:$4 sm:$0xff] (!%p367_p10)   ;;  %v1079_v45 = vld [vmem:[%s1308_s13 + $0x50] ss:$8 sps:$4 sm:$0xff] (!%p367_p10)  }
  0x30   : > { %v1080_v46 = vld [vmem:[%s1308_s13 + $0x64] ss:$8 sps:$4 sm:$0xff] (!%p367_p10)   ;;  %v1082_v47 = vld [vmem:[%s1308_s13 + $0x60] ss:$8 sps:$4 sm:$0xff] (!%p367_p10)   ;;  %v1083_v48 = vld [vmem:[%s1308_s13 + $0x74] ss:$8 sps:$4 sm:$0xff] (!%p367_p10)  }
  0x31   : > { %v1085_v49 = vld [vmem:[%s1308_s13 + $0x70] ss:$8 sps:$4 sm:$0xff]   ;;  %v1086_v50 = vld [vmem:[%s1308_s13 + $0x84] ss:$8 sps:$4 sm:$0xff]   ;;  %v1088_v51 = vld [vmem:[%s1308_s13 + $0x80] ss:$8 sps:$4 sm:$0xff]  }
  0x32   : > { %650 = vmatpush1.bf16.msra.mxu0 %v1067_v37  ;;  %1007 = vmatpush1.bf16.msra.mxu1 %v1067_v37  ;;  %v1089_v52 = vld [vmem:[%s1308_s13 + $0x94] ss:$8 sps:$4 sm:$0xff]   ;;  %v1091_v53 = vld [vmem:[%s1308_s13 + $0x90] ss:$8 sps:$4 sm:$0xff]   ;;  %v1092_v54 = vld [vmem:[%s1308_s13 + $0xa4] ss:$8 sps:$4 sm:$0xff]  }
  0x33   : > { %651 = vmatprep.subr.bf16.mxu0 %v1068_v38  ;;  %992 = vmatprep.subr.bf16.mxu1 %v1068_v38  ;;  %v1094_v55 = vld [vmem:[%s1308_s13 + $0xa0] ss:$8 sps:$4 sm:$0xff]   ;;  %v1095_v56 = vld [vmem:[%s1308_s13 + $0xb4] ss:$8 sps:$4 sm:$0xff]   ;;  %v1097_v57 = vld [vmem:[%s1308_s13 + $0xb0] ss:$8 sps:$4 sm:$0xff]  }
  0x34   : > { %v1098_v58 = vld [vmem:[%s1308_s13 + $0xc4] ss:$8 sps:$4 sm:$0xff]   ;;  %v1100_v59 = vld [vmem:[%s1308_s13 + $0xc0] ss:$8 sps:$4 sm:$0xff]   ;;  %v1101_v60 = vld [vmem:[%s1308_s13 + $0xd4] ss:$8 sps:$4 sm:$0xff]  }
  0x35   : > { %v1103_v61 = vld [vmem:[%s1308_s13 + $0xd0] ss:$8 sps:$4 sm:$0xff]   ;;  %v1104_v62 = vld [vmem:[%s1308_s13 + $0xe4] ss:$8 sps:$4 sm:$0xff]   ;;  %v1106_v63 = vld [vmem:[%s1308_s13 + $0xe0] ss:$8 sps:$4 sm:$0xff]  }
  0x36   : > { %652 = vmatpush1.bf16.msra.mxu0 %v1070_v39  ;;  %1008 = vmatpush1.bf16.msra.mxu1 %v1070_v39  ;;  %v1107_v0 = vld [vmem:[%s1308_s13 + $0xf4] ss:$8 sps:$4 sm:$0xff]   ;;  %v1109_v1 = vld [vmem:[%s1308_s13 + $0xf0] ss:$8 sps:$4 sm:$0xff]   ;;  %s1391_s26 = smov (!%p420_p11, %s937_s26), 3  ;;  %v704_v6 = vsub.s32 0, %v703_v5 }
  0x37   : > { %653 = vmatprep.subr.bf16.mxu0 %v1071_v40  ;;  %993 = vmatprep.subr.bf16.mxu1 %v1071_v40  ;;  %s422_s29 = scalar_lea.vmem %s1380_s2, %s1391_s26  ;;  %s427_s6 = scalar_lea.vmem %s1381_s3, %s1391_s26  ;;  %v708_v8 = vsub.s32 1, %v703_v5 }
  0x38   : > { %v700_v7 = vld [vmem:[%s422_s29] sm:$0x3]  ;;  %s936_s8 = sshll.u32 %s373_s7, 5  ;;  %s989_s7 = sshll.u32 (%p1216_p6), %s1146_s17, 3 }
  0x39   : > { %v720_v9 = vld [vmem:[%s427_s6] sm:$0x3]  ;;  %v705_v10 = vrot.slane %v700_v7, %v704_v6  ;;  %v709_v11 = vrot.slane %v700_v7, %v708_v8  ;;  %s410_s15 = scalar_lea.vmem [#allocation3], %s936_s8  ;;  %s780_s11 = scalar_lea.vmem (%p1216_p6), %s1382_s4, %s989_s7 }
  0x3a   : > { %654 = vmatpush1.bf16.msra.mxu0 %v1073_v41  ;;  %1009 = vmatpush1.bf16.msra.mxu1 %v1073_v41  ;;  %v725_v12 = vrot.slane %v720_v9, %v704_v6  ;;  %v729_v15 = vrot.slane %v720_v9, %v708_v8 }
  0x3b   : > { %655 = vmatprep.subr.bf16.mxu0 %v1074_v42  ;;  %994 = vmatprep.subr.bf16.mxu1 %v1074_v42 }
  0x3e   : > { %656 = vmatpush1.bf16.msra.mxu0 %v1076_v43  ;;  %1010 = vmatpush1.bf16.msra.mxu1 %v1076_v43 }
  0x3f   : > { %657 = vmatprep.subr.bf16.mxu0 %v1077_v44  ;;  %995 = vmatprep.subr.bf16.mxu1 %v1077_v44 }
  0x42   : > { %658 = vmatpush1.bf16.msra.mxu0 %v1079_v45  ;;  %1011 = vmatpush1.bf16.msra.mxu1 %v1079_v45 }
  0x43   : > { %659 = vmatprep.subr.bf16.mxu0 %v1080_v46  ;;  %996 = vmatprep.subr.bf16.mxu1 %v1080_v46 }
  0x46   : > { %660 = vmatpush1.bf16.msra.mxu0 %v1082_v47  ;;  %1012 = vmatpush1.bf16.msra.mxu1 %v1082_v47 }
  0x47   : > { %661 = vmatprep.subr.bf16.mxu0 %v1083_v48  ;;  %997 = vmatprep.subr.bf16.mxu1 %v1083_v48 }
  0x4a   : > { %662 = vmatpush1.bf16.msra.mxu0 %v1085_v49  ;;  %1013 = vmatpush1.bf16.msra.mxu1 %v1085_v49 }
  0x4b   : > { %663 = vmatprep.subr.bf16.mxu0 %v1086_v50  ;;  %998 = vmatprep.subr.bf16.mxu1 %v1086_v50 }
  0x4e   : > { %664 = vmatpush1.bf16.msra.mxu0 %v1088_v51  ;;  %1014 = vmatpush1.bf16.msra.mxu1 %v1088_v51 }
  0x4f   : > { %665 = vmatprep.subr.bf16.mxu0 %v1089_v52  ;;  %999 = vmatprep.subr.bf16.mxu1 %v1089_v52 }
  0x52   : > { %666 = vmatpush1.bf16.msra.mxu0 %v1091_v53  ;;  %1015 = vmatpush1.bf16.msra.mxu1 %v1091_v53 }
  0x53   : > { %667 = vmatprep.subr.bf16.mxu0 %v1092_v54  ;;  %1000 = vmatprep.subr.bf16.mxu1 %v1092_v54 }
  0x56   : > { %668 = vmatpush1.bf16.msra.mxu0 %v1094_v55  ;;  %1016 = vmatpush1.bf16.msra.mxu1 %v1094_v55 }
  0x57   : > { %669 = vmatprep.subr.bf16.mxu0 %v1095_v56  ;;  %1001 = vmatprep.subr.bf16.mxu1 %v1095_v56 }
  0x5a   : > { %670 = vmatpush1.bf16.msra.mxu0 %v1097_v57  ;;  %1017 = vmatpush1.bf16.msra.mxu1 %v1097_v57 }
  0x5b   : > { %671 = vmatprep.subr.bf16.mxu0 %v1098_v58  ;;  %1002 = vmatprep.subr.bf16.mxu1 %v1098_v58 }
  0x5e   : > { %672 = vmatpush1.bf16.msra.mxu0 %v1100_v59  ;;  %1018 = vmatpush1.bf16.msra.mxu1 %v1100_v59 }
  0x5f   : > { %673 = vmatprep.subr.bf16.mxu0 %v1101_v60  ;;  %1003 = vmatprep.subr.bf16.mxu1 %v1101_v60 }
  0x62   : > { %674 = vmatpush1.bf16.msra.mxu0 %v1103_v61  ;;  %1019 = vmatpush1.bf16.msra.mxu1 %v1103_v61 }
  0x63   : > { %675 = vmatprep.subr.bf16.mxu0 %v1104_v62  ;;  %1004 = vmatprep.subr.bf16.mxu1 %v1104_v62 }
  0x66   : > { %676 = vmatpush1.bf16.msra.mxu0 %v1106_v63  ;;  %1020 = vmatpush1.bf16.msra.mxu1 %v1106_v63 }
  0x67   : > { %677 = vmatprep.subr.bf16.mxu0 %v1107_v0  ;;  %1005 = vmatprep.subr.bf16.mxu1 %v1107_v0 }
  0x6a   : > { %678 = vmatpush1.bf16.msra.mxu0 %v1109_v1  ;;  %1021 = vmatpush1.bf16.msra.mxu1 %v1109_v1 }
  0x6d   : > { %680 = vmatmul.mubr.bf16.vlgmr.msra.gmra.mrb[0].mxu0 %v1110_v2  ;;  %690 = vmatmul.mubr.bf16.vlgmr.msra.gmra.mrb[0].mxu1 %v1113_v3 }
 0x140   : > { %v681_v13 = vpop.f32.mrb[0].mxu0  ;;  %v691_v14 = vpop.f32.mrb[0].mxu1 }
 0x141   : > { %v712_v16 = vmul.f32 %v705_v10, %v681_v13  ;;  %v716_v17 = vmul.f32 %v705_v10, %v691_v14  ;;  %v683_v18 = vpop.f32.mrb[1].mxu0  ;;  %v693_v19 = vpop.f32.mrb[1].mxu1 }
 0x142   : > { %v713_v20 = vmul.f32 %v709_v11, %v683_v18  ;;  %v717_v21 = vmul.f32 %v709_v11, %v693_v19  ;;  %v685_v22 = vpop.f32.mrb[2].mxu0  ;;  %v695_v23 = vpop.f32.mrb[2].mxu1 }
 0x143   : > { %v732_v24 = vadd.f32 %v725_v12, %v712_v16  ;;  %v736_v25 = vadd.f32 %v725_v12, %v716_v17  ;;  %v714_v26 = vmul.f32 %v705_v10, %v685_v22  ;;  %v718_v27 = vmul.f32 %v705_v10, %v695_v23  ;;  %v687_v28 = vpop.f32.mrb[3].mxu0  ;;  %v697_v29 = vpop.f32.mrb[3].mxu1 }
 0x144   : > { %v733_v30 = vadd.f32 %v729_v15, %v713_v20  ;;  %v737_v31 = vadd.f32 %v729_v15, %v717_v21  ;;  %v715_v32 = vmul.f32 %v709_v11, %v687_v28  ;;  %v719_v33 = vmul.f32 %v709_v11, %v697_v29  ;;  %774 = sbr.rel (!%p1216_p6) target bundleno = 339 (0x153), region = 78 }
 0x145   : > { %v734_v34 = vadd.f32 %v725_v12, %v714_v26  ;;  %v738_v35 = vadd.f32 %v725_v12, %v718_v27 }
 0x146   : > { %v985_v36 = vpack.c.bf16 %v733_v30, %v732_v24  ;;  %v987_v37 = vpack.c.bf16 %v737_v31, %v736_v25  ;;  %v735_v38 = vadd.f32 %v729_v15, %v715_v32  ;;  %v739_v39 = vadd.f32 %v729_v15, %v719_v33 }
 0x148   : > { %764 = vst [vmem:[%s410_s15] sm:$0xff] %v985_v36  ;;  %766 = vst [vmem:[%s410_s15 + $0x10] sm:$0xff] %v987_v37  ;;  %v986_v40 = vpack.c.bf16 %v735_v38, %v734_v34  ;;  %v988_v41 = vpack.c.bf16 %v739_v39, %v738_v35 }
 0x14a   : > { %765 = vst [vmem:[%s410_s15 + $0x8] sm:$0xff] %v986_v40  ;;  %767 = vst [vmem:[%s410_s15 + $0x18] sm:$0xff] %v988_v41 }
 0x14f   : > { %v814_v42 = vld [vmem:[%s410_s15] sm:$0xff]  ;;  %v818_v44 = vld [vmem:[%s410_s15 + $0x10] sm:$0xff] }
 0x150   : > { %815 = vst [vmem:[%s780_s11] sm:$0xff] %v814_v42  ;;  %819 = vst [vmem:[%s780_s11 + $0x20] sm:$0xff] %v818_v44 }
 0x151   : > { %v816_v43 = vld [vmem:[%s410_s15 + $0x8] sm:$0xff]  ;;  %v820_v45 = vld [vmem:[%s410_s15 + $0x18] sm:$0xff] }
 0x152   : > { %817 = vst [vmem:[%s780_s11 + $0x10] sm:$0xff] %v816_v43  ;;  %821 = vst [vmem:[%s780_s11 + $0x30] sm:$0xff] %v820_v45 }
 0x153 PF: > { %s14_s19 = sadd.s32 1, %s1154_s19   ;;  %s1384_s15 = smov %s1142_s16 }
 0x154   : > { %p11_p12 = scmp.ge.s32.totalorder %s14_s19, 4   ;;  %s1385_s16 = smov %s1221_s25 }
 0x155   : > { %s1386_s17 = smov %s1150_s18  ;;  %s1387_s18 = smov %s1389_s20 }
 0x156   :  { %13 = sbr.rel (!%p11_p12) target bundleno = 3 (0x3), region = 156 }

// kernel: shared_module_fr_forward.51
= control target key start
LH: loop header
LB: loop body
LE: loop exit
PB: predicated region body
PF: predicated region fallthrough
CT: control target
= control target key end

     0   :  { %s254_s0 = inlined_call_operand.vmem [shape: bf16[32,512], index: 0, kind: input, shape index: {}]   ;;  %s255_s1 = inlined_call_operand.vmem [shape: bf16[32,512], index: 1, kind: input, shape index: {}]   ;;  %s256_s2 = inlined_call_operand.vmem [shape: bf16[32,512], index: 2, kind: output, shape index: {}]  }
   0x1   :  { %v11_v0 = vld [vmem:[%s254_s0] sm:$0xff]  ;;  %v12_v2 = vld [vmem:[%s254_s0 + $0x8] sm:$0xff]  ;;  %v13_v8 = vld [vmem:[%s254_s0 + $0x10] sm:$0xff] }
   0x2   :  { %v35_v1 = vld [vmem:[%s255_s1] sm:$0xff]  ;;  %v19_v3 = vunpack.c.l.bf16 %v11_v0  ;;  %v20_v4 = vunpack.c.h.bf16 %v11_v0  ;;  %v36_v7 = vld [vmem:[%s255_s1 + $0x8] sm:$0xff]  ;;  %v37_v9 = vld [vmem:[%s255_s1 + $0x10] sm:$0xff]  ;;  %v21_v10 = vunpack.c.l.bf16 %v12_v2  ;;  %v22_v11 = vunpack.c.h.bf16 %v12_v2 }
   0x3   :  { %v43_v5 = vunpack.c.l.bf16 %v35_v1  ;;  %v44_v6 = vunpack.c.h.bf16 %v35_v1  ;;  %v45_v12 = vunpack.c.l.bf16 %v36_v7  ;;  %v46_v13 = vunpack.c.h.bf16 %v36_v7  ;;  %v14_v14 = vld [vmem:[%s254_s0 + $0x18] sm:$0xff]  ;;  %v15_v24 = vld [vmem:[%s254_s0 + $0x20] sm:$0xff]  ;;  %v16_v38 = vld [vmem:[%s254_s0 + $0x28] sm:$0xff] }
   0x4   :  { %v23_v17 = vunpack.c.l.bf16 %v13_v8  ;;  %v24_v18 = vunpack.c.h.bf16 %v13_v8  ;;  %v47_v21 = vunpack.c.l.bf16 %v37_v9  ;;  %v48_v22 = vunpack.c.h.bf16 %v37_v9  ;;  %v38_v23 = vld [vmem:[%s255_s1 + $0x18] sm:$0xff]  ;;  %v39_v33 = vld [vmem:[%s255_s1 + $0x20] sm:$0xff]  ;;  %v40_v39 = vld [vmem:[%s255_s1 + $0x28] sm:$0xff] }
   0x5   :  { %v59_v15 = vadd.f32 %v43_v5, %v19_v3  ;;  %v60_v16 = vadd.f32 %v44_v6, %v20_v4  ;;  %v61_v19 = vadd.f32 %v45_v12, %v21_v10  ;;  %v62_v20 = vadd.f32 %v46_v13, %v22_v11  ;;  %v17_v48 = vld [vmem:[%s254_s0 + $0x30] sm:$0xff]  ;;  %v18_v58 = vld [vmem:[%s254_s0 + $0x38] sm:$0xff] }
   0x6   :  { %v25_v27 = vunpack.c.l.bf16 %v14_v14  ;;  %v26_v28 = vunpack.c.h.bf16 %v14_v14  ;;  %v63_v31 = vadd.f32 %v47_v21, %v23_v17  ;;  %v64_v32 = vadd.f32 %v48_v22, %v24_v18  ;;  %v41_v53 = vld [vmem:[%s255_s1 + $0x30] sm:$0xff]  ;;  %v42_v63 = vld [vmem:[%s255_s1 + $0x38] sm:$0xff] }
   0x7   :  { %v75_v25 = vmax.f32 %v59_v15, 0.0  ;;  %v76_v26 = vmax.f32 %v60_v16, 0.0  ;;  %v77_v29 = vmax.f32 %v61_v19, 0.0  ;;  %v78_v30 = vmax.f32 %v62_v20, 0.0 }
   0x8   :  { %v49_v35 = vunpack.c.l.bf16 %v38_v23  ;;  %v50_v36 = vunpack.c.h.bf16 %v38_v23  ;;  %v27_v37 = vunpack.c.l.bf16 %v15_v24  ;;  %v79_v41 = vmax.f32 %v63_v31, 0.0 }
   0x9   :  { %v159_v34 = vpack.c.bf16 %v76_v26, %v75_v25  ;;  %v160_v40 = vpack.c.bf16 %v78_v30, %v77_v29  ;;  %v80_v42 = vmax.f32 %v64_v32, 0.0  ;;  %v28_v43 = vunpack.c.h.bf16 %v15_v24 }
   0xa   :  { %v65_v44 = vadd.f32 %v49_v35, %v25_v27  ;;  %v66_v45 = vadd.f32 %v50_v36, %v26_v28  ;;  %v51_v46 = vunpack.c.l.bf16 %v39_v33  ;;  %v52_v47 = vunpack.c.h.bf16 %v39_v33 }
   0xb   :  { %139 = vst [vmem:[%s256_s2] sm:$0xff] %v159_v34  ;;  %140 = vst [vmem:[%s256_s2 + $0x8] sm:$0xff] %v160_v40  ;;  %v161_v49 = vpack.c.bf16 %v80_v42, %v79_v41  ;;  %v29_v50 = vunpack.c.l.bf16 %v16_v38  ;;  %v30_v51 = vunpack.c.h.bf16 %v16_v38  ;;  %v53_v52 = vunpack.c.l.bf16 %v40_v39 }
   0xc   :  { %v81_v54 = vmax.f32 %v65_v44, 0.0  ;;  %v82_v55 = vmax.f32 %v66_v45, 0.0  ;;  %v67_v56 = vadd.f32 %v51_v46, %v27_v37  ;;  %v68_v57 = vadd.f32 %v52_v47, %v28_v43 }
   0xd   :  { %141 = vst [vmem:[%s256_s2 + $0x10] sm:$0xff] %v161_v49  ;;  %v54_v59 = vunpack.c.h.bf16 %v40_v39  ;;  %v69_v60 = vadd.f32 %v53_v52, %v29_v50  ;;  %v31_v61 = vunpack.c.l.bf16 %v17_v48  ;;  %v32_v62 = vunpack.c.h.bf16 %v17_v48 }
   0xe   :  { %v162_v0 = vpack.c.bf16 %v82_v55, %v81_v54  ;;  %v83_v1 = vmax.f32 %v67_v56, 0.0  ;;  %v84_v2 = vmax.f32 %v68_v57, 0.0  ;;  %v55_v3 = vunpack.c.l.bf16 %v41_v53 }
   0xf   :  { %v70_v4 = vadd.f32 %v54_v59, %v30_v51  ;;  %v85_v5 = vmax.f32 %v69_v60, 0.0  ;;  %v56_v6 = vunpack.c.h.bf16 %v41_v53  ;;  %v33_v7 = vunpack.c.l.bf16 %v18_v58 }
  0x10   :  { %142 = vst [vmem:[%s256_s2 + $0x18] sm:$0xff] %v162_v0  ;;  %v163_v8 = vpack.c.bf16 %v84_v2, %v83_v1  ;;  %v71_v9 = vadd.f32 %v55_v3, %v31_v61  ;;  %v34_v10 = vunpack.c.h.bf16 %v18_v58  ;;  %v57_v11 = vunpack.c.l.bf16 %v42_v63 }
  0x11   :  { %v86_v12 = vmax.f32 %v70_v4, 0.0  ;;  %v72_v13 = vadd.f32 %v56_v6, %v32_v62  ;;  %v58_v14 = vunpack.c.h.bf16 %v42_v63 }
  0x12   :  { %143 = vst [vmem:[%s256_s2 + $0x20] sm:$0xff] %v163_v8  ;;  %v87_v15 = vmax.f32 %v71_v9, 0.0  ;;  %v73_v16 = vadd.f32 %v57_v11, %v33_v7 }
  0x13   :  { %v164_v17 = vpack.c.bf16 %v86_v12, %v85_v5  ;;  %v88_v18 = vmax.f32 %v72_v13, 0.0  ;;  %v74_v19 = vadd.f32 %v58_v14, %v34_v10 }
  0x14   :  { %v89_v20 = vmax.f32 %v73_v16, 0.0 }
  0x15   :  { %144 = vst [vmem:[%s256_s2 + $0x28] sm:$0xff] %v164_v17  ;;  %v165_v21 = vpack.c.bf16 %v88_v18, %v87_v15  ;;  %v90_v22 = vmax.f32 %v74_v19, 0.0 }
  0x17   :  { %145 = vst [vmem:[%s256_s2 + $0x30] sm:$0xff] %v165_v21  ;;  %v166_v23 = vpack.c.bf16 %v90_v22, %v89_v20 }
  0x19   :  { %146 = vst [vmem:[%s256_s2 + $0x38] sm:$0xff] %v166_v23 }

// kernel: shared_module_fr_forward.48
= control target key start
LH: loop header
LB: loop body
LE: loop exit
PB: predicated region body
PF: predicated region fallthrough
CT: control target
= control target key end

     0   :  { %s1787_s18 = smov 0   ;;  %s1789_s19 = smov 0   ;;  %s2073_s0 = inlined_call_operand.vmem [shape: bf16[2,10,5,128], index: 0, kind: input, shape index: {}]   ;;  %s2074_s1 = inlined_call_operand.vmem [shape: bf16[2,10,5,128], index: 1, kind: input, shape index: {}]   ;;  %s2075_s2 = inlined_call_operand.vmem [shape: bf16[3,3,128,128], index: 2, kind: input, shape index: {}]   ;;  %s2076_s3 = inlined_call_operand.vmem [shape: f32[1,1,128], index: 3, kind: input, shape index: {}]   ;;  %s2077_s4 = inlined_call_operand.vmem [shape: f32[1,1,128], index: 4, kind: input, shape index: {}]   ;;  %s2078_s5 = inlined_call_operand.vmem [shape: bf16[2,4,4,128], index: 5, kind: output, shape index: {}]  }
   0x1   :  { %s1791_s20 = smov 0   ;;  %s1793_s21 = smov 0  }
   0x2   :  { %s1795_s22 = smov 0   ;;  %s1797_s23 = smov 0  }
   0x3   :  { %s1799_s24 = smov 0   ;;  %s1801_s25 = smov 0  }
   0x4   :  { %s1803_s26 = smov 0  }
   0x5 LB: > { %2082 = sst [smem:[#allocation6_spill]] %s1748_s25  ;;  %s1223_s27 = sadd.s32 4294967295, %s1752_s26   ;;  %s1752_s26 = sphi %s1803_s26, %s15_s26   ;;  %s1748_s25 = sphi %s1801_s25, %s2089_s25   ;;  %s1744_s24 = sphi %s1799_s24, %s2095_s24   ;;  %s1740_s23 = sphi %s1797_s23, %s2087_s23   ;;  %s1736_s22 = sphi %s1795_s22, %s2094_s22   ;;  %s1732_s21 = sphi %s1793_s21, %s2093_s21   ;;  %s1728_s20 = sphi %s1791_s20, %s2092_s20   ;;  %s1724_s19 = sphi %s1789_s19, %s2091_s19   ;;  %s1720_s18 = sphi %s1787_s18, %s2090_s18  }
   0x6   : > { %s24_s28 = sadd.s32 1, %s1744_s24  ;;  %s27_s29 = sadd.s32 1, %s1748_s25 }
   0x7   : > { %p25_p0 = scmp.ge.s32.totalorder %s24_s28, 3  ;;  %s1225_s30 = sshll.u32 %s1748_s25, 1 }
   0x8   : > { %s38_s6 = sadd.s32 1, %s1732_s21  ;;  %s1841_s7 = sadd.s32 %s1744_s24, %s1225_s30 }
   0x9   : > { %s2097_s28 = smov (%p25_p0, %s24_s28), 0  ;;  %s2099_s29 = smov (!%p25_p0, %s27_s29), %s1748_s25 }
   0xa   : > { %2083 = sst [smem:[#allocation7_spill]] %s2097_s28  ;;  %p45_p1 = scmp.ne.s32.totalorder %s1732_s21, %s1728_s20 }
   0xb   : > { %p29_p2 = scmp.ge.s32.totalorder %s2099_s29, 4  ;;  %p46_p3 = scmp.eq.s32.totalorder %s1752_s26, 0 }
   0xc   : > { %s162_s8 = sadd.s32 1, %s1724_s19  ;;  %p172_p4 = scmp.ne.s32.totalorder %s1724_s19, %s1720_s18 }
   0xd   : > { %s2101_s29 = smov (%p29_p2, %s2099_s29), 0  ;;  %p1851_p5 = por %p46_p3, %p45_p1 }
   0xe   : > { %2084 = sst [smem:[#allocation8_spill]] %s2101_s29  ;;  %p173_p6 = scmp.eq.s32.totalorder %s1223_s27, 11 }
   0xf   : > { %s1226_s10 = sshll.u32 %s2101_s29, 1  ;;  %s159_s11 = ssub.s32 %s1748_s25, %s2101_s29 }
  0x10   : > { %s34_s12 = sadd.s32 %s1226_s10, %s2097_s28  ;;  %p160_p7 = scmp.eq.s32.totalorder %s159_s11, 0 }
  0x11   : > { %s35_s13 = ssub.s32 %s1841_s7, %s34_s12  ;;  %p1860_p8 = por %p173_p6, %p172_p4 }
  0x12   : > { %p36_p9 = scmp.eq.s32.totalorder %s35_s13, 0  ;;  %p1230_p10 = scmp.ge.s32.totalorder %s1752_s26, 12 }
  0x13   : > { %s1865_s15 = scalar_select %p160_p7, %s1724_s19, %s162_s8  }
  0x14   : > { %s1868_s16 = scalar_select %p36_p9, %s1732_s21, %s38_s6  }
  0x15   : > { %201 = sbr.rel (%p1230_p10) target bundleno = 42 (0x2a), region = 24 }
  0x1c   : > { %204 = sbr.rel (!%p1851_p5) target bundleno = 35 (0x23), region = 28  ;;  %s206_s17 = sand.u32 (%p1851_p5), 1, %s1732_s21  }
  0x1d   : > { %s1233_s27 = sshll.u32 (%p1851_p5), %s1841_s7, 2  ;;  %s1231_s30 = sshll.u32 (%p1851_p5), %s206_s17, 3 }
  0x1e   : > { %s212_s12 = scalar_lea.vmem (%p1851_p5), %s2073_s0, %s1233_s27  ;;  %s208_s8 = scalar_lea.vmem (%p1851_p5), [#allocation3], %s1231_s30 }
  0x1f   : > { %v228_v0 = vld [vmem:[%s212_s12] sm:$0xf] (%p1851_p5)  ;;  %v230_v1 = vld [vmem:[%s212_s12 + $0x28] sm:$0xf] (%p1851_p5) }
  0x20   : > { %229 = vst [vmem:[%s208_s8] sm:$0xf] (%p1851_p5), %v228_v0  ;;  %231 = vst [vmem:[%s208_s8 + $0x4] sm:$0xf] (%p1851_p5), %v230_v1 }
  0x23 PF: > { %258 = sbr.rel (!%p1851_p5) target bundleno = 42 (0x2a), region = 69  ;;  %s260_s6 = sand.u32 (%p1851_p5), 1, %s1732_s21  }
  0x24   : > { %s1236_s13 = sshll.u32 (%p1851_p5), %s1841_s7, 2  ;;  %s1234_s29 = sshll.u32 (%p1851_p5), %s260_s6, 3 }
  0x25   : > { %s266_s25 = scalar_lea.vmem (%p1851_p5), %s2074_s1, %s1236_s13  ;;  %s262_s27 = scalar_lea.vmem (%p1851_p5), [#allocation4], %s1234_s29 }
  0x26   : > { %v282_v2 = vld [vmem:[%s266_s25] sm:$0xf] (%p1851_p5)  ;;  %v284_v3 = vld [vmem:[%s266_s25 + $0x28] sm:$0xf] (%p1851_p5) }
  0x27   : > { %283 = vst [vmem:[%s262_s27] sm:$0xf] (%p1851_p5), %v282_v2  ;;  %285 = vst [vmem:[%s262_s27 + $0x4] sm:$0xf] (%p1851_p5), %v284_v3 }
  0x2a PF: > { %p1237_p11 = scmp.ge.s32.totalorder %s1752_s26, 1  ;;  %p319_p12 = scmp.lt.s32.totalorder %s1752_s26, 13 }
  0x2c   : > { %p320_p13 = pnand %p1237_p11, %p319_p12 }
  0x2d   : > { %s326_s7 = sand.u32 (!%p320_p13), 1, %s1728_s20   ;;  %s365_s28 = sand.u32 (!%p320_p13), 1, %s1720_s18  }
  0x2e   : > { %323 = sbr.rel (%p320_p13) target bundleno = 398 (0x18e), region = 114  ;;  %s1889_s9 = sshll.u32 (!%p320_p13), %s326_s7, 3 }
  0x2f   : > { %s1240_s25 = sshll.u32 (!%p320_p13), %s365_s28, 2  ;;  %p372_p0 = scmp.lt.s32.totalorder (!%p320_p13), %s1736_s22, 2 }
  0x30   : > { %s328_s8 = scalar_lea.vmem (!%p320_p13), [#allocation3], %s1889_s9  ;;  %s335_s6 = scalar_lea.vmem (!%p320_p13), [#allocation4], %s1889_s9 }
  0x31   : > { %s1900_s13 = scalar_lea.vmem (!%p320_p13), [#allocation5], %s1240_s25  ;;  %p1242_p1 = scmp.ne.s32.totalorder (!%p320_p13), %s1736_s22, 0 }
  0x35   : > { %s373_s29 = scalar_select %p372_p0, %s1736_s22, 2 }
  0x36   : > { %381 = sbr.rel (%p1242_p1) target bundleno = 61 (0x3d), region = 126  ;;  %v1754_v4 = vmov (!%p1242_p1), 0.0  }
  0x37   : > { %s1556_s30 = smul.u32 192, %s373_s29  ;;  %382 = vst [vmem:[#allocation2] sm:$0xf] (!%p1242_p1), %v1754_v4  ;;  %383 = vst [vmem:[#allocation2 + $0x4] sm:$0xf] (!%p1242_p1), %v1754_v4 }
  0x39   : > { %s1896_s12 = scalar_lea.vmem %s2075_s2, %s1556_s30 }
  0x3d PF: > { %v1632_v5 = vld [vmem:[%s1896_s12] sm:$0xff]   ;;  %v1755_v6 = vmov 0.0   ;;  %v1634_v8 = vld [vmem:[%s1896_s12 + $0x8] sm:$0xff]   ;;  %vm1756_vm0 = vmmov 0   ;;  %v1636_v10 = vld [vmem:[%s1896_s12 + $0x10] sm:$0xff]   ;;  %p1357_p2 = scmp.ne.s32.totalorder %s1736_s22, 2 }
  0x3e   : > { %1418 = vmatprep.subr.bf16.mxu0 %v1755_v6  ;;  %1478 = vmatprep.subr.bf16.mxu1 %v1755_v6  ;;  %v1633_v7 = vld [vmem:[%s1896_s12] sm:$0xff]   ;;  %v1635_v9 = vld [vmem:[%s1896_s12 + $0x8] sm:$0xff]   ;;  %v1637_v11 = vld [vmem:[%s1896_s12 + $0x10] sm:$0xff]  }
  0x3f   : > { %1419 = vmatpush3.bf16.msra.mxu0 %v1632_v5  ;;  %1434 = vmatprep.mubr.msk.bf16.mxu0 %vm1756_vm0, %v1755_v6  ;;  %v1638_v12 = vld [vmem:[%s1896_s12 + $0x18] sm:$0xff]   ;;  %v1640_v14 = vld [vmem:[%s1896_s12 + $0x20] sm:$0xff]   ;;  %v1642_v16 = vld [vmem:[%s1896_s12 + $0x28] sm:$0xff]  }
  0x40   : > { %1479 = vmatpush3.bf16.msra.mxu1 %v1633_v7  ;;  %1420 = vmatprep.subr.bf16.mxu0 %v1755_v6  ;;  %v1639_v13 = vld [vmem:[%s1896_s12 + $0x18] sm:$0xff]   ;;  %v1641_v15 = vld [vmem:[%s1896_s12 + $0x20] sm:$0xff]   ;;  %v1643_v17 = vld [vmem:[%s1896_s12 + $0x28] sm:$0xff]  }
  0x41   : > { %1480 = vmatprep.subr.bf16.mxu1 %v1755_v6  ;;  %1494 = vmatprep.mubr.msk.bf16.mxu1 %vm1756_vm0, %v1755_v6  ;;  %v1644_v18 = vld [vmem:[%s1896_s12 + $0x30] sm:$0xff]   ;;  %v1646_v20 = vld [vmem:[%s1896_s12 + $0x38] sm:$0xff]   ;;  %v1649_v23 = vld [vmem:[%s1896_s12 + $0x40] sm:$0xff]  }
  0x42   : > { %v1645_v19 = vld [vmem:[%s1896_s12 + $0x30] sm:$0xff]   ;;  %v1647_v21 = vld [vmem:[%s1896_s12 + $0x38] sm:$0xff]   ;;  %v1651_v25 = vld [vmem:[%s1896_s12 + $0x40] sm:$0xff]  }
  0x43   : > { %1421 = vmatpush3.bf16.msra.mxu0 %v1634_v8  ;;  %v1941_v22 = vld [vmem:[%s328_s8] sm:$0x7]  ;;  %v1946_v24 = vld [vmem:[%s328_s8 + $0x4] sm:$0x7]  ;;  %v1656_v30 = vld [vmem:[%s1896_s12 + $0x58] sm:$0xff]  }
  0x44   : > { %1481 = vmatpush3.bf16.msra.mxu1 %v1635_v9  ;;  %1422 = vmatprep.subr.bf16.mxu0 %v1755_v6  ;;  %v1652_v26 = vld [vmem:[%s1896_s12 + $0x48] sm:$0xff]   ;;  %v1654_v28 = vld [vmem:[%s1896_s12 + $0x50] sm:$0xff]   ;;  %v1657_v31 = vld [vmem:[%s1896_s12 + $0x58] sm:$0xff]   ;;  %v1291_v52 = vcombine.low %v1941_v22, %v1941_v22  ;;  %v1348_v53 = vcombine.low %v1946_v24, %v1946_v24 }
  0x45   : > { %1482 = vmatprep.subr.bf16.mxu1 %v1755_v6  ;;  %v1653_v27 = vld [vmem:[%s1896_s12 + $0x48] sm:$0xff]   ;;  %v1655_v29 = vld [vmem:[%s1896_s12 + $0x50] sm:$0xff]   ;;  %v1658_v32 = vld [vmem:[%s1896_s12 + $0x60] sm:$0xff]  }
  0x46   : > { %v1659_v33 = vld [vmem:[%s1896_s12 + $0x60] sm:$0xff]   ;;  %v1660_v34 = vld [vmem:[%s1896_s12 + $0x68] sm:$0xff]   ;;  %v1662_v36 = vld [vmem:[%s1896_s12 + $0x70] sm:$0xff]   ;;  %v623_v56 = vshll.u32 %v1291_v52, 16  ;;  %v952_v57 = vshll.u32 %v1348_v53, 16  ;;  %v621_v60 = vshrl.u32 %v1291_v52, 16 }
  0x47   : > { %1423 = vmatpush3.bf16.msra.mxu0 %v1636_v10  ;;  %v1661_v35 = vld [vmem:[%s1896_s12 + $0x68] sm:$0xff]   ;;  %v1663_v37 = vld [vmem:[%s1896_s12 + $0x70] sm:$0xff]   ;;  %v1664_v38 = vld [vmem:[%s1896_s12 + $0x78] sm:$0xff]   ;;  %v950_v62 = vshrl.u32 %v1348_v53, 16 }
  0x48   : > { %1483 = vmatpush3.bf16.msra.mxu1 %v1637_v11  ;;  %1424 = vmatprep.subr.bf16.mxu0 %v1755_v6  ;;  %v1665_v39 = vld [vmem:[%s1896_s12 + $0x78] sm:$0xff]   ;;  %v1666_v41 = vld [vmem:[%s1896_s12 + $0x80] sm:$0xff]   ;;  %v1668_v44 = vld [vmem:[%s1896_s12 + $0x88] sm:$0xff]   ;;  %v625_v61 = vrot.slane %v623_v56, 1  ;;  %v954_v63 = vrot.slane %v952_v57, 1 }
  0x49   : > { %1484 = vmatprep.subr.bf16.mxu1 %v1755_v6  ;;  %v386_v40 = vld [vmem:[%s335_s6] sm:$0x7]  ;;  %v387_v42 = vld [vmem:[%s335_s6 + $0x4] sm:$0x7]  ;;  %v1669_v45 = vld [vmem:[%s1896_s12 + $0x88] sm:$0xff]  }
  0x4a   : > { %v1667_v43 = vld [vmem:[%s1896_s12 + $0x80] sm:$0xff]   ;;  %v1670_v46 = vld [vmem:[%s1896_s12 + $0x90] sm:$0xff]   ;;  %v1672_v48 = vld [vmem:[%s1896_s12 + $0x98] sm:$0xff]   ;;  %v626_v2 = vor.u32 %v625_v61, %v621_v60  ;;  %v955_v3 = vor.u32 %v954_v63, %v950_v62 }
  0x4b   : > { %1425 = vmatpush3.bf16.msra.mxu0 %v1638_v12  ;;  %v1671_v47 = vld [vmem:[%s1896_s12 + $0x90] sm:$0xff]   ;;  %v1673_v49 = vld [vmem:[%s1896_s12 + $0x98] sm:$0xff]   ;;  %v1674_v50 = vld [vmem:[%s1896_s12 + $0xa0] sm:$0xff]  }
  0x4c   : > { %1485 = vmatpush3.bf16.msra.mxu1 %v1639_v13  ;;  %1426 = vmatprep.subr.bf16.mxu0 %v1755_v6  ;;  %v1675_v51 = vld [vmem:[%s1896_s12 + $0xa0] sm:$0xff]   ;;  %v1676_v54 = vld [vmem:[%s1896_s12 + $0xa8] sm:$0xff]   ;;  %v1678_v58 = vld [vmem:[%s1896_s12 + $0xb0] sm:$0xff]  }
  0x4d   : > { %1486 = vmatprep.subr.bf16.mxu1 %v1755_v6  ;;  %v1677_v55 = vld [vmem:[%s1896_s12 + $0xa8] sm:$0xff]   ;;  %v1679_v59 = vld [vmem:[%s1896_s12 + $0xb0] sm:$0xff]   ;;  %v1680_v0 = vld [vmem:[%s1896_s12 + $0xb8] sm:$0xff]  }
  0x4e   : > { %v1681_v1 = vld [vmem:[%s1896_s12 + $0xb8] sm:$0xff]   ;;  %v388_v4 = vld [vmem:[#allocation2] sm:$0xf]  ;;  %v719_v5 = vld [vmem:[#allocation2 + $0x4] sm:$0xf] }
  0x4f   : > { %1427 = vmatpush3.bf16.msra.mxu0 %v1640_v14 }
  0x50   : > { %1487 = vmatpush3.bf16.msra.mxu1 %v1641_v15  ;;  %1428 = vmatprep.subr.bf16.mxu0 %v1755_v6 }
  0x51   : > { %1488 = vmatprep.subr.bf16.mxu1 %v1755_v6 }
  0x53   : > { %1429 = vmatpush3.bf16.msra.mxu0 %v1642_v16 }
  0x54   : > { %1489 = vmatpush3.bf16.msra.mxu1 %v1643_v17  ;;  %1430 = vmatprep.subr.bf16.mxu0 %v1755_v6  ;;  %v1358_v17 = vld [vmem:[%s2076_s3] ss:$0 sm:$0xff] (!%p1357_p2) }
  0x55   : > { %1490 = vmatprep.subr.bf16.mxu1 %v1755_v6 }
  0x57   : > { %1431 = vmatpush3.bf16.msra.mxu0 %v1644_v18  ;;  %v1359_v18 = vld [vmem:[%s2077_s4] ss:$0 sm:$0xff] (!%p1357_p2) }
  0x58   : > { %1491 = vmatpush3.bf16.msra.mxu1 %v1645_v19  ;;  %1432 = vmatprep.subr.bf16.mxu0 %v1755_v6 }
  0x59   : > { %1492 = vmatprep.subr.bf16.mxu1 %v1755_v6 }
  0x5b   : > { %1433 = vmatpush3.bf16.msra.mxu0 %v1646_v20 }
  0x5c   : > { %1493 = vmatpush3.bf16.msra.mxu1 %v1647_v21  ;;  %1438 = vmatprep.subr.bf16.mxu0 %v1755_v6 }
  0x5d   : > { %1498 = vmatprep.subr.bf16.mxu1 %v1755_v6 }
  0x5e   : > { %1435 = vmatmul.mubr.bf16.vlgmr.msra.gmra.mrb[0].mxu0 %v1941_v22 }
  0x5f   : > { %1439 = vmatpush3.bf16.msra.mxu0 %v1649_v23  ;;  %1495 = vmatmul.mubr.bf16.vlgmr.msra.gmra.mrb[0].mxu1 %v1946_v24 }
  0x60   : > { %1499 = vmatpush3.bf16.msra.mxu1 %v1651_v25  ;;  %1440 = vmatprep.subr.bf16.mxu0 %v1755_v6 }
  0x61   : > { %1500 = vmatprep.subr.bf16.mxu1 %v1755_v6  ;;  %1454 = vmatprep.mubr.msk.bf16.mxu0 %vm1756_vm0, %v1755_v6 }
  0x62   : > { %1514 = vmatprep.mubr.msk.bf16.mxu1 %vm1756_vm0, %v1755_v6 }
  0x63   : > { %1441 = vmatpush3.bf16.msra.mxu0 %v1652_v26 }
  0x64   : > { %1501 = vmatpush3.bf16.msra.mxu1 %v1653_v27  ;;  %1442 = vmatprep.subr.bf16.mxu0 %v1755_v6 }
  0x65   : > { %1502 = vmatprep.subr.bf16.mxu1 %v1755_v6 }
  0x67   : > { %1443 = vmatpush3.bf16.msra.mxu0 %v1654_v28 }
  0x68   : > { %1503 = vmatpush3.bf16.msra.mxu1 %v1655_v29  ;;  %1444 = vmatprep.subr.bf16.mxu0 %v1755_v6 }
  0x69   : > { %1504 = vmatprep.subr.bf16.mxu1 %v1755_v6 }
  0x6b   : > { %1445 = vmatpush3.bf16.msra.mxu0 %v1656_v30 }
  0x6c   : > { %1505 = vmatpush3.bf16.msra.mxu1 %v1657_v31  ;;  %1446 = vmatprep.subr.bf16.mxu0 %v1755_v6 }
  0x6d   : > { %1506 = vmatprep.subr.bf16.mxu1 %v1755_v6 }
  0x6f   : > { %1447 = vmatpush3.bf16.msra.mxu0 %v1658_v32 }
  0x70   : > { %1507 = vmatpush3.bf16.msra.mxu1 %v1659_v33  ;;  %1448 = vmatprep.subr.bf16.mxu0 %v1755_v6 }
  0x71   : > { %1508 = vmatprep.subr.bf16.mxu1 %v1755_v6 }
  0x73   : > { %1449 = vmatpush3.bf16.msra.mxu0 %v1660_v34 }
  0x74   : > { %1509 = vmatpush3.bf16.msra.mxu1 %v1661_v35  ;;  %1450 = vmatprep.subr.bf16.mxu0 %v1755_v6 }
  0x75   : > { %1510 = vmatprep.subr.bf16.mxu1 %v1755_v6 }
  0x77   : > { %1451 = vmatpush3.bf16.msra.mxu0 %v1662_v36 }
  0x78   : > { %1511 = vmatpush3.bf16.msra.mxu1 %v1663_v37  ;;  %1452 = vmatprep.subr.bf16.mxu0 %v1755_v6 }
  0x79   : > { %1512 = vmatprep.subr.bf16.mxu1 %v1755_v6 }
  0x7b   : > { %1453 = vmatpush3.bf16.msra.mxu0 %v1664_v38 }
  0x7c   : > { %1513 = vmatpush3.bf16.msra.mxu1 %v1665_v39  ;;  %1458 = vmatprep.subr.bf16.mxu0 %v1755_v6 }
  0x7d   : > { %1518 = vmatprep.subr.bf16.mxu1 %v1755_v6 }
  0x7e   : > { %1455 = vmatmul.mubr.bf16.vlgmr.msra.gmra.mrb[0].mxu0 %v386_v40 }
  0x7f   : > { %1459 = vmatpush3.bf16.msra.mxu0 %v1666_v41  ;;  %1515 = vmatmul.mubr.bf16.vlgmr.msra.gmra.mrb[0].mxu1 %v387_v42 }
  0x80   : > { %1519 = vmatpush3.bf16.msra.mxu1 %v1667_v43  ;;  %1460 = vmatprep.subr.bf16.mxu0 %v1755_v6 }
  0x81   : > { %1520 = vmatprep.subr.bf16.mxu1 %v1755_v6  ;;  %1474 = vmatprep.mubr.msk.bf16.mxu0 %vm1756_vm0, %v1755_v6 }
  0x82   : > { %1534 = vmatprep.mubr.msk.bf16.mxu1 %vm1756_vm0, %v1755_v6 }
  0x83   : > { %1461 = vmatpush3.bf16.msra.mxu0 %v1668_v44 }
  0x84   : > { %1521 = vmatpush3.bf16.msra.mxu1 %v1669_v45  ;;  %1462 = vmatprep.subr.bf16.mxu0 %v1755_v6 }
  0x85   : > { %1522 = vmatprep.subr.bf16.mxu1 %v1755_v6 }
  0x87   : > { %1463 = vmatpush3.bf16.msra.mxu0 %v1670_v46 }
  0x88   : > { %1523 = vmatpush3.bf16.msra.mxu1 %v1671_v47  ;;  %1464 = vmatprep.subr.bf16.mxu0 %v1755_v6 }
  0x89   : > { %1524 = vmatprep.subr.bf16.mxu1 %v1755_v6 }
  0x8b   : > { %1465 = vmatpush3.bf16.msra.mxu0 %v1672_v48 }
  0x8c   : > { %1525 = vmatpush3.bf16.msra.mxu1 %v1673_v49  ;;  %1466 = vmatprep.subr.bf16.mxu0 %v1755_v6 }
  0x8d   : > { %1526 = vmatprep.subr.bf16.mxu1 %v1755_v6 }
  0x8f   : > { %1467 = vmatpush3.bf16.msra.mxu0 %v1674_v50 }
  0x90   : > { %1527 = vmatpush3.bf16.msra.mxu1 %v1675_v51  ;;  %1468 = vmatprep.subr.bf16.mxu0 %v1755_v6 }
  0x91   : > { %1528 = vmatprep.subr.bf16.mxu1 %v1755_v6 }
  0x93   : > { %1469 = vmatpush3.bf16.msra.mxu0 %v1676_v54 }
  0x94   : > { %1529 = vmatpush3.bf16.msra.mxu1 %v1677_v55  ;;  %1470 = vmatprep.subr.bf16.mxu0 %v1755_v6 }
  0x95   : > { %1530 = vmatprep.subr.bf16.mxu1 %v1755_v6 }
  0x97   : > { %1471 = vmatpush3.bf16.msra.mxu0 %v1678_v58 }
  0x98   : > { %1531 = vmatpush3.bf16.msra.mxu1 %v1679_v59  ;;  %1472 = vmatprep.subr.bf16.mxu0 %v1755_v6 }
  0x99   : > { %1532 = vmatprep.subr.bf16.mxu1 %v1755_v6 }
  0x9b   : > { %1473 = vmatpush3.bf16.msra.mxu0 %v1680_v0 }
  0x9c   : > { %1533 = vmatpush3.bf16.msra.mxu1 %v1681_v1 }
  0x9e   : > { %1475 = vmatmul.mubr.bf16.vlgmr.msra.gmra.mrb[0].mxu0 %v626_v2 }
  0x9f   : > { %1535 = vmatmul.mubr.bf16.vlgmr.msra.gmra.mrb[0].mxu1 %v955_v3 }
 0x16f   : > { %1050 = sbr.rel (%p1357_p2) target bundleno = 390 (0x186), region = 130 }
 0x171   : > { %v710_v7 = vpop.f32.mrb[0].mxu0 }
 0x172   : > { %v1538_v8 = vadd.f32 %v710_v7, %v388_v4  ;;  %v1039_v9 = vpop.f32.mrb[0].mxu1  ;;  %v1476_v10 = vpop.f32.mrb[1].mxu0 }
 0x173   : > { %v1539_v11 = vadd.f32 %v1039_v9, %v719_v5  ;;  %v1536_v12 = vpop.f32.mrb[1].mxu1  ;;  %v713_v13 = vpop.f32.mrb[2].mxu0 }
 0x174   : > { %717 = vst [vmem:[#allocation2] sm:$0xf] %v1538_v8  ;;  %v1042_v14 = vpop.f32.mrb[2].mxu1  ;;  %v1477_v15 = vpop.f32.mrb[3].mxu0 }
 0x175   : > { %1046 = vst [vmem:[#allocation2 + $0x4] sm:$0xf] %v1539_v11  ;;  %v1537_v6 = vpop.f32.mrb[3].mxu1 }
 0x17b   : > { %v1051_v16 = vld [vmem:[#allocation2] sm:$0xf] }
 0x17c   : > { %v1060_v19 = vmul.f32 %v1358_v17, %v1051_v16  ;;  %v1052_v20 = vld [vmem:[#allocation2 + $0x4] sm:$0xf] }
 0x17d   : > { %v1061_v21 = vmul.f32 %v1358_v17, %v1052_v20 }
 0x17e   : > { %v1069_v22 = vadd.f32 %v1359_v18, %v1060_v19 }
 0x17f   : > { %v1070_v23 = vadd.f32 %v1359_v18, %v1061_v21 }
 0x180   : > { %v1071_v24 = vmax.f32 %v1069_v22, 0.0 }
 0x181   : > { %v1072_v25 = vmax.f32 %v1070_v23, 0.0 }
 0x182   : > { %v1073_v26 = vpack.c.bf16 %v1071_v24, %v1071_v24 }
 0x183   : > { %v1074_v27 = vpack.c.bf16 %v1072_v25, %v1072_v25 }
 0x184   : > { %1075 = vst [vmem:[%s1900_s13] sm:$0x3] %v1073_v26 }
 0x185   : > { %1076 = vst [vmem:[%s1900_s13 + $0x2] sm:$0x3] %v1074_v27 }
 0x186 PF: > { %1083 = sbr.rel (!%p1860_p8) target bundleno = 398 (0x18e), region = 134  ;;  %s1361_s22 = sshll.u32 (%p1860_p8), %s1740_s23, 1 }
 0x187   : > { %s1085_s9 = scalar_lea.vmem (%p1860_p8), %s2078_s5, %s1361_s22 }
 0x18b   : > { %v1101_v28 = vld [vmem:[%s1900_s13] sm:$0x3] (%p1860_p8) }
 0x18c   : > { %v1103_v29 = vld [vmem:[%s1900_s13 + $0x2] sm:$0x3] (%p1860_p8)  ;;  %1102 = vst [vmem:[%s1085_s9] sm:$0x3] (%p1860_p8), %v1101_v28 }
 0x18d   : > { %1104 = vst [vmem:[%s1085_s9 + $0x8] sm:$0x3] %v1103_v29 }
 0x18e PF: > { %s15_s26 = sadd.s32 1, %s1752_s26   ;;  %s2087_s23 = sld [smem:[#allocation6_spill]] }
 0x18f   : > { %p12_p3 = scmp.ge.s32.totalorder %s15_s26, 14   ;;  %s2088_s14 = sld [smem:[#allocation7_spill]] }
 0x190   : > { %s2089_s25 = sld [smem:[#allocation8_spill]]  ;;  %s2090_s18 = smov %s1724_s19 }
 0x191   : > { %s2091_s19 = smov %s1865_s15  ;;  %s2092_s20 = smov %s1732_s21 }
 0x192   : > { %s2093_s21 = smov %s1868_s16  ;;  %s2094_s22 = smov %s1744_s24 }
 0x193   :  { %14 = sbr.rel (!%p12_p3) target bundleno = 5 (0x5), region = 213 }
 0x195   : > { %s2095_s24 = smov %s2088_s14 }

// kernel: shared_module_fr_forward.52
= control target key start
LH: loop header
LB: loop body
LE: loop exit
PB: predicated region body
PF: predicated region fallthrough
CT: control target
= control target key end

     0   :  { %s788_s1 = inlined_call_operand.vmem [shape: bf16[512,128], index: 1, kind: input, shape index: {}]   ;;  %s789_s0 = inlined_call_operand.vmem [shape: bf16[32,512], index: 0, kind: input, shape index: {}]   ;;  %s790_s2 = inlined_call_operand.vmem [shape: f32[1,128], index: 2, kind: input, shape index: {}]   ;;  %s791_s3 = inlined_call_operand.vmem [shape: f32[1,128], index: 3, kind: input, shape index: {}]   ;;  %s792_s4 = inlined_call_operand.vmem [shape: bf16[32,128], index: 4, kind: output, shape index: {}]  }
   0x1   :  { %v587_v0 = vld [vmem:[%s788_s1 + $0x40] sm:$0xff]   ;;  %v591_v4 = vld [vmem:[%s788_s1 + $0x48] sm:$0xff]   ;;  %v595_v8 = vld [vmem:[%s788_s1 + $0x50] sm:$0xff]  }
   0x2   :  { %v588_v1 = vld [vmem:[%s788_s1 + $0xc0] sm:$0xff]   ;;  %531 = vmatprep.subr.bf16.mxu0 %v587_v0  ;;  %v592_v5 = vld [vmem:[%s788_s1 + $0xc8] sm:$0xff]   ;;  %v596_v9 = vld [vmem:[%s788_s1 + $0xd0] sm:$0xff]  }
   0x3   :  { %v589_v2 = vld [vmem:[%s788_s1] sm:$0xff]   ;;  %559 = vmatprep.subr.bf16.mxu1 %v588_v1  ;;  %v593_v6 = vld [vmem:[%s788_s1 + $0x8] sm:$0xff]   ;;  %v597_v10 = vld [vmem:[%s788_s1 + $0x10] sm:$0xff]  }
   0x4   :  { %v590_v3 = vld [vmem:[%s788_s1 + $0x80] sm:$0xff]   ;;  %532 = vmatpush3.bf16.msra.mxu0 %v589_v2  ;;  %v594_v7 = vld [vmem:[%s788_s1 + $0x88] sm:$0xff]   ;;  %v598_v11 = vld [vmem:[%s788_s1 + $0x90] sm:$0xff]  }
   0x5   :  { %560 = vmatpush3.bf16.msra.mxu1 %v590_v3  ;;  %533 = vmatprep.subr.bf16.mxu0 %v591_v4  ;;  %v599_v12 = vld [vmem:[%s788_s1 + $0x58] sm:$0xff]   ;;  %v603_v16 = vld [vmem:[%s788_s1 + $0x60] sm:$0xff]   ;;  %v607_v20 = vld [vmem:[%s788_s1 + $0x68] sm:$0xff]  }
   0x6   :  { %561 = vmatprep.subr.bf16.mxu1 %v592_v5  ;;  %v600_v13 = vld [vmem:[%s788_s1 + $0xd8] sm:$0xff]   ;;  %v604_v17 = vld [vmem:[%s788_s1 + $0xe0] sm:$0xff]   ;;  %v608_v21 = vld [vmem:[%s788_s1 + $0xe8] sm:$0xff]  }
   0x7   :  { %v601_v14 = vld [vmem:[%s788_s1 + $0x18] sm:$0xff]   ;;  %v605_v18 = vld [vmem:[%s788_s1 + $0x20] sm:$0xff]   ;;  %v609_v22 = vld [vmem:[%s788_s1 + $0x28] sm:$0xff]  }
   0x8   :  { %534 = vmatpush3.bf16.msra.mxu0 %v593_v6  ;;  %v602_v15 = vld [vmem:[%s788_s1 + $0x98] sm:$0xff]   ;;  %v606_v19 = vld [vmem:[%s788_s1 + $0xa0] sm:$0xff]   ;;  %v610_v23 = vld [vmem:[%s788_s1 + $0xa8] sm:$0xff]  }
   0x9   :  { %562 = vmatpush3.bf16.msra.mxu1 %v594_v7  ;;  %535 = vmatprep.subr.bf16.mxu0 %v595_v8  ;;  %v611_v24 = vld [vmem:[%s788_s1 + $0x70] sm:$0xff]   ;;  %v615_v28 = vld [vmem:[%s788_s1 + $0x78] sm:$0xff]   ;;  %v510_v49 = vld [vmem:[%s790_s2] ss:$0 sm:$0xff] }
   0xa   :  { %563 = vmatprep.subr.bf16.mxu1 %v596_v9  ;;  %v612_v25 = vld [vmem:[%s788_s1 + $0xf0] sm:$0xff]   ;;  %v616_v29 = vld [vmem:[%s788_s1 + $0xf8] sm:$0xff]   ;;  %v511_v54 = vld [vmem:[%s791_s3] ss:$0 sm:$0xff] }
   0xb   :  { %v613_v26 = vld [vmem:[%s788_s1 + $0x30] sm:$0xff]   ;;  %v617_v30 = vld [vmem:[%s788_s1 + $0x38] sm:$0xff]  }
   0xc   :  { %536 = vmatpush3.bf16.msra.mxu0 %v597_v10  ;;  %v614_v27 = vld [vmem:[%s788_s1 + $0xb0] sm:$0xff]   ;;  %v618_v31 = vld [vmem:[%s788_s1 + $0xb8] sm:$0xff]  }
   0xd   :  { %564 = vmatpush3.bf16.msra.mxu1 %v598_v11  ;;  %537 = vmatprep.subr.bf16.mxu0 %v599_v12  ;;  %v619_v32 = vld [vmem:[%s789_s0] ss:$16 sps:$4 sm:$0xff]   ;;  %v621_v33 = vld [vmem:[%s789_s0 + $0x4] ss:$16 sps:$4 sm:$0xff]   ;;  %v622_v34 = vld [vmem:[%s789_s0 + $0x8] ss:$16 sps:$4 sm:$0xff]  }
   0xe   :  { %565 = vmatprep.subr.bf16.mxu1 %v600_v13  ;;  %v624_v35 = vld [vmem:[%s789_s0 + $0xc] ss:$16 sps:$4 sm:$0xff]   ;;  %354 = vmatprep.mubr.bf16.mxu0 %v621_v33  ;;  %v625_v36 = vld [vmem:[%s789_s0 + $0x24] ss:$16 sps:$4 sm:$0xff]   ;;  %v629_v38 = vld [vmem:[%s789_s0 + $0x20] ss:$16 sps:$4 sm:$0xff]  }
   0xf   :  { %403 = vmatprep.mubr.bf16.mxu1 %v624_v35  ;;  %v627_v37 = vld [vmem:[%s789_s0 + $0x2c] ss:$16 sps:$4 sm:$0xff]   ;;  %v630_v39 = vld [vmem:[%s789_s0 + $0x28] ss:$16 sps:$4 sm:$0xff]  }
  0x10   :  { %538 = vmatpush3.bf16.msra.mxu0 %v601_v14 }
  0x11   :  { %566 = vmatpush3.bf16.msra.mxu1 %v602_v15  ;;  %539 = vmatprep.subr.bf16.mxu0 %v603_v16 }
  0x12   :  { %567 = vmatprep.subr.bf16.mxu1 %v604_v17 }
  0x14   :  { %540 = vmatpush3.bf16.msra.mxu0 %v605_v18 }
  0x15   :  { %568 = vmatpush3.bf16.msra.mxu1 %v606_v19  ;;  %541 = vmatprep.subr.bf16.mxu0 %v607_v20 }
  0x16   :  { %569 = vmatprep.subr.bf16.mxu1 %v608_v21 }
  0x18   :  { %542 = vmatpush3.bf16.msra.mxu0 %v609_v22 }
  0x19   :  { %570 = vmatpush3.bf16.msra.mxu1 %v610_v23  ;;  %543 = vmatprep.subr.bf16.mxu0 %v611_v24 }
  0x1a   :  { %571 = vmatprep.subr.bf16.mxu1 %v612_v25 }
  0x1c   :  { %544 = vmatpush3.bf16.msra.mxu0 %v613_v26 }
  0x1d   :  { %572 = vmatpush3.bf16.msra.mxu1 %v614_v27  ;;  %545 = vmatprep.subr.bf16.mxu0 %v615_v28 }
  0x1e   :  { %573 = vmatprep.subr.bf16.mxu1 %v616_v29 }
  0x20   :  { %546 = vmatpush3.bf16.msra.mxu0 %v617_v30 }
  0x21   :  { %574 = vmatpush3.bf16.msra.mxu1 %v618_v31 }
  0x23   :  { %355 = vmatmul.mubr.bf16.vlgmr.msra.gmra.mrb[0].mxu0 %v619_v32 }
  0x24   :  { %404 = vmatmul.mubr.bf16.vlgmr.msra.gmra.mrb[0].mxu1 %v622_v34  ;;  %362 = vmatprep.mubr.bf16.mxu0 %v625_v36 }
  0x25   :  { %411 = vmatprep.mubr.bf16.mxu1 %v627_v37 }
  0x2b   :  { %363 = vmatmul.mubr.bf16.gmra.mrb[4].mxu0 %v629_v38 }
  0x2c   :  { %412 = vmatmul.mubr.bf16.gmra.mrb[4].mxu1 %v630_v39 }
  0xf6   :  { %v547_v40 = vpop.f32.mrb[0].mxu0 }
  0xf7   :  { %v575_v41 = vpop.f32.mrb[0].mxu1  ;;  %v548_v42 = vpop.f32.mrb[1].mxu0 }
  0xf8   :  { %v549_v43 = vadd.f32 %v548_v42, %v547_v40  ;;  %v576_v44 = vpop.f32.mrb[1].mxu1  ;;  %v550_v45 = vpop.f32.mrb[2].mxu0 }
  0xf9   :  { %v577_v46 = vadd.f32 %v576_v44, %v575_v41  ;;  %v578_v47 = vpop.f32.mrb[2].mxu1  ;;  %v551_v48 = vpop.f32.mrb[3].mxu0 }
  0xfa   :  { %v552_v50 = vadd.f32 %v551_v48, %v550_v45  ;;  %v579_v51 = vpop.f32.mrb[3].mxu1 }
  0xfb   :  { %v406_v52 = vadd.f32 %v577_v46, %v549_v43  ;;  %v580_v53 = vadd.f32 %v579_v51, %v578_v47 }
  0xfd   :  { %v427_v55 = vmul.f32 %v510_v49, %v406_v52  ;;  %v409_v56 = vadd.f32 %v580_v53, %v552_v50 }
  0xfe   :  { %v553_v57 = vpop.f32.mrb[4].mxu0 }
  0xff   :  { %v438_v58 = vadd.f32 %v511_v54, %v427_v55  ;;  %v428_v59 = vmul.f32 %v510_v49, %v409_v56  ;;  %v581_v60 = vpop.f32.mrb[4].mxu1  ;;  %v554_v61 = vpop.f32.mrb[5].mxu0 }
 0x100   :  { %v555_v62 = vadd.f32 %v554_v61, %v553_v57  ;;  %v582_v63 = vpop.f32.mrb[5].mxu1  ;;  %v556_v0 = vpop.f32.mrb[6].mxu0 }
 0x101   :  { %v439_v1 = vadd.f32 %v511_v54, %v428_v59  ;;  %v583_v2 = vadd.f32 %v582_v63, %v581_v60  ;;  %v584_v3 = vpop.f32.mrb[6].mxu1  ;;  %v557_v4 = vpop.f32.mrb[7].mxu0  ;;  %v442_v7 = vmax.f32 %v438_v58, 0.0 }
 0x102   :  { %v558_v5 = vadd.f32 %v557_v4, %v556_v0  ;;  %v585_v6 = vpop.f32.mrb[7].mxu1 }
 0x103   :  { %v443_v8 = vmax.f32 %v439_v1, 0.0  ;;  %v414_v9 = vadd.f32 %v583_v2, %v555_v62  ;;  %v586_v10 = vadd.f32 %v585_v6, %v584_v3 }
 0x105   :  { %v523_v11 = vpack.c.bf16 %v443_v8, %v442_v7  ;;  %v429_v12 = vmul.f32 %v510_v49, %v414_v9  ;;  %v417_v13 = vadd.f32 %v586_v10, %v558_v5 }
 0x107   :  { %524 = vst [vmem:[%s792_s4] sm:$0xff] %v523_v11   ;;  %v440_v14 = vadd.f32 %v511_v54, %v429_v12  ;;  %v430_v15 = vmul.f32 %v510_v49, %v417_v13 }
 0x109   :  { %v441_v16 = vadd.f32 %v511_v54, %v430_v15  ;;  %v444_v17 = vmax.f32 %v440_v14, 0.0 }
 0x10b   :  { %v445_v18 = vmax.f32 %v441_v16, 0.0 }
 0x10d   :  { %v528_v19 = vpack.c.bf16 %v445_v18, %v444_v17 }
 0x10f   :  { %530 = vst [vmem:[%s792_s4 + $0x8] sm:$0xff] %v528_v19  }

// kernel: shared_module_fr_forward.53
= control target key start
LH: loop header
LB: loop body
LE: loop exit
PB: predicated region body
PF: predicated region fallthrough
CT: control target
= control target key end

     0   :  { %s1650_s15 = smov 0   ;;  %s1652_s16 = smov 0   ;;  %s1920_s0 = inlined_call_operand.vmem [shape: bf16[2,6,6,128], index: 0, kind: input, shape index: {}]   ;;  %s1921_s1 = inlined_call_operand.vmem [shape: bf16[3,3,128,128], index: 1, kind: input, shape index: {}]   ;;  %s1922_s2 = inlined_call_operand.vmem [shape: f32[1,1,128], index: 2, kind: input, shape index: {}]   ;;  %s1923_s3 = inlined_call_operand.vmem [shape: f32[1,1,128], index: 3, kind: input, shape index: {}]   ;;  %s1924_s4 = inlined_call_operand.vmem [shape: bf16[2,4,4,128], index: 4, kind: output, shape index: {}]  }
   0x1   :  { %s1654_s17 = smov 0   ;;  %s1656_s18 = smov 0  }
   0x2   :  { %s1658_s19 = smov 0   ;;  %s1660_s20 = smov 0  }
   0x3   :  { %s1662_s21 = smov 0   ;;  %s1664_s22 = smov 0  }
   0x4   :  { %s1666_s23 = smov 0  }
   0x5 LB: > { %s23_s24 = sadd.s32 1, %s1612_s21  ;;  %s26_s25 = sadd.s32 1, %s1616_s22  ;;  %s1620_s23 = sphi %s1666_s23, %s14_s23   ;;  %s1616_s22 = sphi %s1664_s22, %s1934_s22   ;;  %s1612_s21 = sphi %s1662_s21, %s1933_s21   ;;  %s1608_s20 = sphi %s1660_s20, %s1932_s20   ;;  %s1604_s19 = sphi %s1658_s19, %s1931_s19   ;;  %s1600_s18 = sphi %s1656_s18, %s1930_s18   ;;  %s1596_s17 = sphi %s1654_s17, %s1929_s17   ;;  %s1592_s16 = sphi %s1652_s16, %s1928_s16   ;;  %s1588_s15 = sphi %s1650_s15, %s1927_s15  }
   0x6   : > { %p24_p0 = scmp.ge.s32.totalorder %s23_s24, 3  ;;  %s1100_s26 = sadd.s32 4294967295, %s1620_s23  }
   0x7   : > { %s30_s27 = sadd.s32 %s1612_s21, %s1616_s22  ;;  %p42_p1 = scmp.ne.s32.totalorder %s1600_s18, %s1596_s17 }
   0x8   : > { %s1936_s24 = smov (%p24_p0, %s23_s24), 0  ;;  %s1938_s25 = smov (!%p24_p0, %s26_s25), %s1616_s22 }
   0x9   : > { %p43_p2 = scmp.eq.s32.totalorder %s1620_s23, 0  ;;  %p28_p3 = scmp.ge.s32.totalorder %s1938_s25, 4 }
   0xa   : > { %s35_s28 = sadd.s32 1, %s1600_s18  ;;  %p139_p5 = scmp.ne.s32.totalorder %s1592_s16, %s1588_s15 }
   0xb   : > { %p1707_p4 = por %p43_p2, %p42_p1  ;;  %s1940_s25 = smov (%p28_p3, %s1938_s25), 0 }
   0xc   : > { %s129_s30 = sadd.s32 1, %s1592_s16  ;;  %p140_p6 = scmp.eq.s32.totalorder %s1100_s26, 11 }
   0xd   : > { %s31_s5 = sadd.s32 %s1940_s25, %s1936_s24  ;;  %s126_s6 = ssub.s32 %s1616_s22, %s1940_s25 }
   0xe   : > { %s32_s7 = ssub.s32 %s30_s27, %s31_s5  ;;  %p127_p7 = scmp.eq.s32.totalorder %s126_s6, 0 }
   0xf   : > { %p33_p8 = scmp.eq.s32.totalorder %s32_s7, 0  ;;  %p1720_p9 = por %p140_p6, %p139_p5 }
  0x10   : > { %s1725_s9 = scalar_select %p127_p7, %s1592_s16, %s129_s30  }
  0x11   : > { %s1728_s10 = scalar_select %p33_p8, %s1600_s18, %s35_s28  }
  0x12   : > { %p1103_p10 = scmp.ge.s32.totalorder %s1620_s23, 12 }
  0x14   : > { %168 = sbr.rel (%p1103_p10) target bundleno = 34 (0x22), region = 24 }
  0x1b   : > { %171 = sbr.rel (!%p1707_p4) target bundleno = 34 (0x22), region = 28  ;;  %s173_s11 = sand.u32 (%p1707_p4), 1, %s1600_s18  }
  0x1c   : > { %s1105_s12 = sshll.u32 (%p1707_p4), %s30_s27, 2  ;;  %s1104_s13 = sshll.u32 (%p1707_p4), %s173_s11, 3 }
  0x1d   : > { %s178_s5 = scalar_lea.vmem (%p1707_p4), %s1920_s0, %s1105_s12  ;;  %s175_s30 = scalar_lea.vmem (%p1707_p4), [#allocation3], %s1104_s13 }
  0x1e   : > { %v194_v0 = vld [vmem:[%s178_s5] sm:$0xf] (%p1707_p4)  ;;  %v196_v1 = vld [vmem:[%s178_s5 + $0x18] sm:$0xf] (%p1707_p4) }
  0x1f   : > { %195 = vst [vmem:[%s175_s30] sm:$0xf] (%p1707_p4), %v194_v0  ;;  %197 = vst [vmem:[%s175_s30 + $0x4] sm:$0xf] (%p1707_p4), %v196_v1 }
  0x22 PF: > { %p1106_p11 = scmp.ge.s32.totalorder %s1620_s23, 1  ;;  %p231_p12 = scmp.lt.s32.totalorder %s1620_s23, 13 }
  0x24   : > { %p232_p13 = pnand %p1106_p11, %p231_p12 }
  0x25   : > { %s238_s27 = sand.u32 (!%p232_p13), 1, %s1596_s17   ;;  %s264_s28 = sand.u32 (!%p232_p13), 1, %s1588_s15  }
  0x26   : > { %235 = sbr.rel (%p232_p13) target bundleno = 390 (0x186), region = 73  ;;  %s1741_s29 = sshll.u32 (!%p232_p13), %s238_s27, 3 }
  0x27   : > { %s1108_s6 = sshll.u32 (!%p232_p13), %s264_s28, 2  ;;  %p268_p0 = scmp.lt.s32.totalorder (!%p232_p13), %s1604_s19, 2 }
  0x28   : > { %s240_s26 = scalar_lea.vmem (!%p232_p13), [#allocation3], %s1741_s29  ;;  %s1751_s5 = scalar_lea.vmem (!%p232_p13), [#allocation4], %s1108_s6 }
  0x29   : > { %p1110_p1 = scmp.ne.s32.totalorder (!%p232_p13), %s1604_s19, 0 }
  0x2d   : > { %s269_s7 = scalar_select %p268_p0, %s1604_s19, 2 }
  0x2e   : > { %277 = sbr.rel (%p1110_p1) target bundleno = 53 (0x35), region = 81  ;;  %v1622_v2 = vmov (!%p1110_p1), 0.0  }
  0x2f   : > { %s1424_s11 = smul.u32 192, %s269_s7  ;;  %278 = vst [vmem:[#allocation2] sm:$0xf] (!%p1110_p1), %v1622_v2  ;;  %279 = vst [vmem:[#allocation2 + $0x4] sm:$0xf] (!%p1110_p1), %v1622_v2 }
  0x31   : > { %s1748_s14 = scalar_lea.vmem %s1921_s1, %s1424_s11 }
  0x35 PF: > { %v1500_v3 = vld [vmem:[%s1748_s14] sm:$0xff]   ;;  %v1623_v4 = vmov 0.0   ;;  %v1502_v6 = vld [vmem:[%s1748_s14 + $0x8] sm:$0xff]   ;;  %vm1624_vm0 = vmmov 0   ;;  %v1504_v8 = vld [vmem:[%s1748_s14 + $0x10] sm:$0xff]   ;;  %p1225_p2 = scmp.ne.s32.totalorder %s1604_s19, 2 }
  0x36   : > { %1286 = vmatprep.subr.bf16.mxu0 %v1623_v4  ;;  %1346 = vmatprep.subr.bf16.mxu1 %v1623_v4  ;;  %v1501_v5 = vld [vmem:[%s1748_s14] sm:$0xff]   ;;  %v1503_v7 = vld [vmem:[%s1748_s14 + $0x8] sm:$0xff]   ;;  %v1505_v9 = vld [vmem:[%s1748_s14 + $0x10] sm:$0xff]  }
  0x37   : > { %1287 = vmatpush3.bf16.msra.mxu0 %v1500_v3  ;;  %1302 = vmatprep.mubr.msk.bf16.mxu0 %vm1624_vm0, %v1623_v4  ;;  %v1506_v10 = vld [vmem:[%s1748_s14 + $0x18] sm:$0xff]   ;;  %v1508_v12 = vld [vmem:[%s1748_s14 + $0x20] sm:$0xff]   ;;  %v1510_v14 = vld [vmem:[%s1748_s14 + $0x28] sm:$0xff]  }
  0x38   : > { %1347 = vmatpush3.bf16.msra.mxu1 %v1501_v5  ;;  %1288 = vmatprep.subr.bf16.mxu0 %v1623_v4  ;;  %v1507_v11 = vld [vmem:[%s1748_s14 + $0x18] sm:$0xff]   ;;  %v1509_v13 = vld [vmem:[%s1748_s14 + $0x20] sm:$0xff]   ;;  %v1511_v15 = vld [vmem:[%s1748_s14 + $0x28] sm:$0xff]  }
  0x39   : > { %1348 = vmatprep.subr.bf16.mxu1 %v1623_v4  ;;  %1362 = vmatprep.mubr.msk.bf16.mxu1 %vm1624_vm0, %v1623_v4  ;;  %v1512_v16 = vld [vmem:[%s1748_s14 + $0x30] sm:$0xff]   ;;  %v1514_v18 = vld [vmem:[%s1748_s14 + $0x38] sm:$0xff]   ;;  %v1517_v21 = vld [vmem:[%s1748_s14 + $0x40] sm:$0xff]  }
  0x3a   : > { %v1513_v17 = vld [vmem:[%s1748_s14 + $0x30] sm:$0xff]   ;;  %v1515_v19 = vld [vmem:[%s1748_s14 + $0x38] sm:$0xff]   ;;  %v1519_v23 = vld [vmem:[%s1748_s14 + $0x40] sm:$0xff]  }
  0x3b   : > { %1289 = vmatpush3.bf16.msra.mxu0 %v1502_v6  ;;  %v280_v20 = vld [vmem:[%s240_s26] sm:$0x7]  ;;  %v281_v22 = vld [vmem:[%s240_s26 + $0x4] sm:$0x7]  ;;  %v1524_v28 = vld [vmem:[%s1748_s14 + $0x58] sm:$0xff]  }
  0x3c   : > { %1349 = vmatpush3.bf16.msra.mxu1 %v1503_v7  ;;  %1290 = vmatprep.subr.bf16.mxu0 %v1623_v4  ;;  %v1520_v24 = vld [vmem:[%s1748_s14 + $0x48] sm:$0xff]   ;;  %v1522_v26 = vld [vmem:[%s1748_s14 + $0x50] sm:$0xff]   ;;  %v1525_v29 = vld [vmem:[%s1748_s14 + $0x58] sm:$0xff]   ;;  %v1818_v32 = vcombine.low %v280_v20, %v280_v20  ;;  %v1820_v33 = vcombine.low %v281_v22, %v281_v22 }
  0x3d   : > { %1350 = vmatprep.subr.bf16.mxu1 %v1623_v4  ;;  %v1521_v25 = vld [vmem:[%s1748_s14 + $0x48] sm:$0xff]   ;;  %v1523_v27 = vld [vmem:[%s1748_s14 + $0x50] sm:$0xff]   ;;  %v1526_v30 = vld [vmem:[%s1748_s14 + $0x60] sm:$0xff]  }
  0x3e   : > { %v1527_v31 = vld [vmem:[%s1748_s14 + $0x60] sm:$0xff]   ;;  %v1528_v34 = vld [vmem:[%s1748_s14 + $0x68] sm:$0xff]   ;;  %v411_v36 = vshll.u32 %v1818_v32, 16  ;;  %v743_v37 = vshll.u32 %v1820_v33, 16  ;;  %v1530_v38 = vld [vmem:[%s1748_s14 + $0x70] sm:$0xff]   ;;  %v409_v40 = vshrl.u32 %v1818_v32, 16 }
  0x3f   : > { %1291 = vmatpush3.bf16.msra.mxu0 %v1504_v8  ;;  %v1529_v35 = vld [vmem:[%s1748_s14 + $0x68] sm:$0xff]   ;;  %v1531_v39 = vld [vmem:[%s1748_s14 + $0x70] sm:$0xff]   ;;  %v741_v42 = vshrl.u32 %v1820_v33, 16  ;;  %v1532_v44 = vld [vmem:[%s1748_s14 + $0x78] sm:$0xff]   ;;  %v522_v0 = vrot.slane %v1818_v32, 1  ;;  %v853_v1 = vrot.slane %v1820_v33, 1 }
  0x40   : > { %1351 = vmatpush3.bf16.msra.mxu1 %v1505_v9  ;;  %1292 = vmatprep.subr.bf16.mxu0 %v1623_v4  ;;  %v413_v41 = vrot.slane %v411_v36, 1  ;;  %v745_v43 = vrot.slane %v743_v37, 1  ;;  %v1533_v45 = vld [vmem:[%s1748_s14 + $0x78] sm:$0xff]   ;;  %v1534_v47 = vld [vmem:[%s1748_s14 + $0x80] sm:$0xff]   ;;  %v1536_v50 = vld [vmem:[%s1748_s14 + $0x88] sm:$0xff]  }
  0x41   : > { %1352 = vmatprep.subr.bf16.mxu1 %v1623_v4  ;;  %v1535_v49 = vld [vmem:[%s1748_s14 + $0x80] sm:$0xff]   ;;  %v1537_v51 = vld [vmem:[%s1748_s14 + $0x88] sm:$0xff]   ;;  %v1538_v52 = vld [vmem:[%s1748_s14 + $0x90] sm:$0xff]  }
  0x42   : > { %v414_v46 = vor.u32 %v413_v41, %v409_v40  ;;  %v746_v48 = vor.u32 %v745_v43, %v741_v42  ;;  %v1539_v53 = vld [vmem:[%s1748_s14 + $0x90] sm:$0xff]   ;;  %v1540_v54 = vld [vmem:[%s1748_s14 + $0x98] sm:$0xff]   ;;  %v1542_v56 = vld [vmem:[%s1748_s14 + $0xa0] sm:$0xff]  }
  0x43   : > { %1293 = vmatpush3.bf16.msra.mxu0 %v1506_v10  ;;  %v1541_v55 = vld [vmem:[%s1748_s14 + $0x98] sm:$0xff]   ;;  %v1543_v57 = vld [vmem:[%s1748_s14 + $0xa0] sm:$0xff]   ;;  %v1544_v58 = vld [vmem:[%s1748_s14 + $0xa8] sm:$0xff]  }
  0x44   : > { %1353 = vmatpush3.bf16.msra.mxu1 %v1507_v11  ;;  %1294 = vmatprep.subr.bf16.mxu0 %v1623_v4  ;;  %v1545_v59 = vld [vmem:[%s1748_s14 + $0xa8] sm:$0xff]   ;;  %v1546_v60 = vld [vmem:[%s1748_s14 + $0xb0] sm:$0xff]   ;;  %v1548_v62 = vld [vmem:[%s1748_s14 + $0xb8] sm:$0xff]  }
  0x45   : > { %1354 = vmatprep.subr.bf16.mxu1 %v1623_v4  ;;  %v1547_v61 = vld [vmem:[%s1748_s14 + $0xb0] sm:$0xff]   ;;  %v1549_v63 = vld [vmem:[%s1748_s14 + $0xb8] sm:$0xff]   ;;  %v282_v2 = vld [vmem:[#allocation2] sm:$0xf] }
  0x46   : > { %v615_v3 = vld [vmem:[#allocation2 + $0x4] sm:$0xf] }
  0x47   : > { %1295 = vmatpush3.bf16.msra.mxu0 %v1508_v12 }
  0x48   : > { %1355 = vmatpush3.bf16.msra.mxu1 %v1509_v13  ;;  %1296 = vmatprep.subr.bf16.mxu0 %v1623_v4 }
  0x49   : > { %1356 = vmatprep.subr.bf16.mxu1 %v1623_v4 }
  0x4b   : > { %1297 = vmatpush3.bf16.msra.mxu0 %v1510_v14 }
  0x4c   : > { %1357 = vmatpush3.bf16.msra.mxu1 %v1511_v15  ;;  %1298 = vmatprep.subr.bf16.mxu0 %v1623_v4  ;;  %v1226_v15 = vld [vmem:[%s1922_s2] ss:$0 sm:$0xff] (!%p1225_p2) }
  0x4d   : > { %1358 = vmatprep.subr.bf16.mxu1 %v1623_v4 }
  0x4f   : > { %1299 = vmatpush3.bf16.msra.mxu0 %v1512_v16  ;;  %v1227_v16 = vld [vmem:[%s1923_s3] ss:$0 sm:$0xff] (!%p1225_p2) }
  0x50   : > { %1359 = vmatpush3.bf16.msra.mxu1 %v1513_v17  ;;  %1300 = vmatprep.subr.bf16.mxu0 %v1623_v4 }
  0x51   : > { %1360 = vmatprep.subr.bf16.mxu1 %v1623_v4 }
  0x53   : > { %1301 = vmatpush3.bf16.msra.mxu0 %v1514_v18 }
  0x54   : > { %1361 = vmatpush3.bf16.msra.mxu1 %v1515_v19  ;;  %1306 = vmatprep.subr.bf16.mxu0 %v1623_v4 }
  0x55   : > { %1366 = vmatprep.subr.bf16.mxu1 %v1623_v4 }
  0x56   : > { %1303 = vmatmul.mubr.bf16.vlgmr.msra.gmra.mrb[0].mxu0 %v280_v20 }
  0x57   : > { %1307 = vmatpush3.bf16.msra.mxu0 %v1517_v21  ;;  %1363 = vmatmul.mubr.bf16.vlgmr.msra.gmra.mrb[0].mxu1 %v281_v22 }
  0x58   : > { %1367 = vmatpush3.bf16.msra.mxu1 %v1519_v23  ;;  %1308 = vmatprep.subr.bf16.mxu0 %v1623_v4 }
  0x59   : > { %1368 = vmatprep.subr.bf16.mxu1 %v1623_v4  ;;  %1322 = vmatprep.mubr.msk.bf16.mxu0 %vm1624_vm0, %v1623_v4 }
  0x5a   : > { %1382 = vmatprep.mubr.msk.bf16.mxu1 %vm1624_vm0, %v1623_v4 }
  0x5b   : > { %1309 = vmatpush3.bf16.msra.mxu0 %v1520_v24 }
  0x5c   : > { %1369 = vmatpush3.bf16.msra.mxu1 %v1521_v25  ;;  %1310 = vmatprep.subr.bf16.mxu0 %v1623_v4 }
  0x5d   : > { %1370 = vmatprep.subr.bf16.mxu1 %v1623_v4 }
  0x5f   : > { %1311 = vmatpush3.bf16.msra.mxu0 %v1522_v26 }
  0x60   : > { %1371 = vmatpush3.bf16.msra.mxu1 %v1523_v27  ;;  %1312 = vmatprep.subr.bf16.mxu0 %v1623_v4 }
  0x61   : > { %1372 = vmatprep.subr.bf16.mxu1 %v1623_v4 }
  0x63   : > { %1313 = vmatpush3.bf16.msra.mxu0 %v1524_v28 }
  0x64   : > { %1373 = vmatpush3.bf16.msra.mxu1 %v1525_v29  ;;  %1314 = vmatprep.subr.bf16.mxu0 %v1623_v4 }
  0x65   : > { %1374 = vmatprep.subr.bf16.mxu1 %v1623_v4 }
  0x67   : > { %1315 = vmatpush3.bf16.msra.mxu0 %v1526_v30 }
  0x68   : > { %1375 = vmatpush3.bf16.msra.mxu1 %v1527_v31  ;;  %1316 = vmatprep.subr.bf16.mxu0 %v1623_v4 }
  0x69   : > { %1376 = vmatprep.subr.bf16.mxu1 %v1623_v4 }
  0x6b   : > { %1317 = vmatpush3.bf16.msra.mxu0 %v1528_v34 }
  0x6c   : > { %1377 = vmatpush3.bf16.msra.mxu1 %v1529_v35  ;;  %1318 = vmatprep.subr.bf16.mxu0 %v1623_v4 }
  0x6d   : > { %1378 = vmatprep.subr.bf16.mxu1 %v1623_v4 }
  0x6f   : > { %1319 = vmatpush3.bf16.msra.mxu0 %v1530_v38 }
  0x70   : > { %1379 = vmatpush3.bf16.msra.mxu1 %v1531_v39  ;;  %1320 = vmatprep.subr.bf16.mxu0 %v1623_v4 }
  0x71   : > { %1380 = vmatprep.subr.bf16.mxu1 %v1623_v4 }
  0x73   : > { %1321 = vmatpush3.bf16.msra.mxu0 %v1532_v44 }
  0x74   : > { %1381 = vmatpush3.bf16.msra.mxu1 %v1533_v45  ;;  %1326 = vmatprep.subr.bf16.mxu0 %v1623_v4 }
  0x75   : > { %1386 = vmatprep.subr.bf16.mxu1 %v1623_v4 }
  0x76   : > { %1323 = vmatmul.mubr.bf16.vlgmr.msra.gmra.mrb[0].mxu0 %v414_v46 }
  0x77   : > { %1327 = vmatpush3.bf16.msra.mxu0 %v1534_v47  ;;  %1383 = vmatmul.mubr.bf16.vlgmr.msra.gmra.mrb[0].mxu1 %v746_v48 }
  0x78   : > { %1387 = vmatpush3.bf16.msra.mxu1 %v1535_v49  ;;  %1328 = vmatprep.subr.bf16.mxu0 %v1623_v4 }
  0x79   : > { %1388 = vmatprep.subr.bf16.mxu1 %v1623_v4  ;;  %1342 = vmatprep.mubr.msk.bf16.mxu0 %vm1624_vm0, %v1623_v4 }
  0x7a   : > { %1402 = vmatprep.mubr.msk.bf16.mxu1 %vm1624_vm0, %v1623_v4 }
  0x7b   : > { %1329 = vmatpush3.bf16.msra.mxu0 %v1536_v50 }
  0x7c   : > { %1389 = vmatpush3.bf16.msra.mxu1 %v1537_v51  ;;  %1330 = vmatprep.subr.bf16.mxu0 %v1623_v4 }
  0x7d   : > { %1390 = vmatprep.subr.bf16.mxu1 %v1623_v4 }
  0x7f   : > { %1331 = vmatpush3.bf16.msra.mxu0 %v1538_v52 }
  0x80   : > { %1391 = vmatpush3.bf16.msra.mxu1 %v1539_v53  ;;  %1332 = vmatprep.subr.bf16.mxu0 %v1623_v4 }
  0x81   : > { %1392 = vmatprep.subr.bf16.mxu1 %v1623_v4 }
  0x83   : > { %1333 = vmatpush3.bf16.msra.mxu0 %v1540_v54 }
  0x84   : > { %1393 = vmatpush3.bf16.msra.mxu1 %v1541_v55  ;;  %1334 = vmatprep.subr.bf16.mxu0 %v1623_v4 }
  0x85   : > { %1394 = vmatprep.subr.bf16.mxu1 %v1623_v4 }
  0x87   : > { %1335 = vmatpush3.bf16.msra.mxu0 %v1542_v56 }
  0x88   : > { %1395 = vmatpush3.bf16.msra.mxu1 %v1543_v57  ;;  %1336 = vmatprep.subr.bf16.mxu0 %v1623_v4 }
  0x89   : > { %1396 = vmatprep.subr.bf16.mxu1 %v1623_v4 }
  0x8b   : > { %1337 = vmatpush3.bf16.msra.mxu0 %v1544_v58 }
  0x8c   : > { %1397 = vmatpush3.bf16.msra.mxu1 %v1545_v59  ;;  %1338 = vmatprep.subr.bf16.mxu0 %v1623_v4 }
  0x8d   : > { %1398 = vmatprep.subr.bf16.mxu1 %v1623_v4 }
  0x8f   : > { %1339 = vmatpush3.bf16.msra.mxu0 %v1546_v60 }
  0x90   : > { %1399 = vmatpush3.bf16.msra.mxu1 %v1547_v61  ;;  %1340 = vmatprep.subr.bf16.mxu0 %v1623_v4 }
  0x91   : > { %1400 = vmatprep.subr.bf16.mxu1 %v1623_v4 }
  0x93   : > { %1341 = vmatpush3.bf16.msra.mxu0 %v1548_v62 }
  0x94   : > { %1401 = vmatpush3.bf16.msra.mxu1 %v1549_v63 }
  0x96   : > { %1343 = vmatmul.mubr.bf16.vlgmr.msra.gmra.mrb[0].mxu0 %v522_v0 }
  0x97   : > { %1403 = vmatmul.mubr.bf16.vlgmr.msra.gmra.mrb[0].mxu1 %v853_v1 }
 0x167   : > { %948 = sbr.rel (%p1225_p2) target bundleno = 382 (0x17e), region = 85 }
 0x169   : > { %v606_v5 = vpop.f32.mrb[0].mxu0 }
 0x16a   : > { %v1406_v6 = vadd.f32 %v606_v5, %v282_v2  ;;  %v937_v7 = vpop.f32.mrb[0].mxu1  ;;  %v1344_v8 = vpop.f32.mrb[1].mxu0 }
 0x16b   : > { %v1407_v9 = vadd.f32 %v937_v7, %v615_v3  ;;  %v1404_v10 = vpop.f32.mrb[1].mxu1  ;;  %v609_v11 = vpop.f32.mrb[2].mxu0 }
 0x16c   : > { %613 = vst [vmem:[#allocation2] sm:$0xf] %v1406_v6  ;;  %v940_v12 = vpop.f32.mrb[2].mxu1  ;;  %v1345_v4 = vpop.f32.mrb[3].mxu0 }
 0x16d   : > { %944 = vst [vmem:[#allocation2 + $0x4] sm:$0xf] %v1407_v9  ;;  %v1405_v13 = vpop.f32.mrb[3].mxu1 }
 0x173   : > { %v949_v14 = vld [vmem:[#allocation2] sm:$0xf] }
 0x174   : > { %v958_v17 = vmul.f32 %v1226_v15, %v949_v14  ;;  %v950_v18 = vld [vmem:[#allocation2 + $0x4] sm:$0xf] }
 0x175   : > { %v959_v19 = vmul.f32 %v1226_v15, %v950_v18 }
 0x176   : > { %v967_v20 = vadd.f32 %v1227_v16, %v958_v17 }
 0x177   : > { %v968_v21 = vadd.f32 %v1227_v16, %v959_v19 }
 0x178   : > { %v969_v22 = vmax.f32 %v967_v20, 0.0 }
 0x179   : > { %v970_v23 = vmax.f32 %v968_v21, 0.0 }
 0x17a   : > { %v971_v24 = vpack.c.bf16 %v969_v22, %v969_v22 }
 0x17b   : > { %v972_v25 = vpack.c.bf16 %v970_v23, %v970_v23 }
 0x17c   : > { %973 = vst [vmem:[%s1751_s5] sm:$0x3] %v971_v24 }
 0x17d   : > { %974 = vst [vmem:[%s1751_s5 + $0x2] sm:$0x3] %v972_v25 }
 0x17e PF: > { %981 = sbr.rel (!%p1720_p9) target bundleno = 390 (0x186), region = 89  ;;  %s1229_s19 = sshll.u32 (%p1720_p9), %s1608_s20, 1 }
 0x17f   : > { %s983_s6 = scalar_lea.vmem (%p1720_p9), %s1924_s4, %s1229_s19 }
 0x183   : > { %v999_v26 = vld [vmem:[%s1751_s5] sm:$0x3] (%p1720_p9) }
 0x184   : > { %v1001_v27 = vld [vmem:[%s1751_s5 + $0x2] sm:$0x3] (%p1720_p9)  ;;  %1000 = vst [vmem:[%s983_s6] sm:$0x3] (%p1720_p9), %v999_v26 }
 0x185   : > { %1002 = vst [vmem:[%s983_s6 + $0x8] sm:$0x3] %v1001_v27 }
 0x186 PF: > { %s14_s23 = sadd.s32 1, %s1620_s23   ;;  %s1927_s15 = smov %s1592_s16 }
 0x187   : > { %p11_p3 = scmp.ge.s32.totalorder %s14_s23, 14   ;;  %s1928_s16 = smov %s1725_s9 }
 0x188   : > { %s1929_s17 = smov %s1600_s18  ;;  %s1930_s18 = smov %s1728_s10 }
 0x189   : > { %s1931_s19 = smov %s1612_s21  ;;  %s1932_s20 = smov %s1616_s22 }
 0x18a   : > { %s1933_s21 = smov %s1936_s24  ;;  %s1934_s22 = smov %s1940_s25 }
 0x18b   :  { %13 = sbr.rel (!%p11_p3) target bundleno = 5 (0x5), region = 160 }

</bundles_post_ra>
